<compile_context>
chip_gen: v7x
topology: tpu7x:2x2x1
jax: 0.10.0
libtpu: 0.0.40
codegen_flags: <defaults>
</compile_context>

<pallas_src>
import math

import jax
import jax.numpy as jnp
from jax.experimental import pallas as pl
from jax.experimental.pallas import tpu as pltpu


# ----------------------------------------------------------------------------
# Model configuration helpers (mirror ResCNN.__init__)
# ----------------------------------------------------------------------------
def default_cnn_param(input_channel=1):
    p = [[[2 ** (3 + i), 2 ** (4 + i), 1],
          [2 ** (4 + i), 2 ** (4 + i), 1],
          [2 ** (4 + i), 2 ** (4 + i), 3]] for i in range(4)]
    p[0][0][0] = input_channel
    return p


def _round_up(v, m):
    return ((v + m - 1) // m) * m


def build_layer_meta(cnn_param, input_size, use_residual):
    """Static per-layer metadata (shapes, strides, residual capture/add,
    packed-weight row offsets)."""
    metas = []
    w = input_size
    for sub in cnn_param:
        for j, (cin, cout, sy) in enumerate(sub):
            wout = (w - 1) // sy + 1            # ceil(w / sy) for k=3, pad=1
            metas.append(dict(
                cin=cin,                         # original (residual rule)
                cin_p=_round_up(cin, 16),        # bf16-tile-aligned compute cin
                cout=cout, s=sy, win=w, wout=wout,
                # torch: `x = h` before a conv with in==out and W-stride 1
                capture=bool(use_residual and cin == cout and sy == 1),
                # torch: `h = relu(h) + x` at relu_*_1
                add=bool(use_residual and j == 1)))
            w = wout
    off = 0
    for m in metas:
        m["woff"] = off                          # row offset into weight slab
        off += 9 * m["cin_p"]
    return metas, off


# ----------------------------------------------------------------------------
# Fused Pallas kernel: whole ResCNN forward for one batch element / grid step
# ----------------------------------------------------------------------------
def _make_fused_rescnn_kernel(metas, H, c_pack):
    NEG = 0.3          # LeakyReLU slope
    EPS = 1e-5         # InstanceNorm eps

    def kernel(x_ref, w_ref, gb_ref, o_ref, hp):
        # Activation layout: (W, H, C) -- H == 8 sublanes, C lanes, W major.
        h = x_ref[0]                     # (W0, H, cin_p0) f32
        res = None

        for li, m in enumerate(metas):
            cin, cout, s = m["cin_p"], m["cout"], m["s"]
            win, wout, woff = m["win"], m["wout"], m["woff"]
            M = wout * H

            if m["capture"]:
                res = h

            # ---- activation -> W-padded scratch (sublane/lane aligned) -----
            zrow = jnp.zeros((1, H, cin), jnp.float32)
            hp[0:1, :, 0:cin] = zrow
            hp[win + 1:win + 2, :, 0:cin] = zrow
            hp[1:win + 1, :, 0:cin] = h

            # boundary-row masks for the dh = 0 / dh = 2 sublane rolls
            rows = jax.lax.broadcasted_iota(jnp.int32, (wout, H, cin), 1)
            not_top = rows > 0
            not_bot = rows < (H - 1)

            # ---- 9 per-tap MXU matmuls, f32 accumulation -------------------
            acc = jnp.zeros((M, cout), jnp.float32)
            for dw in range(3):
                if s == 1:
                    tw = hp[pl.ds(dw, wout), :, 0:cin]
                else:
                    tw = hp[pl.ds(dw, wout, stride=s), :, 0:cin]
                for dh in range(3):
                    if dh == 0:      # needs input row i-1: roll down, mask row 0
                        t = jnp.where(not_top, pltpu.roll(tw, 1, axis=1), 0.0)
                    elif dh == 1:
                        t = tw
                    else:            # needs input row i+1: roll up, mask row H-1
                        t = jnp.where(not_bot,
                                      pltpu.roll(tw, H - 1, axis=1), 0.0)
                    r0 = woff + (dh * 3 + dw) * cin
                    acc = acc + jnp.dot(
                        t.reshape(M, cin).astype(jnp.bfloat16),
                        w_ref[r0:r0 + cin, 0:cout],
                        preferred_element_type=jnp.float32)

            # ---- InstanceNorm2d (affine), one-pass stats -------------------
            # conv bias dropped: it is exactly cancelled by mean subtraction.
            inv_m = 1.0 / M
            mean = jnp.sum(acc, axis=0, keepdims=True) * inv_m
            ex2 = jnp.sum(acc * acc, axis=0, keepdims=True) * inv_m
            var = ex2 - mean * mean
            g = gb_ref[0:1, li * c_pack:li * c_pack + cout]     # (1, cout)
            be = gb_ref[1:2, li * c_pack:li * c_pack + cout]    # (1, cout)
            scale = g * jax.lax.rsqrt(var + EPS)
            y = acc * scale + (be - mean * scale)

            # LeakyReLU(0.3)
            y = jnp.where(y >= 0.0, y, NEG * y)

            y = y.reshape(wout, H, cout)         # free view (H == 8 sublanes)
            if m["add"] and res is not None:
                y = y + res
            h = y

        o_ref[0] = h                             # (Wout_last, H, C_last)

    return kernel


# ----------------------------------------------------------------------------
# Wrapper: parameter packing + batched pallas_call
# ----------------------------------------------------------------------------
def res_cnn_forward_pallas(s, params, cnn_param, use_residual=True):
    """s: (B, C_in, H, W) float32 batch; each element is the torch input
    before Unsqueeze(0).  Returns (B, H, output_size * C_last)."""
    B, Cin, H, W = s.shape
    metas, w_rows = build_layer_meta(cnn_param, W, use_residual)
    L = len(metas)
    C_PACK = 128

    cp0 = metas[0]["cin_p"]
    # (B, C, H, W) -> (B, W, H, C); zero-pad channels to the packed cin
    x = jnp.transpose(s.astype(jnp.float32), (0, 3, 2, 1))
    x = jnp.pad(x, ((0, 0), (0, 0), (0, 0), (0, cp0 - Cin)))

    # ---- pack parameters: one bf16 weight slab + one f32 gamma/beta table --
    w_blocks, g_rows, b_rows = [], [], []
    for m, (w, _b, g, be) in zip(metas, params):
        cin, cin_p, cout = m["cin"], m["cin_p"], m["cout"]
        w9 = w.astype(jnp.float32).reshape(9, cin, cout)           # tap-major
        w9 = jnp.pad(w9, ((0, 0), (0, cin_p - cin), (0, C_PACK - cout)))
        w_blocks.append(w9.reshape(9 * cin_p, C_PACK))
        g_rows.append(jnp.pad(g.reshape(-1), (0, C_PACK - cout)))
        b_rows.append(jnp.pad(be.reshape(-1), (0, C_PACK - cout)))
        # conv bias `_b` intentionally not passed (cancelled by InstanceNorm)
    w_slab = jnp.concatenate(w_blocks, axis=0).astype(jnp.bfloat16)
    gb_tab = jnp.stack([jnp.concatenate(g_rows),
                        jnp.concatenate(b_rows)], axis=0).astype(jnp.float32)

    wmax = max(m["win"] for m in metas)
    cmax = max(m["cin_p"] for m in metas)
    wout_last = metas[-1]["wout"]
    c_last = metas[-1]["cout"]

    out = pl.pallas_call(
        _make_fused_rescnn_kernel(metas, H, C_PACK),
        out_shape=jax.ShapeDtypeStruct((B, wout_last, H, c_last), jnp.float32),
        grid=(B,),
        in_specs=[
            pl.BlockSpec((1, W, H, cp0), lambda b: (b, 0, 0, 0)),
            pl.BlockSpec((w_rows, C_PACK), lambda b: (0, 0)),      # resident
            pl.BlockSpec((2, L * C_PACK), lambda b: (0, 0)),       # resident
        ],
        out_specs=pl.BlockSpec((1, wout_last, H, c_last),
                               lambda b: (b, 0, 0, 0)),
        scratch_shapes=[pltpu.VMEM((wmax + 2, H, cmax), jnp.float32)],
        compiler_params=pltpu.CompilerParams(
            dimension_semantics=("parallel",)),
    )(x, w_slab, gb_tab)

    # torch Reshape: permute(0, 2, 3, 1).reshape(1, -1, output_size * C_last)
    return jnp.transpose(out, (0, 2, 1, 3)).reshape(B, H, wout_last * c_last)


# ----------------------------------------------------------------------------
# Pure-JAX reference (correctness check, mirrors the torch module incl. bias)
# ----------------------------------------------------------------------------
def _conv_in_lrelu_ref(x, w, b, g, be, stride_w, residual=None):
    y = jax.lax.conv_general_dilated(
        x[None], w, window_strides=(1, stride_w), padding=((1, 1), (1, 1)),
        dimension_numbers=("NHWC", "HWIO", "NHWC"),
        precision=jax.lax.Precision.HIGHEST)[0]
    y = y + b.reshape(1, 1, -1)
    mean = jnp.mean(y, axis=(0, 1), keepdims=True)
    var = jnp.mean(jnp.square(y - mean), axis=(0, 1), keepdims=True)
    y = (y - mean) * jax.lax.rsqrt(var + 1e-5)
    y = y * g.reshape(1, 1, -1) + be.reshape(1, 1, -1)
    y = jnp.where(y >= 0.0, y, 0.3 * y)
    if residual is not None:
        y = y + residual
    return y


def res_cnn_forward_ref(s, params, cnn_param, use_residual=True):
    h = jnp.transpose(s.astype(jnp.float32), (1, 2, 0))   # (H, W, C)
    res = None
    li = 0
    for sub in cnn_param:
        for j, (cin, cout, sy) in enumerate(sub):
            w, b, g, be = params[li]
            li += 1
            if use_residual and cin == cout and sy == 1:
                res = h
            add = res if (use_residual and j == 1) else None
            h = _conv_in_lrelu_ref(h, w, b, g, be, sy, add)
    H, Wo, C = h.shape
    return h.reshape(1, H, Wo * C)


# ----------------------------------------------------------------------------
# Parameter init (mirrors torch Conv2d / affine InstanceNorm2d shapes)
# ----------------------------------------------------------------------------
def init_params(key, cnn_param):
    params = []
    for sub in cnn_param:
        for (cin, cout, _sy) in sub:
            key, kw, kb, kg, kbe = jax.random.split(key, 5)
            bound = 1.0 / math.sqrt(cin * 9)
            w = jax.random.uniform(kw, (3, 3, cin, cout), jnp.float32,
                                   -bound, bound)          # HWIO
            b = jax.random.uniform(kb, (1, cout), jnp.float32, -bound, bound)
            g = 1.0 + 0.1 * jax.random.normal(kg, (1, cout), jnp.float32)
            be = 0.1 * jax.random.normal(kbe, (1, cout), jnp.float32)
            params.append((w, b, g, be))
    return params


# ----------------------------------------------------------------------------
# Main
# ----------------------------------------------------------------------------
if __name__ == "__main__":
    input_channel = 1
    H_time = 8        # conv H dim (stride always 1)
    input_size = 16   # conv W dim ("freq"); downsampled by the stride-3 convs
    B = 2             # batch of independent forwards, one grid step each

    cnn_param = default_cnn_param(input_channel)

    # output_size exactly as computed in ResCNN.__init__
    output_size = input_size
    for sub in cnn_param:
        for _, _, sy in sub:
            output_size = math.ceil(output_size / sy)
    c_last = cnn_param[-1][-1][1]

    key = jax.random.PRNGKey(0)
    key, pkey, xkey = jax.random.split(key, 3)
    params = init_params(pkey, cnn_param)
    s = jax.random.normal(xkey, (B, input_channel, H_time, input_size),
                          dtype=jnp.float32)

    out = res_cnn_forward_pallas(s, params, cnn_param, use_residual=True)
    out = jax.block_until_ready(out)

    assert out.shape == (B, H_time, output_size * c_last), out.shape

    # correctness check vs pure-JAX reference (kernel uses bf16 MXU operands)
    for b in range(B):
        ref = res_cnn_forward_ref(s[b], params, cnn_param, use_residual=True)
        rel = float(jnp.linalg.norm(out[b] - ref[0]) /
                    (jnp.linalg.norm(ref[0]) + 1e-12))
        assert rel < 5e-2, f"relative error too high (batch {b}): {rel}"

    print("KERNEL_OK")
</pallas_src>

<mosaic_0001>
module attributes {stable_mosaic.version = 11 : i64} {
  func.func @kernel(%arg0: i32, %arg1: memref<1x16x8x16xf32, #tpu.memory_space<vmem>>, %arg2: memref<5472x128xbf16, #tpu.memory_space<vmem>>, %arg3: memref<2x1536xf32, #tpu.memory_space<vmem>>, %arg4: memref<1x1x8x128xf32, #tpu.memory_space<vmem>>, %arg5: memref<18x8x128xf32, #tpu.memory_space<vmem>>) attributes {dimension_semantics = [#tpu.dimension_semantics<parallel>], iteration_bounds = array<i64: 2>, scalar_prefetch = 0 : i64, scratch_operands = 1 : i64, tpu.core_type = #tpu.core_type<tc>, window_params = [{transform_indices = @transform_0, window_bounds = array<i64: 1, 16, 8, 16>}, {pipeline_mode = #tpu.pipeline_mode<synchronous>, transform_indices = @transform_1, window_bounds = array<i64: 5472, 128>}, {pipeline_mode = #tpu.pipeline_mode<synchronous>, transform_indices = @transform_2, window_bounds = array<i64: 2, 1536>}, {transform_indices = @transform_3, window_bounds = array<i64: 1, 1, 8, 128>}]} {
    %c0 = arith.constant 0 : index
    %c0_0 = arith.constant 0 : index
    %c0_1 = arith.constant 0 : index
    %c0_2 = arith.constant 0 : index
    %0 = vector.load %arg1[%c0, %c0_0, %c0_1, %c0_2] : memref<1x16x8x16xf32, #tpu.memory_space<vmem>>, vector<1x16x8x16xf32>
    %1 = vector.shape_cast %0 : vector<1x16x8x16xf32> to vector<16x8x16xf32>
    %cst = arith.constant 0.000000e+00 : f32
    %2 = vector.broadcast %cst : f32 to vector<1x8x16xf32>
    %c0_3 = arith.constant 0 : index
    %c0_4 = arith.constant 0 : index
    %c0_5 = arith.constant 0 : index
    %3 = vector.load %arg5[%c0_3, %c0_4, %c0_5] : memref<18x8x128xf32, #tpu.memory_space<vmem>>, vector<1x8x16xf32>
    tpu.vector_store %arg5[%c0_3, %c0_4, %c0_5], %2 {strides = array<i32>} : memref<18x8x128xf32, #tpu.memory_space<vmem>>, vector<1x8x16xf32>,
    %c17 = arith.constant 17 : index
    %c0_6 = arith.constant 0 : index
    %c0_7 = arith.constant 0 : index
    %4 = vector.load %arg5[%c17, %c0_6, %c0_7] : memref<18x8x128xf32, #tpu.memory_space<vmem>>, vector<1x8x16xf32>
    tpu.vector_store %arg5[%c17, %c0_6, %c0_7], %2 {strides = array<i32>} : memref<18x8x128xf32, #tpu.memory_space<vmem>>, vector<1x8x16xf32>,
    %c1 = arith.constant 1 : index
    %c0_8 = arith.constant 0 : index
    %c0_9 = arith.constant 0 : index
    %5 = vector.load %arg5[%c1, %c0_8, %c0_9] : memref<18x8x128xf32, #tpu.memory_space<vmem>>, vector<16x8x16xf32>
    tpu.vector_store %arg5[%c1, %c0_8, %c0_9], %1 {strides = array<i32>} : memref<18x8x128xf32, #tpu.memory_space<vmem>>, vector<16x8x16xf32>,
    %6 = tpu.iota {dimensions = array<i32: 1>} : vector<16x8x16xi32>
    %c0_i32 = arith.constant 0 : i32
    %7 = vector.broadcast %c0_i32 : i32 to vector<16x8x16xi32>
    %8 = arith.cmpi sgt, %6, %7 : vector<16x8x16xi32>
    %c7_i32 = arith.constant 7 : i32
    %9 = vector.broadcast %c7_i32 : i32 to vector<16x8x16xi32>
    %10 = arith.cmpi slt, %6, %9 : vector<16x8x16xi32>
    %cst_10 = arith.constant 0.000000e+00 : f32
    %11 = vector.broadcast %cst_10 : f32 to vector<128x16xf32>
    %c0_11 = arith.constant 0 : index
    %c0_12 = arith.constant 0 : index
    %c0_13 = arith.constant 0 : index
    %12 = vector.load %arg5[%c0_11, %c0_12, %c0_13] : memref<18x8x128xf32, #tpu.memory_space<vmem>>, vector<16x8x16xf32>
    %c1_i32 = arith.constant 1 : i32
    %13 = tpu.dynamic_rotate %12 by %c1_i32 dim 1 : vector<16x8x16xf32>, i32 -> vector<16x8x16xf32>
    %cst_14 = arith.constant 0.000000e+00 : f32
    %14 = vector.broadcast %cst_14 : f32 to vector<16x8x16xf32>
    %15 = arith.select %8, %13, %14 : vector<16x8x16xi1>, vector<16x8x16xf32>
    %16 = vector.shape_cast %15 : vector<16x8x16xf32> to vector<128x16xf32>
    %17 = arith.truncf %16 : vector<128x16xf32> to vector<128x16xbf16>
    %c0_15 = arith.constant 0 : index
    %c0_16 = arith.constant 0 : index
    %18 = vector.load %arg2[%c0_15, %c0_16] : memref<5472x128xbf16, #tpu.memory_space<vmem>>, vector<16x16xbf16>
    %cst_17 = arith.constant dense<0.000000e+00> : vector<128x16xf32>
    %19 = tpu.matmul %17, %18, %cst_17 {dimension_numbers = #tpu.dot_dimension_numbers<[1], [0], [0], [1], [0, 0, 1, 1], [], []>} : vector<128x16xbf16>, vector<16x16xbf16>, vector<128x16xf32> -> vector<128x16xf32>
    %20 = arith.addf %11, %19 : vector<128x16xf32>
    %21 = vector.shape_cast %12 : vector<16x8x16xf32> to vector<128x16xf32>
    %22 = arith.truncf %21 : vector<128x16xf32> to vector<128x16xbf16>
    %c48 = arith.constant 48 : index
    %c0_18 = arith.constant 0 : index
    %23 = vector.load %arg2[%c48, %c0_18] : memref<5472x128xbf16, #tpu.memory_space<vmem>>, vector<16x16xbf16>
    %cst_19 = arith.constant dense<0.000000e+00> : vector<128x16xf32>
    %24 = tpu.matmul %22, %23, %cst_19 {dimension_numbers = #tpu.dot_dimension_numbers<[1], [0], [0], [1], [0, 0, 1, 1], [], []>} : vector<128x16xbf16>, vector<16x16xbf16>, vector<128x16xf32> -> vector<128x16xf32>
    %25 = arith.addf %20, %24 : vector<128x16xf32>
    %c7_i32_20 = arith.constant 7 : i32
    %26 = tpu.dynamic_rotate %12 by %c7_i32_20 dim 1 : vector<16x8x16xf32>, i32 -> vector<16x8x16xf32>
    %cst_21 = arith.constant 0.000000e+00 : f32
    %27 = vector.broadcast %cst_21 : f32 to vector<16x8x16xf32>
    %28 = arith.select %10, %26, %27 : vector<16x8x16xi1>, vector<16x8x16xf32>
    %29 = vector.shape_cast %28 : vector<16x8x16xf32> to vector<128x16xf32>
    %30 = arith.truncf %29 : vector<128x16xf32> to vector<128x16xbf16>
    %c96 = arith.constant 96 : index
    %c0_22 = arith.constant 0 : index
    %31 = vector.load %arg2[%c96, %c0_22] : memref<5472x128xbf16, #tpu.memory_space<vmem>>, vector<16x16xbf16>
    %cst_23 = arith.constant dense<0.000000e+00> : vector<128x16xf32>
    %32 = tpu.matmul %30, %31, %cst_23 {dimension_numbers = #tpu.dot_dimension_numbers<[1], [0], [0], [1], [0, 0, 1, 1], [], []>} : vector<128x16xbf16>, vector<16x16xbf16>, vector<128x16xf32> -> vector<128x16xf32>
    %33 = arith.addf %25, %32 : vector<128x16xf32>
    %c1_24 = arith.constant 1 : index
    %c0_25 = arith.constant 0 : index
    %c0_26 = arith.constant 0 : index
    %34 = vector.load %arg5[%c1_24, %c0_25, %c0_26] : memref<18x8x128xf32, #tpu.memory_space<vmem>>, vector<16x8x16xf32>
    %c1_i32_27 = arith.constant 1 : i32
    %35 = tpu.dynamic_rotate %34 by %c1_i32_27 dim 1 : vector<16x8x16xf32>, i32 -> vector<16x8x16xf32>
    %cst_28 = arith.constant 0.000000e+00 : f32
    %36 = vector.broadcast %cst_28 : f32 to vector<16x8x16xf32>
    %37 = arith.select %8, %35, %36 : vector<16x8x16xi1>, vector<16x8x16xf32>
    %38 = vector.shape_cast %37 : vector<16x8x16xf32> to vector<128x16xf32>
    %39 = arith.truncf %38 : vector<128x16xf32> to vector<128x16xbf16>
    %c16 = arith.constant 16 : index
    %c0_29 = arith.constant 0 : index
    %40 = vector.load %arg2[%c16, %c0_29] : memref<5472x128xbf16, #tpu.memory_space<vmem>>, vector<16x16xbf16>
    %cst_30 = arith.constant dense<0.000000e+00> : vector<128x16xf32>
    %41 = tpu.matmul %39, %40, %cst_30 {dimension_numbers = #tpu.dot_dimension_numbers<[1], [0], [0], [1], [0, 0, 1, 1], [], []>} : vector<128x16xbf16>, vector<16x16xbf16>, vector<128x16xf32> -> vector<128x16xf32>
    %42 = arith.addf %33, %41 : vector<128x16xf32>
    %43 = vector.shape_cast %34 : vector<16x8x16xf32> to vector<128x16xf32>
    %44 = arith.truncf %43 : vector<128x16xf32> to vector<128x16xbf16>
    %c64 = arith.constant 64 : index
    %c0_31 = arith.constant 0 : index
    %45 = vector.load %arg2[%c64, %c0_31] : memref<5472x128xbf16, #tpu.memory_space<vmem>>, vector<16x16xbf16>
    %cst_32 = arith.constant dense<0.000000e+00> : vector<128x16xf32>
    %46 = tpu.matmul %44, %45, %cst_32 {dimension_numbers = #tpu.dot_dimension_numbers<[1], [0], [0], [1], [0, 0, 1, 1], [], []>} : vector<128x16xbf16>, vector<16x16xbf16>, vector<128x16xf32> -> vector<128x16xf32>
    %47 = arith.addf %42, %46 : vector<128x16xf32>
    %c7_i32_33 = arith.constant 7 : i32
    %48 = tpu.dynamic_rotate %34 by %c7_i32_33 dim 1 : vector<16x8x16xf32>, i32 -> vector<16x8x16xf32>
    %cst_34 = arith.constant 0.000000e+00 : f32
    %49 = vector.broadcast %cst_34 : f32 to vector<16x8x16xf32>
    %50 = arith.select %10, %48, %49 : vector<16x8x16xi1>, vector<16x8x16xf32>
    %51 = vector.shape_cast %50 : vector<16x8x16xf32> to vector<128x16xf32>
    %52 = arith.truncf %51 : vector<128x16xf32> to vector<128x16xbf16>
    %c112 = arith.constant 112 : index
    %c0_35 = arith.constant 0 : index
    %53 = vector.load %arg2[%c112, %c0_35] : memref<5472x128xbf16, #tpu.memory_space<vmem>>, vector<16x16xbf16>
    %cst_36 = arith.constant dense<0.000000e+00> : vector<128x16xf32>
    %54 = tpu.matmul %52, %53, %cst_36 {dimension_numbers = #tpu.dot_dimension_numbers<[1], [0], [0], [1], [0, 0, 1, 1], [], []>} : vector<128x16xbf16>, vector<16x16xbf16>, vector<128x16xf32> -> vector<128x16xf32>
    %55 = arith.addf %47, %54 : vector<128x16xf32>
    %c2 = arith.constant 2 : index
    %c0_37 = arith.constant 0 : index
    %c0_38 = arith.constant 0 : index
    %56 = vector.load %arg5[%c2, %c0_37, %c0_38] : memref<18x8x128xf32, #tpu.memory_space<vmem>>, vector<16x8x16xf32>
    %c1_i32_39 = arith.constant 1 : i32
    %57 = tpu.dynamic_rotate %56 by %c1_i32_39 dim 1 : vector<16x8x16xf32>, i32 -> vector<16x8x16xf32>
    %cst_40 = arith.constant 0.000000e+00 : f32
    %58 = vector.broadcast %cst_40 : f32 to vector<16x8x16xf32>
    %59 = arith.select %8, %57, %58 : vector<16x8x16xi1>, vector<16x8x16xf32>
    %60 = vector.shape_cast %59 : vector<16x8x16xf32> to vector<128x16xf32>
    %61 = arith.truncf %60 : vector<128x16xf32> to vector<128x16xbf16>
    %c32 = arith.constant 32 : index
    %c0_41 = arith.constant 0 : index
    %62 = vector.load %arg2[%c32, %c0_41] : memref<5472x128xbf16, #tpu.memory_space<vmem>>, vector<16x16xbf16>
    %cst_42 = arith.constant dense<0.000000e+00> : vector<128x16xf32>
    %63 = tpu.matmul %61, %62, %cst_42 {dimension_numbers = #tpu.dot_dimension_numbers<[1], [0], [0], [1], [0, 0, 1, 1], [], []>} : vector<128x16xbf16>, vector<16x16xbf16>, vector<128x16xf32> -> vector<128x16xf32>
    %64 = arith.addf %55, %63 : vector<128x16xf32>
    %65 = vector.shape_cast %56 : vector<16x8x16xf32> to vector<128x16xf32>
    %66 = arith.truncf %65 : vector<128x16xf32> to vector<128x16xbf16>
    %c80 = arith.constant 80 : index
    %c0_43 = arith.constant 0 : index
    %67 = vector.load %arg2[%c80, %c0_43] : memref<5472x128xbf16, #tpu.memory_space<vmem>>, vector<16x16xbf16>
    %cst_44 = arith.constant dense<0.000000e+00> : vector<128x16xf32>
    %68 = tpu.matmul %66, %67, %cst_44 {dimension_numbers = #tpu.dot_dimension_numbers<[1], [0], [0], [1], [0, 0, 1, 1], [], []>} : vector<128x16xbf16>, vector<16x16xbf16>, vector<128x16xf32> -> vector<128x16xf32>
    %69 = arith.addf %64, %68 : vector<128x16xf32>
    %c7_i32_45 = arith.constant 7 : i32
    %70 = tpu.dynamic_rotate %56 by %c7_i32_45 dim 1 : vector<16x8x16xf32>, i32 -> vector<16x8x16xf32>
    %cst_46 = arith.constant 0.000000e+00 : f32
    %71 = vector.broadcast %cst_46 : f32 to vector<16x8x16xf32>
    %72 = arith.select %10, %70, %71 : vector<16x8x16xi1>, vector<16x8x16xf32>
    %73 = vector.shape_cast %72 : vector<16x8x16xf32> to vector<128x16xf32>
    %74 = arith.truncf %73 : vector<128x16xf32> to vector<128x16xbf16>
    %c128 = arith.constant 128 : index
    %c0_47 = arith.constant 0 : index
    %75 = vector.load %arg2[%c128, %c0_47] : memref<5472x128xbf16, #tpu.memory_space<vmem>>, vector<16x16xbf16>
    %cst_48 = arith.constant dense<0.000000e+00> : vector<128x16xf32>
    %76 = tpu.matmul %74, %75, %cst_48 {dimension_numbers = #tpu.dot_dimension_numbers<[1], [0], [0], [1], [0, 0, 1, 1], [], []>} : vector<128x16xbf16>, vector<16x16xbf16>, vector<128x16xf32> -> vector<128x16xf32>
    %77 = arith.addf %69, %76 : vector<128x16xf32>
    %cst_49 = arith.constant dense<0.000000e+00> : vector<16xf32>
    %78 = vector.multi_reduction <add>, %77, %cst_49 [0] : vector<128x16xf32> to vector<16xf32>
    %79 = vector.shape_cast %78 : vector<16xf32> to vector<1x16xf32>
    %cst_50 = arith.constant 7.812500e-03 : f32
    %80 = vector.broadcast %cst_50 : f32 to vector<1x16xf32>
    %81 = arith.mulf %79, %80 : vector<1x16xf32>
    %82 = arith.mulf %77, %77 : vector<128x16xf32>
    %cst_51 = arith.constant dense<0.000000e+00> : vector<16xf32>
    %83 = vector.multi_reduction <add>, %82, %cst_51 [0] : vector<128x16xf32> to vector<16xf32>
    %84 = vector.shape_cast %83 : vector<16xf32> to vector<1x16xf32>
    %cst_52 = arith.constant 7.812500e-03 : f32
    %85 = vector.broadcast %cst_52 : f32 to vector<1x16xf32>
    %86 = arith.mulf %84, %85 : vector<1x16xf32>
    %87 = arith.mulf %81, %81 : vector<1x16xf32>
    %88 = arith.subf %86, %87 : vector<1x16xf32>
    %c0_53 = arith.constant 0 : index
    %c0_54 = arith.constant 0 : index
    %89 = vector.load %arg3[%c0_53, %c0_54] : memref<2x1536xf32, #tpu.memory_space<vmem>>, vector<1x16xf32>
    %c1_55 = arith.constant 1 : index
    %c0_56 = arith.constant 0 : index
    %90 = vector.load %arg3[%c1_55, %c0_56] : memref<2x1536xf32, #tpu.memory_space<vmem>>, vector<1x16xf32>
    %cst_57 = arith.constant 9.99999974E-6 : f32
    %91 = vector.broadcast %cst_57 : f32 to vector<1x16xf32>
    %92 = arith.addf %88, %91 : vector<1x16xf32>
    %93 = math.rsqrt %92 : vector<1x16xf32>
    %94 = arith.mulf %89, %93 : vector<1x16xf32>
    %95 = vector.broadcast %94 : vector<1x16xf32> to vector<128x16xf32>
    %96 = arith.mulf %77, %95 : vector<128x16xf32>
    %97 = arith.mulf %81, %94 : vector<1x16xf32>
    %98 = arith.subf %90, %97 : vector<1x16xf32>
    %99 = vector.broadcast %98 : vector<1x16xf32> to vector<128x16xf32>
    %100 = arith.addf %96, %99 : vector<128x16xf32>
    %cst_58 = arith.constant 0.000000e+00 : f32
    %101 = vector.broadcast %cst_58 : f32 to vector<128x16xf32>
    %102 = arith.cmpf oge, %100, %101 : vector<128x16xf32>
    %cst_59 = arith.constant 3.000000e-01 : f32
    %103 = vector.broadcast %cst_59 : f32 to vector<128x16xf32>
    %104 = arith.mulf %103, %100 : vector<128x16xf32>
    %105 = arith.select %102, %100, %104 : vector<128x16xi1>, vector<128x16xf32>
    %106 = vector.shape_cast %105 : vector<128x16xf32> to vector<16x8x16xf32>
    %cst_60 = arith.constant 0.000000e+00 : f32
    %107 = vector.broadcast %cst_60 : f32 to vector<1x8x16xf32>
    %c0_61 = arith.constant 0 : index
    %c0_62 = arith.constant 0 : index
    %c0_63 = arith.constant 0 : index
    %108 = vector.load %arg5[%c0_61, %c0_62, %c0_63] : memref<18x8x128xf32, #tpu.memory_space<vmem>>, vector<1x8x16xf32>
    tpu.vector_store %arg5[%c0_61, %c0_62, %c0_63], %107 {strides = array<i32>} : memref<18x8x128xf32, #tpu.memory_space<vmem>>, vector<1x8x16xf32>,
    %c17_64 = arith.constant 17 : index
    %c0_65 = arith.constant 0 : index
    %c0_66 = arith.constant 0 : index
    %109 = vector.load %arg5[%c17_64, %c0_65, %c0_66] : memref<18x8x128xf32, #tpu.memory_space<vmem>>, vector<1x8x16xf32>
    tpu.vector_store %arg5[%c17_64, %c0_65, %c0_66], %107 {strides = array<i32>} : memref<18x8x128xf32, #tpu.memory_space<vmem>>, vector<1x8x16xf32>,
    %c1_67 = arith.constant 1 : index
    %c0_68 = arith.constant 0 : index
    %c0_69 = arith.constant 0 : index
    %110 = vector.load %arg5[%c1_67, %c0_68, %c0_69] : memref<18x8x128xf32, #tpu.memory_space<vmem>>, vector<16x8x16xf32>
    tpu.vector_store %arg5[%c1_67, %c0_68, %c0_69], %106 {strides = array<i32>} : memref<18x8x128xf32, #tpu.memory_space<vmem>>, vector<16x8x16xf32>,
    %111 = tpu.iota {dimensions = array<i32: 1>} : vector<16x8x16xi32>
    %c0_i32_70 = arith.constant 0 : i32
    %112 = vector.broadcast %c0_i32_70 : i32 to vector<16x8x16xi32>
    %113 = arith.cmpi sgt, %111, %112 : vector<16x8x16xi32>
    %c7_i32_71 = arith.constant 7 : i32
    %114 = vector.broadcast %c7_i32_71 : i32 to vector<16x8x16xi32>
    %115 = arith.cmpi slt, %111, %114 : vector<16x8x16xi32>
    %cst_72 = arith.constant 0.000000e+00 : f32
    %116 = vector.broadcast %cst_72 : f32 to vector<128x16xf32>
    %c0_73 = arith.constant 0 : index
    %c0_74 = arith.constant 0 : index
    %c0_75 = arith.constant 0 : index
    %117 = vector.load %arg5[%c0_73, %c0_74, %c0_75] : memref<18x8x128xf32, #tpu.memory_space<vmem>>, vector<16x8x16xf32>
    %c1_i32_76 = arith.constant 1 : i32
    %118 = tpu.dynamic_rotate %117 by %c1_i32_76 dim 1 : vector<16x8x16xf32>, i32 -> vector<16x8x16xf32>
    %cst_77 = arith.constant 0.000000e+00 : f32
    %119 = vector.broadcast %cst_77 : f32 to vector<16x8x16xf32>
    %120 = arith.select %113, %118, %119 : vector<16x8x16xi1>, vector<16x8x16xf32>
    %121 = vector.shape_cast %120 : vector<16x8x16xf32> to vector<128x16xf32>
    %122 = arith.truncf %121 : vector<128x16xf32> to vector<128x16xbf16>
    %c144 = arith.constant 144 : index
    %c0_78 = arith.constant 0 : index
    %123 = vector.load %arg2[%c144, %c0_78] : memref<5472x128xbf16, #tpu.memory_space<vmem>>, vector<16x16xbf16>
    %cst_79 = arith.constant dense<0.000000e+00> : vector<128x16xf32>
    %124 = tpu.matmul %122, %123, %cst_79 {dimension_numbers = #tpu.dot_dimension_numbers<[1], [0], [0], [1], [0, 0, 1, 1], [], []>} : vector<128x16xbf16>, vector<16x16xbf16>, vector<128x16xf32> -> vector<128x16xf32>
    %125 = arith.addf %116, %124 : vector<128x16xf32>
    %126 = vector.shape_cast %117 : vector<16x8x16xf32> to vector<128x16xf32>
    %127 = arith.truncf %126 : vector<128x16xf32> to vector<128x16xbf16>
    %c192 = arith.constant 192 : index
    %c0_80 = arith.constant 0 : index
    %128 = vector.load %arg2[%c192, %c0_80] : memref<5472x128xbf16, #tpu.memory_space<vmem>>, vector<16x16xbf16>
    %cst_81 = arith.constant dense<0.000000e+00> : vector<128x16xf32>
    %129 = tpu.matmul %127, %128, %cst_81 {dimension_numbers = #tpu.dot_dimension_numbers<[1], [0], [0], [1], [0, 0, 1, 1], [], []>} : vector<128x16xbf16>, vector<16x16xbf16>, vector<128x16xf32> -> vector<128x16xf32>
    %130 = arith.addf %125, %129 : vector<128x16xf32>
    %c7_i32_82 = arith.constant 7 : i32
    %131 = tpu.dynamic_rotate %117 by %c7_i32_82 dim 1 : vector<16x8x16xf32>, i32 -> vector<16x8x16xf32>
    %cst_83 = arith.constant 0.000000e+00 : f32
    %132 = vector.broadcast %cst_83 : f32 to vector<16x8x16xf32>
    %133 = arith.select %115, %131, %132 : vector<16x8x16xi1>, vector<16x8x16xf32>
    %134 = vector.shape_cast %133 : vector<16x8x16xf32> to vector<128x16xf32>
    %135 = arith.truncf %134 : vector<128x16xf32> to vector<128x16xbf16>
    %c240 = arith.constant 240 : index
    %c0_84 = arith.constant 0 : index
    %136 = vector.load %arg2[%c240, %c0_84] : memref<5472x128xbf16, #tpu.memory_space<vmem>>, vector<16x16xbf16>
    %cst_85 = arith.constant dense<0.000000e+00> : vector<128x16xf32>
    %137 = tpu.matmul %135, %136, %cst_85 {dimension_numbers = #tpu.dot_dimension_numbers<[1], [0], [0], [1], [0, 0, 1, 1], [], []>} : vector<128x16xbf16>, vector<16x16xbf16>, vector<128x16xf32> -> vector<128x16xf32>
    %138 = arith.addf %130, %137 : vector<128x16xf32>
    %c1_86 = arith.constant 1 : index
    %c0_87 = arith.constant 0 : index
    %c0_88 = arith.constant 0 : index
    %139 = vector.load %arg5[%c1_86, %c0_87, %c0_88] : memref<18x8x128xf32, #tpu.memory_space<vmem>>, vector<16x8x16xf32>
    %c1_i32_89 = arith.constant 1 : i32
    %140 = tpu.dynamic_rotate %139 by %c1_i32_89 dim 1 : vector<16x8x16xf32>, i32 -> vector<16x8x16xf32>
    %cst_90 = arith.constant 0.000000e+00 : f32
    %141 = vector.broadcast %cst_90 : f32 to vector<16x8x16xf32>
    %142 = arith.select %113, %140, %141 : vector<16x8x16xi1>, vector<16x8x16xf32>
    %143 = vector.shape_cast %142 : vector<16x8x16xf32> to vector<128x16xf32>
    %144 = arith.truncf %143 : vector<128x16xf32> to vector<128x16xbf16>
    %c160 = arith.constant 160 : index
    %c0_91 = arith.constant 0 : index
    %145 = vector.load %arg2[%c160, %c0_91] : memref<5472x128xbf16, #tpu.memory_space<vmem>>, vector<16x16xbf16>
    %cst_92 = arith.constant dense<0.000000e+00> : vector<128x16xf32>
    %146 = tpu.matmul %144, %145, %cst_92 {dimension_numbers = #tpu.dot_dimension_numbers<[1], [0], [0], [1], [0, 0, 1, 1], [], []>} : vector<128x16xbf16>, vector<16x16xbf16>, vector<128x16xf32> -> vector<128x16xf32>
    %147 = arith.addf %138, %146 : vector<128x16xf32>
    %148 = vector.shape_cast %139 : vector<16x8x16xf32> to vector<128x16xf32>
    %149 = arith.truncf %148 : vector<128x16xf32> to vector<128x16xbf16>
    %c208 = arith.constant 208 : index
    %c0_93 = arith.constant 0 : index
    %150 = vector.load %arg2[%c208, %c0_93] : memref<5472x128xbf16, #tpu.memory_space<vmem>>, vector<16x16xbf16>
    %cst_94 = arith.constant dense<0.000000e+00> : vector<128x16xf32>
    %151 = tpu.matmul %149, %150, %cst_94 {dimension_numbers = #tpu.dot_dimension_numbers<[1], [0], [0], [1], [0, 0, 1, 1], [], []>} : vector<128x16xbf16>, vector<16x16xbf16>, vector<128x16xf32> -> vector<128x16xf32>
    %152 = arith.addf %147, %151 : vector<128x16xf32>
    %c7_i32_95 = arith.constant 7 : i32
    %153 = tpu.dynamic_rotate %139 by %c7_i32_95 dim 1 : vector<16x8x16xf32>, i32 -> vector<16x8x16xf32>
    %cst_96 = arith.constant 0.000000e+00 : f32
    %154 = vector.broadcast %cst_96 : f32 to vector<16x8x16xf32>
    %155 = arith.select %115, %153, %154 : vector<16x8x16xi1>, vector<16x8x16xf32>
    %156 = vector.shape_cast %155 : vector<16x8x16xf32> to vector<128x16xf32>
    %157 = arith.truncf %156 : vector<128x16xf32> to vector<128x16xbf16>
    %c256 = arith.constant 256 : index
    %c0_97 = arith.constant 0 : index
    %158 = vector.load %arg2[%c256, %c0_97] : memref<5472x128xbf16, #tpu.memory_space<vmem>>, vector<16x16xbf16>
    %cst_98 = arith.constant dense<0.000000e+00> : vector<128x16xf32>
    %159 = tpu.matmul %157, %158, %cst_98 {dimension_numbers = #tpu.dot_dimension_numbers<[1], [0], [0], [1], [0, 0, 1, 1], [], []>} : vector<128x16xbf16>, vector<16x16xbf16>, vector<128x16xf32> -> vector<128x16xf32>
    %160 = arith.addf %152, %159 : vector<128x16xf32>
    %c2_99 = arith.constant 2 : index
    %c0_100 = arith.constant 0 : index
    %c0_101 = arith.constant 0 : index
    %161 = vector.load %arg5[%c2_99, %c0_100, %c0_101] : memref<18x8x128xf32, #tpu.memory_space<vmem>>, vector<16x8x16xf32>
    %c1_i32_102 = arith.constant 1 : i32
    %162 = tpu.dynamic_rotate %161 by %c1_i32_102 dim 1 : vector<16x8x16xf32>, i32 -> vector<16x8x16xf32>
    %cst_103 = arith.constant 0.000000e+00 : f32
    %163 = vector.broadcast %cst_103 : f32 to vector<16x8x16xf32>
    %164 = arith.select %113, %162, %163 : vector<16x8x16xi1>, vector<16x8x16xf32>
    %165 = vector.shape_cast %164 : vector<16x8x16xf32> to vector<128x16xf32>
    %166 = arith.truncf %165 : vector<128x16xf32> to vector<128x16xbf16>
    %c176 = arith.constant 176 : index
    %c0_104 = arith.constant 0 : index
    %167 = vector.load %arg2[%c176, %c0_104] : memref<5472x128xbf16, #tpu.memory_space<vmem>>, vector<16x16xbf16>
    %cst_105 = arith.constant dense<0.000000e+00> : vector<128x16xf32>
    %168 = tpu.matmul %166, %167, %cst_105 {dimension_numbers = #tpu.dot_dimension_numbers<[1], [0], [0], [1], [0, 0, 1, 1], [], []>} : vector<128x16xbf16>, vector<16x16xbf16>, vector<128x16xf32> -> vector<128x16xf32>
    %169 = arith.addf %160, %168 : vector<128x16xf32>
    %170 = vector.shape_cast %161 : vector<16x8x16xf32> to vector<128x16xf32>
    %171 = arith.truncf %170 : vector<128x16xf32> to vector<128x16xbf16>
    %c224 = arith.constant 224 : index
    %c0_106 = arith.constant 0 : index
    %172 = vector.load %arg2[%c224, %c0_106] : memref<5472x128xbf16, #tpu.memory_space<vmem>>, vector<16x16xbf16>
    %cst_107 = arith.constant dense<0.000000e+00> : vector<128x16xf32>
    %173 = tpu.matmul %171, %172, %cst_107 {dimension_numbers = #tpu.dot_dimension_numbers<[1], [0], [0], [1], [0, 0, 1, 1], [], []>} : vector<128x16xbf16>, vector<16x16xbf16>, vector<128x16xf32> -> vector<128x16xf32>
    %174 = arith.addf %169, %173 : vector<128x16xf32>
    %c7_i32_108 = arith.constant 7 : i32
    %175 = tpu.dynamic_rotate %161 by %c7_i32_108 dim 1 : vector<16x8x16xf32>, i32 -> vector<16x8x16xf32>
    %cst_109 = arith.constant 0.000000e+00 : f32
    %176 = vector.broadcast %cst_109 : f32 to vector<16x8x16xf32>
    %177 = arith.select %115, %175, %176 : vector<16x8x16xi1>, vector<16x8x16xf32>
    %178 = vector.shape_cast %177 : vector<16x8x16xf32> to vector<128x16xf32>
    %179 = arith.truncf %178 : vector<128x16xf32> to vector<128x16xbf16>
    %c272 = arith.constant 272 : index
    %c0_110 = arith.constant 0 : index
    %180 = vector.load %arg2[%c272, %c0_110] : memref<5472x128xbf16, #tpu.memory_space<vmem>>, vector<16x16xbf16>
    %cst_111 = arith.constant dense<0.000000e+00> : vector<128x16xf32>
    %181 = tpu.matmul %179, %180, %cst_111 {dimension_numbers = #tpu.dot_dimension_numbers<[1], [0], [0], [1], [0, 0, 1, 1], [], []>} : vector<128x16xbf16>, vector<16x16xbf16>, vector<128x16xf32> -> vector<128x16xf32>
    %182 = arith.addf %174, %181 : vector<128x16xf32>
    %cst_112 = arith.constant dense<0.000000e+00> : vector<16xf32>
    %183 = vector.multi_reduction <add>, %182, %cst_112 [0] : vector<128x16xf32> to vector<16xf32>
    %184 = vector.shape_cast %183 : vector<16xf32> to vector<1x16xf32>
    %cst_113 = arith.constant 7.812500e-03 : f32
    %185 = vector.broadcast %cst_113 : f32 to vector<1x16xf32>
    %186 = arith.mulf %184, %185 : vector<1x16xf32>
    %187 = arith.mulf %182, %182 : vector<128x16xf32>
    %cst_114 = arith.constant dense<0.000000e+00> : vector<16xf32>
    %188 = vector.multi_reduction <add>, %187, %cst_114 [0] : vector<128x16xf32> to vector<16xf32>
    %189 = vector.shape_cast %188 : vector<16xf32> to vector<1x16xf32>
    %cst_115 = arith.constant 7.812500e-03 : f32
    %190 = vector.broadcast %cst_115 : f32 to vector<1x16xf32>
    %191 = arith.mulf %189, %190 : vector<1x16xf32>
    %192 = arith.mulf %186, %186 : vector<1x16xf32>
    %193 = arith.subf %191, %192 : vector<1x16xf32>
    %c0_116 = arith.constant 0 : index
    %c128_117 = arith.constant 128 : index
    %194 = vector.load %arg3[%c0_116, %c128_117] : memref<2x1536xf32, #tpu.memory_space<vmem>>, vector<1x16xf32>
    %c1_118 = arith.constant 1 : index
    %c128_119 = arith.constant 128 : index
    %195 = vector.load %arg3[%c1_118, %c128_119] : memref<2x1536xf32, #tpu.memory_space<vmem>>, vector<1x16xf32>
    %cst_120 = arith.constant 9.99999974E-6 : f32
    %196 = vector.broadcast %cst_120 : f32 to vector<1x16xf32>
    %197 = arith.addf %193, %196 : vector<1x16xf32>
    %198 = math.rsqrt %197 : vector<1x16xf32>
    %199 = arith.mulf %194, %198 : vector<1x16xf32>
    %200 = vector.broadcast %199 : vector<1x16xf32> to vector<128x16xf32>
    %201 = arith.mulf %182, %200 : vector<128x16xf32>
    %202 = arith.mulf %186, %199 : vector<1x16xf32>
    %203 = arith.subf %195, %202 : vector<1x16xf32>
    %204 = vector.broadcast %203 : vector<1x16xf32> to vector<128x16xf32>
    %205 = arith.addf %201, %204 : vector<128x16xf32>
    %cst_121 = arith.constant 0.000000e+00 : f32
    %206 = vector.broadcast %cst_121 : f32 to vector<128x16xf32>
    %207 = arith.cmpf oge, %205, %206 : vector<128x16xf32>
    %cst_122 = arith.constant 3.000000e-01 : f32
    %208 = vector.broadcast %cst_122 : f32 to vector<128x16xf32>
    %209 = arith.mulf %208, %205 : vector<128x16xf32>
    %210 = arith.select %207, %205, %209 : vector<128x16xi1>, vector<128x16xf32>
    %211 = vector.shape_cast %210 : vector<128x16xf32> to vector<16x8x16xf32>
    %212 = arith.addf %211, %106 : vector<16x8x16xf32>
    %cst_123 = arith.constant 0.000000e+00 : f32
    %213 = vector.broadcast %cst_123 : f32 to vector<1x8x16xf32>
    %c0_124 = arith.constant 0 : index
    %c0_125 = arith.constant 0 : index
    %c0_126 = arith.constant 0 : index
    %214 = vector.load %arg5[%c0_124, %c0_125, %c0_126] : memref<18x8x128xf32, #tpu.memory_space<vmem>>, vector<1x8x16xf32>
    tpu.vector_store %arg5[%c0_124, %c0_125, %c0_126], %213 {strides = array<i32>} : memref<18x8x128xf32, #tpu.memory_space<vmem>>, vector<1x8x16xf32>,
    %c17_127 = arith.constant 17 : index
    %c0_128 = arith.constant 0 : index
    %c0_129 = arith.constant 0 : index
    %215 = vector.load %arg5[%c17_127, %c0_128, %c0_129] : memref<18x8x128xf32, #tpu.memory_space<vmem>>, vector<1x8x16xf32>
    tpu.vector_store %arg5[%c17_127, %c0_128, %c0_129], %213 {strides = array<i32>} : memref<18x8x128xf32, #tpu.memory_space<vmem>>, vector<1x8x16xf32>,
    %c1_130 = arith.constant 1 : index
    %c0_131 = arith.constant 0 : index
    %c0_132 = arith.constant 0 : index
    %216 = vector.load %arg5[%c1_130, %c0_131, %c0_132] : memref<18x8x128xf32, #tpu.memory_space<vmem>>, vector<16x8x16xf32>
    tpu.vector_store %arg5[%c1_130, %c0_131, %c0_132], %212 {strides = array<i32>} : memref<18x8x128xf32, #tpu.memory_space<vmem>>, vector<16x8x16xf32>,
    %217 = tpu.iota {dimensions = array<i32: 1>} : vector<6x8x16xi32>
    %c0_i32_133 = arith.constant 0 : i32
    %218 = vector.broadcast %c0_i32_133 : i32 to vector<6x8x16xi32>
    %219 = arith.cmpi sgt, %217, %218 : vector<6x8x16xi32>
    %c7_i32_134 = arith.constant 7 : i32
    %220 = vector.broadcast %c7_i32_134 : i32 to vector<6x8x16xi32>
    %221 = arith.cmpi slt, %217, %220 : vector<6x8x16xi32>
    %cst_135 = arith.constant 0.000000e+00 : f32
    %222 = vector.broadcast %cst_135 : f32 to vector<48x16xf32>
    %c0_136 = arith.constant 0 : index
    %c0_137 = arith.constant 0 : index
    %c0_138 = arith.constant 0 : index
    %223 = tpu.strided_load %arg5[%c0_136, %c0_137, %c0_138] {strides = array<i32: 3, 1, 1>} : memref<18x8x128xf32, #tpu.memory_space<vmem>>, vector<6x8x16xf32>
    %c1_i32_139 = arith.constant 1 : i32
    %224 = tpu.dynamic_rotate %223 by %c1_i32_139 dim 1 : vector<6x8x16xf32>, i32 -> vector<6x8x16xf32>
    %cst_140 = arith.constant 0.000000e+00 : f32
    %225 = vector.broadcast %cst_140 : f32 to vector<6x8x16xf32>
    %226 = arith.select %219, %224, %225 : vector<6x8x16xi1>, vector<6x8x16xf32>
    %227 = vector.shape_cast %226 : vector<6x8x16xf32> to vector<48x16xf32>
    %228 = arith.truncf %227 : vector<48x16xf32> to vector<48x16xbf16>
    %c288 = arith.constant 288 : index
    %c0_141 = arith.constant 0 : index
    %229 = vector.load %arg2[%c288, %c0_141] : memref<5472x128xbf16, #tpu.memory_space<vmem>>, vector<16x16xbf16>
    %cst_142 = arith.constant dense<0.000000e+00> : vector<48x16xf32>
    %230 = tpu.matmul %228, %229, %cst_142 {dimension_numbers = #tpu.dot_dimension_numbers<[1], [0], [0], [1], [0, 0, 1, 1], [], []>} : vector<48x16xbf16>, vector<16x16xbf16>, vector<48x16xf32> -> vector<48x16xf32>
    %231 = arith.addf %222, %230 : vector<48x16xf32>
    %232 = vector.shape_cast %223 : vector<6x8x16xf32> to vector<48x16xf32>
    %233 = arith.truncf %232 : vector<48x16xf32> to vector<48x16xbf16>
    %c336 = arith.constant 336 : index
    %c0_143 = arith.constant 0 : index
    %234 = vector.load %arg2[%c336, %c0_143] : memref<5472x128xbf16, #tpu.memory_space<vmem>>, vector<16x16xbf16>
    %cst_144 = arith.constant dense<0.000000e+00> : vector<48x16xf32>
    %235 = tpu.matmul %233, %234, %cst_144 {dimension_numbers = #tpu.dot_dimension_numbers<[1], [0], [0], [1], [0, 0, 1, 1], [], []>} : vector<48x16xbf16>, vector<16x16xbf16>, vector<48x16xf32> -> vector<48x16xf32>
    %236 = arith.addf %231, %235 : vector<48x16xf32>
    %c7_i32_145 = arith.constant 7 : i32
    %237 = tpu.dynamic_rotate %223 by %c7_i32_145 dim 1 : vector<6x8x16xf32>, i32 -> vector<6x8x16xf32>
    %cst_146 = arith.constant 0.000000e+00 : f32
    %238 = vector.broadcast %cst_146 : f32 to vector<6x8x16xf32>
    %239 = arith.select %221, %237, %238 : vector<6x8x16xi1>, vector<6x8x16xf32>
    %240 = vector.shape_cast %239 : vector<6x8x16xf32> to vector<48x16xf32>
    %241 = arith.truncf %240 : vector<48x16xf32> to vector<48x16xbf16>
    %c384 = arith.constant 384 : index
    %c0_147 = arith.constant 0 : index
    %242 = vector.load %arg2[%c384, %c0_147] : memref<5472x128xbf16, #tpu.memory_space<vmem>>, vector<16x16xbf16>
    %cst_148 = arith.constant dense<0.000000e+00> : vector<48x16xf32>
    %243 = tpu.matmul %241, %242, %cst_148 {dimension_numbers = #tpu.dot_dimension_numbers<[1], [0], [0], [1], [0, 0, 1, 1], [], []>} : vector<48x16xbf16>, vector<16x16xbf16>, vector<48x16xf32> -> vector<48x16xf32>
    %244 = arith.addf %236, %243 : vector<48x16xf32>
    %c1_149 = arith.constant 1 : index
    %c0_150 = arith.constant 0 : index
    %c0_151 = arith.constant 0 : index
    %245 = tpu.strided_load %arg5[%c1_149, %c0_150, %c0_151] {strides = array<i32: 3, 1, 1>} : memref<18x8x128xf32, #tpu.memory_space<vmem>>, vector<6x8x16xf32>
    %c1_i32_152 = arith.constant 1 : i32
    %246 = tpu.dynamic_rotate %245 by %c1_i32_152 dim 1 : vector<6x8x16xf32>, i32 -> vector<6x8x16xf32>
    %cst_153 = arith.constant 0.000000e+00 : f32
    %247 = vector.broadcast %cst_153 : f32 to vector<6x8x16xf32>
    %248 = arith.select %219, %246, %247 : vector<6x8x16xi1>, vector<6x8x16xf32>
    %249 = vector.shape_cast %248 : vector<6x8x16xf32> to vector<48x16xf32>
    %250 = arith.truncf %249 : vector<48x16xf32> to vector<48x16xbf16>
    %c304 = arith.constant 304 : index
    %c0_154 = arith.constant 0 : index
    %251 = vector.load %arg2[%c304, %c0_154] : memref<5472x128xbf16, #tpu.memory_space<vmem>>, vector<16x16xbf16>
    %cst_155 = arith.constant dense<0.000000e+00> : vector<48x16xf32>
    %252 = tpu.matmul %250, %251, %cst_155 {dimension_numbers = #tpu.dot_dimension_numbers<[1], [0], [0], [1], [0, 0, 1, 1], [], []>} : vector<48x16xbf16>, vector<16x16xbf16>, vector<48x16xf32> -> vector<48x16xf32>
    %253 = arith.addf %244, %252 : vector<48x16xf32>
    %254 = vector.shape_cast %245 : vector<6x8x16xf32> to vector<48x16xf32>
    %255 = arith.truncf %254 : vector<48x16xf32> to vector<48x16xbf16>
    %c352 = arith.constant 352 : index
    %c0_156 = arith.constant 0 : index
    %256 = vector.load %arg2[%c352, %c0_156] : memref<5472x128xbf16, #tpu.memory_space<vmem>>, vector<16x16xbf16>
    %cst_157 = arith.constant dense<0.000000e+00> : vector<48x16xf32>
    %257 = tpu.matmul %255, %256, %cst_157 {dimension_numbers = #tpu.dot_dimension_numbers<[1], [0], [0], [1], [0, 0, 1, 1], [], []>} : vector<48x16xbf16>, vector<16x16xbf16>, vector<48x16xf32> -> vector<48x16xf32>
    %258 = arith.addf %253, %257 : vector<48x16xf32>
    %c7_i32_158 = arith.constant 7 : i32
    %259 = tpu.dynamic_rotate %245 by %c7_i32_158 dim 1 : vector<6x8x16xf32>, i32 -> vector<6x8x16xf32>
    %cst_159 = arith.constant 0.000000e+00 : f32
    %260 = vector.broadcast %cst_159 : f32 to vector<6x8x16xf32>
    %261 = arith.select %221, %259, %260 : vector<6x8x16xi1>, vector<6x8x16xf32>
    %262 = vector.shape_cast %261 : vector<6x8x16xf32> to vector<48x16xf32>
    %263 = arith.truncf %262 : vector<48x16xf32> to vector<48x16xbf16>
    %c400 = arith.constant 400 : index
    %c0_160 = arith.constant 0 : index
    %264 = vector.load %arg2[%c400, %c0_160] : memref<5472x128xbf16, #tpu.memory_space<vmem>>, vector<16x16xbf16>
    %cst_161 = arith.constant dense<0.000000e+00> : vector<48x16xf32>
    %265 = tpu.matmul %263, %264, %cst_161 {dimension_numbers = #tpu.dot_dimension_numbers<[1], [0], [0], [1], [0, 0, 1, 1], [], []>} : vector<48x16xbf16>, vector<16x16xbf16>, vector<48x16xf32> -> vector<48x16xf32>
    %266 = arith.addf %258, %265 : vector<48x16xf32>
    %c2_162 = arith.constant 2 : index
    %c0_163 = arith.constant 0 : index
    %c0_164 = arith.constant 0 : index
    %267 = tpu.strided_load %arg5[%c2_162, %c0_163, %c0_164] {strides = array<i32: 3, 1, 1>} : memref<18x8x128xf32, #tpu.memory_space<vmem>>, vector<6x8x16xf32>
    %c1_i32_165 = arith.constant 1 : i32
    %268 = tpu.dynamic_rotate %267 by %c1_i32_165 dim 1 : vector<6x8x16xf32>, i32 -> vector<6x8x16xf32>
    %cst_166 = arith.constant 0.000000e+00 : f32
    %269 = vector.broadcast %cst_166 : f32 to vector<6x8x16xf32>
    %270 = arith.select %219, %268, %269 : vector<6x8x16xi1>, vector<6x8x16xf32>
    %271 = vector.shape_cast %270 : vector<6x8x16xf32> to vector<48x16xf32>
    %272 = arith.truncf %271 : vector<48x16xf32> to vector<48x16xbf16>
    %c320 = arith.constant 320 : index
    %c0_167 = arith.constant 0 : index
    %273 = vector.load %arg2[%c320, %c0_167] : memref<5472x128xbf16, #tpu.memory_space<vmem>>, vector<16x16xbf16>
    %cst_168 = arith.constant dense<0.000000e+00> : vector<48x16xf32>
    %274 = tpu.matmul %272, %273, %cst_168 {dimension_numbers = #tpu.dot_dimension_numbers<[1], [0], [0], [1], [0, 0, 1, 1], [], []>} : vector<48x16xbf16>, vector<16x16xbf16>, vector<48x16xf32> -> vector<48x16xf32>
    %275 = arith.addf %266, %274 : vector<48x16xf32>
    %276 = vector.shape_cast %267 : vector<6x8x16xf32> to vector<48x16xf32>
    %277 = arith.truncf %276 : vector<48x16xf32> to vector<48x16xbf16>
    %c368 = arith.constant 368 : index
    %c0_169 = arith.constant 0 : index
    %278 = vector.load %arg2[%c368, %c0_169] : memref<5472x128xbf16, #tpu.memory_space<vmem>>, vector<16x16xbf16>
    %cst_170 = arith.constant dense<0.000000e+00> : vector<48x16xf32>
    %279 = tpu.matmul %277, %278, %cst_170 {dimension_numbers = #tpu.dot_dimension_numbers<[1], [0], [0], [1], [0, 0, 1, 1], [], []>} : vector<48x16xbf16>, vector<16x16xbf16>, vector<48x16xf32> -> vector<48x16xf32>
    %280 = arith.addf %275, %279 : vector<48x16xf32>
    %c7_i32_171 = arith.constant 7 : i32
    %281 = tpu.dynamic_rotate %267 by %c7_i32_171 dim 1 : vector<6x8x16xf32>, i32 -> vector<6x8x16xf32>
    %cst_172 = arith.constant 0.000000e+00 : f32
    %282 = vector.broadcast %cst_172 : f32 to vector<6x8x16xf32>
    %283 = arith.select %221, %281, %282 : vector<6x8x16xi1>, vector<6x8x16xf32>
    %284 = vector.shape_cast %283 : vector<6x8x16xf32> to vector<48x16xf32>
    %285 = arith.truncf %284 : vector<48x16xf32> to vector<48x16xbf16>
    %c416 = arith.constant 416 : index
    %c0_173 = arith.constant 0 : index
    %286 = vector.load %arg2[%c416, %c0_173] : memref<5472x128xbf16, #tpu.memory_space<vmem>>, vector<16x16xbf16>
    %cst_174 = arith.constant dense<0.000000e+00> : vector<48x16xf32>
    %287 = tpu.matmul %285, %286, %cst_174 {dimension_numbers = #tpu.dot_dimension_numbers<[1], [0], [0], [1], [0, 0, 1, 1], [], []>} : vector<48x16xbf16>, vector<16x16xbf16>, vector<48x16xf32> -> vector<48x16xf32>
    %288 = arith.addf %280, %287 : vector<48x16xf32>
    %cst_175 = arith.constant dense<0.000000e+00> : vector<16xf32>
    %289 = vector.multi_reduction <add>, %288, %cst_175 [0] : vector<48x16xf32> to vector<16xf32>
    %290 = vector.shape_cast %289 : vector<16xf32> to vector<1x16xf32>
    %cst_176 = arith.constant 0.020833334 : f32
    %291 = vector.broadcast %cst_176 : f32 to vector<1x16xf32>
    %292 = arith.mulf %290, %291 : vector<1x16xf32>
    %293 = arith.mulf %288, %288 : vector<48x16xf32>
    %cst_177 = arith.constant dense<0.000000e+00> : vector<16xf32>
    %294 = vector.multi_reduction <add>, %293, %cst_177 [0] : vector<48x16xf32> to vector<16xf32>
    %295 = vector.shape_cast %294 : vector<16xf32> to vector<1x16xf32>
    %cst_178 = arith.constant 0.020833334 : f32
    %296 = vector.broadcast %cst_178 : f32 to vector<1x16xf32>
    %297 = arith.mulf %295, %296 : vector<1x16xf32>
    %298 = arith.mulf %292, %292 : vector<1x16xf32>
    %299 = arith.subf %297, %298 : vector<1x16xf32>
    %c0_179 = arith.constant 0 : index
    %c256_180 = arith.constant 256 : index
    %300 = vector.load %arg3[%c0_179, %c256_180] : memref<2x1536xf32, #tpu.memory_space<vmem>>, vector<1x16xf32>
    %c1_181 = arith.constant 1 : index
    %c256_182 = arith.constant 256 : index
    %301 = vector.load %arg3[%c1_181, %c256_182] : memref<2x1536xf32, #tpu.memory_space<vmem>>, vector<1x16xf32>
    %cst_183 = arith.constant 9.99999974E-6 : f32
    %302 = vector.broadcast %cst_183 : f32 to vector<1x16xf32>
    %303 = arith.addf %299, %302 : vector<1x16xf32>
    %304 = math.rsqrt %303 : vector<1x16xf32>
    %305 = arith.mulf %300, %304 : vector<1x16xf32>
    %306 = vector.broadcast %305 : vector<1x16xf32> to vector<48x16xf32>
    %307 = arith.mulf %288, %306 : vector<48x16xf32>
    %308 = arith.mulf %292, %305 : vector<1x16xf32>
    %309 = arith.subf %301, %308 : vector<1x16xf32>
    %310 = vector.broadcast %309 : vector<1x16xf32> to vector<48x16xf32>
    %311 = arith.addf %307, %310 : vector<48x16xf32>
    %cst_184 = arith.constant 0.000000e+00 : f32
    %312 = vector.broadcast %cst_184 : f32 to vector<48x16xf32>
    %313 = arith.cmpf oge, %311, %312 : vector<48x16xf32>
    %cst_185 = arith.constant 3.000000e-01 : f32
    %314 = vector.broadcast %cst_185 : f32 to vector<48x16xf32>
    %315 = arith.mulf %314, %311 : vector<48x16xf32>
    %316 = arith.select %313, %311, %315 : vector<48x16xi1>, vector<48x16xf32>
    %317 = vector.shape_cast %316 : vector<48x16xf32> to vector<6x8x16xf32>
    %cst_186 = arith.constant 0.000000e+00 : f32
    %318 = vector.broadcast %cst_186 : f32 to vector<1x8x16xf32>
    %c0_187 = arith.constant 0 : index
    %c0_188 = arith.constant 0 : index
    %c0_189 = arith.constant 0 : index
    %319 = vector.load %arg5[%c0_187, %c0_188, %c0_189] : memref<18x8x128xf32, #tpu.memory_space<vmem>>, vector<1x8x16xf32>
    tpu.vector_store %arg5[%c0_187, %c0_188, %c0_189], %318 {strides = array<i32>} : memref<18x8x128xf32, #tpu.memory_space<vmem>>, vector<1x8x16xf32>,
    %c7 = arith.constant 7 : index
    %c0_190 = arith.constant 0 : index
    %c0_191 = arith.constant 0 : index
    %320 = vector.load %arg5[%c7, %c0_190, %c0_191] : memref<18x8x128xf32, #tpu.memory_space<vmem>>, vector<1x8x16xf32>
    tpu.vector_store %arg5[%c7, %c0_190, %c0_191], %318 {strides = array<i32>} : memref<18x8x128xf32, #tpu.memory_space<vmem>>, vector<1x8x16xf32>,
    %c1_192 = arith.constant 1 : index
    %c0_193 = arith.constant 0 : index
    %c0_194 = arith.constant 0 : index
    %321 = vector.load %arg5[%c1_192, %c0_193, %c0_194] : memref<18x8x128xf32, #tpu.memory_space<vmem>>, vector<6x8x16xf32>
    tpu.vector_store %arg5[%c1_192, %c0_193, %c0_194], %317 {strides = array<i32>} : memref<18x8x128xf32, #tpu.memory_space<vmem>>, vector<6x8x16xf32>,
    %322 = tpu.iota {dimensions = array<i32: 1>} : vector<6x8x16xi32>
    %c0_i32_195 = arith.constant 0 : i32
    %323 = vector.broadcast %c0_i32_195 : i32 to vector<6x8x16xi32>
    %324 = arith.cmpi sgt, %322, %323 : vector<6x8x16xi32>
    %c7_i32_196 = arith.constant 7 : i32
    %325 = vector.broadcast %c7_i32_196 : i32 to vector<6x8x16xi32>
    %326 = arith.cmpi slt, %322, %325 : vector<6x8x16xi32>
    %cst_197 = arith.constant 0.000000e+00 : f32
    %327 = vector.broadcast %cst_197 : f32 to vector<48x32xf32>
    %c0_198 = arith.constant 0 : index
    %c0_199 = arith.constant 0 : index
    %c0_200 = arith.constant 0 : index
    %328 = vector.load %arg5[%c0_198, %c0_199, %c0_200] : memref<18x8x128xf32, #tpu.memory_space<vmem>>, vector<6x8x16xf32>
    %c1_i32_201 = arith.constant 1 : i32
    %329 = tpu.dynamic_rotate %328 by %c1_i32_201 dim 1 : vector<6x8x16xf32>, i32 -> vector<6x8x16xf32>
    %cst_202 = arith.constant 0.000000e+00 : f32
    %330 = vector.broadcast %cst_202 : f32 to vector<6x8x16xf32>
    %331 = arith.select %324, %329, %330 : vector<6x8x16xi1>, vector<6x8x16xf32>
    %332 = vector.shape_cast %331 : vector<6x8x16xf32> to vector<48x16xf32>
    %333 = arith.truncf %332 : vector<48x16xf32> to vector<48x16xbf16>
    %c432 = arith.constant 432 : index
    %c0_203 = arith.constant 0 : index
    %334 = vector.load %arg2[%c432, %c0_203] : memref<5472x128xbf16, #tpu.memory_space<vmem>>, vector<16x32xbf16>
    %cst_204 = arith.constant dense<0.000000e+00> : vector<48x32xf32>
    %335 = tpu.matmul %333, %334, %cst_204 {dimension_numbers = #tpu.dot_dimension_numbers<[1], [0], [0], [1], [0, 0, 1, 1], [], []>} : vector<48x16xbf16>, vector<16x32xbf16>, vector<48x32xf32> -> vector<48x32xf32>
    %336 = arith.addf %327, %335 : vector<48x32xf32>
    %337 = vector.shape_cast %328 : vector<6x8x16xf32> to vector<48x16xf32>
    %338 = arith.truncf %337 : vector<48x16xf32> to vector<48x16xbf16>
    %c480 = arith.constant 480 : index
    %c0_205 = arith.constant 0 : index
    %339 = vector.load %arg2[%c480, %c0_205] : memref<5472x128xbf16, #tpu.memory_space<vmem>>, vector<16x32xbf16>
    %cst_206 = arith.constant dense<0.000000e+00> : vector<48x32xf32>
    %340 = tpu.matmul %338, %339, %cst_206 {dimension_numbers = #tpu.dot_dimension_numbers<[1], [0], [0], [1], [0, 0, 1, 1], [], []>} : vector<48x16xbf16>, vector<16x32xbf16>, vector<48x32xf32> -> vector<48x32xf32>
    %341 = arith.addf %336, %340 : vector<48x32xf32>
    %c7_i32_207 = arith.constant 7 : i32
    %342 = tpu.dynamic_rotate %328 by %c7_i32_207 dim 1 : vector<6x8x16xf32>, i32 -> vector<6x8x16xf32>
    %cst_208 = arith.constant 0.000000e+00 : f32
    %343 = vector.broadcast %cst_208 : f32 to vector<6x8x16xf32>
    %344 = arith.select %326, %342, %343 : vector<6x8x16xi1>, vector<6x8x16xf32>
    %345 = vector.shape_cast %344 : vector<6x8x16xf32> to vector<48x16xf32>
    %346 = arith.truncf %345 : vector<48x16xf32> to vector<48x16xbf16>
    %c528 = arith.constant 528 : index
    %c0_209 = arith.constant 0 : index
    %347 = vector.load %arg2[%c528, %c0_209] : memref<5472x128xbf16, #tpu.memory_space<vmem>>, vector<16x32xbf16>
    %cst_210 = arith.constant dense<0.000000e+00> : vector<48x32xf32>
    %348 = tpu.matmul %346, %347, %cst_210 {dimension_numbers = #tpu.dot_dimension_numbers<[1], [0], [0], [1], [0, 0, 1, 1], [], []>} : vector<48x16xbf16>, vector<16x32xbf16>, vector<48x32xf32> -> vector<48x32xf32>
    %349 = arith.addf %341, %348 : vector<48x32xf32>
    %c1_211 = arith.constant 1 : index
    %c0_212 = arith.constant 0 : index
    %c0_213 = arith.constant 0 : index
    %350 = vector.load %arg5[%c1_211, %c0_212, %c0_213] : memref<18x8x128xf32, #tpu.memory_space<vmem>>, vector<6x8x16xf32>
    %c1_i32_214 = arith.constant 1 : i32
    %351 = tpu.dynamic_rotate %350 by %c1_i32_214 dim 1 : vector<6x8x16xf32>, i32 -> vector<6x8x16xf32>
    %cst_215 = arith.constant 0.000000e+00 : f32
    %352 = vector.broadcast %cst_215 : f32 to vector<6x8x16xf32>
    %353 = arith.select %324, %351, %352 : vector<6x8x16xi1>, vector<6x8x16xf32>
    %354 = vector.shape_cast %353 : vector<6x8x16xf32> to vector<48x16xf32>
    %355 = arith.truncf %354 : vector<48x16xf32> to vector<48x16xbf16>
    %c448 = arith.constant 448 : index
    %c0_216 = arith.constant 0 : index
    %356 = vector.load %arg2[%c448, %c0_216] : memref<5472x128xbf16, #tpu.memory_space<vmem>>, vector<16x32xbf16>
    %cst_217 = arith.constant dense<0.000000e+00> : vector<48x32xf32>
    %357 = tpu.matmul %355, %356, %cst_217 {dimension_numbers = #tpu.dot_dimension_numbers<[1], [0], [0], [1], [0, 0, 1, 1], [], []>} : vector<48x16xbf16>, vector<16x32xbf16>, vector<48x32xf32> -> vector<48x32xf32>
    %358 = arith.addf %349, %357 : vector<48x32xf32>
    %359 = vector.shape_cast %350 : vector<6x8x16xf32> to vector<48x16xf32>
    %360 = arith.truncf %359 : vector<48x16xf32> to vector<48x16xbf16>
    %c496 = arith.constant 496 : index
    %c0_218 = arith.constant 0 : index
    %361 = vector.load %arg2[%c496, %c0_218] : memref<5472x128xbf16, #tpu.memory_space<vmem>>, vector<16x32xbf16>
    %cst_219 = arith.constant dense<0.000000e+00> : vector<48x32xf32>
    %362 = tpu.matmul %360, %361, %cst_219 {dimension_numbers = #tpu.dot_dimension_numbers<[1], [0], [0], [1], [0, 0, 1, 1], [], []>} : vector<48x16xbf16>, vector<16x32xbf16>, vector<48x32xf32> -> vector<48x32xf32>
    %363 = arith.addf %358, %362 : vector<48x32xf32>
    %c7_i32_220 = arith.constant 7 : i32
    %364 = tpu.dynamic_rotate %350 by %c7_i32_220 dim 1 : vector<6x8x16xf32>, i32 -> vector<6x8x16xf32>
    %cst_221 = arith.constant 0.000000e+00 : f32
    %365 = vector.broadcast %cst_221 : f32 to vector<6x8x16xf32>
    %366 = arith.select %326, %364, %365 : vector<6x8x16xi1>, vector<6x8x16xf32>
    %367 = vector.shape_cast %366 : vector<6x8x16xf32> to vector<48x16xf32>
    %368 = arith.truncf %367 : vector<48x16xf32> to vector<48x16xbf16>
    %c544 = arith.constant 544 : index
    %c0_222 = arith.constant 0 : index
    %369 = vector.load %arg2[%c544, %c0_222] : memref<5472x128xbf16, #tpu.memory_space<vmem>>, vector<16x32xbf16>
    %cst_223 = arith.constant dense<0.000000e+00> : vector<48x32xf32>
    %370 = tpu.matmul %368, %369, %cst_223 {dimension_numbers = #tpu.dot_dimension_numbers<[1], [0], [0], [1], [0, 0, 1, 1], [], []>} : vector<48x16xbf16>, vector<16x32xbf16>, vector<48x32xf32> -> vector<48x32xf32>
    %371 = arith.addf %363, %370 : vector<48x32xf32>
    %c2_224 = arith.constant 2 : index
    %c0_225 = arith.constant 0 : index
    %c0_226 = arith.constant 0 : index
    %372 = vector.load %arg5[%c2_224, %c0_225, %c0_226] : memref<18x8x128xf32, #tpu.memory_space<vmem>>, vector<6x8x16xf32>
    %c1_i32_227 = arith.constant 1 : i32
    %373 = tpu.dynamic_rotate %372 by %c1_i32_227 dim 1 : vector<6x8x16xf32>, i32 -> vector<6x8x16xf32>
    %cst_228 = arith.constant 0.000000e+00 : f32
    %374 = vector.broadcast %cst_228 : f32 to vector<6x8x16xf32>
    %375 = arith.select %324, %373, %374 : vector<6x8x16xi1>, vector<6x8x16xf32>
    %376 = vector.shape_cast %375 : vector<6x8x16xf32> to vector<48x16xf32>
    %377 = arith.truncf %376 : vector<48x16xf32> to vector<48x16xbf16>
    %c464 = arith.constant 464 : index
    %c0_229 = arith.constant 0 : index
    %378 = vector.load %arg2[%c464, %c0_229] : memref<5472x128xbf16, #tpu.memory_space<vmem>>, vector<16x32xbf16>
    %cst_230 = arith.constant dense<0.000000e+00> : vector<48x32xf32>
    %379 = tpu.matmul %377, %378, %cst_230 {dimension_numbers = #tpu.dot_dimension_numbers<[1], [0], [0], [1], [0, 0, 1, 1], [], []>} : vector<48x16xbf16>, vector<16x32xbf16>, vector<48x32xf32> -> vector<48x32xf32>
    %380 = arith.addf %371, %379 : vector<48x32xf32>
    %381 = vector.shape_cast %372 : vector<6x8x16xf32> to vector<48x16xf32>
    %382 = arith.truncf %381 : vector<48x16xf32> to vector<48x16xbf16>
    %c512 = arith.constant 512 : index
    %c0_231 = arith.constant 0 : index
    %383 = vector.load %arg2[%c512, %c0_231] : memref<5472x128xbf16, #tpu.memory_space<vmem>>, vector<16x32xbf16>
    %cst_232 = arith.constant dense<0.000000e+00> : vector<48x32xf32>
    %384 = tpu.matmul %382, %383, %cst_232 {dimension_numbers = #tpu.dot_dimension_numbers<[1], [0], [0], [1], [0, 0, 1, 1], [], []>} : vector<48x16xbf16>, vector<16x32xbf16>, vector<48x32xf32> -> vector<48x32xf32>
    %385 = arith.addf %380, %384 : vector<48x32xf32>
    %c7_i32_233 = arith.constant 7 : i32
    %386 = tpu.dynamic_rotate %372 by %c7_i32_233 dim 1 : vector<6x8x16xf32>, i32 -> vector<6x8x16xf32>
    %cst_234 = arith.constant 0.000000e+00 : f32
    %387 = vector.broadcast %cst_234 : f32 to vector<6x8x16xf32>
    %388 = arith.select %326, %386, %387 : vector<6x8x16xi1>, vector<6x8x16xf32>
    %389 = vector.shape_cast %388 : vector<6x8x16xf32> to vector<48x16xf32>
    %390 = arith.truncf %389 : vector<48x16xf32> to vector<48x16xbf16>
    %c560 = arith.constant 560 : index
    %c0_235 = arith.constant 0 : index
    %391 = vector.load %arg2[%c560, %c0_235] : memref<5472x128xbf16, #tpu.memory_space<vmem>>, vector<16x32xbf16>
    %cst_236 = arith.constant dense<0.000000e+00> : vector<48x32xf32>
    %392 = tpu.matmul %390, %391, %cst_236 {dimension_numbers = #tpu.dot_dimension_numbers<[1], [0], [0], [1], [0, 0, 1, 1], [], []>} : vector<48x16xbf16>, vector<16x32xbf16>, vector<48x32xf32> -> vector<48x32xf32>
    %393 = arith.addf %385, %392 : vector<48x32xf32>
    %cst_237 = arith.constant dense<0.000000e+00> : vector<32xf32>
    %394 = vector.multi_reduction <add>, %393, %cst_237 [0] : vector<48x32xf32> to vector<32xf32>
    %395 = vector.shape_cast %394 : vector<32xf32> to vector<1x32xf32>
    %cst_238 = arith.constant 0.020833334 : f32
    %396 = vector.broadcast %cst_238 : f32 to vector<1x32xf32>
    %397 = arith.mulf %395, %396 : vector<1x32xf32>
    %398 = arith.mulf %393, %393 : vector<48x32xf32>
    %cst_239 = arith.constant dense<0.000000e+00> : vector<32xf32>
    %399 = vector.multi_reduction <add>, %398, %cst_239 [0] : vector<48x32xf32> to vector<32xf32>
    %400 = vector.shape_cast %399 : vector<32xf32> to vector<1x32xf32>
    %cst_240 = arith.constant 0.020833334 : f32
    %401 = vector.broadcast %cst_240 : f32 to vector<1x32xf32>
    %402 = arith.mulf %400, %401 : vector<1x32xf32>
    %403 = arith.mulf %397, %397 : vector<1x32xf32>
    %404 = arith.subf %402, %403 : vector<1x32xf32>
    %c0_241 = arith.constant 0 : index
    %c384_242 = arith.constant 384 : index
    %405 = vector.load %arg3[%c0_241, %c384_242] : memref<2x1536xf32, #tpu.memory_space<vmem>>, vector<1x32xf32>
    %c1_243 = arith.constant 1 : index
    %c384_244 = arith.constant 384 : index
    %406 = vector.load %arg3[%c1_243, %c384_244] : memref<2x1536xf32, #tpu.memory_space<vmem>>, vector<1x32xf32>
    %cst_245 = arith.constant 9.99999974E-6 : f32
    %407 = vector.broadcast %cst_245 : f32 to vector<1x32xf32>
    %408 = arith.addf %404, %407 : vector<1x32xf32>
    %409 = math.rsqrt %408 : vector<1x32xf32>
    %410 = arith.mulf %405, %409 : vector<1x32xf32>
    %411 = vector.broadcast %410 : vector<1x32xf32> to vector<48x32xf32>
    %412 = arith.mulf %393, %411 : vector<48x32xf32>
    %413 = arith.mulf %397, %410 : vector<1x32xf32>
    %414 = arith.subf %406, %413 : vector<1x32xf32>
    %415 = vector.broadcast %414 : vector<1x32xf32> to vector<48x32xf32>
    %416 = arith.addf %412, %415 : vector<48x32xf32>
    %cst_246 = arith.constant 0.000000e+00 : f32
    %417 = vector.broadcast %cst_246 : f32 to vector<48x32xf32>
    %418 = arith.cmpf oge, %416, %417 : vector<48x32xf32>
    %cst_247 = arith.constant 3.000000e-01 : f32
    %419 = vector.broadcast %cst_247 : f32 to vector<48x32xf32>
    %420 = arith.mulf %419, %416 : vector<48x32xf32>
    %421 = arith.select %418, %416, %420 : vector<48x32xi1>, vector<48x32xf32>
    %422 = vector.shape_cast %421 : vector<48x32xf32> to vector<6x8x32xf32>
    %cst_248 = arith.constant 0.000000e+00 : f32
    %423 = vector.broadcast %cst_248 : f32 to vector<1x8x32xf32>
    %c0_249 = arith.constant 0 : index
    %c0_250 = arith.constant 0 : index
    %c0_251 = arith.constant 0 : index
    %424 = vector.load %arg5[%c0_249, %c0_250, %c0_251] : memref<18x8x128xf32, #tpu.memory_space<vmem>>, vector<1x8x32xf32>
    tpu.vector_store %arg5[%c0_249, %c0_250, %c0_251], %423 {strides = array<i32>} : memref<18x8x128xf32, #tpu.memory_space<vmem>>, vector<1x8x32xf32>,
    %c7_252 = arith.constant 7 : index
    %c0_253 = arith.constant 0 : index
    %c0_254 = arith.constant 0 : index
    %425 = vector.load %arg5[%c7_252, %c0_253, %c0_254] : memref<18x8x128xf32, #tpu.memory_space<vmem>>, vector<1x8x32xf32>
    tpu.vector_store %arg5[%c7_252, %c0_253, %c0_254], %423 {strides = array<i32>} : memref<18x8x128xf32, #tpu.memory_space<vmem>>, vector<1x8x32xf32>,
    %c1_255 = arith.constant 1 : index
    %c0_256 = arith.constant 0 : index
    %c0_257 = arith.constant 0 : index
    %426 = vector.load %arg5[%c1_255, %c0_256, %c0_257] : memref<18x8x128xf32, #tpu.memory_space<vmem>>, vector<6x8x32xf32>
    tpu.vector_store %arg5[%c1_255, %c0_256, %c0_257], %422 {strides = array<i32>} : memref<18x8x128xf32, #tpu.memory_space<vmem>>, vector<6x8x32xf32>,
    %427 = tpu.iota {dimensions = array<i32: 1>} : vector<6x8x32xi32>
    %c0_i32_258 = arith.constant 0 : i32
    %428 = vector.broadcast %c0_i32_258 : i32 to vector<6x8x32xi32>
    %429 = arith.cmpi sgt, %427, %428 : vector<6x8x32xi32>
    %c7_i32_259 = arith.constant 7 : i32
    %430 = vector.broadcast %c7_i32_259 : i32 to vector<6x8x32xi32>
    %431 = arith.cmpi slt, %427, %430 : vector<6x8x32xi32>
    %cst_260 = arith.constant 0.000000e+00 : f32
    %432 = vector.broadcast %cst_260 : f32 to vector<48x32xf32>
    %c0_261 = arith.constant 0 : index
    %c0_262 = arith.constant 0 : index
    %c0_263 = arith.constant 0 : index
    %433 = vector.load %arg5[%c0_261, %c0_262, %c0_263] : memref<18x8x128xf32, #tpu.memory_space<vmem>>, vector<6x8x32xf32>
    %c1_i32_264 = arith.constant 1 : i32
    %434 = tpu.dynamic_rotate %433 by %c1_i32_264 dim 1 : vector<6x8x32xf32>, i32 -> vector<6x8x32xf32>
    %cst_265 = arith.constant 0.000000e+00 : f32
    %435 = vector.broadcast %cst_265 : f32 to vector<6x8x32xf32>
    %436 = arith.select %429, %434, %435 : vector<6x8x32xi1>, vector<6x8x32xf32>
    %437 = vector.shape_cast %436 : vector<6x8x32xf32> to vector<48x32xf32>
    %438 = arith.truncf %437 : vector<48x32xf32> to vector<48x32xbf16>
    %c576 = arith.constant 576 : index
    %c0_266 = arith.constant 0 : index
    %439 = vector.load %arg2[%c576, %c0_266] : memref<5472x128xbf16, #tpu.memory_space<vmem>>, vector<32x32xbf16>
    %cst_267 = arith.constant dense<0.000000e+00> : vector<48x32xf32>
    %440 = tpu.matmul %438, %439, %cst_267 {dimension_numbers = #tpu.dot_dimension_numbers<[1], [0], [0], [1], [0, 0, 1, 1], [], []>} : vector<48x32xbf16>, vector<32x32xbf16>, vector<48x32xf32> -> vector<48x32xf32>
    %441 = arith.addf %432, %440 : vector<48x32xf32>
    %442 = vector.shape_cast %433 : vector<6x8x32xf32> to vector<48x32xf32>
    %443 = arith.truncf %442 : vector<48x32xf32> to vector<48x32xbf16>
    %c672 = arith.constant 672 : index
    %c0_268 = arith.constant 0 : index
    %444 = vector.load %arg2[%c672, %c0_268] : memref<5472x128xbf16, #tpu.memory_space<vmem>>, vector<32x32xbf16>
    %cst_269 = arith.constant dense<0.000000e+00> : vector<48x32xf32>
    %445 = tpu.matmul %443, %444, %cst_269 {dimension_numbers = #tpu.dot_dimension_numbers<[1], [0], [0], [1], [0, 0, 1, 1], [], []>} : vector<48x32xbf16>, vector<32x32xbf16>, vector<48x32xf32> -> vector<48x32xf32>
    %446 = arith.addf %441, %445 : vector<48x32xf32>
    %c7_i32_270 = arith.constant 7 : i32
    %447 = tpu.dynamic_rotate %433 by %c7_i32_270 dim 1 : vector<6x8x32xf32>, i32 -> vector<6x8x32xf32>
    %cst_271 = arith.constant 0.000000e+00 : f32
    %448 = vector.broadcast %cst_271 : f32 to vector<6x8x32xf32>
    %449 = arith.select %431, %447, %448 : vector<6x8x32xi1>, vector<6x8x32xf32>
    %450 = vector.shape_cast %449 : vector<6x8x32xf32> to vector<48x32xf32>
    %451 = arith.truncf %450 : vector<48x32xf32> to vector<48x32xbf16>
    %c768 = arith.constant 768 : index
    %c0_272 = arith.constant 0 : index
    %452 = vector.load %arg2[%c768, %c0_272] : memref<5472x128xbf16, #tpu.memory_space<vmem>>, vector<32x32xbf16>
    %cst_273 = arith.constant dense<0.000000e+00> : vector<48x32xf32>
    %453 = tpu.matmul %451, %452, %cst_273 {dimension_numbers = #tpu.dot_dimension_numbers<[1], [0], [0], [1], [0, 0, 1, 1], [], []>} : vector<48x32xbf16>, vector<32x32xbf16>, vector<48x32xf32> -> vector<48x32xf32>
    %454 = arith.addf %446, %453 : vector<48x32xf32>
    %c1_274 = arith.constant 1 : index
    %c0_275 = arith.constant 0 : index
    %c0_276 = arith.constant 0 : index
    %455 = vector.load %arg5[%c1_274, %c0_275, %c0_276] : memref<18x8x128xf32, #tpu.memory_space<vmem>>, vector<6x8x32xf32>
    %c1_i32_277 = arith.constant 1 : i32
    %456 = tpu.dynamic_rotate %455 by %c1_i32_277 dim 1 : vector<6x8x32xf32>, i32 -> vector<6x8x32xf32>
    %cst_278 = arith.constant 0.000000e+00 : f32
    %457 = vector.broadcast %cst_278 : f32 to vector<6x8x32xf32>
    %458 = arith.select %429, %456, %457 : vector<6x8x32xi1>, vector<6x8x32xf32>
    %459 = vector.shape_cast %458 : vector<6x8x32xf32> to vector<48x32xf32>
    %460 = arith.truncf %459 : vector<48x32xf32> to vector<48x32xbf16>
    %c608 = arith.constant 608 : index
    %c0_279 = arith.constant 0 : index
    %461 = vector.load %arg2[%c608, %c0_279] : memref<5472x128xbf16, #tpu.memory_space<vmem>>, vector<32x32xbf16>
    %cst_280 = arith.constant dense<0.000000e+00> : vector<48x32xf32>
    %462 = tpu.matmul %460, %461, %cst_280 {dimension_numbers = #tpu.dot_dimension_numbers<[1], [0], [0], [1], [0, 0, 1, 1], [], []>} : vector<48x32xbf16>, vector<32x32xbf16>, vector<48x32xf32> -> vector<48x32xf32>
    %463 = arith.addf %454, %462 : vector<48x32xf32>
    %464 = vector.shape_cast %455 : vector<6x8x32xf32> to vector<48x32xf32>
    %465 = arith.truncf %464 : vector<48x32xf32> to vector<48x32xbf16>
    %c704 = arith.constant 704 : index
    %c0_281 = arith.constant 0 : index
    %466 = vector.load %arg2[%c704, %c0_281] : memref<5472x128xbf16, #tpu.memory_space<vmem>>, vector<32x32xbf16>
    %cst_282 = arith.constant dense<0.000000e+00> : vector<48x32xf32>
    %467 = tpu.matmul %465, %466, %cst_282 {dimension_numbers = #tpu.dot_dimension_numbers<[1], [0], [0], [1], [0, 0, 1, 1], [], []>} : vector<48x32xbf16>, vector<32x32xbf16>, vector<48x32xf32> -> vector<48x32xf32>
    %468 = arith.addf %463, %467 : vector<48x32xf32>
    %c7_i32_283 = arith.constant 7 : i32
    %469 = tpu.dynamic_rotate %455 by %c7_i32_283 dim 1 : vector<6x8x32xf32>, i32 -> vector<6x8x32xf32>
    %cst_284 = arith.constant 0.000000e+00 : f32
    %470 = vector.broadcast %cst_284 : f32 to vector<6x8x32xf32>
    %471 = arith.select %431, %469, %470 : vector<6x8x32xi1>, vector<6x8x32xf32>
    %472 = vector.shape_cast %471 : vector<6x8x32xf32> to vector<48x32xf32>
    %473 = arith.truncf %472 : vector<48x32xf32> to vector<48x32xbf16>
    %c800 = arith.constant 800 : index
    %c0_285 = arith.constant 0 : index
    %474 = vector.load %arg2[%c800, %c0_285] : memref<5472x128xbf16, #tpu.memory_space<vmem>>, vector<32x32xbf16>
    %cst_286 = arith.constant dense<0.000000e+00> : vector<48x32xf32>
    %475 = tpu.matmul %473, %474, %cst_286 {dimension_numbers = #tpu.dot_dimension_numbers<[1], [0], [0], [1], [0, 0, 1, 1], [], []>} : vector<48x32xbf16>, vector<32x32xbf16>, vector<48x32xf32> -> vector<48x32xf32>
    %476 = arith.addf %468, %475 : vector<48x32xf32>
    %c2_287 = arith.constant 2 : index
    %c0_288 = arith.constant 0 : index
    %c0_289 = arith.constant 0 : index
    %477 = vector.load %arg5[%c2_287, %c0_288, %c0_289] : memref<18x8x128xf32, #tpu.memory_space<vmem>>, vector<6x8x32xf32>
    %c1_i32_290 = arith.constant 1 : i32
    %478 = tpu.dynamic_rotate %477 by %c1_i32_290 dim 1 : vector<6x8x32xf32>, i32 -> vector<6x8x32xf32>
    %cst_291 = arith.constant 0.000000e+00 : f32
    %479 = vector.broadcast %cst_291 : f32 to vector<6x8x32xf32>
    %480 = arith.select %429, %478, %479 : vector<6x8x32xi1>, vector<6x8x32xf32>
    %481 = vector.shape_cast %480 : vector<6x8x32xf32> to vector<48x32xf32>
    %482 = arith.truncf %481 : vector<48x32xf32> to vector<48x32xbf16>
    %c640 = arith.constant 640 : index
    %c0_292 = arith.constant 0 : index
    %483 = vector.load %arg2[%c640, %c0_292] : memref<5472x128xbf16, #tpu.memory_space<vmem>>, vector<32x32xbf16>
    %cst_293 = arith.constant dense<0.000000e+00> : vector<48x32xf32>
    %484 = tpu.matmul %482, %483, %cst_293 {dimension_numbers = #tpu.dot_dimension_numbers<[1], [0], [0], [1], [0, 0, 1, 1], [], []>} : vector<48x32xbf16>, vector<32x32xbf16>, vector<48x32xf32> -> vector<48x32xf32>
    %485 = arith.addf %476, %484 : vector<48x32xf32>
    %486 = vector.shape_cast %477 : vector<6x8x32xf32> to vector<48x32xf32>
    %487 = arith.truncf %486 : vector<48x32xf32> to vector<48x32xbf16>
    %c736 = arith.constant 736 : index
    %c0_294 = arith.constant 0 : index
    %488 = vector.load %arg2[%c736, %c0_294] : memref<5472x128xbf16, #tpu.memory_space<vmem>>, vector<32x32xbf16>
    %cst_295 = arith.constant dense<0.000000e+00> : vector<48x32xf32>
    %489 = tpu.matmul %487, %488, %cst_295 {dimension_numbers = #tpu.dot_dimension_numbers<[1], [0], [0], [1], [0, 0, 1, 1], [], []>} : vector<48x32xbf16>, vector<32x32xbf16>, vector<48x32xf32> -> vector<48x32xf32>
    %490 = arith.addf %485, %489 : vector<48x32xf32>
    %c7_i32_296 = arith.constant 7 : i32
    %491 = tpu.dynamic_rotate %477 by %c7_i32_296 dim 1 : vector<6x8x32xf32>, i32 -> vector<6x8x32xf32>
    %cst_297 = arith.constant 0.000000e+00 : f32
    %492 = vector.broadcast %cst_297 : f32 to vector<6x8x32xf32>
    %493 = arith.select %431, %491, %492 : vector<6x8x32xi1>, vector<6x8x32xf32>
    %494 = vector.shape_cast %493 : vector<6x8x32xf32> to vector<48x32xf32>
    %495 = arith.truncf %494 : vector<48x32xf32> to vector<48x32xbf16>
    %c832 = arith.constant 832 : index
    %c0_298 = arith.constant 0 : index
    %496 = vector.load %arg2[%c832, %c0_298] : memref<5472x128xbf16, #tpu.memory_space<vmem>>, vector<32x32xbf16>
    %cst_299 = arith.constant dense<0.000000e+00> : vector<48x32xf32>
    %497 = tpu.matmul %495, %496, %cst_299 {dimension_numbers = #tpu.dot_dimension_numbers<[1], [0], [0], [1], [0, 0, 1, 1], [], []>} : vector<48x32xbf16>, vector<32x32xbf16>, vector<48x32xf32> -> vector<48x32xf32>
    %498 = arith.addf %490, %497 : vector<48x32xf32>
    %cst_300 = arith.constant dense<0.000000e+00> : vector<32xf32>
    %499 = vector.multi_reduction <add>, %498, %cst_300 [0] : vector<48x32xf32> to vector<32xf32>
    %500 = vector.shape_cast %499 : vector<32xf32> to vector<1x32xf32>
    %cst_301 = arith.constant 0.020833334 : f32
    %501 = vector.broadcast %cst_301 : f32 to vector<1x32xf32>
    %502 = arith.mulf %500, %501 : vector<1x32xf32>
    %503 = arith.mulf %498, %498 : vector<48x32xf32>
    %cst_302 = arith.constant dense<0.000000e+00> : vector<32xf32>
    %504 = vector.multi_reduction <add>, %503, %cst_302 [0] : vector<48x32xf32> to vector<32xf32>
    %505 = vector.shape_cast %504 : vector<32xf32> to vector<1x32xf32>
    %cst_303 = arith.constant 0.020833334 : f32
    %506 = vector.broadcast %cst_303 : f32 to vector<1x32xf32>
    %507 = arith.mulf %505, %506 : vector<1x32xf32>
    %508 = arith.mulf %502, %502 : vector<1x32xf32>
    %509 = arith.subf %507, %508 : vector<1x32xf32>
    %c0_304 = arith.constant 0 : index
    %c512_305 = arith.constant 512 : index
    %510 = vector.load %arg3[%c0_304, %c512_305] : memref<2x1536xf32, #tpu.memory_space<vmem>>, vector<1x32xf32>
    %c1_306 = arith.constant 1 : index
    %c512_307 = arith.constant 512 : index
    %511 = vector.load %arg3[%c1_306, %c512_307] : memref<2x1536xf32, #tpu.memory_space<vmem>>, vector<1x32xf32>
    %cst_308 = arith.constant 9.99999974E-6 : f32
    %512 = vector.broadcast %cst_308 : f32 to vector<1x32xf32>
    %513 = arith.addf %509, %512 : vector<1x32xf32>
    %514 = math.rsqrt %513 : vector<1x32xf32>
    %515 = arith.mulf %510, %514 : vector<1x32xf32>
    %516 = vector.broadcast %515 : vector<1x32xf32> to vector<48x32xf32>
    %517 = arith.mulf %498, %516 : vector<48x32xf32>
    %518 = arith.mulf %502, %515 : vector<1x32xf32>
    %519 = arith.subf %511, %518 : vector<1x32xf32>
    %520 = vector.broadcast %519 : vector<1x32xf32> to vector<48x32xf32>
    %521 = arith.addf %517, %520 : vector<48x32xf32>
    %cst_309 = arith.constant 0.000000e+00 : f32
    %522 = vector.broadcast %cst_309 : f32 to vector<48x32xf32>
    %523 = arith.cmpf oge, %521, %522 : vector<48x32xf32>
    %cst_310 = arith.constant 3.000000e-01 : f32
    %524 = vector.broadcast %cst_310 : f32 to vector<48x32xf32>
    %525 = arith.mulf %524, %521 : vector<48x32xf32>
    %526 = arith.select %523, %521, %525 : vector<48x32xi1>, vector<48x32xf32>
    %527 = vector.shape_cast %526 : vector<48x32xf32> to vector<6x8x32xf32>
    %528 = arith.addf %527, %422 : vector<6x8x32xf32>
    %cst_311 = arith.constant 0.000000e+00 : f32
    %529 = vector.broadcast %cst_311 : f32 to vector<1x8x32xf32>
    %c0_312 = arith.constant 0 : index
    %c0_313 = arith.constant 0 : index
    %c0_314 = arith.constant 0 : index
    %530 = vector.load %arg5[%c0_312, %c0_313, %c0_314] : memref<18x8x128xf32, #tpu.memory_space<vmem>>, vector<1x8x32xf32>
    tpu.vector_store %arg5[%c0_312, %c0_313, %c0_314], %529 {strides = array<i32>} : memref<18x8x128xf32, #tpu.memory_space<vmem>>, vector<1x8x32xf32>,
    %c7_315 = arith.constant 7 : index
    %c0_316 = arith.constant 0 : index
    %c0_317 = arith.constant 0 : index
    %531 = vector.load %arg5[%c7_315, %c0_316, %c0_317] : memref<18x8x128xf32, #tpu.memory_space<vmem>>, vector<1x8x32xf32>
    tpu.vector_store %arg5[%c7_315, %c0_316, %c0_317], %529 {strides = array<i32>} : memref<18x8x128xf32, #tpu.memory_space<vmem>>, vector<1x8x32xf32>,
    %c1_318 = arith.constant 1 : index
    %c0_319 = arith.constant 0 : index
    %c0_320 = arith.constant 0 : index
    %532 = vector.load %arg5[%c1_318, %c0_319, %c0_320] : memref<18x8x128xf32, #tpu.memory_space<vmem>>, vector<6x8x32xf32>
    tpu.vector_store %arg5[%c1_318, %c0_319, %c0_320], %528 {strides = array<i32>} : memref<18x8x128xf32, #tpu.memory_space<vmem>>, vector<6x8x32xf32>,
    %533 = tpu.iota {dimensions = array<i32: 1>} : vector<2x8x32xi32>
    %c0_i32_321 = arith.constant 0 : i32
    %534 = vector.broadcast %c0_i32_321 : i32 to vector<2x8x32xi32>
    %535 = arith.cmpi sgt, %533, %534 : vector<2x8x32xi32>
    %c7_i32_322 = arith.constant 7 : i32
    %536 = vector.broadcast %c7_i32_322 : i32 to vector<2x8x32xi32>
    %537 = arith.cmpi slt, %533, %536 : vector<2x8x32xi32>
    %cst_323 = arith.constant 0.000000e+00 : f32
    %538 = vector.broadcast %cst_323 : f32 to vector<16x32xf32>
    %c0_324 = arith.constant 0 : index
    %c0_325 = arith.constant 0 : index
    %c0_326 = arith.constant 0 : index
    %539 = tpu.strided_load %arg5[%c0_324, %c0_325, %c0_326] {strides = array<i32: 3, 1, 1>} : memref<18x8x128xf32, #tpu.memory_space<vmem>>, vector<2x8x32xf32>
    %c1_i32_327 = arith.constant 1 : i32
    %540 = tpu.dynamic_rotate %539 by %c1_i32_327 dim 1 : vector<2x8x32xf32>, i32 -> vector<2x8x32xf32>
    %cst_328 = arith.constant 0.000000e+00 : f32
    %541 = vector.broadcast %cst_328 : f32 to vector<2x8x32xf32>
    %542 = arith.select %535, %540, %541 : vector<2x8x32xi1>, vector<2x8x32xf32>
    %543 = vector.shape_cast %542 : vector<2x8x32xf32> to vector<16x32xf32>
    %544 = arith.truncf %543 : vector<16x32xf32> to vector<16x32xbf16>
    %c864 = arith.constant 864 : index
    %c0_329 = arith.constant 0 : index
    %545 = vector.load %arg2[%c864, %c0_329] : memref<5472x128xbf16, #tpu.memory_space<vmem>>, vector<32x32xbf16>
    %cst_330 = arith.constant dense<0.000000e+00> : vector<16x32xf32>
    %546 = tpu.matmul %544, %545, %cst_330 {dimension_numbers = #tpu.dot_dimension_numbers<[1], [0], [0], [1], [0, 0, 1, 1], [], []>} : vector<16x32xbf16>, vector<32x32xbf16>, vector<16x32xf32> -> vector<16x32xf32>
    %547 = arith.addf %538, %546 : vector<16x32xf32>
    %548 = vector.shape_cast %539 : vector<2x8x32xf32> to vector<16x32xf32>
    %549 = arith.truncf %548 : vector<16x32xf32> to vector<16x32xbf16>
    %c960 = arith.constant 960 : index
    %c0_331 = arith.constant 0 : index
    %550 = vector.load %arg2[%c960, %c0_331] : memref<5472x128xbf16, #tpu.memory_space<vmem>>, vector<32x32xbf16>
    %cst_332 = arith.constant dense<0.000000e+00> : vector<16x32xf32>
    %551 = tpu.matmul %549, %550, %cst_332 {dimension_numbers = #tpu.dot_dimension_numbers<[1], [0], [0], [1], [0, 0, 1, 1], [], []>} : vector<16x32xbf16>, vector<32x32xbf16>, vector<16x32xf32> -> vector<16x32xf32>
    %552 = arith.addf %547, %551 : vector<16x32xf32>
    %c7_i32_333 = arith.constant 7 : i32
    %553 = tpu.dynamic_rotate %539 by %c7_i32_333 dim 1 : vector<2x8x32xf32>, i32 -> vector<2x8x32xf32>
    %cst_334 = arith.constant 0.000000e+00 : f32
    %554 = vector.broadcast %cst_334 : f32 to vector<2x8x32xf32>
    %555 = arith.select %537, %553, %554 : vector<2x8x32xi1>, vector<2x8x32xf32>
    %556 = vector.shape_cast %555 : vector<2x8x32xf32> to vector<16x32xf32>
    %557 = arith.truncf %556 : vector<16x32xf32> to vector<16x32xbf16>
    %c1056 = arith.constant 1056 : index
    %c0_335 = arith.constant 0 : index
    %558 = vector.load %arg2[%c1056, %c0_335] : memref<5472x128xbf16, #tpu.memory_space<vmem>>, vector<32x32xbf16>
    %cst_336 = arith.constant dense<0.000000e+00> : vector<16x32xf32>
    %559 = tpu.matmul %557, %558, %cst_336 {dimension_numbers = #tpu.dot_dimension_numbers<[1], [0], [0], [1], [0, 0, 1, 1], [], []>} : vector<16x32xbf16>, vector<32x32xbf16>, vector<16x32xf32> -> vector<16x32xf32>
    %560 = arith.addf %552, %559 : vector<16x32xf32>
    %c1_337 = arith.constant 1 : index
    %c0_338 = arith.constant 0 : index
    %c0_339 = arith.constant 0 : index
    %561 = tpu.strided_load %arg5[%c1_337, %c0_338, %c0_339] {strides = array<i32: 3, 1, 1>} : memref<18x8x128xf32, #tpu.memory_space<vmem>>, vector<2x8x32xf32>
    %c1_i32_340 = arith.constant 1 : i32
    %562 = tpu.dynamic_rotate %561 by %c1_i32_340 dim 1 : vector<2x8x32xf32>, i32 -> vector<2x8x32xf32>
    %cst_341 = arith.constant 0.000000e+00 : f32
    %563 = vector.broadcast %cst_341 : f32 to vector<2x8x32xf32>
    %564 = arith.select %535, %562, %563 : vector<2x8x32xi1>, vector<2x8x32xf32>
    %565 = vector.shape_cast %564 : vector<2x8x32xf32> to vector<16x32xf32>
    %566 = arith.truncf %565 : vector<16x32xf32> to vector<16x32xbf16>
    %c896 = arith.constant 896 : index
    %c0_342 = arith.constant 0 : index
    %567 = vector.load %arg2[%c896, %c0_342] : memref<5472x128xbf16, #tpu.memory_space<vmem>>, vector<32x32xbf16>
    %cst_343 = arith.constant dense<0.000000e+00> : vector<16x32xf32>
    %568 = tpu.matmul %566, %567, %cst_343 {dimension_numbers = #tpu.dot_dimension_numbers<[1], [0], [0], [1], [0, 0, 1, 1], [], []>} : vector<16x32xbf16>, vector<32x32xbf16>, vector<16x32xf32> -> vector<16x32xf32>
    %569 = arith.addf %560, %568 : vector<16x32xf32>
    %570 = vector.shape_cast %561 : vector<2x8x32xf32> to vector<16x32xf32>
    %571 = arith.truncf %570 : vector<16x32xf32> to vector<16x32xbf16>
    %c992 = arith.constant 992 : index
    %c0_344 = arith.constant 0 : index
    %572 = vector.load %arg2[%c992, %c0_344] : memref<5472x128xbf16, #tpu.memory_space<vmem>>, vector<32x32xbf16>
    %cst_345 = arith.constant dense<0.000000e+00> : vector<16x32xf32>
    %573 = tpu.matmul %571, %572, %cst_345 {dimension_numbers = #tpu.dot_dimension_numbers<[1], [0], [0], [1], [0, 0, 1, 1], [], []>} : vector<16x32xbf16>, vector<32x32xbf16>, vector<16x32xf32> -> vector<16x32xf32>
    %574 = arith.addf %569, %573 : vector<16x32xf32>
    %c7_i32_346 = arith.constant 7 : i32
    %575 = tpu.dynamic_rotate %561 by %c7_i32_346 dim 1 : vector<2x8x32xf32>, i32 -> vector<2x8x32xf32>
    %cst_347 = arith.constant 0.000000e+00 : f32
    %576 = vector.broadcast %cst_347 : f32 to vector<2x8x32xf32>
    %577 = arith.select %537, %575, %576 : vector<2x8x32xi1>, vector<2x8x32xf32>
    %578 = vector.shape_cast %577 : vector<2x8x32xf32> to vector<16x32xf32>
    %579 = arith.truncf %578 : vector<16x32xf32> to vector<16x32xbf16>
    %c1088 = arith.constant 1088 : index
    %c0_348 = arith.constant 0 : index
    %580 = vector.load %arg2[%c1088, %c0_348] : memref<5472x128xbf16, #tpu.memory_space<vmem>>, vector<32x32xbf16>
    %cst_349 = arith.constant dense<0.000000e+00> : vector<16x32xf32>
    %581 = tpu.matmul %579, %580, %cst_349 {dimension_numbers = #tpu.dot_dimension_numbers<[1], [0], [0], [1], [0, 0, 1, 1], [], []>} : vector<16x32xbf16>, vector<32x32xbf16>, vector<16x32xf32> -> vector<16x32xf32>
    %582 = arith.addf %574, %581 : vector<16x32xf32>
    %c2_350 = arith.constant 2 : index
    %c0_351 = arith.constant 0 : index
    %c0_352 = arith.constant 0 : index
    %583 = tpu.strided_load %arg5[%c2_350, %c0_351, %c0_352] {strides = array<i32: 3, 1, 1>} : memref<18x8x128xf32, #tpu.memory_space<vmem>>, vector<2x8x32xf32>
    %c1_i32_353 = arith.constant 1 : i32
    %584 = tpu.dynamic_rotate %583 by %c1_i32_353 dim 1 : vector<2x8x32xf32>, i32 -> vector<2x8x32xf32>
    %cst_354 = arith.constant 0.000000e+00 : f32
    %585 = vector.broadcast %cst_354 : f32 to vector<2x8x32xf32>
    %586 = arith.select %535, %584, %585 : vector<2x8x32xi1>, vector<2x8x32xf32>
    %587 = vector.shape_cast %586 : vector<2x8x32xf32> to vector<16x32xf32>
    %588 = arith.truncf %587 : vector<16x32xf32> to vector<16x32xbf16>
    %c928 = arith.constant 928 : index
    %c0_355 = arith.constant 0 : index
    %589 = vector.load %arg2[%c928, %c0_355] : memref<5472x128xbf16, #tpu.memory_space<vmem>>, vector<32x32xbf16>
    %cst_356 = arith.constant dense<0.000000e+00> : vector<16x32xf32>
    %590 = tpu.matmul %588, %589, %cst_356 {dimension_numbers = #tpu.dot_dimension_numbers<[1], [0], [0], [1], [0, 0, 1, 1], [], []>} : vector<16x32xbf16>, vector<32x32xbf16>, vector<16x32xf32> -> vector<16x32xf32>
    %591 = arith.addf %582, %590 : vector<16x32xf32>
    %592 = vector.shape_cast %583 : vector<2x8x32xf32> to vector<16x32xf32>
    %593 = arith.truncf %592 : vector<16x32xf32> to vector<16x32xbf16>
    %c1024 = arith.constant 1024 : index
    %c0_357 = arith.constant 0 : index
    %594 = vector.load %arg2[%c1024, %c0_357] : memref<5472x128xbf16, #tpu.memory_space<vmem>>, vector<32x32xbf16>
    %cst_358 = arith.constant dense<0.000000e+00> : vector<16x32xf32>
    %595 = tpu.matmul %593, %594, %cst_358 {dimension_numbers = #tpu.dot_dimension_numbers<[1], [0], [0], [1], [0, 0, 1, 1], [], []>} : vector<16x32xbf16>, vector<32x32xbf16>, vector<16x32xf32> -> vector<16x32xf32>
    %596 = arith.addf %591, %595 : vector<16x32xf32>
    %c7_i32_359 = arith.constant 7 : i32
    %597 = tpu.dynamic_rotate %583 by %c7_i32_359 dim 1 : vector<2x8x32xf32>, i32 -> vector<2x8x32xf32>
    %cst_360 = arith.constant 0.000000e+00 : f32
    %598 = vector.broadcast %cst_360 : f32 to vector<2x8x32xf32>
    %599 = arith.select %537, %597, %598 : vector<2x8x32xi1>, vector<2x8x32xf32>
    %600 = vector.shape_cast %599 : vector<2x8x32xf32> to vector<16x32xf32>
    %601 = arith.truncf %600 : vector<16x32xf32> to vector<16x32xbf16>
    %c1120 = arith.constant 1120 : index
    %c0_361 = arith.constant 0 : index
    %602 = vector.load %arg2[%c1120, %c0_361] : memref<5472x128xbf16, #tpu.memory_space<vmem>>, vector<32x32xbf16>
    %cst_362 = arith.constant dense<0.000000e+00> : vector<16x32xf32>
    %603 = tpu.matmul %601, %602, %cst_362 {dimension_numbers = #tpu.dot_dimension_numbers<[1], [0], [0], [1], [0, 0, 1, 1], [], []>} : vector<16x32xbf16>, vector<32x32xbf16>, vector<16x32xf32> -> vector<16x32xf32>
    %604 = arith.addf %596, %603 : vector<16x32xf32>
    %cst_363 = arith.constant dense<0.000000e+00> : vector<32xf32>
    %605 = vector.multi_reduction <add>, %604, %cst_363 [0] : vector<16x32xf32> to vector<32xf32>
    %606 = vector.shape_cast %605 : vector<32xf32> to vector<1x32xf32>
    %cst_364 = arith.constant 6.250000e-02 : f32
    %607 = vector.broadcast %cst_364 : f32 to vector<1x32xf32>
    %608 = arith.mulf %606, %607 : vector<1x32xf32>
    %609 = arith.mulf %604, %604 : vector<16x32xf32>
    %cst_365 = arith.constant dense<0.000000e+00> : vector<32xf32>
    %610 = vector.multi_reduction <add>, %609, %cst_365 [0] : vector<16x32xf32> to vector<32xf32>
    %611 = vector.shape_cast %610 : vector<32xf32> to vector<1x32xf32>
    %cst_366 = arith.constant 6.250000e-02 : f32
    %612 = vector.broadcast %cst_366 : f32 to vector<1x32xf32>
    %613 = arith.mulf %611, %612 : vector<1x32xf32>
    %614 = arith.mulf %608, %608 : vector<1x32xf32>
    %615 = arith.subf %613, %614 : vector<1x32xf32>
    %c0_367 = arith.constant 0 : index
    %c640_368 = arith.constant 640 : index
    %616 = vector.load %arg3[%c0_367, %c640_368] : memref<2x1536xf32, #tpu.memory_space<vmem>>, vector<1x32xf32>
    %c1_369 = arith.constant 1 : index
    %c640_370 = arith.constant 640 : index
    %617 = vector.load %arg3[%c1_369, %c640_370] : memref<2x1536xf32, #tpu.memory_space<vmem>>, vector<1x32xf32>
    %cst_371 = arith.constant 9.99999974E-6 : f32
    %618 = vector.broadcast %cst_371 : f32 to vector<1x32xf32>
    %619 = arith.addf %615, %618 : vector<1x32xf32>
    %620 = math.rsqrt %619 : vector<1x32xf32>
    %621 = arith.mulf %616, %620 : vector<1x32xf32>
    %622 = vector.broadcast %621 : vector<1x32xf32> to vector<16x32xf32>
    %623 = arith.mulf %604, %622 : vector<16x32xf32>
    %624 = arith.mulf %608, %621 : vector<1x32xf32>
    %625 = arith.subf %617, %624 : vector<1x32xf32>
    %626 = vector.broadcast %625 : vector<1x32xf32> to vector<16x32xf32>
    %627 = arith.addf %623, %626 : vector<16x32xf32>
    %cst_372 = arith.constant 0.000000e+00 : f32
    %628 = vector.broadcast %cst_372 : f32 to vector<16x32xf32>
    %629 = arith.cmpf oge, %627, %628 : vector<16x32xf32>
    %cst_373 = arith.constant 3.000000e-01 : f32
    %630 = vector.broadcast %cst_373 : f32 to vector<16x32xf32>
    %631 = arith.mulf %630, %627 : vector<16x32xf32>
    %632 = arith.select %629, %627, %631 : vector<16x32xi1>, vector<16x32xf32>
    %633 = vector.shape_cast %632 : vector<16x32xf32> to vector<2x8x32xf32>
    %cst_374 = arith.constant 0.000000e+00 : f32
    %634 = vector.broadcast %cst_374 : f32 to vector<1x8x32xf32>
    %c0_375 = arith.constant 0 : index
    %c0_376 = arith.constant 0 : index
    %c0_377 = arith.constant 0 : index
    %635 = vector.load %arg5[%c0_375, %c0_376, %c0_377] : memref<18x8x128xf32, #tpu.memory_space<vmem>>, vector<1x8x32xf32>
    tpu.vector_store %arg5[%c0_375, %c0_376, %c0_377], %634 {strides = array<i32>} : memref<18x8x128xf32, #tpu.memory_space<vmem>>, vector<1x8x32xf32>,
    %c3 = arith.constant 3 : index
    %c0_378 = arith.constant 0 : index
    %c0_379 = arith.constant 0 : index
    %636 = vector.load %arg5[%c3, %c0_378, %c0_379] : memref<18x8x128xf32, #tpu.memory_space<vmem>>, vector<1x8x32xf32>
    tpu.vector_store %arg5[%c3, %c0_378, %c0_379], %634 {strides = array<i32>} : memref<18x8x128xf32, #tpu.memory_space<vmem>>, vector<1x8x32xf32>,
    %c1_380 = arith.constant 1 : index
    %c0_381 = arith.constant 0 : index
    %c0_382 = arith.constant 0 : index
    %637 = vector.load %arg5[%c1_380, %c0_381, %c0_382] : memref<18x8x128xf32, #tpu.memory_space<vmem>>, vector<2x8x32xf32>
    tpu.vector_store %arg5[%c1_380, %c0_381, %c0_382], %633 {strides = array<i32>} : memref<18x8x128xf32, #tpu.memory_space<vmem>>, vector<2x8x32xf32>,
    %638 = tpu.iota {dimensions = array<i32: 1>} : vector<2x8x32xi32>
    %c0_i32_383 = arith.constant 0 : i32
    %639 = vector.broadcast %c0_i32_383 : i32 to vector<2x8x32xi32>
    %640 = arith.cmpi sgt, %638, %639 : vector<2x8x32xi32>
    %c7_i32_384 = arith.constant 7 : i32
    %641 = vector.broadcast %c7_i32_384 : i32 to vector<2x8x32xi32>
    %642 = arith.cmpi slt, %638, %641 : vector<2x8x32xi32>
    %cst_385 = arith.constant 0.000000e+00 : f32
    %643 = vector.broadcast %cst_385 : f32 to vector<16x64xf32>
    %c0_386 = arith.constant 0 : index
    %c0_387 = arith.constant 0 : index
    %c0_388 = arith.constant 0 : index
    %644 = vector.load %arg5[%c0_386, %c0_387, %c0_388] : memref<18x8x128xf32, #tpu.memory_space<vmem>>, vector<2x8x32xf32>
    %c1_i32_389 = arith.constant 1 : i32
    %645 = tpu.dynamic_rotate %644 by %c1_i32_389 dim 1 : vector<2x8x32xf32>, i32 -> vector<2x8x32xf32>
    %cst_390 = arith.constant 0.000000e+00 : f32
    %646 = vector.broadcast %cst_390 : f32 to vector<2x8x32xf32>
    %647 = arith.select %640, %645, %646 : vector<2x8x32xi1>, vector<2x8x32xf32>
    %648 = vector.shape_cast %647 : vector<2x8x32xf32> to vector<16x32xf32>
    %649 = arith.truncf %648 : vector<16x32xf32> to vector<16x32xbf16>
    %c1152 = arith.constant 1152 : index
    %c0_391 = arith.constant 0 : index
    %650 = vector.load %arg2[%c1152, %c0_391] : memref<5472x128xbf16, #tpu.memory_space<vmem>>, vector<32x64xbf16>
    %cst_392 = arith.constant dense<0.000000e+00> : vector<16x64xf32>
    %651 = tpu.matmul %649, %650, %cst_392 {dimension_numbers = #tpu.dot_dimension_numbers<[1], [0], [0], [1], [0, 0, 1, 1], [], []>} : vector<16x32xbf16>, vector<32x64xbf16>, vector<16x64xf32> -> vector<16x64xf32>
    %652 = arith.addf %643, %651 : vector<16x64xf32>
    %653 = vector.shape_cast %644 : vector<2x8x32xf32> to vector<16x32xf32>
    %654 = arith.truncf %653 : vector<16x32xf32> to vector<16x32xbf16>
    %c1248 = arith.constant 1248 : index
    %c0_393 = arith.constant 0 : index
    %655 = vector.load %arg2[%c1248, %c0_393] : memref<5472x128xbf16, #tpu.memory_space<vmem>>, vector<32x64xbf16>
    %cst_394 = arith.constant dense<0.000000e+00> : vector<16x64xf32>
    %656 = tpu.matmul %654, %655, %cst_394 {dimension_numbers = #tpu.dot_dimension_numbers<[1], [0], [0], [1], [0, 0, 1, 1], [], []>} : vector<16x32xbf16>, vector<32x64xbf16>, vector<16x64xf32> -> vector<16x64xf32>
    %657 = arith.addf %652, %656 : vector<16x64xf32>
    %c7_i32_395 = arith.constant 7 : i32
    %658 = tpu.dynamic_rotate %644 by %c7_i32_395 dim 1 : vector<2x8x32xf32>, i32 -> vector<2x8x32xf32>
    %cst_396 = arith.constant 0.000000e+00 : f32
    %659 = vector.broadcast %cst_396 : f32 to vector<2x8x32xf32>
    %660 = arith.select %642, %658, %659 : vector<2x8x32xi1>, vector<2x8x32xf32>
    %661 = vector.shape_cast %660 : vector<2x8x32xf32> to vector<16x32xf32>
    %662 = arith.truncf %661 : vector<16x32xf32> to vector<16x32xbf16>
    %c1344 = arith.constant 1344 : index
    %c0_397 = arith.constant 0 : index
    %663 = vector.load %arg2[%c1344, %c0_397] : memref<5472x128xbf16, #tpu.memory_space<vmem>>, vector<32x64xbf16>
    %cst_398 = arith.constant dense<0.000000e+00> : vector<16x64xf32>
    %664 = tpu.matmul %662, %663, %cst_398 {dimension_numbers = #tpu.dot_dimension_numbers<[1], [0], [0], [1], [0, 0, 1, 1], [], []>} : vector<16x32xbf16>, vector<32x64xbf16>, vector<16x64xf32> -> vector<16x64xf32>
    %665 = arith.addf %657, %664 : vector<16x64xf32>
    %c1_399 = arith.constant 1 : index
    %c0_400 = arith.constant 0 : index
    %c0_401 = arith.constant 0 : index
    %666 = vector.load %arg5[%c1_399, %c0_400, %c0_401] : memref<18x8x128xf32, #tpu.memory_space<vmem>>, vector<2x8x32xf32>
    %c1_i32_402 = arith.constant 1 : i32
    %667 = tpu.dynamic_rotate %666 by %c1_i32_402 dim 1 : vector<2x8x32xf32>, i32 -> vector<2x8x32xf32>
    %cst_403 = arith.constant 0.000000e+00 : f32
    %668 = vector.broadcast %cst_403 : f32 to vector<2x8x32xf32>
    %669 = arith.select %640, %667, %668 : vector<2x8x32xi1>, vector<2x8x32xf32>
    %670 = vector.shape_cast %669 : vector<2x8x32xf32> to vector<16x32xf32>
    %671 = arith.truncf %670 : vector<16x32xf32> to vector<16x32xbf16>
    %c1184 = arith.constant 1184 : index
    %c0_404 = arith.constant 0 : index
    %672 = vector.load %arg2[%c1184, %c0_404] : memref<5472x128xbf16, #tpu.memory_space<vmem>>, vector<32x64xbf16>
    %cst_405 = arith.constant dense<0.000000e+00> : vector<16x64xf32>
    %673 = tpu.matmul %671, %672, %cst_405 {dimension_numbers = #tpu.dot_dimension_numbers<[1], [0], [0], [1], [0, 0, 1, 1], [], []>} : vector<16x32xbf16>, vector<32x64xbf16>, vector<16x64xf32> -> vector<16x64xf32>
    %674 = arith.addf %665, %673 : vector<16x64xf32>
    %675 = vector.shape_cast %666 : vector<2x8x32xf32> to vector<16x32xf32>
    %676 = arith.truncf %675 : vector<16x32xf32> to vector<16x32xbf16>
    %c1280 = arith.constant 1280 : index
    %c0_406 = arith.constant 0 : index
    %677 = vector.load %arg2[%c1280, %c0_406] : memref<5472x128xbf16, #tpu.memory_space<vmem>>, vector<32x64xbf16>
    %cst_407 = arith.constant dense<0.000000e+00> : vector<16x64xf32>
    %678 = tpu.matmul %676, %677, %cst_407 {dimension_numbers = #tpu.dot_dimension_numbers<[1], [0], [0], [1], [0, 0, 1, 1], [], []>} : vector<16x32xbf16>, vector<32x64xbf16>, vector<16x64xf32> -> vector<16x64xf32>
    %679 = arith.addf %674, %678 : vector<16x64xf32>
    %c7_i32_408 = arith.constant 7 : i32
    %680 = tpu.dynamic_rotate %666 by %c7_i32_408 dim 1 : vector<2x8x32xf32>, i32 -> vector<2x8x32xf32>
    %cst_409 = arith.constant 0.000000e+00 : f32
    %681 = vector.broadcast %cst_409 : f32 to vector<2x8x32xf32>
    %682 = arith.select %642, %680, %681 : vector<2x8x32xi1>, vector<2x8x32xf32>
    %683 = vector.shape_cast %682 : vector<2x8x32xf32> to vector<16x32xf32>
    %684 = arith.truncf %683 : vector<16x32xf32> to vector<16x32xbf16>
    %c1376 = arith.constant 1376 : index
    %c0_410 = arith.constant 0 : index
    %685 = vector.load %arg2[%c1376, %c0_410] : memref<5472x128xbf16, #tpu.memory_space<vmem>>, vector<32x64xbf16>
    %cst_411 = arith.constant dense<0.000000e+00> : vector<16x64xf32>
    %686 = tpu.matmul %684, %685, %cst_411 {dimension_numbers = #tpu.dot_dimension_numbers<[1], [0], [0], [1], [0, 0, 1, 1], [], []>} : vector<16x32xbf16>, vector<32x64xbf16>, vector<16x64xf32> -> vector<16x64xf32>
    %687 = arith.addf %679, %686 : vector<16x64xf32>
    %c2_412 = arith.constant 2 : index
    %c0_413 = arith.constant 0 : index
    %c0_414 = arith.constant 0 : index
    %688 = vector.load %arg5[%c2_412, %c0_413, %c0_414] : memref<18x8x128xf32, #tpu.memory_space<vmem>>, vector<2x8x32xf32>
    %c1_i32_415 = arith.constant 1 : i32
    %689 = tpu.dynamic_rotate %688 by %c1_i32_415 dim 1 : vector<2x8x32xf32>, i32 -> vector<2x8x32xf32>
    %cst_416 = arith.constant 0.000000e+00 : f32
    %690 = vector.broadcast %cst_416 : f32 to vector<2x8x32xf32>
    %691 = arith.select %640, %689, %690 : vector<2x8x32xi1>, vector<2x8x32xf32>
    %692 = vector.shape_cast %691 : vector<2x8x32xf32> to vector<16x32xf32>
    %693 = arith.truncf %692 : vector<16x32xf32> to vector<16x32xbf16>
    %c1216 = arith.constant 1216 : index
    %c0_417 = arith.constant 0 : index
    %694 = vector.load %arg2[%c1216, %c0_417] : memref<5472x128xbf16, #tpu.memory_space<vmem>>, vector<32x64xbf16>
    %cst_418 = arith.constant dense<0.000000e+00> : vector<16x64xf32>
    %695 = tpu.matmul %693, %694, %cst_418 {dimension_numbers = #tpu.dot_dimension_numbers<[1], [0], [0], [1], [0, 0, 1, 1], [], []>} : vector<16x32xbf16>, vector<32x64xbf16>, vector<16x64xf32> -> vector<16x64xf32>
    %696 = arith.addf %687, %695 : vector<16x64xf32>
    %697 = vector.shape_cast %688 : vector<2x8x32xf32> to vector<16x32xf32>
    %698 = arith.truncf %697 : vector<16x32xf32> to vector<16x32xbf16>
    %c1312 = arith.constant 1312 : index
    %c0_419 = arith.constant 0 : index
    %699 = vector.load %arg2[%c1312, %c0_419] : memref<5472x128xbf16, #tpu.memory_space<vmem>>, vector<32x64xbf16>
    %cst_420 = arith.constant dense<0.000000e+00> : vector<16x64xf32>
    %700 = tpu.matmul %698, %699, %cst_420 {dimension_numbers = #tpu.dot_dimension_numbers<[1], [0], [0], [1], [0, 0, 1, 1], [], []>} : vector<16x32xbf16>, vector<32x64xbf16>, vector<16x64xf32> -> vector<16x64xf32>
    %701 = arith.addf %696, %700 : vector<16x64xf32>
    %c7_i32_421 = arith.constant 7 : i32
    %702 = tpu.dynamic_rotate %688 by %c7_i32_421 dim 1 : vector<2x8x32xf32>, i32 -> vector<2x8x32xf32>
    %cst_422 = arith.constant 0.000000e+00 : f32
    %703 = vector.broadcast %cst_422 : f32 to vector<2x8x32xf32>
    %704 = arith.select %642, %702, %703 : vector<2x8x32xi1>, vector<2x8x32xf32>
    %705 = vector.shape_cast %704 : vector<2x8x32xf32> to vector<16x32xf32>
    %706 = arith.truncf %705 : vector<16x32xf32> to vector<16x32xbf16>
    %c1408 = arith.constant 1408 : index
    %c0_423 = arith.constant 0 : index
    %707 = vector.load %arg2[%c1408, %c0_423] : memref<5472x128xbf16, #tpu.memory_space<vmem>>, vector<32x64xbf16>
    %cst_424 = arith.constant dense<0.000000e+00> : vector<16x64xf32>
    %708 = tpu.matmul %706, %707, %cst_424 {dimension_numbers = #tpu.dot_dimension_numbers<[1], [0], [0], [1], [0, 0, 1, 1], [], []>} : vector<16x32xbf16>, vector<32x64xbf16>, vector<16x64xf32> -> vector<16x64xf32>
    %709 = arith.addf %701, %708 : vector<16x64xf32>
    %cst_425 = arith.constant dense<0.000000e+00> : vector<64xf32>
    %710 = vector.multi_reduction <add>, %709, %cst_425 [0] : vector<16x64xf32> to vector<64xf32>
    %711 = vector.shape_cast %710 : vector<64xf32> to vector<1x64xf32>
    %cst_426 = arith.constant 6.250000e-02 : f32
    %712 = vector.broadcast %cst_426 : f32 to vector<1x64xf32>
    %713 = arith.mulf %711, %712 : vector<1x64xf32>
    %714 = arith.mulf %709, %709 : vector<16x64xf32>
    %cst_427 = arith.constant dense<0.000000e+00> : vector<64xf32>
    %715 = vector.multi_reduction <add>, %714, %cst_427 [0] : vector<16x64xf32> to vector<64xf32>
    %716 = vector.shape_cast %715 : vector<64xf32> to vector<1x64xf32>
    %cst_428 = arith.constant 6.250000e-02 : f32
    %717 = vector.broadcast %cst_428 : f32 to vector<1x64xf32>
    %718 = arith.mulf %716, %717 : vector<1x64xf32>
    %719 = arith.mulf %713, %713 : vector<1x64xf32>
    %720 = arith.subf %718, %719 : vector<1x64xf32>
    %c0_429 = arith.constant 0 : index
    %c768_430 = arith.constant 768 : index
    %721 = vector.load %arg3[%c0_429, %c768_430] : memref<2x1536xf32, #tpu.memory_space<vmem>>, vector<1x64xf32>
    %c1_431 = arith.constant 1 : index
    %c768_432 = arith.constant 768 : index
    %722 = vector.load %arg3[%c1_431, %c768_432] : memref<2x1536xf32, #tpu.memory_space<vmem>>, vector<1x64xf32>
    %cst_433 = arith.constant 9.99999974E-6 : f32
    %723 = vector.broadcast %cst_433 : f32 to vector<1x64xf32>
    %724 = arith.addf %720, %723 : vector<1x64xf32>
    %725 = math.rsqrt %724 : vector<1x64xf32>
    %726 = arith.mulf %721, %725 : vector<1x64xf32>
    %727 = vector.broadcast %726 : vector<1x64xf32> to vector<16x64xf32>
    %728 = arith.mulf %709, %727 : vector<16x64xf32>
    %729 = arith.mulf %713, %726 : vector<1x64xf32>
    %730 = arith.subf %722, %729 : vector<1x64xf32>
    %731 = vector.broadcast %730 : vector<1x64xf32> to vector<16x64xf32>
    %732 = arith.addf %728, %731 : vector<16x64xf32>
    %cst_434 = arith.constant 0.000000e+00 : f32
    %733 = vector.broadcast %cst_434 : f32 to vector<16x64xf32>
    %734 = arith.cmpf oge, %732, %733 : vector<16x64xf32>
    %cst_435 = arith.constant 3.000000e-01 : f32
    %735 = vector.broadcast %cst_435 : f32 to vector<16x64xf32>
    %736 = arith.mulf %735, %732 : vector<16x64xf32>
    %737 = arith.select %734, %732, %736 : vector<16x64xi1>, vector<16x64xf32>
    %738 = vector.shape_cast %737 : vector<16x64xf32> to vector<2x8x64xf32>
    %cst_436 = arith.constant 0.000000e+00 : f32
    %739 = vector.broadcast %cst_436 : f32 to vector<1x8x64xf32>
    %c0_437 = arith.constant 0 : index
    %c0_438 = arith.constant 0 : index
    %c0_439 = arith.constant 0 : index
    %740 = vector.load %arg5[%c0_437, %c0_438, %c0_439] : memref<18x8x128xf32, #tpu.memory_space<vmem>>, vector<1x8x64xf32>
    tpu.vector_store %arg5[%c0_437, %c0_438, %c0_439], %739 {strides = array<i32>} : memref<18x8x128xf32, #tpu.memory_space<vmem>>, vector<1x8x64xf32>,
    %c3_440 = arith.constant 3 : index
    %c0_441 = arith.constant 0 : index
    %c0_442 = arith.constant 0 : index
    %741 = vector.load %arg5[%c3_440, %c0_441, %c0_442] : memref<18x8x128xf32, #tpu.memory_space<vmem>>, vector<1x8x64xf32>
    tpu.vector_store %arg5[%c3_440, %c0_441, %c0_442], %739 {strides = array<i32>} : memref<18x8x128xf32, #tpu.memory_space<vmem>>, vector<1x8x64xf32>,
    %c1_443 = arith.constant 1 : index
    %c0_444 = arith.constant 0 : index
    %c0_445 = arith.constant 0 : index
    %742 = vector.load %arg5[%c1_443, %c0_444, %c0_445] : memref<18x8x128xf32, #tpu.memory_space<vmem>>, vector<2x8x64xf32>
    tpu.vector_store %arg5[%c1_443, %c0_444, %c0_445], %738 {strides = array<i32>} : memref<18x8x128xf32, #tpu.memory_space<vmem>>, vector<2x8x64xf32>,
    %743 = tpu.iota {dimensions = array<i32: 1>} : vector<2x8x64xi32>
    %c0_i32_446 = arith.constant 0 : i32
    %744 = vector.broadcast %c0_i32_446 : i32 to vector<2x8x64xi32>
    %745 = arith.cmpi sgt, %743, %744 : vector<2x8x64xi32>
    %c7_i32_447 = arith.constant 7 : i32
    %746 = vector.broadcast %c7_i32_447 : i32 to vector<2x8x64xi32>
    %747 = arith.cmpi slt, %743, %746 : vector<2x8x64xi32>
    %cst_448 = arith.constant 0.000000e+00 : f32
    %748 = vector.broadcast %cst_448 : f32 to vector<16x64xf32>
    %c0_449 = arith.constant 0 : index
    %c0_450 = arith.constant 0 : index
    %c0_451 = arith.constant 0 : index
    %749 = vector.load %arg5[%c0_449, %c0_450, %c0_451] : memref<18x8x128xf32, #tpu.memory_space<vmem>>, vector<2x8x64xf32>
    %c1_i32_452 = arith.constant 1 : i32
    %750 = tpu.dynamic_rotate %749 by %c1_i32_452 dim 1 : vector<2x8x64xf32>, i32 -> vector<2x8x64xf32>
    %cst_453 = arith.constant 0.000000e+00 : f32
    %751 = vector.broadcast %cst_453 : f32 to vector<2x8x64xf32>
    %752 = arith.select %745, %750, %751 : vector<2x8x64xi1>, vector<2x8x64xf32>
    %753 = vector.shape_cast %752 : vector<2x8x64xf32> to vector<16x64xf32>
    %754 = arith.truncf %753 : vector<16x64xf32> to vector<16x64xbf16>
    %c1440 = arith.constant 1440 : index
    %c0_454 = arith.constant 0 : index
    %755 = vector.load %arg2[%c1440, %c0_454] : memref<5472x128xbf16, #tpu.memory_space<vmem>>, vector<64x64xbf16>
    %cst_455 = arith.constant dense<0.000000e+00> : vector<16x64xf32>
    %756 = tpu.matmul %754, %755, %cst_455 {dimension_numbers = #tpu.dot_dimension_numbers<[1], [0], [0], [1], [0, 0, 1, 1], [], []>} : vector<16x64xbf16>, vector<64x64xbf16>, vector<16x64xf32> -> vector<16x64xf32>
    %757 = arith.addf %748, %756 : vector<16x64xf32>
    %758 = vector.shape_cast %749 : vector<2x8x64xf32> to vector<16x64xf32>
    %759 = arith.truncf %758 : vector<16x64xf32> to vector<16x64xbf16>
    %c1632 = arith.constant 1632 : index
    %c0_456 = arith.constant 0 : index
    %760 = vector.load %arg2[%c1632, %c0_456] : memref<5472x128xbf16, #tpu.memory_space<vmem>>, vector<64x64xbf16>
    %cst_457 = arith.constant dense<0.000000e+00> : vector<16x64xf32>
    %761 = tpu.matmul %759, %760, %cst_457 {dimension_numbers = #tpu.dot_dimension_numbers<[1], [0], [0], [1], [0, 0, 1, 1], [], []>} : vector<16x64xbf16>, vector<64x64xbf16>, vector<16x64xf32> -> vector<16x64xf32>
    %762 = arith.addf %757, %761 : vector<16x64xf32>
    %c7_i32_458 = arith.constant 7 : i32
    %763 = tpu.dynamic_rotate %749 by %c7_i32_458 dim 1 : vector<2x8x64xf32>, i32 -> vector<2x8x64xf32>
    %cst_459 = arith.constant 0.000000e+00 : f32
    %764 = vector.broadcast %cst_459 : f32 to vector<2x8x64xf32>
    %765 = arith.select %747, %763, %764 : vector<2x8x64xi1>, vector<2x8x64xf32>
    %766 = vector.shape_cast %765 : vector<2x8x64xf32> to vector<16x64xf32>
    %767 = arith.truncf %766 : vector<16x64xf32> to vector<16x64xbf16>
    %c1824 = arith.constant 1824 : index
    %c0_460 = arith.constant 0 : index
    %768 = vector.load %arg2[%c1824, %c0_460] : memref<5472x128xbf16, #tpu.memory_space<vmem>>, vector<64x64xbf16>
    %cst_461 = arith.constant dense<0.000000e+00> : vector<16x64xf32>
    %769 = tpu.matmul %767, %768, %cst_461 {dimension_numbers = #tpu.dot_dimension_numbers<[1], [0], [0], [1], [0, 0, 1, 1], [], []>} : vector<16x64xbf16>, vector<64x64xbf16>, vector<16x64xf32> -> vector<16x64xf32>
    %770 = arith.addf %762, %769 : vector<16x64xf32>
    %c1_462 = arith.constant 1 : index
    %c0_463 = arith.constant 0 : index
    %c0_464 = arith.constant 0 : index
    %771 = vector.load %arg5[%c1_462, %c0_463, %c0_464] : memref<18x8x128xf32, #tpu.memory_space<vmem>>, vector<2x8x64xf32>
    %c1_i32_465 = arith.constant 1 : i32
    %772 = tpu.dynamic_rotate %771 by %c1_i32_465 dim 1 : vector<2x8x64xf32>, i32 -> vector<2x8x64xf32>
    %cst_466 = arith.constant 0.000000e+00 : f32
    %773 = vector.broadcast %cst_466 : f32 to vector<2x8x64xf32>
    %774 = arith.select %745, %772, %773 : vector<2x8x64xi1>, vector<2x8x64xf32>
    %775 = vector.shape_cast %774 : vector<2x8x64xf32> to vector<16x64xf32>
    %776 = arith.truncf %775 : vector<16x64xf32> to vector<16x64xbf16>
    %c1504 = arith.constant 1504 : index
    %c0_467 = arith.constant 0 : index
    %777 = vector.load %arg2[%c1504, %c0_467] : memref<5472x128xbf16, #tpu.memory_space<vmem>>, vector<64x64xbf16>
    %cst_468 = arith.constant dense<0.000000e+00> : vector<16x64xf32>
    %778 = tpu.matmul %776, %777, %cst_468 {dimension_numbers = #tpu.dot_dimension_numbers<[1], [0], [0], [1], [0, 0, 1, 1], [], []>} : vector<16x64xbf16>, vector<64x64xbf16>, vector<16x64xf32> -> vector<16x64xf32>
    %779 = arith.addf %770, %778 : vector<16x64xf32>
    %780 = vector.shape_cast %771 : vector<2x8x64xf32> to vector<16x64xf32>
    %781 = arith.truncf %780 : vector<16x64xf32> to vector<16x64xbf16>
    %c1696 = arith.constant 1696 : index
    %c0_469 = arith.constant 0 : index
    %782 = vector.load %arg2[%c1696, %c0_469] : memref<5472x128xbf16, #tpu.memory_space<vmem>>, vector<64x64xbf16>
    %cst_470 = arith.constant dense<0.000000e+00> : vector<16x64xf32>
    %783 = tpu.matmul %781, %782, %cst_470 {dimension_numbers = #tpu.dot_dimension_numbers<[1], [0], [0], [1], [0, 0, 1, 1], [], []>} : vector<16x64xbf16>, vector<64x64xbf16>, vector<16x64xf32> -> vector<16x64xf32>
    %784 = arith.addf %779, %783 : vector<16x64xf32>
    %c7_i32_471 = arith.constant 7 : i32
    %785 = tpu.dynamic_rotate %771 by %c7_i32_471 dim 1 : vector<2x8x64xf32>, i32 -> vector<2x8x64xf32>
    %cst_472 = arith.constant 0.000000e+00 : f32
    %786 = vector.broadcast %cst_472 : f32 to vector<2x8x64xf32>
    %787 = arith.select %747, %785, %786 : vector<2x8x64xi1>, vector<2x8x64xf32>
    %788 = vector.shape_cast %787 : vector<2x8x64xf32> to vector<16x64xf32>
    %789 = arith.truncf %788 : vector<16x64xf32> to vector<16x64xbf16>
    %c1888 = arith.constant 1888 : index
    %c0_473 = arith.constant 0 : index
    %790 = vector.load %arg2[%c1888, %c0_473] : memref<5472x128xbf16, #tpu.memory_space<vmem>>, vector<64x64xbf16>
    %cst_474 = arith.constant dense<0.000000e+00> : vector<16x64xf32>
    %791 = tpu.matmul %789, %790, %cst_474 {dimension_numbers = #tpu.dot_dimension_numbers<[1], [0], [0], [1], [0, 0, 1, 1], [], []>} : vector<16x64xbf16>, vector<64x64xbf16>, vector<16x64xf32> -> vector<16x64xf32>
    %792 = arith.addf %784, %791 : vector<16x64xf32>
    %c2_475 = arith.constant 2 : index
    %c0_476 = arith.constant 0 : index
    %c0_477 = arith.constant 0 : index
    %793 = vector.load %arg5[%c2_475, %c0_476, %c0_477] : memref<18x8x128xf32, #tpu.memory_space<vmem>>, vector<2x8x64xf32>
    %c1_i32_478 = arith.constant 1 : i32
    %794 = tpu.dynamic_rotate %793 by %c1_i32_478 dim 1 : vector<2x8x64xf32>, i32 -> vector<2x8x64xf32>
    %cst_479 = arith.constant 0.000000e+00 : f32
    %795 = vector.broadcast %cst_479 : f32 to vector<2x8x64xf32>
    %796 = arith.select %745, %794, %795 : vector<2x8x64xi1>, vector<2x8x64xf32>
    %797 = vector.shape_cast %796 : vector<2x8x64xf32> to vector<16x64xf32>
    %798 = arith.truncf %797 : vector<16x64xf32> to vector<16x64xbf16>
    %c1568 = arith.constant 1568 : index
    %c0_480 = arith.constant 0 : index
    %799 = vector.load %arg2[%c1568, %c0_480] : memref<5472x128xbf16, #tpu.memory_space<vmem>>, vector<64x64xbf16>
    %cst_481 = arith.constant dense<0.000000e+00> : vector<16x64xf32>
    %800 = tpu.matmul %798, %799, %cst_481 {dimension_numbers = #tpu.dot_dimension_numbers<[1], [0], [0], [1], [0, 0, 1, 1], [], []>} : vector<16x64xbf16>, vector<64x64xbf16>, vector<16x64xf32> -> vector<16x64xf32>
    %801 = arith.addf %792, %800 : vector<16x64xf32>
    %802 = vector.shape_cast %793 : vector<2x8x64xf32> to vector<16x64xf32>
    %803 = arith.truncf %802 : vector<16x64xf32> to vector<16x64xbf16>
    %c1760 = arith.constant 1760 : index
    %c0_482 = arith.constant 0 : index
    %804 = vector.load %arg2[%c1760, %c0_482] : memref<5472x128xbf16, #tpu.memory_space<vmem>>, vector<64x64xbf16>
    %cst_483 = arith.constant dense<0.000000e+00> : vector<16x64xf32>
    %805 = tpu.matmul %803, %804, %cst_483 {dimension_numbers = #tpu.dot_dimension_numbers<[1], [0], [0], [1], [0, 0, 1, 1], [], []>} : vector<16x64xbf16>, vector<64x64xbf16>, vector<16x64xf32> -> vector<16x64xf32>
    %806 = arith.addf %801, %805 : vector<16x64xf32>
    %c7_i32_484 = arith.constant 7 : i32
    %807 = tpu.dynamic_rotate %793 by %c7_i32_484 dim 1 : vector<2x8x64xf32>, i32 -> vector<2x8x64xf32>
    %cst_485 = arith.constant 0.000000e+00 : f32
    %808 = vector.broadcast %cst_485 : f32 to vector<2x8x64xf32>
    %809 = arith.select %747, %807, %808 : vector<2x8x64xi1>, vector<2x8x64xf32>
    %810 = vector.shape_cast %809 : vector<2x8x64xf32> to vector<16x64xf32>
    %811 = arith.truncf %810 : vector<16x64xf32> to vector<16x64xbf16>
    %c1952 = arith.constant 1952 : index
    %c0_486 = arith.constant 0 : index
    %812 = vector.load %arg2[%c1952, %c0_486] : memref<5472x128xbf16, #tpu.memory_space<vmem>>, vector<64x64xbf16>
    %cst_487 = arith.constant dense<0.000000e+00> : vector<16x64xf32>
    %813 = tpu.matmul %811, %812, %cst_487 {dimension_numbers = #tpu.dot_dimension_numbers<[1], [0], [0], [1], [0, 0, 1, 1], [], []>} : vector<16x64xbf16>, vector<64x64xbf16>, vector<16x64xf32> -> vector<16x64xf32>
    %814 = arith.addf %806, %813 : vector<16x64xf32>
    %cst_488 = arith.constant dense<0.000000e+00> : vector<64xf32>
    %815 = vector.multi_reduction <add>, %814, %cst_488 [0] : vector<16x64xf32> to vector<64xf32>
    %816 = vector.shape_cast %815 : vector<64xf32> to vector<1x64xf32>
    %cst_489 = arith.constant 6.250000e-02 : f32
    %817 = vector.broadcast %cst_489 : f32 to vector<1x64xf32>
    %818 = arith.mulf %816, %817 : vector<1x64xf32>
    %819 = arith.mulf %814, %814 : vector<16x64xf32>
    %cst_490 = arith.constant dense<0.000000e+00> : vector<64xf32>
    %820 = vector.multi_reduction <add>, %819, %cst_490 [0] : vector<16x64xf32> to vector<64xf32>
    %821 = vector.shape_cast %820 : vector<64xf32> to vector<1x64xf32>
    %cst_491 = arith.constant 6.250000e-02 : f32
    %822 = vector.broadcast %cst_491 : f32 to vector<1x64xf32>
    %823 = arith.mulf %821, %822 : vector<1x64xf32>
    %824 = arith.mulf %818, %818 : vector<1x64xf32>
    %825 = arith.subf %823, %824 : vector<1x64xf32>
    %c0_492 = arith.constant 0 : index
    %c896_493 = arith.constant 896 : index
    %826 = vector.load %arg3[%c0_492, %c896_493] : memref<2x1536xf32, #tpu.memory_space<vmem>>, vector<1x64xf32>
    %c1_494 = arith.constant 1 : index
    %c896_495 = arith.constant 896 : index
    %827 = vector.load %arg3[%c1_494, %c896_495] : memref<2x1536xf32, #tpu.memory_space<vmem>>, vector<1x64xf32>
    %cst_496 = arith.constant 9.99999974E-6 : f32
    %828 = vector.broadcast %cst_496 : f32 to vector<1x64xf32>
    %829 = arith.addf %825, %828 : vector<1x64xf32>
    %830 = math.rsqrt %829 : vector<1x64xf32>
    %831 = arith.mulf %826, %830 : vector<1x64xf32>
    %832 = vector.broadcast %831 : vector<1x64xf32> to vector<16x64xf32>
    %833 = arith.mulf %814, %832 : vector<16x64xf32>
    %834 = arith.mulf %818, %831 : vector<1x64xf32>
    %835 = arith.subf %827, %834 : vector<1x64xf32>
    %836 = vector.broadcast %835 : vector<1x64xf32> to vector<16x64xf32>
    %837 = arith.addf %833, %836 : vector<16x64xf32>
    %cst_497 = arith.constant 0.000000e+00 : f32
    %838 = vector.broadcast %cst_497 : f32 to vector<16x64xf32>
    %839 = arith.cmpf oge, %837, %838 : vector<16x64xf32>
    %cst_498 = arith.constant 3.000000e-01 : f32
    %840 = vector.broadcast %cst_498 : f32 to vector<16x64xf32>
    %841 = arith.mulf %840, %837 : vector<16x64xf32>
    %842 = arith.select %839, %837, %841 : vector<16x64xi1>, vector<16x64xf32>
    %843 = vector.shape_cast %842 : vector<16x64xf32> to vector<2x8x64xf32>
    %844 = arith.addf %843, %738 : vector<2x8x64xf32>
    %cst_499 = arith.constant 0.000000e+00 : f32
    %845 = vector.broadcast %cst_499 : f32 to vector<1x8x64xf32>
    %c0_500 = arith.constant 0 : index
    %c0_501 = arith.constant 0 : index
    %c0_502 = arith.constant 0 : index
    %846 = vector.load %arg5[%c0_500, %c0_501, %c0_502] : memref<18x8x128xf32, #tpu.memory_space<vmem>>, vector<1x8x64xf32>
    tpu.vector_store %arg5[%c0_500, %c0_501, %c0_502], %845 {strides = array<i32>} : memref<18x8x128xf32, #tpu.memory_space<vmem>>, vector<1x8x64xf32>,
    %c3_503 = arith.constant 3 : index
    %c0_504 = arith.constant 0 : index
    %c0_505 = arith.constant 0 : index
    %847 = vector.load %arg5[%c3_503, %c0_504, %c0_505] : memref<18x8x128xf32, #tpu.memory_space<vmem>>, vector<1x8x64xf32>
    tpu.vector_store %arg5[%c3_503, %c0_504, %c0_505], %845 {strides = array<i32>} : memref<18x8x128xf32, #tpu.memory_space<vmem>>, vector<1x8x64xf32>,
    %c1_506 = arith.constant 1 : index
    %c0_507 = arith.constant 0 : index
    %c0_508 = arith.constant 0 : index
    %848 = vector.load %arg5[%c1_506, %c0_507, %c0_508] : memref<18x8x128xf32, #tpu.memory_space<vmem>>, vector<2x8x64xf32>
    tpu.vector_store %arg5[%c1_506, %c0_507, %c0_508], %844 {strides = array<i32>} : memref<18x8x128xf32, #tpu.memory_space<vmem>>, vector<2x8x64xf32>,
    %849 = tpu.iota {dimensions = array<i32: 1>} : vector<1x8x64xi32>
    %c0_i32_509 = arith.constant 0 : i32
    %850 = vector.broadcast %c0_i32_509 : i32 to vector<1x8x64xi32>
    %851 = arith.cmpi sgt, %849, %850 : vector<1x8x64xi32>
    %c7_i32_510 = arith.constant 7 : i32
    %852 = vector.broadcast %c7_i32_510 : i32 to vector<1x8x64xi32>
    %853 = arith.cmpi slt, %849, %852 : vector<1x8x64xi32>
    %cst_511 = arith.constant 0.000000e+00 : f32
    %854 = vector.broadcast %cst_511 : f32 to vector<8x64xf32>
    %c0_512 = arith.constant 0 : index
    %c0_513 = arith.constant 0 : index
    %c0_514 = arith.constant 0 : index
    %855 = tpu.strided_load %arg5[%c0_512, %c0_513, %c0_514] {strides = array<i32: 3, 1, 1>} : memref<18x8x128xf32, #tpu.memory_space<vmem>>, vector<1x8x64xf32>
    %c1_i32_515 = arith.constant 1 : i32
    %856 = tpu.dynamic_rotate %855 by %c1_i32_515 dim 1 : vector<1x8x64xf32>, i32 -> vector<1x8x64xf32>
    %cst_516 = arith.constant 0.000000e+00 : f32
    %857 = vector.broadcast %cst_516 : f32 to vector<1x8x64xf32>
    %858 = arith.select %851, %856, %857 : vector<1x8x64xi1>, vector<1x8x64xf32>
    %859 = vector.shape_cast %858 : vector<1x8x64xf32> to vector<8x64xf32>
    %860 = arith.truncf %859 : vector<8x64xf32> to vector<8x64xbf16>
    %c2016 = arith.constant 2016 : index
    %c0_517 = arith.constant 0 : index
    %861 = vector.load %arg2[%c2016, %c0_517] : memref<5472x128xbf16, #tpu.memory_space<vmem>>, vector<64x64xbf16>
    %cst_518 = arith.constant dense<0.000000e+00> : vector<8x64xf32>
    %862 = tpu.matmul %860, %861, %cst_518 {dimension_numbers = #tpu.dot_dimension_numbers<[1], [0], [0], [1], [0, 0, 1, 1], [], []>} : vector<8x64xbf16>, vector<64x64xbf16>, vector<8x64xf32> -> vector<8x64xf32>
    %863 = arith.addf %854, %862 : vector<8x64xf32>
    %864 = vector.shape_cast %855 : vector<1x8x64xf32> to vector<8x64xf32>
    %865 = arith.truncf %864 : vector<8x64xf32> to vector<8x64xbf16>
    %c2208 = arith.constant 2208 : index
    %c0_519 = arith.constant 0 : index
    %866 = vector.load %arg2[%c2208, %c0_519] : memref<5472x128xbf16, #tpu.memory_space<vmem>>, vector<64x64xbf16>
    %cst_520 = arith.constant dense<0.000000e+00> : vector<8x64xf32>
    %867 = tpu.matmul %865, %866, %cst_520 {dimension_numbers = #tpu.dot_dimension_numbers<[1], [0], [0], [1], [0, 0, 1, 1], [], []>} : vector<8x64xbf16>, vector<64x64xbf16>, vector<8x64xf32> -> vector<8x64xf32>
    %868 = arith.addf %863, %867 : vector<8x64xf32>
    %c7_i32_521 = arith.constant 7 : i32
    %869 = tpu.dynamic_rotate %855 by %c7_i32_521 dim 1 : vector<1x8x64xf32>, i32 -> vector<1x8x64xf32>
    %cst_522 = arith.constant 0.000000e+00 : f32
    %870 = vector.broadcast %cst_522 : f32 to vector<1x8x64xf32>
    %871 = arith.select %853, %869, %870 : vector<1x8x64xi1>, vector<1x8x64xf32>
    %872 = vector.shape_cast %871 : vector<1x8x64xf32> to vector<8x64xf32>
    %873 = arith.truncf %872 : vector<8x64xf32> to vector<8x64xbf16>
    %c2400 = arith.constant 2400 : index
    %c0_523 = arith.constant 0 : index
    %874 = vector.load %arg2[%c2400, %c0_523] : memref<5472x128xbf16, #tpu.memory_space<vmem>>, vector<64x64xbf16>
    %cst_524 = arith.constant dense<0.000000e+00> : vector<8x64xf32>
    %875 = tpu.matmul %873, %874, %cst_524 {dimension_numbers = #tpu.dot_dimension_numbers<[1], [0], [0], [1], [0, 0, 1, 1], [], []>} : vector<8x64xbf16>, vector<64x64xbf16>, vector<8x64xf32> -> vector<8x64xf32>
    %876 = arith.addf %868, %875 : vector<8x64xf32>
    %c1_525 = arith.constant 1 : index
    %c0_526 = arith.constant 0 : index
    %c0_527 = arith.constant 0 : index
    %877 = tpu.strided_load %arg5[%c1_525, %c0_526, %c0_527] {strides = array<i32: 3, 1, 1>} : memref<18x8x128xf32, #tpu.memory_space<vmem>>, vector<1x8x64xf32>
    %c1_i32_528 = arith.constant 1 : i32
    %878 = tpu.dynamic_rotate %877 by %c1_i32_528 dim 1 : vector<1x8x64xf32>, i32 -> vector<1x8x64xf32>
    %cst_529 = arith.constant 0.000000e+00 : f32
    %879 = vector.broadcast %cst_529 : f32 to vector<1x8x64xf32>
    %880 = arith.select %851, %878, %879 : vector<1x8x64xi1>, vector<1x8x64xf32>
    %881 = vector.shape_cast %880 : vector<1x8x64xf32> to vector<8x64xf32>
    %882 = arith.truncf %881 : vector<8x64xf32> to vector<8x64xbf16>
    %c2080 = arith.constant 2080 : index
    %c0_530 = arith.constant 0 : index
    %883 = vector.load %arg2[%c2080, %c0_530] : memref<5472x128xbf16, #tpu.memory_space<vmem>>, vector<64x64xbf16>
    %cst_531 = arith.constant dense<0.000000e+00> : vector<8x64xf32>
    %884 = tpu.matmul %882, %883, %cst_531 {dimension_numbers = #tpu.dot_dimension_numbers<[1], [0], [0], [1], [0, 0, 1, 1], [], []>} : vector<8x64xbf16>, vector<64x64xbf16>, vector<8x64xf32> -> vector<8x64xf32>
    %885 = arith.addf %876, %884 : vector<8x64xf32>
    %886 = vector.shape_cast %877 : vector<1x8x64xf32> to vector<8x64xf32>
    %887 = arith.truncf %886 : vector<8x64xf32> to vector<8x64xbf16>
    %c2272 = arith.constant 2272 : index
    %c0_532 = arith.constant 0 : index
    %888 = vector.load %arg2[%c2272, %c0_532] : memref<5472x128xbf16, #tpu.memory_space<vmem>>, vector<64x64xbf16>
    %cst_533 = arith.constant dense<0.000000e+00> : vector<8x64xf32>
    %889 = tpu.matmul %887, %888, %cst_533 {dimension_numbers = #tpu.dot_dimension_numbers<[1], [0], [0], [1], [0, 0, 1, 1], [], []>} : vector<8x64xbf16>, vector<64x64xbf16>, vector<8x64xf32> -> vector<8x64xf32>
    %890 = arith.addf %885, %889 : vector<8x64xf32>
    %c7_i32_534 = arith.constant 7 : i32
    %891 = tpu.dynamic_rotate %877 by %c7_i32_534 dim 1 : vector<1x8x64xf32>, i32 -> vector<1x8x64xf32>
    %cst_535 = arith.constant 0.000000e+00 : f32
    %892 = vector.broadcast %cst_535 : f32 to vector<1x8x64xf32>
    %893 = arith.select %853, %891, %892 : vector<1x8x64xi1>, vector<1x8x64xf32>
    %894 = vector.shape_cast %893 : vector<1x8x64xf32> to vector<8x64xf32>
    %895 = arith.truncf %894 : vector<8x64xf32> to vector<8x64xbf16>
    %c2464 = arith.constant 2464 : index
    %c0_536 = arith.constant 0 : index
    %896 = vector.load %arg2[%c2464, %c0_536] : memref<5472x128xbf16, #tpu.memory_space<vmem>>, vector<64x64xbf16>
    %cst_537 = arith.constant dense<0.000000e+00> : vector<8x64xf32>
    %897 = tpu.matmul %895, %896, %cst_537 {dimension_numbers = #tpu.dot_dimension_numbers<[1], [0], [0], [1], [0, 0, 1, 1], [], []>} : vector<8x64xbf16>, vector<64x64xbf16>, vector<8x64xf32> -> vector<8x64xf32>
    %898 = arith.addf %890, %897 : vector<8x64xf32>
    %c2_538 = arith.constant 2 : index
    %c0_539 = arith.constant 0 : index
    %c0_540 = arith.constant 0 : index
    %899 = tpu.strided_load %arg5[%c2_538, %c0_539, %c0_540] {strides = array<i32: 3, 1, 1>} : memref<18x8x128xf32, #tpu.memory_space<vmem>>, vector<1x8x64xf32>
    %c1_i32_541 = arith.constant 1 : i32
    %900 = tpu.dynamic_rotate %899 by %c1_i32_541 dim 1 : vector<1x8x64xf32>, i32 -> vector<1x8x64xf32>
    %cst_542 = arith.constant 0.000000e+00 : f32
    %901 = vector.broadcast %cst_542 : f32 to vector<1x8x64xf32>
    %902 = arith.select %851, %900, %901 : vector<1x8x64xi1>, vector<1x8x64xf32>
    %903 = vector.shape_cast %902 : vector<1x8x64xf32> to vector<8x64xf32>
    %904 = arith.truncf %903 : vector<8x64xf32> to vector<8x64xbf16>
    %c2144 = arith.constant 2144 : index
    %c0_543 = arith.constant 0 : index
    %905 = vector.load %arg2[%c2144, %c0_543] : memref<5472x128xbf16, #tpu.memory_space<vmem>>, vector<64x64xbf16>
    %cst_544 = arith.constant dense<0.000000e+00> : vector<8x64xf32>
    %906 = tpu.matmul %904, %905, %cst_544 {dimension_numbers = #tpu.dot_dimension_numbers<[1], [0], [0], [1], [0, 0, 1, 1], [], []>} : vector<8x64xbf16>, vector<64x64xbf16>, vector<8x64xf32> -> vector<8x64xf32>
    %907 = arith.addf %898, %906 : vector<8x64xf32>
    %908 = vector.shape_cast %899 : vector<1x8x64xf32> to vector<8x64xf32>
    %909 = arith.truncf %908 : vector<8x64xf32> to vector<8x64xbf16>
    %c2336 = arith.constant 2336 : index
    %c0_545 = arith.constant 0 : index
    %910 = vector.load %arg2[%c2336, %c0_545] : memref<5472x128xbf16, #tpu.memory_space<vmem>>, vector<64x64xbf16>
    %cst_546 = arith.constant dense<0.000000e+00> : vector<8x64xf32>
    %911 = tpu.matmul %909, %910, %cst_546 {dimension_numbers = #tpu.dot_dimension_numbers<[1], [0], [0], [1], [0, 0, 1, 1], [], []>} : vector<8x64xbf16>, vector<64x64xbf16>, vector<8x64xf32> -> vector<8x64xf32>
    %912 = arith.addf %907, %911 : vector<8x64xf32>
    %c7_i32_547 = arith.constant 7 : i32
    %913 = tpu.dynamic_rotate %899 by %c7_i32_547 dim 1 : vector<1x8x64xf32>, i32 -> vector<1x8x64xf32>
    %cst_548 = arith.constant 0.000000e+00 : f32
    %914 = vector.broadcast %cst_548 : f32 to vector<1x8x64xf32>
    %915 = arith.select %853, %913, %914 : vector<1x8x64xi1>, vector<1x8x64xf32>
    %916 = vector.shape_cast %915 : vector<1x8x64xf32> to vector<8x64xf32>
    %917 = arith.truncf %916 : vector<8x64xf32> to vector<8x64xbf16>
    %c2528 = arith.constant 2528 : index
    %c0_549 = arith.constant 0 : index
    %918 = vector.load %arg2[%c2528, %c0_549] : memref<5472x128xbf16, #tpu.memory_space<vmem>>, vector<64x64xbf16>
    %cst_550 = arith.constant dense<0.000000e+00> : vector<8x64xf32>
    %919 = tpu.matmul %917, %918, %cst_550 {dimension_numbers = #tpu.dot_dimension_numbers<[1], [0], [0], [1], [0, 0, 1, 1], [], []>} : vector<8x64xbf16>, vector<64x64xbf16>, vector<8x64xf32> -> vector<8x64xf32>
    %920 = arith.addf %912, %919 : vector<8x64xf32>
    %cst_551 = arith.constant dense<0.000000e+00> : vector<64xf32>
    %921 = vector.multi_reduction <add>, %920, %cst_551 [0] : vector<8x64xf32> to vector<64xf32>
    %922 = vector.shape_cast %921 : vector<64xf32> to vector<1x64xf32>
    %cst_552 = arith.constant 1.250000e-01 : f32
    %923 = vector.broadcast %cst_552 : f32 to vector<1x64xf32>
    %924 = arith.mulf %922, %923 : vector<1x64xf32>
    %925 = arith.mulf %920, %920 : vector<8x64xf32>
    %cst_553 = arith.constant dense<0.000000e+00> : vector<64xf32>
    %926 = vector.multi_reduction <add>, %925, %cst_553 [0] : vector<8x64xf32> to vector<64xf32>
    %927 = vector.shape_cast %926 : vector<64xf32> to vector<1x64xf32>
    %cst_554 = arith.constant 1.250000e-01 : f32
    %928 = vector.broadcast %cst_554 : f32 to vector<1x64xf32>
    %929 = arith.mulf %927, %928 : vector<1x64xf32>
    %930 = arith.mulf %924, %924 : vector<1x64xf32>
    %931 = arith.subf %929, %930 : vector<1x64xf32>
    %c0_555 = arith.constant 0 : index
    %c1024_556 = arith.constant 1024 : index
    %932 = vector.load %arg3[%c0_555, %c1024_556] : memref<2x1536xf32, #tpu.memory_space<vmem>>, vector<1x64xf32>
    %c1_557 = arith.constant 1 : index
    %c1024_558 = arith.constant 1024 : index
    %933 = vector.load %arg3[%c1_557, %c1024_558] : memref<2x1536xf32, #tpu.memory_space<vmem>>, vector<1x64xf32>
    %cst_559 = arith.constant 9.99999974E-6 : f32
    %934 = vector.broadcast %cst_559 : f32 to vector<1x64xf32>
    %935 = arith.addf %931, %934 : vector<1x64xf32>
    %936 = math.rsqrt %935 : vector<1x64xf32>
    %937 = arith.mulf %932, %936 : vector<1x64xf32>
    %938 = vector.broadcast %937 : vector<1x64xf32> to vector<8x64xf32>
    %939 = arith.mulf %920, %938 : vector<8x64xf32>
    %940 = arith.mulf %924, %937 : vector<1x64xf32>
    %941 = arith.subf %933, %940 : vector<1x64xf32>
    %942 = vector.broadcast %941 : vector<1x64xf32> to vector<8x64xf32>
    %943 = arith.addf %939, %942 : vector<8x64xf32>
    %cst_560 = arith.constant 0.000000e+00 : f32
    %944 = vector.broadcast %cst_560 : f32 to vector<8x64xf32>
    %945 = arith.cmpf oge, %943, %944 : vector<8x64xf32>
    %cst_561 = arith.constant 3.000000e-01 : f32
    %946 = vector.broadcast %cst_561 : f32 to vector<8x64xf32>
    %947 = arith.mulf %946, %943 : vector<8x64xf32>
    %948 = arith.select %945, %943, %947 : vector<8x64xi1>, vector<8x64xf32>
    %949 = vector.shape_cast %948 : vector<8x64xf32> to vector<1x8x64xf32>
    %cst_562 = arith.constant 0.000000e+00 : f32
    %950 = vector.broadcast %cst_562 : f32 to vector<1x8x64xf32>
    %c0_563 = arith.constant 0 : index
    %c0_564 = arith.constant 0 : index
    %c0_565 = arith.constant 0 : index
    %951 = vector.load %arg5[%c0_563, %c0_564, %c0_565] : memref<18x8x128xf32, #tpu.memory_space<vmem>>, vector<1x8x64xf32>
    tpu.vector_store %arg5[%c0_563, %c0_564, %c0_565], %950 {strides = array<i32>} : memref<18x8x128xf32, #tpu.memory_space<vmem>>, vector<1x8x64xf32>,
    %c2_566 = arith.constant 2 : index
    %c0_567 = arith.constant 0 : index
    %c0_568 = arith.constant 0 : index
    %952 = vector.load %arg5[%c2_566, %c0_567, %c0_568] : memref<18x8x128xf32, #tpu.memory_space<vmem>>, vector<1x8x64xf32>
    tpu.vector_store %arg5[%c2_566, %c0_567, %c0_568], %950 {strides = array<i32>} : memref<18x8x128xf32, #tpu.memory_space<vmem>>, vector<1x8x64xf32>,
    %c1_569 = arith.constant 1 : index
    %c0_570 = arith.constant 0 : index
    %c0_571 = arith.constant 0 : index
    %953 = vector.load %arg5[%c1_569, %c0_570, %c0_571] : memref<18x8x128xf32, #tpu.memory_space<vmem>>, vector<1x8x64xf32>
    tpu.vector_store %arg5[%c1_569, %c0_570, %c0_571], %949 {strides = array<i32>} : memref<18x8x128xf32, #tpu.memory_space<vmem>>, vector<1x8x64xf32>,
    %954 = tpu.iota {dimensions = array<i32: 1>} : vector<1x8x64xi32>
    %c0_i32_572 = arith.constant 0 : i32
    %955 = vector.broadcast %c0_i32_572 : i32 to vector<1x8x64xi32>
    %956 = arith.cmpi sgt, %954, %955 : vector<1x8x64xi32>
    %c7_i32_573 = arith.constant 7 : i32
    %957 = vector.broadcast %c7_i32_573 : i32 to vector<1x8x64xi32>
    %958 = arith.cmpi slt, %954, %957 : vector<1x8x64xi32>
    %cst_574 = arith.constant 0.000000e+00 : f32
    %959 = vector.broadcast %cst_574 : f32 to vector<8x128xf32>
    %c0_575 = arith.constant 0 : index
    %c0_576 = arith.constant 0 : index
    %c0_577 = arith.constant 0 : index
    %960 = vector.load %arg5[%c0_575, %c0_576, %c0_577] : memref<18x8x128xf32, #tpu.memory_space<vmem>>, vector<1x8x64xf32>
    %c1_i32_578 = arith.constant 1 : i32
    %961 = tpu.dynamic_rotate %960 by %c1_i32_578 dim 1 : vector<1x8x64xf32>, i32 -> vector<1x8x64xf32>
    %cst_579 = arith.constant 0.000000e+00 : f32
    %962 = vector.broadcast %cst_579 : f32 to vector<1x8x64xf32>
    %963 = arith.select %956, %961, %962 : vector<1x8x64xi1>, vector<1x8x64xf32>
    %964 = vector.shape_cast %963 : vector<1x8x64xf32> to vector<8x64xf32>
    %965 = arith.truncf %964 : vector<8x64xf32> to vector<8x64xbf16>
    %c2592 = arith.constant 2592 : index
    %c0_580 = arith.constant 0 : index
    %966 = vector.load %arg2[%c2592, %c0_580] : memref<5472x128xbf16, #tpu.memory_space<vmem>>, vector<64x128xbf16>
    %cst_581 = arith.constant dense<0.000000e+00> : vector<8x128xf32>
    %967 = tpu.matmul %965, %966, %cst_581 {dimension_numbers = #tpu.dot_dimension_numbers<[1], [0], [0], [1], [0, 0, 1, 1], [], []>} : vector<8x64xbf16>, vector<64x128xbf16>, vector<8x128xf32> -> vector<8x128xf32>
    %968 = arith.addf %959, %967 : vector<8x128xf32>
    %969 = vector.shape_cast %960 : vector<1x8x64xf32> to vector<8x64xf32>
    %970 = arith.truncf %969 : vector<8x64xf32> to vector<8x64xbf16>
    %c2784 = arith.constant 2784 : index
    %c0_582 = arith.constant 0 : index
    %971 = vector.load %arg2[%c2784, %c0_582] : memref<5472x128xbf16, #tpu.memory_space<vmem>>, vector<64x128xbf16>
    %cst_583 = arith.constant dense<0.000000e+00> : vector<8x128xf32>
    %972 = tpu.matmul %970, %971, %cst_583 {dimension_numbers = #tpu.dot_dimension_numbers<[1], [0], [0], [1], [0, 0, 1, 1], [], []>} : vector<8x64xbf16>, vector<64x128xbf16>, vector<8x128xf32> -> vector<8x128xf32>
    %973 = arith.addf %968, %972 : vector<8x128xf32>
    %c7_i32_584 = arith.constant 7 : i32
    %974 = tpu.dynamic_rotate %960 by %c7_i32_584 dim 1 : vector<1x8x64xf32>, i32 -> vector<1x8x64xf32>
    %cst_585 = arith.constant 0.000000e+00 : f32
    %975 = vector.broadcast %cst_585 : f32 to vector<1x8x64xf32>
    %976 = arith.select %958, %974, %975 : vector<1x8x64xi1>, vector<1x8x64xf32>
    %977 = vector.shape_cast %976 : vector<1x8x64xf32> to vector<8x64xf32>
    %978 = arith.truncf %977 : vector<8x64xf32> to vector<8x64xbf16>
    %c2976 = arith.constant 2976 : index
    %c0_586 = arith.constant 0 : index
    %979 = vector.load %arg2[%c2976, %c0_586] : memref<5472x128xbf16, #tpu.memory_space<vmem>>, vector<64x128xbf16>
    %cst_587 = arith.constant dense<0.000000e+00> : vector<8x128xf32>
    %980 = tpu.matmul %978, %979, %cst_587 {dimension_numbers = #tpu.dot_dimension_numbers<[1], [0], [0], [1], [0, 0, 1, 1], [], []>} : vector<8x64xbf16>, vector<64x128xbf16>, vector<8x128xf32> -> vector<8x128xf32>
    %981 = arith.addf %973, %980 : vector<8x128xf32>
    %c1_588 = arith.constant 1 : index
    %c0_589 = arith.constant 0 : index
    %c0_590 = arith.constant 0 : index
    %982 = vector.load %arg5[%c1_588, %c0_589, %c0_590] : memref<18x8x128xf32, #tpu.memory_space<vmem>>, vector<1x8x64xf32>
    %c1_i32_591 = arith.constant 1 : i32
    %983 = tpu.dynamic_rotate %982 by %c1_i32_591 dim 1 : vector<1x8x64xf32>, i32 -> vector<1x8x64xf32>
    %cst_592 = arith.constant 0.000000e+00 : f32
    %984 = vector.broadcast %cst_592 : f32 to vector<1x8x64xf32>
    %985 = arith.select %956, %983, %984 : vector<1x8x64xi1>, vector<1x8x64xf32>
    %986 = vector.shape_cast %985 : vector<1x8x64xf32> to vector<8x64xf32>
    %987 = arith.truncf %986 : vector<8x64xf32> to vector<8x64xbf16>
    %c2656 = arith.constant 2656 : index
    %c0_593 = arith.constant 0 : index
    %988 = vector.load %arg2[%c2656, %c0_593] : memref<5472x128xbf16, #tpu.memory_space<vmem>>, vector<64x128xbf16>
    %cst_594 = arith.constant dense<0.000000e+00> : vector<8x128xf32>
    %989 = tpu.matmul %987, %988, %cst_594 {dimension_numbers = #tpu.dot_dimension_numbers<[1], [0], [0], [1], [0, 0, 1, 1], [], []>} : vector<8x64xbf16>, vector<64x128xbf16>, vector<8x128xf32> -> vector<8x128xf32>
    %990 = arith.addf %981, %989 : vector<8x128xf32>
    %991 = vector.shape_cast %982 : vector<1x8x64xf32> to vector<8x64xf32>
    %992 = arith.truncf %991 : vector<8x64xf32> to vector<8x64xbf16>
    %c2848 = arith.constant 2848 : index
    %c0_595 = arith.constant 0 : index
    %993 = vector.load %arg2[%c2848, %c0_595] : memref<5472x128xbf16, #tpu.memory_space<vmem>>, vector<64x128xbf16>
    %cst_596 = arith.constant dense<0.000000e+00> : vector<8x128xf32>
    %994 = tpu.matmul %992, %993, %cst_596 {dimension_numbers = #tpu.dot_dimension_numbers<[1], [0], [0], [1], [0, 0, 1, 1], [], []>} : vector<8x64xbf16>, vector<64x128xbf16>, vector<8x128xf32> -> vector<8x128xf32>
    %995 = arith.addf %990, %994 : vector<8x128xf32>
    %c7_i32_597 = arith.constant 7 : i32
    %996 = tpu.dynamic_rotate %982 by %c7_i32_597 dim 1 : vector<1x8x64xf32>, i32 -> vector<1x8x64xf32>
    %cst_598 = arith.constant 0.000000e+00 : f32
    %997 = vector.broadcast %cst_598 : f32 to vector<1x8x64xf32>
    %998 = arith.select %958, %996, %997 : vector<1x8x64xi1>, vector<1x8x64xf32>
    %999 = vector.shape_cast %998 : vector<1x8x64xf32> to vector<8x64xf32>
    %1000 = arith.truncf %999 : vector<8x64xf32> to vector<8x64xbf16>
    %c3040 = arith.constant 3040 : index
    %c0_599 = arith.constant 0 : index
    %1001 = vector.load %arg2[%c3040, %c0_599] : memref<5472x128xbf16, #tpu.memory_space<vmem>>, vector<64x128xbf16>
    %cst_600 = arith.constant dense<0.000000e+00> : vector<8x128xf32>
    %1002 = tpu.matmul %1000, %1001, %cst_600 {dimension_numbers = #tpu.dot_dimension_numbers<[1], [0], [0], [1], [0, 0, 1, 1], [], []>} : vector<8x64xbf16>, vector<64x128xbf16>, vector<8x128xf32> -> vector<8x128xf32>
    %1003 = arith.addf %995, %1002 : vector<8x128xf32>
    %c2_601 = arith.constant 2 : index
    %c0_602 = arith.constant 0 : index
    %c0_603 = arith.constant 0 : index
    %1004 = vector.load %arg5[%c2_601, %c0_602, %c0_603] : memref<18x8x128xf32, #tpu.memory_space<vmem>>, vector<1x8x64xf32>
    %c1_i32_604 = arith.constant 1 : i32
    %1005 = tpu.dynamic_rotate %1004 by %c1_i32_604 dim 1 : vector<1x8x64xf32>, i32 -> vector<1x8x64xf32>
    %cst_605 = arith.constant 0.000000e+00 : f32
    %1006 = vector.broadcast %cst_605 : f32 to vector<1x8x64xf32>
    %1007 = arith.select %956, %1005, %1006 : vector<1x8x64xi1>, vector<1x8x64xf32>
    %1008 = vector.shape_cast %1007 : vector<1x8x64xf32> to vector<8x64xf32>
    %1009 = arith.truncf %1008 : vector<8x64xf32> to vector<8x64xbf16>
    %c2720 = arith.constant 2720 : index
    %c0_606 = arith.constant 0 : index
    %1010 = vector.load %arg2[%c2720, %c0_606] : memref<5472x128xbf16, #tpu.memory_space<vmem>>, vector<64x128xbf16>
    %cst_607 = arith.constant dense<0.000000e+00> : vector<8x128xf32>
    %1011 = tpu.matmul %1009, %1010, %cst_607 {dimension_numbers = #tpu.dot_dimension_numbers<[1], [0], [0], [1], [0, 0, 1, 1], [], []>} : vector<8x64xbf16>, vector<64x128xbf16>, vector<8x128xf32> -> vector<8x128xf32>
    %1012 = arith.addf %1003, %1011 : vector<8x128xf32>
    %1013 = vector.shape_cast %1004 : vector<1x8x64xf32> to vector<8x64xf32>
    %1014 = arith.truncf %1013 : vector<8x64xf32> to vector<8x64xbf16>
    %c2912 = arith.constant 2912 : index
    %c0_608 = arith.constant 0 : index
    %1015 = vector.load %arg2[%c2912, %c0_608] : memref<5472x128xbf16, #tpu.memory_space<vmem>>, vector<64x128xbf16>
    %cst_609 = arith.constant dense<0.000000e+00> : vector<8x128xf32>
    %1016 = tpu.matmul %1014, %1015, %cst_609 {dimension_numbers = #tpu.dot_dimension_numbers<[1], [0], [0], [1], [0, 0, 1, 1], [], []>} : vector<8x64xbf16>, vector<64x128xbf16>, vector<8x128xf32> -> vector<8x128xf32>
    %1017 = arith.addf %1012, %1016 : vector<8x128xf32>
    %c7_i32_610 = arith.constant 7 : i32
    %1018 = tpu.dynamic_rotate %1004 by %c7_i32_610 dim 1 : vector<1x8x64xf32>, i32 -> vector<1x8x64xf32>
    %cst_611 = arith.constant 0.000000e+00 : f32
    %1019 = vector.broadcast %cst_611 : f32 to vector<1x8x64xf32>
    %1020 = arith.select %958, %1018, %1019 : vector<1x8x64xi1>, vector<1x8x64xf32>
    %1021 = vector.shape_cast %1020 : vector<1x8x64xf32> to vector<8x64xf32>
    %1022 = arith.truncf %1021 : vector<8x64xf32> to vector<8x64xbf16>
    %c3104 = arith.constant 3104 : index
    %c0_612 = arith.constant 0 : index
    %1023 = vector.load %arg2[%c3104, %c0_612] : memref<5472x128xbf16, #tpu.memory_space<vmem>>, vector<64x128xbf16>
    %cst_613 = arith.constant dense<0.000000e+00> : vector<8x128xf32>
    %1024 = tpu.matmul %1022, %1023, %cst_613 {dimension_numbers = #tpu.dot_dimension_numbers<[1], [0], [0], [1], [0, 0, 1, 1], [], []>} : vector<8x64xbf16>, vector<64x128xbf16>, vector<8x128xf32> -> vector<8x128xf32>
    %1025 = arith.addf %1017, %1024 : vector<8x128xf32>
    %cst_614 = arith.constant dense<0.000000e+00> : vector<128xf32>
    %1026 = vector.multi_reduction <add>, %1025, %cst_614 [0] : vector<8x128xf32> to vector<128xf32>
    %1027 = vector.shape_cast %1026 : vector<128xf32> to vector<1x128xf32>
    %cst_615 = arith.constant 1.250000e-01 : f32
    %1028 = vector.broadcast %cst_615 : f32 to vector<1x128xf32>
    %1029 = arith.mulf %1027, %1028 : vector<1x128xf32>
    %1030 = arith.mulf %1025, %1025 : vector<8x128xf32>
    %cst_616 = arith.constant dense<0.000000e+00> : vector<128xf32>
    %1031 = vector.multi_reduction <add>, %1030, %cst_616 [0] : vector<8x128xf32> to vector<128xf32>
    %1032 = vector.shape_cast %1031 : vector<128xf32> to vector<1x128xf32>
    %cst_617 = arith.constant 1.250000e-01 : f32
    %1033 = vector.broadcast %cst_617 : f32 to vector<1x128xf32>
    %1034 = arith.mulf %1032, %1033 : vector<1x128xf32>
    %1035 = arith.mulf %1029, %1029 : vector<1x128xf32>
    %1036 = arith.subf %1034, %1035 : vector<1x128xf32>
    %c0_618 = arith.constant 0 : index
    %c1152_619 = arith.constant 1152 : index
    %1037 = vector.load %arg3[%c0_618, %c1152_619] : memref<2x1536xf32, #tpu.memory_space<vmem>>, vector<1x128xf32>
    %c1_620 = arith.constant 1 : index
    %c1152_621 = arith.constant 1152 : index
    %1038 = vector.load %arg3[%c1_620, %c1152_621] : memref<2x1536xf32, #tpu.memory_space<vmem>>, vector<1x128xf32>
    %cst_622 = arith.constant 9.99999974E-6 : f32
    %1039 = vector.broadcast %cst_622 : f32 to vector<1x128xf32>
    %1040 = arith.addf %1036, %1039 : vector<1x128xf32>
    %1041 = math.rsqrt %1040 : vector<1x128xf32>
    %1042 = arith.mulf %1037, %1041 : vector<1x128xf32>
    %1043 = vector.broadcast %1042 : vector<1x128xf32> to vector<8x128xf32>
    %1044 = arith.mulf %1025, %1043 : vector<8x128xf32>
    %1045 = arith.mulf %1029, %1042 : vector<1x128xf32>
    %1046 = arith.subf %1038, %1045 : vector<1x128xf32>
    %1047 = vector.broadcast %1046 : vector<1x128xf32> to vector<8x128xf32>
    %1048 = arith.addf %1044, %1047 : vector<8x128xf32>
    %cst_623 = arith.constant 0.000000e+00 : f32
    %1049 = vector.broadcast %cst_623 : f32 to vector<8x128xf32>
    %1050 = arith.cmpf oge, %1048, %1049 : vector<8x128xf32>
    %cst_624 = arith.constant 3.000000e-01 : f32
    %1051 = vector.broadcast %cst_624 : f32 to vector<8x128xf32>
    %1052 = arith.mulf %1051, %1048 : vector<8x128xf32>
    %1053 = arith.select %1050, %1048, %1052 : vector<8x128xi1>, vector<8x128xf32>
    %1054 = vector.shape_cast %1053 : vector<8x128xf32> to vector<1x8x128xf32>
    %cst_625 = arith.constant 0.000000e+00 : f32
    %1055 = vector.broadcast %cst_625 : f32 to vector<1x8x128xf32>
    %c0_626 = arith.constant 0 : index
    %c0_627 = arith.constant 0 : index
    %c0_628 = arith.constant 0 : index
    %1056 = vector.load %arg5[%c0_626, %c0_627, %c0_628] : memref<18x8x128xf32, #tpu.memory_space<vmem>>, vector<1x8x128xf32>
    tpu.vector_store %arg5[%c0_626, %c0_627, %c0_628], %1055 {strides = array<i32>} : memref<18x8x128xf32, #tpu.memory_space<vmem>>, vector<1x8x128xf32>,
    %c2_629 = arith.constant 2 : index
    %c0_630 = arith.constant 0 : index
    %c0_631 = arith.constant 0 : index
    %1057 = vector.load %arg5[%c2_629, %c0_630, %c0_631] : memref<18x8x128xf32, #tpu.memory_space<vmem>>, vector<1x8x128xf32>
    tpu.vector_store %arg5[%c2_629, %c0_630, %c0_631], %1055 {strides = array<i32>} : memref<18x8x128xf32, #tpu.memory_space<vmem>>, vector<1x8x128xf32>,
    %c1_632 = arith.constant 1 : index
    %c0_633 = arith.constant 0 : index
    %c0_634 = arith.constant 0 : index
    %1058 = vector.load %arg5[%c1_632, %c0_633, %c0_634] : memref<18x8x128xf32, #tpu.memory_space<vmem>>, vector<1x8x128xf32>
    tpu.vector_store %arg5[%c1_632, %c0_633, %c0_634], %1054 {strides = array<i32>} : memref<18x8x128xf32, #tpu.memory_space<vmem>>, vector<1x8x128xf32>,
    %1059 = tpu.iota {dimensions = array<i32: 1>} : vector<1x8x128xi32>
    %c0_i32_635 = arith.constant 0 : i32
    %1060 = vector.broadcast %c0_i32_635 : i32 to vector<1x8x128xi32>
    %1061 = arith.cmpi sgt, %1059, %1060 : vector<1x8x128xi32>
    %c7_i32_636 = arith.constant 7 : i32
    %1062 = vector.broadcast %c7_i32_636 : i32 to vector<1x8x128xi32>
    %1063 = arith.cmpi slt, %1059, %1062 : vector<1x8x128xi32>
    %cst_637 = arith.constant 0.000000e+00 : f32
    %1064 = vector.broadcast %cst_637 : f32 to vector<8x128xf32>
    %c0_638 = arith.constant 0 : index
    %c0_639 = arith.constant 0 : index
    %c0_640 = arith.constant 0 : index
    %1065 = vector.load %arg5[%c0_638, %c0_639, %c0_640] : memref<18x8x128xf32, #tpu.memory_space<vmem>>, vector<1x8x128xf32>
    %c1_i32_641 = arith.constant 1 : i32
    %1066 = tpu.dynamic_rotate %1065 by %c1_i32_641 dim 1 : vector<1x8x128xf32>, i32 -> vector<1x8x128xf32>
    %cst_642 = arith.constant 0.000000e+00 : f32
    %1067 = vector.broadcast %cst_642 : f32 to vector<1x8x128xf32>
    %1068 = arith.select %1061, %1066, %1067 : vector<1x8x128xi1>, vector<1x8x128xf32>
    %1069 = vector.shape_cast %1068 : vector<1x8x128xf32> to vector<8x128xf32>
    %1070 = arith.truncf %1069 : vector<8x128xf32> to vector<8x128xbf16>
    %c3168 = arith.constant 3168 : index
    %c0_643 = arith.constant 0 : index
    %1071 = vector.load %arg2[%c3168, %c0_643] : memref<5472x128xbf16, #tpu.memory_space<vmem>>, vector<128x128xbf16>
    %cst_644 = arith.constant dense<0.000000e+00> : vector<8x128xf32>
    %1072 = tpu.matmul %1070, %1071, %cst_644 {dimension_numbers = #tpu.dot_dimension_numbers<[1], [0], [0], [1], [0, 0, 1, 1], [], []>} : vector<8x128xbf16>, vector<128x128xbf16>, vector<8x128xf32> -> vector<8x128xf32>
    %1073 = arith.addf %1064, %1072 : vector<8x128xf32>
    %1074 = vector.shape_cast %1065 : vector<1x8x128xf32> to vector<8x128xf32>
    %1075 = arith.truncf %1074 : vector<8x128xf32> to vector<8x128xbf16>
    %c3552 = arith.constant 3552 : index
    %c0_645 = arith.constant 0 : index
    %1076 = vector.load %arg2[%c3552, %c0_645] : memref<5472x128xbf16, #tpu.memory_space<vmem>>, vector<128x128xbf16>
    %cst_646 = arith.constant dense<0.000000e+00> : vector<8x128xf32>
    %1077 = tpu.matmul %1075, %1076, %cst_646 {dimension_numbers = #tpu.dot_dimension_numbers<[1], [0], [0], [1], [0, 0, 1, 1], [], []>} : vector<8x128xbf16>, vector<128x128xbf16>, vector<8x128xf32> -> vector<8x128xf32>
    %1078 = arith.addf %1073, %1077 : vector<8x128xf32>
    %c7_i32_647 = arith.constant 7 : i32
    %1079 = tpu.dynamic_rotate %1065 by %c7_i32_647 dim 1 : vector<1x8x128xf32>, i32 -> vector<1x8x128xf32>
    %cst_648 = arith.constant 0.000000e+00 : f32
    %1080 = vector.broadcast %cst_648 : f32 to vector<1x8x128xf32>
    %1081 = arith.select %1063, %1079, %1080 : vector<1x8x128xi1>, vector<1x8x128xf32>
    %1082 = vector.shape_cast %1081 : vector<1x8x128xf32> to vector<8x128xf32>
    %1083 = arith.truncf %1082 : vector<8x128xf32> to vector<8x128xbf16>
    %c3936 = arith.constant 3936 : index
    %c0_649 = arith.constant 0 : index
    %1084 = vector.load %arg2[%c3936, %c0_649] : memref<5472x128xbf16, #tpu.memory_space<vmem>>, vector<128x128xbf16>
    %cst_650 = arith.constant dense<0.000000e+00> : vector<8x128xf32>
    %1085 = tpu.matmul %1083, %1084, %cst_650 {dimension_numbers = #tpu.dot_dimension_numbers<[1], [0], [0], [1], [0, 0, 1, 1], [], []>} : vector<8x128xbf16>, vector<128x128xbf16>, vector<8x128xf32> -> vector<8x128xf32>
    %1086 = arith.addf %1078, %1085 : vector<8x128xf32>
    %c1_651 = arith.constant 1 : index
    %c0_652 = arith.constant 0 : index
    %c0_653 = arith.constant 0 : index
    %1087 = vector.load %arg5[%c1_651, %c0_652, %c0_653] : memref<18x8x128xf32, #tpu.memory_space<vmem>>, vector<1x8x128xf32>
    %c1_i32_654 = arith.constant 1 : i32
    %1088 = tpu.dynamic_rotate %1087 by %c1_i32_654 dim 1 : vector<1x8x128xf32>, i32 -> vector<1x8x128xf32>
    %cst_655 = arith.constant 0.000000e+00 : f32
    %1089 = vector.broadcast %cst_655 : f32 to vector<1x8x128xf32>
    %1090 = arith.select %1061, %1088, %1089 : vector<1x8x128xi1>, vector<1x8x128xf32>
    %1091 = vector.shape_cast %1090 : vector<1x8x128xf32> to vector<8x128xf32>
    %1092 = arith.truncf %1091 : vector<8x128xf32> to vector<8x128xbf16>
    %c3296 = arith.constant 3296 : index
    %c0_656 = arith.constant 0 : index
    %1093 = vector.load %arg2[%c3296, %c0_656] : memref<5472x128xbf16, #tpu.memory_space<vmem>>, vector<128x128xbf16>
    %cst_657 = arith.constant dense<0.000000e+00> : vector<8x128xf32>
    %1094 = tpu.matmul %1092, %1093, %cst_657 {dimension_numbers = #tpu.dot_dimension_numbers<[1], [0], [0], [1], [0, 0, 1, 1], [], []>} : vector<8x128xbf16>, vector<128x128xbf16>, vector<8x128xf32> -> vector<8x128xf32>
    %1095 = arith.addf %1086, %1094 : vector<8x128xf32>
    %1096 = vector.shape_cast %1087 : vector<1x8x128xf32> to vector<8x128xf32>
    %1097 = arith.truncf %1096 : vector<8x128xf32> to vector<8x128xbf16>
    %c3680 = arith.constant 3680 : index
    %c0_658 = arith.constant 0 : index
    %1098 = vector.load %arg2[%c3680, %c0_658] : memref<5472x128xbf16, #tpu.memory_space<vmem>>, vector<128x128xbf16>
    %cst_659 = arith.constant dense<0.000000e+00> : vector<8x128xf32>
    %1099 = tpu.matmul %1097, %1098, %cst_659 {dimension_numbers = #tpu.dot_dimension_numbers<[1], [0], [0], [1], [0, 0, 1, 1], [], []>} : vector<8x128xbf16>, vector<128x128xbf16>, vector<8x128xf32> -> vector<8x128xf32>
    %1100 = arith.addf %1095, %1099 : vector<8x128xf32>
    %c7_i32_660 = arith.constant 7 : i32
    %1101 = tpu.dynamic_rotate %1087 by %c7_i32_660 dim 1 : vector<1x8x128xf32>, i32 -> vector<1x8x128xf32>
    %cst_661 = arith.constant 0.000000e+00 : f32
    %1102 = vector.broadcast %cst_661 : f32 to vector<1x8x128xf32>
    %1103 = arith.select %1063, %1101, %1102 : vector<1x8x128xi1>, vector<1x8x128xf32>
    %1104 = vector.shape_cast %1103 : vector<1x8x128xf32> to vector<8x128xf32>
    %1105 = arith.truncf %1104 : vector<8x128xf32> to vector<8x128xbf16>
    %c4064 = arith.constant 4064 : index
    %c0_662 = arith.constant 0 : index
    %1106 = vector.load %arg2[%c4064, %c0_662] : memref<5472x128xbf16, #tpu.memory_space<vmem>>, vector<128x128xbf16>
    %cst_663 = arith.constant dense<0.000000e+00> : vector<8x128xf32>
    %1107 = tpu.matmul %1105, %1106, %cst_663 {dimension_numbers = #tpu.dot_dimension_numbers<[1], [0], [0], [1], [0, 0, 1, 1], [], []>} : vector<8x128xbf16>, vector<128x128xbf16>, vector<8x128xf32> -> vector<8x128xf32>
    %1108 = arith.addf %1100, %1107 : vector<8x128xf32>
    %c2_664 = arith.constant 2 : index
    %c0_665 = arith.constant 0 : index
    %c0_666 = arith.constant 0 : index
    %1109 = vector.load %arg5[%c2_664, %c0_665, %c0_666] : memref<18x8x128xf32, #tpu.memory_space<vmem>>, vector<1x8x128xf32>
    %c1_i32_667 = arith.constant 1 : i32
    %1110 = tpu.dynamic_rotate %1109 by %c1_i32_667 dim 1 : vector<1x8x128xf32>, i32 -> vector<1x8x128xf32>
    %cst_668 = arith.constant 0.000000e+00 : f32
    %1111 = vector.broadcast %cst_668 : f32 to vector<1x8x128xf32>
    %1112 = arith.select %1061, %1110, %1111 : vector<1x8x128xi1>, vector<1x8x128xf32>
    %1113 = vector.shape_cast %1112 : vector<1x8x128xf32> to vector<8x128xf32>
    %1114 = arith.truncf %1113 : vector<8x128xf32> to vector<8x128xbf16>
    %c3424 = arith.constant 3424 : index
    %c0_669 = arith.constant 0 : index
    %1115 = vector.load %arg2[%c3424, %c0_669] : memref<5472x128xbf16, #tpu.memory_space<vmem>>, vector<128x128xbf16>
    %cst_670 = arith.constant dense<0.000000e+00> : vector<8x128xf32>
    %1116 = tpu.matmul %1114, %1115, %cst_670 {dimension_numbers = #tpu.dot_dimension_numbers<[1], [0], [0], [1], [0, 0, 1, 1], [], []>} : vector<8x128xbf16>, vector<128x128xbf16>, vector<8x128xf32> -> vector<8x128xf32>
    %1117 = arith.addf %1108, %1116 : vector<8x128xf32>
    %1118 = vector.shape_cast %1109 : vector<1x8x128xf32> to vector<8x128xf32>
    %1119 = arith.truncf %1118 : vector<8x128xf32> to vector<8x128xbf16>
    %c3808 = arith.constant 3808 : index
    %c0_671 = arith.constant 0 : index
    %1120 = vector.load %arg2[%c3808, %c0_671] : memref<5472x128xbf16, #tpu.memory_space<vmem>>, vector<128x128xbf16>
    %cst_672 = arith.constant dense<0.000000e+00> : vector<8x128xf32>
    %1121 = tpu.matmul %1119, %1120, %cst_672 {dimension_numbers = #tpu.dot_dimension_numbers<[1], [0], [0], [1], [0, 0, 1, 1], [], []>} : vector<8x128xbf16>, vector<128x128xbf16>, vector<8x128xf32> -> vector<8x128xf32>
    %1122 = arith.addf %1117, %1121 : vector<8x128xf32>
    %c7_i32_673 = arith.constant 7 : i32
    %1123 = tpu.dynamic_rotate %1109 by %c7_i32_673 dim 1 : vector<1x8x128xf32>, i32 -> vector<1x8x128xf32>
    %cst_674 = arith.constant 0.000000e+00 : f32
    %1124 = vector.broadcast %cst_674 : f32 to vector<1x8x128xf32>
    %1125 = arith.select %1063, %1123, %1124 : vector<1x8x128xi1>, vector<1x8x128xf32>
    %1126 = vector.shape_cast %1125 : vector<1x8x128xf32> to vector<8x128xf32>
    %1127 = arith.truncf %1126 : vector<8x128xf32> to vector<8x128xbf16>
    %c4192 = arith.constant 4192 : index
    %c0_675 = arith.constant 0 : index
    %1128 = vector.load %arg2[%c4192, %c0_675] : memref<5472x128xbf16, #tpu.memory_space<vmem>>, vector<128x128xbf16>
    %cst_676 = arith.constant dense<0.000000e+00> : vector<8x128xf32>
    %1129 = tpu.matmul %1127, %1128, %cst_676 {dimension_numbers = #tpu.dot_dimension_numbers<[1], [0], [0], [1], [0, 0, 1, 1], [], []>} : vector<8x128xbf16>, vector<128x128xbf16>, vector<8x128xf32> -> vector<8x128xf32>
    %1130 = arith.addf %1122, %1129 : vector<8x128xf32>
    %cst_677 = arith.constant dense<0.000000e+00> : vector<128xf32>
    %1131 = vector.multi_reduction <add>, %1130, %cst_677 [0] : vector<8x128xf32> to vector<128xf32>
    %1132 = vector.shape_cast %1131 : vector<128xf32> to vector<1x128xf32>
    %cst_678 = arith.constant 1.250000e-01 : f32
    %1133 = vector.broadcast %cst_678 : f32 to vector<1x128xf32>
    %1134 = arith.mulf %1132, %1133 : vector<1x128xf32>
    %1135 = arith.mulf %1130, %1130 : vector<8x128xf32>
    %cst_679 = arith.constant dense<0.000000e+00> : vector<128xf32>
    %1136 = vector.multi_reduction <add>, %1135, %cst_679 [0] : vector<8x128xf32> to vector<128xf32>
    %1137 = vector.shape_cast %1136 : vector<128xf32> to vector<1x128xf32>
    %cst_680 = arith.constant 1.250000e-01 : f32
    %1138 = vector.broadcast %cst_680 : f32 to vector<1x128xf32>
    %1139 = arith.mulf %1137, %1138 : vector<1x128xf32>
    %1140 = arith.mulf %1134, %1134 : vector<1x128xf32>
    %1141 = arith.subf %1139, %1140 : vector<1x128xf32>
    %c0_681 = arith.constant 0 : index
    %c1280_682 = arith.constant 1280 : index
    %1142 = vector.load %arg3[%c0_681, %c1280_682] : memref<2x1536xf32, #tpu.memory_space<vmem>>, vector<1x128xf32>
    %c1_683 = arith.constant 1 : index
    %c1280_684 = arith.constant 1280 : index
    %1143 = vector.load %arg3[%c1_683, %c1280_684] : memref<2x1536xf32, #tpu.memory_space<vmem>>, vector<1x128xf32>
    %cst_685 = arith.constant 9.99999974E-6 : f32
    %1144 = vector.broadcast %cst_685 : f32 to vector<1x128xf32>
    %1145 = arith.addf %1141, %1144 : vector<1x128xf32>
    %1146 = math.rsqrt %1145 : vector<1x128xf32>
    %1147 = arith.mulf %1142, %1146 : vector<1x128xf32>
    %1148 = vector.broadcast %1147 : vector<1x128xf32> to vector<8x128xf32>
    %1149 = arith.mulf %1130, %1148 : vector<8x128xf32>
    %1150 = arith.mulf %1134, %1147 : vector<1x128xf32>
    %1151 = arith.subf %1143, %1150 : vector<1x128xf32>
    %1152 = vector.broadcast %1151 : vector<1x128xf32> to vector<8x128xf32>
    %1153 = arith.addf %1149, %1152 : vector<8x128xf32>
    %cst_686 = arith.constant 0.000000e+00 : f32
    %1154 = vector.broadcast %cst_686 : f32 to vector<8x128xf32>
    %1155 = arith.cmpf oge, %1153, %1154 : vector<8x128xf32>
    %cst_687 = arith.constant 3.000000e-01 : f32
    %1156 = vector.broadcast %cst_687 : f32 to vector<8x128xf32>
    %1157 = arith.mulf %1156, %1153 : vector<8x128xf32>
    %1158 = arith.select %1155, %1153, %1157 : vector<8x128xi1>, vector<8x128xf32>
    %1159 = vector.shape_cast %1158 : vector<8x128xf32> to vector<1x8x128xf32>
    %1160 = arith.addf %1159, %1054 : vector<1x8x128xf32>
    %cst_688 = arith.constant 0.000000e+00 : f32
    %1161 = vector.broadcast %cst_688 : f32 to vector<1x8x128xf32>
    %c0_689 = arith.constant 0 : index
    %c0_690 = arith.constant 0 : index
    %c0_691 = arith.constant 0 : index
    %1162 = vector.load %arg5[%c0_689, %c0_690, %c0_691] : memref<18x8x128xf32, #tpu.memory_space<vmem>>, vector<1x8x128xf32>
    tpu.vector_store %arg5[%c0_689, %c0_690, %c0_691], %1161 {strides = array<i32>} : memref<18x8x128xf32, #tpu.memory_space<vmem>>, vector<1x8x128xf32>,
    %c2_692 = arith.constant 2 : index
    %c0_693 = arith.constant 0 : index
    %c0_694 = arith.constant 0 : index
    %1163 = vector.load %arg5[%c2_692, %c0_693, %c0_694] : memref<18x8x128xf32, #tpu.memory_space<vmem>>, vector<1x8x128xf32>
    tpu.vector_store %arg5[%c2_692, %c0_693, %c0_694], %1161 {strides = array<i32>} : memref<18x8x128xf32, #tpu.memory_space<vmem>>, vector<1x8x128xf32>,
    %c1_695 = arith.constant 1 : index
    %c0_696 = arith.constant 0 : index
    %c0_697 = arith.constant 0 : index
    %1164 = vector.load %arg5[%c1_695, %c0_696, %c0_697] : memref<18x8x128xf32, #tpu.memory_space<vmem>>, vector<1x8x128xf32>
    tpu.vector_store %arg5[%c1_695, %c0_696, %c0_697], %1160 {strides = array<i32>} : memref<18x8x128xf32, #tpu.memory_space<vmem>>, vector<1x8x128xf32>,
    %1165 = tpu.iota {dimensions = array<i32: 1>} : vector<1x8x128xi32>
    %c0_i32_698 = arith.constant 0 : i32
    %1166 = vector.broadcast %c0_i32_698 : i32 to vector<1x8x128xi32>
    %1167 = arith.cmpi sgt, %1165, %1166 : vector<1x8x128xi32>
    %c7_i32_699 = arith.constant 7 : i32
    %1168 = vector.broadcast %c7_i32_699 : i32 to vector<1x8x128xi32>
    %1169 = arith.cmpi slt, %1165, %1168 : vector<1x8x128xi32>
    %cst_700 = arith.constant 0.000000e+00 : f32
    %1170 = vector.broadcast %cst_700 : f32 to vector<8x128xf32>
    %c0_701 = arith.constant 0 : index
    %c0_702 = arith.constant 0 : index
    %c0_703 = arith.constant 0 : index
    %1171 = tpu.strided_load %arg5[%c0_701, %c0_702, %c0_703] {strides = array<i32: 3, 1, 1>} : memref<18x8x128xf32, #tpu.memory_space<vmem>>, vector<1x8x128xf32>
    %c1_i32_704 = arith.constant 1 : i32
    %1172 = tpu.dynamic_rotate %1171 by %c1_i32_704 dim 1 : vector<1x8x128xf32>, i32 -> vector<1x8x128xf32>
    %cst_705 = arith.constant 0.000000e+00 : f32
    %1173 = vector.broadcast %cst_705 : f32 to vector<1x8x128xf32>
    %1174 = arith.select %1167, %1172, %1173 : vector<1x8x128xi1>, vector<1x8x128xf32>
    %1175 = vector.shape_cast %1174 : vector<1x8x128xf32> to vector<8x128xf32>
    %1176 = arith.truncf %1175 : vector<8x128xf32> to vector<8x128xbf16>
    %c4320 = arith.constant 4320 : index
    %c0_706 = arith.constant 0 : index
    %1177 = vector.load %arg2[%c4320, %c0_706] : memref<5472x128xbf16, #tpu.memory_space<vmem>>, vector<128x128xbf16>
    %cst_707 = arith.constant dense<0.000000e+00> : vector<8x128xf32>
    %1178 = tpu.matmul %1176, %1177, %cst_707 {dimension_numbers = #tpu.dot_dimension_numbers<[1], [0], [0], [1], [0, 0, 1, 1], [], []>} : vector<8x128xbf16>, vector<128x128xbf16>, vector<8x128xf32> -> vector<8x128xf32>
    %1179 = arith.addf %1170, %1178 : vector<8x128xf32>
    %1180 = vector.shape_cast %1171 : vector<1x8x128xf32> to vector<8x128xf32>
    %1181 = arith.truncf %1180 : vector<8x128xf32> to vector<8x128xbf16>
    %c4704 = arith.constant 4704 : index
    %c0_708 = arith.constant 0 : index
    %1182 = vector.load %arg2[%c4704, %c0_708] : memref<5472x128xbf16, #tpu.memory_space<vmem>>, vector<128x128xbf16>
    %cst_709 = arith.constant dense<0.000000e+00> : vector<8x128xf32>
    %1183 = tpu.matmul %1181, %1182, %cst_709 {dimension_numbers = #tpu.dot_dimension_numbers<[1], [0], [0], [1], [0, 0, 1, 1], [], []>} : vector<8x128xbf16>, vector<128x128xbf16>, vector<8x128xf32> -> vector<8x128xf32>
    %1184 = arith.addf %1179, %1183 : vector<8x128xf32>
    %c7_i32_710 = arith.constant 7 : i32
    %1185 = tpu.dynamic_rotate %1171 by %c7_i32_710 dim 1 : vector<1x8x128xf32>, i32 -> vector<1x8x128xf32>
    %cst_711 = arith.constant 0.000000e+00 : f32
    %1186 = vector.broadcast %cst_711 : f32 to vector<1x8x128xf32>
    %1187 = arith.select %1169, %1185, %1186 : vector<1x8x128xi1>, vector<1x8x128xf32>
    %1188 = vector.shape_cast %1187 : vector<1x8x128xf32> to vector<8x128xf32>
    %1189 = arith.truncf %1188 : vector<8x128xf32> to vector<8x128xbf16>
    %c5088 = arith.constant 5088 : index
    %c0_712 = arith.constant 0 : index
    %1190 = vector.load %arg2[%c5088, %c0_712] : memref<5472x128xbf16, #tpu.memory_space<vmem>>, vector<128x128xbf16>
    %cst_713 = arith.constant dense<0.000000e+00> : vector<8x128xf32>
    %1191 = tpu.matmul %1189, %1190, %cst_713 {dimension_numbers = #tpu.dot_dimension_numbers<[1], [0], [0], [1], [0, 0, 1, 1], [], []>} : vector<8x128xbf16>, vector<128x128xbf16>, vector<8x128xf32> -> vector<8x128xf32>
    %1192 = arith.addf %1184, %1191 : vector<8x128xf32>
    %c1_714 = arith.constant 1 : index
    %c0_715 = arith.constant 0 : index
    %c0_716 = arith.constant 0 : index
    %1193 = tpu.strided_load %arg5[%c1_714, %c0_715, %c0_716] {strides = array<i32: 3, 1, 1>} : memref<18x8x128xf32, #tpu.memory_space<vmem>>, vector<1x8x128xf32>
    %c1_i32_717 = arith.constant 1 : i32
    %1194 = tpu.dynamic_rotate %1193 by %c1_i32_717 dim 1 : vector<1x8x128xf32>, i32 -> vector<1x8x128xf32>
    %cst_718 = arith.constant 0.000000e+00 : f32
    %1195 = vector.broadcast %cst_718 : f32 to vector<1x8x128xf32>
    %1196 = arith.select %1167, %1194, %1195 : vector<1x8x128xi1>, vector<1x8x128xf32>
    %1197 = vector.shape_cast %1196 : vector<1x8x128xf32> to vector<8x128xf32>
    %1198 = arith.truncf %1197 : vector<8x128xf32> to vector<8x128xbf16>
    %c4448 = arith.constant 4448 : index
    %c0_719 = arith.constant 0 : index
    %1199 = vector.load %arg2[%c4448, %c0_719] : memref<5472x128xbf16, #tpu.memory_space<vmem>>, vector<128x128xbf16>
    %cst_720 = arith.constant dense<0.000000e+00> : vector<8x128xf32>
    %1200 = tpu.matmul %1198, %1199, %cst_720 {dimension_numbers = #tpu.dot_dimension_numbers<[1], [0], [0], [1], [0, 0, 1, 1], [], []>} : vector<8x128xbf16>, vector<128x128xbf16>, vector<8x128xf32> -> vector<8x128xf32>
    %1201 = arith.addf %1192, %1200 : vector<8x128xf32>
    %1202 = vector.shape_cast %1193 : vector<1x8x128xf32> to vector<8x128xf32>
    %1203 = arith.truncf %1202 : vector<8x128xf32> to vector<8x128xbf16>
    %c4832 = arith.constant 4832 : index
    %c0_721 = arith.constant 0 : index
    %1204 = vector.load %arg2[%c4832, %c0_721] : memref<5472x128xbf16, #tpu.memory_space<vmem>>, vector<128x128xbf16>
    %cst_722 = arith.constant dense<0.000000e+00> : vector<8x128xf32>
    %1205 = tpu.matmul %1203, %1204, %cst_722 {dimension_numbers = #tpu.dot_dimension_numbers<[1], [0], [0], [1], [0, 0, 1, 1], [], []>} : vector<8x128xbf16>, vector<128x128xbf16>, vector<8x128xf32> -> vector<8x128xf32>
    %1206 = arith.addf %1201, %1205 : vector<8x128xf32>
    %c7_i32_723 = arith.constant 7 : i32
    %1207 = tpu.dynamic_rotate %1193 by %c7_i32_723 dim 1 : vector<1x8x128xf32>, i32 -> vector<1x8x128xf32>
    %cst_724 = arith.constant 0.000000e+00 : f32
    %1208 = vector.broadcast %cst_724 : f32 to vector<1x8x128xf32>
    %1209 = arith.select %1169, %1207, %1208 : vector<1x8x128xi1>, vector<1x8x128xf32>
    %1210 = vector.shape_cast %1209 : vector<1x8x128xf32> to vector<8x128xf32>
    %1211 = arith.truncf %1210 : vector<8x128xf32> to vector<8x128xbf16>
    %c5216 = arith.constant 5216 : index
    %c0_725 = arith.constant 0 : index
    %1212 = vector.load %arg2[%c5216, %c0_725] : memref<5472x128xbf16, #tpu.memory_space<vmem>>, vector<128x128xbf16>
    %cst_726 = arith.constant dense<0.000000e+00> : vector<8x128xf32>
    %1213 = tpu.matmul %1211, %1212, %cst_726 {dimension_numbers = #tpu.dot_dimension_numbers<[1], [0], [0], [1], [0, 0, 1, 1], [], []>} : vector<8x128xbf16>, vector<128x128xbf16>, vector<8x128xf32> -> vector<8x128xf32>
    %1214 = arith.addf %1206, %1213 : vector<8x128xf32>
    %c2_727 = arith.constant 2 : index
    %c0_728 = arith.constant 0 : index
    %c0_729 = arith.constant 0 : index
    %1215 = tpu.strided_load %arg5[%c2_727, %c0_728, %c0_729] {strides = array<i32: 3, 1, 1>} : memref<18x8x128xf32, #tpu.memory_space<vmem>>, vector<1x8x128xf32>
    %c1_i32_730 = arith.constant 1 : i32
    %1216 = tpu.dynamic_rotate %1215 by %c1_i32_730 dim 1 : vector<1x8x128xf32>, i32 -> vector<1x8x128xf32>
    %cst_731 = arith.constant 0.000000e+00 : f32
    %1217 = vector.broadcast %cst_731 : f32 to vector<1x8x128xf32>
    %1218 = arith.select %1167, %1216, %1217 : vector<1x8x128xi1>, vector<1x8x128xf32>
    %1219 = vector.shape_cast %1218 : vector<1x8x128xf32> to vector<8x128xf32>
    %1220 = arith.truncf %1219 : vector<8x128xf32> to vector<8x128xbf16>
    %c4576 = arith.constant 4576 : index
    %c0_732 = arith.constant 0 : index
    %1221 = vector.load %arg2[%c4576, %c0_732] : memref<5472x128xbf16, #tpu.memory_space<vmem>>, vector<128x128xbf16>
    %cst_733 = arith.constant dense<0.000000e+00> : vector<8x128xf32>
    %1222 = tpu.matmul %1220, %1221, %cst_733 {dimension_numbers = #tpu.dot_dimension_numbers<[1], [0], [0], [1], [0, 0, 1, 1], [], []>} : vector<8x128xbf16>, vector<128x128xbf16>, vector<8x128xf32> -> vector<8x128xf32>
    %1223 = arith.addf %1214, %1222 : vector<8x128xf32>
    %1224 = vector.shape_cast %1215 : vector<1x8x128xf32> to vector<8x128xf32>
    %1225 = arith.truncf %1224 : vector<8x128xf32> to vector<8x128xbf16>
    %c4960 = arith.constant 4960 : index
    %c0_734 = arith.constant 0 : index
    %1226 = vector.load %arg2[%c4960, %c0_734] : memref<5472x128xbf16, #tpu.memory_space<vmem>>, vector<128x128xbf16>
    %cst_735 = arith.constant dense<0.000000e+00> : vector<8x128xf32>
    %1227 = tpu.matmul %1225, %1226, %cst_735 {dimension_numbers = #tpu.dot_dimension_numbers<[1], [0], [0], [1], [0, 0, 1, 1], [], []>} : vector<8x128xbf16>, vector<128x128xbf16>, vector<8x128xf32> -> vector<8x128xf32>
    %1228 = arith.addf %1223, %1227 : vector<8x128xf32>
    %c7_i32_736 = arith.constant 7 : i32
    %1229 = tpu.dynamic_rotate %1215 by %c7_i32_736 dim 1 : vector<1x8x128xf32>, i32 -> vector<1x8x128xf32>
    %cst_737 = arith.constant 0.000000e+00 : f32
    %1230 = vector.broadcast %cst_737 : f32 to vector<1x8x128xf32>
    %1231 = arith.select %1169, %1229, %1230 : vector<1x8x128xi1>, vector<1x8x128xf32>
    %1232 = vector.shape_cast %1231 : vector<1x8x128xf32> to vector<8x128xf32>
    %1233 = arith.truncf %1232 : vector<8x128xf32> to vector<8x128xbf16>
    %c5344 = arith.constant 5344 : index
    %c0_738 = arith.constant 0 : index
    %1234 = vector.load %arg2[%c5344, %c0_738] : memref<5472x128xbf16, #tpu.memory_space<vmem>>, vector<128x128xbf16>
    %cst_739 = arith.constant dense<0.000000e+00> : vector<8x128xf32>
    %1235 = tpu.matmul %1233, %1234, %cst_739 {dimension_numbers = #tpu.dot_dimension_numbers<[1], [0], [0], [1], [0, 0, 1, 1], [], []>} : vector<8x128xbf16>, vector<128x128xbf16>, vector<8x128xf32> -> vector<8x128xf32>
    %1236 = arith.addf %1228, %1235 : vector<8x128xf32>
    %cst_740 = arith.constant dense<0.000000e+00> : vector<128xf32>
    %1237 = vector.multi_reduction <add>, %1236, %cst_740 [0] : vector<8x128xf32> to vector<128xf32>
    %1238 = vector.shape_cast %1237 : vector<128xf32> to vector<1x128xf32>
    %cst_741 = arith.constant 1.250000e-01 : f32
    %1239 = vector.broadcast %cst_741 : f32 to vector<1x128xf32>
    %1240 = arith.mulf %1238, %1239 : vector<1x128xf32>
    %1241 = arith.mulf %1236, %1236 : vector<8x128xf32>
    %cst_742 = arith.constant dense<0.000000e+00> : vector<128xf32>
    %1242 = vector.multi_reduction <add>, %1241, %cst_742 [0] : vector<8x128xf32> to vector<128xf32>
    %1243 = vector.shape_cast %1242 : vector<128xf32> to vector<1x128xf32>
    %cst_743 = arith.constant 1.250000e-01 : f32
    %1244 = vector.broadcast %cst_743 : f32 to vector<1x128xf32>
    %1245 = arith.mulf %1243, %1244 : vector<1x128xf32>
    %1246 = arith.mulf %1240, %1240 : vector<1x128xf32>
    %1247 = arith.subf %1245, %1246 : vector<1x128xf32>
    %c0_744 = arith.constant 0 : index
    %c1408_745 = arith.constant 1408 : index
    %1248 = vector.load %arg3[%c0_744, %c1408_745] : memref<2x1536xf32, #tpu.memory_space<vmem>>, vector<1x128xf32>
    %c1_746 = arith.constant 1 : index
    %c1408_747 = arith.constant 1408 : index
    %1249 = vector.load %arg3[%c1_746, %c1408_747] : memref<2x1536xf32, #tpu.memory_space<vmem>>, vector<1x128xf32>
    %cst_748 = arith.constant 9.99999974E-6 : f32
    %1250 = vector.broadcast %cst_748 : f32 to vector<1x128xf32>
    %1251 = arith.addf %1247, %1250 : vector<1x128xf32>
    %1252 = math.rsqrt %1251 : vector<1x128xf32>
    %1253 = arith.mulf %1248, %1252 : vector<1x128xf32>
    %1254 = vector.broadcast %1253 : vector<1x128xf32> to vector<8x128xf32>
    %1255 = arith.mulf %1236, %1254 : vector<8x128xf32>
    %1256 = arith.mulf %1240, %1253 : vector<1x128xf32>
    %1257 = arith.subf %1249, %1256 : vector<1x128xf32>
    %1258 = vector.broadcast %1257 : vector<1x128xf32> to vector<8x128xf32>
    %1259 = arith.addf %1255, %1258 : vector<8x128xf32>
    %cst_749 = arith.constant 0.000000e+00 : f32
    %1260 = vector.broadcast %cst_749 : f32 to vector<8x128xf32>
    %1261 = arith.cmpf oge, %1259, %1260 : vector<8x128xf32>
    %cst_750 = arith.constant 3.000000e-01 : f32
    %1262 = vector.broadcast %cst_750 : f32 to vector<8x128xf32>
    %1263 = arith.mulf %1262, %1259 : vector<8x128xf32>
    %1264 = arith.select %1261, %1259, %1263 : vector<8x128xi1>, vector<8x128xf32>
    %1265 = vector.shape_cast %1264 : vector<8x128xf32> to vector<1x8x128xf32>
    %c0_751 = arith.constant 0 : index
    %c0_752 = arith.constant 0 : index
    %c0_753 = arith.constant 0 : index
    %c0_754 = arith.constant 0 : index
    %1266 = vector.load %arg4[%c0_751, %c0_752, %c0_753, %c0_754] : memref<1x1x8x128xf32, #tpu.memory_space<vmem>>, vector<1x1x8x128xf32>
    %1267 = vector.shape_cast %1266 : vector<1x1x8x128xf32> to vector<1x8x128xf32>
    %1268 = vector.shape_cast %1265 : vector<1x8x128xf32> to vector<1x1x8x128xf32>
    tpu.vector_store %arg4[%c0_751, %c0_752, %c0_753, %c0_754], %1268 {strides = array<i32>} : memref<1x1x8x128xf32, #tpu.memory_space<vmem>>, vector<1x1x8x128xf32>,
    return
  }
  func.func @transform_0(%arg0: i32) -> (i32, i32, i32, i32) {
    %c0_i32 = arith.constant 0 : i32
    %c0_i32_0 = arith.constant 0 : i32
    %c0_i32_1 = arith.constant 0 : i32
    %c0_i32_2 = arith.constant 0 : i32
    return %arg0, %c0_i32, %c0_i32_0, %c0_i32_1 : i32, i32, i32, i32
  }
  func.func @transform_1(%arg0: i32) -> (i32, i32) {
    %c0_i32 = arith.constant 0 : i32
    %c0_i32_0 = arith.constant 0 : i32
    %c0_i32_1 = arith.constant 0 : i32
    return %c0_i32, %c0_i32_0 : i32, i32
  }
  func.func @transform_2(%arg0: i32) -> (i32, i32) {
    %c0_i32 = arith.constant 0 : i32
    %c0_i32_0 = arith.constant 0 : i32
    %c0_i32_1 = arith.constant 0 : i32
    return %c0_i32, %c0_i32_0 : i32, i32
  }
  func.func @transform_3(%arg0: i32) -> (i32, i32, i32, i32) {
    %c0_i32 = arith.constant 0 : i32
    %c0_i32_0 = arith.constant 0 : i32
    %c0_i32_1 = arith.constant 0 : i32
    %c0_i32_2 = arith.constant 0 : i32
    return %arg0, %c0_i32, %c0_i32_0, %c0_i32_1 : i32, i32, i32, i32
  }
}

</mosaic_0001>

<bundles_post_ra>
// kernel: tpu_custom_call.1
= control target key start
LH: loop header
LB: loop body
LE: loop exit
PB: predicated region body
PF: predicated region fallthrough
CT: control target
= control target key end

     0   :  { %8 = vsyncpa [#allocation4], 0  ;;  %s19788_s0 = inlined_call_operand.hbm [shape: f32[2,16,8,16], index: 0, kind: input, shape index: {}]   ;;  %s19789_s1 = inlined_call_operand.hbm [shape: bf16[5472,128], index: 1, kind: input, shape index: {}]   ;;  %s19790_s2 = inlined_call_operand.hbm [shape: f32[2,1536], index: 2, kind: input, shape index: {}]   ;;  %s19791_s3 = inlined_call_operand.hbm [shape: f32[2,1,8,128], index: 3, kind: output, shape index: {}]  }
   0x1   :  { %10 = vsyncpa [#allocation4 + $0x1], 0 }
   0x2   :  { %11 = vsyncpa [#allocation7], 0 }
   0x3   :  { %12 = vsyncpa [#allocation5], 0 }
   0x4   :  { %14 = vsyncpa [#allocation5 + $0x1], 0  ;;  %s16652_s12 = smov 0   ;;  %s16654_s13 = smov 0  }
   0x5   :  { %s16656_s14 = smov 0   ;;  %s16658_s15 = smov 0  }
   0x6 LB: > { %s16673_s16 = sadd.s32 4294967295, %s16619_s15   ;;  %s12401_s17 = sadd.s32 4294967294, %s16619_s15   ;;  %s16619_s15 = sphi %s16658_s15, %s19939_s15   ;;  %s16615_s14 = sphi %s16656_s14, %s19938_s14   ;;  %s16611_s13 = sphi %s16654_s13, %s19937_s13   ;;  %s16607_s12 = sphi %s16652_s12, %s19936_s12  }
   0x7   : > { %p40_p0 = scmp.ne.s32.totalorder %s16611_s13, %s16607_s12  ;;  %p19792_p1 = scmp.eq.s32.totalorder %s16673_s16, 0 }
   0x8   : > { %p112_p3 = scmp.eq.s32.totalorder %s12401_s17, 1  ;;  %p12402_p5 = scmp.ge.s32.totalorder %s16619_s15, 1 }
   0x9   : > { %p16682_p4 = por %p19792_p1, %p40_p0  ;;  %p119_p7 = scmp.lt.s32.totalorder %s16619_s15, 3 }
   0xa   : > { %p16687_p6 = por %p112_p3, %p40_p0  ;;  %s16621_s21 = smov [#allocation6]  }
   0xb   : > { %s19834_s18 = scalar_select %p16682_p4, 1, 0 }
   0xc   : > { %s19835_s19 = scalar_select %p16687_p6, 1, 0 }
   0xd   : > { %p16692_p8 = pnand %p12402_p5, %p119_p7  ;;  %s131_s22 = sshll.u32 %s16621_s21, 4  ;;  %s16696_s22 = int_to_ptr.vmem [resolvable:$true] %s131_s22 }
   0xe   : > { %s16622_s24 = smov [#allocation8]   ;;  %s16463_s28 = scalar_lea.hbm %s19789_s1, 43776 }
   0xf   : > { %p16027_p9 = pneg %p16692_p8  ;;  %s145_s25 = sshll.u32 %s16622_s24, 4  ;;  %s16707_s25 = int_to_ptr.vmem [resolvable:$true] %s145_s25 }
  0x10   : > { %p16464_p12 = scmp.ne.s32.totalorder %s19789_s1, %s16463_s28  ;;  %p16470_p5 = scmp.lt.u32.totalorder %s16463_s28, %s19789_s1 }
  0x11   : > { %p16703_p11 = pnand %p16027_p9, %p19792_p1 }
  0x13   : > { %p16465_p13 = pneg %p16703_p11 }
  0x15   : > { %p16466_p0 = pnand %p16465_p13, %p16464_p12 }
  0x17   : > { %p16467_p3 = pneg %p16466_p0 }
  0x19   : > { %p16472_p7 = pnand %p16470_p5, %p16467_p3 }
  0x1b   : > { %16475 = shalt.err (!%p16472_p7)
}
  0x1c   : > { %s16476_s6 = scalar_lea.vmem %s16696_s22, 43776  ;;  %p16484_p2 = scmp.lt.s32.totalorder %s16696_s22, %s16696_s22 }
  0x1d   : > { %p16477_p9 = scmp.ne.s32.totalorder %s16696_s22, %s16476_s6  ;;  %p16485_p12 = scmp.lt.s32.totalorder %s16476_s6, %s16476_s6 }
  0x1f   : > { %p16479_p10 = pnand %p16477_p9, %p16465_p13  ;;  %p16486_p0 = por %p16485_p12, %p16484_p2 }
  0x21   : > { %p16480_p1 = pneg %p16479_p10 }
  0x23   : > { %p16487_p6 = pnand %p16486_p0, %p16480_p1 }
  0x25   : > { %16490 = shalt.err (!%p16487_p6)
}
  0x26   : > { %s16623_s7 = smov 64   ;;  %s16624_s8 = smov 4  }
  0x27   : > { %16030 = dma.hbm_to_vmem [thread:$0]  (!%p16703_p11), %s19789_s1, 43776, %s16696_s22, [#allocation7], %s16623_s7, %s16623_s7, %s16624_s8  }
  0x28   : > { %s16491_s21 = scalar_lea.hbm %s19790_s2, 384 }
  0x29   : > { %p16492_p2 = scmp.ne.s32.totalorder %s19790_s2, %s16491_s21  ;;  %p16498_p10 = scmp.lt.u32.totalorder %s16491_s21, %s19790_s2 }
  0x2b   : > { %p16494_p1 = pnand %p16492_p2, %p16465_p13 }
  0x2d   : > { %p16495_p6 = pneg %p16494_p1 }
  0x2f   : > { %p16500_p3 = pnand %p16498_p10, %p16495_p6 }
  0x31   : > { %16503 = shalt.err (!%p16500_p3)
}
  0x32   : > { %s16504_s22 = scalar_lea.vmem %s16707_s25, 384  ;;  %p16512_p12 = scmp.lt.s32.totalorder %s16707_s25, %s16707_s25 }
  0x33   : > { %p16505_p5 = scmp.ne.s32.totalorder %s16707_s25, %s16504_s22  ;;  %p16513_p0 = scmp.lt.s32.totalorder %s16504_s22, %s16504_s22 }
  0x35   : > { %p16507_p7 = pnand %p16505_p5, %p16465_p13  ;;  %p16514_p2 = por %p16513_p0, %p16512_p12 }
  0x37   : > { %p16508_p9 = pneg %p16507_p7 }
  0x39   : > { %p16515_p1 = pnand %p16514_p2, %p16508_p9 }
  0x3b   : > { %16518 = shalt.err (!%p16515_p1)
}
  0x3c   : > { %16033 = dma.hbm_to_vmem [thread:$0]  (!%p16703_p11), %s19790_s2, 384, %s16707_s25, [#allocation7]  }
  0x3d   : > { %s16762_s4 = sadd.s32 1, %s16619_s15   ;;  %s27_s23 = sadd.s32 1, %s16615_s14 }
  0x3e   : > { %s24_s5 = ssub.s32 %s16619_s15, %s16762_s4  ;;  %p34_p13 = scmp.ne.s32.totalorder %s16615_s14, %s16611_s13 }
  0x3f   : > { %p25_p6 = scmp.eq.s32.totalorder %s24_s5, 0  ;;  %p35_p10 = scmp.eq.s32.totalorder %s16619_s15, 0 }
  0x40   : > { %p19838_p3 = scmp.eq.s32.totalorder %s16673_s16, 1  ;;  %p16044_p7 = scmp.lt.s32.totalorder %s16619_s15, 2 }
  0x41   : > { %s16778_s7 = scalar_select %p25_p6, %s16615_s14, %s27_s23  }
  0x42   : > { %p16772_p5 = por %p19838_p3, %p34_p13  ;;  %p36_p9 = por %p35_p10, %p34_p13 }
  0x43   : > { %s156_s8 = sand.u32 1, %s16615_s14   ;;  %s13066_s25 = sshll.u32 %s16619_s15, 11 }
  0x44   : > { %s19839_s6 = scalar_select %p16772_p5, 1, 0 }
  0x45   : > { %s12406_s9 = sshll.u32 %s156_s8, 7  ;;  %s16785_s17 = scalar_lea.hbm %s19788_s0, %s13066_s25 }
  0x46   : > { %s160_s21 = scalar_lea.vmem [#allocation3], %s12406_s9  ;;  %p16789_p11 = pnand %p16044_p7, %p36_p9 }
  0x47   : > { %s167_s24 = sshll.u32 %s160_s21, 4  ;;  %s16793_s27 = scalar_lea.sflag [#allocation4], %s156_s8  ;;  %s16787_s24 = int_to_ptr.vmem [resolvable:$true] %s167_s24 }
  0x48   : > { %s16519_s28 = scalar_lea.hbm %s16785_s17, 2048  ;;  %p16521_p0 = pneg %p16789_p11 }
  0x49   : > { %p16520_p12 = scmp.ne.s32.totalorder %s16785_s17, %s16519_s28  ;;  %s16524_s30 = scalar_lea.hbm %s19788_s0, 4096 }
  0x4a   : > { %p16525_p13 = scmp.lt.u32.totalorder %s16785_s17, %s19788_s0  ;;  %p16526_p6 = scmp.lt.u32.totalorder %s16524_s30, %s16519_s28 }
  0x4b   : > { %p16522_p2 = pnand %p16521_p0, %p16520_p12  ;;  %p16528_p3 = scmp.lt.u32.totalorder %s16519_s28, %s16785_s17 }
  0x4c   : > { %p16527_p10 = por %p16526_p6, %p16525_p13 }
  0x4d   : > { %p16523_p1 = pneg %p16522_p2 }
  0x4e   : > { %p16529_p7 = por %p16528_p3, %p16527_p10 }
  0x50   : > { %p16530_p9 = pnand %p16529_p7, %p16523_p1 }
  0x52   : > { %16533 = shalt.err (!%p16530_p9)
}
  0x53   : > { %s16534_s8 = scalar_lea.vmem %s16787_s24, 2048  ;;  %s16625_s9 = smov [#allocation3]  }
  0x54   : > { %p16535_p12 = scmp.ne.s32.totalorder %s16787_s24, %s16534_s8  ;;  %s16539_s25 = sshll.u32 %s16625_s9, 4  ;;  %s16540_s25 = int_to_ptr.vmem [resolvable:$false] %s16539_s25 }
  0x55   : > { %s16541_s10 = scalar_lea.vmem %s16540_s25, 4096  ;;  %p16542_p4 = scmp.lt.s32.totalorder %s16787_s24, %s16540_s25 }
  0x56   : > { %p16537_p2 = pnand %p16535_p12, %p16521_p0  ;;  %p16543_p13 = scmp.lt.s32.totalorder %s16541_s10, %s16534_s8 }
  0x58   : > { %p16538_p5 = pneg %p16537_p2  ;;  %p16544_p6 = por %p16543_p13, %p16542_p4 }
  0x5a   : > { %p16545_p10 = pnand %p16544_p6, %p16538_p5 }
  0x5c   : > { %16548 = shalt.err (!%p16545_p10)
}
  0x5d   : > { %s16626_s11 = smov 128   ;;  %s16627_s21 = smov 8  }
  0x5e   : > { %16037 = dma.hbm_to_vmem [thread:$0]  (!%p16789_p11), %s16785_s17, 2048, %s16787_s24, %s16793_s27, %s16626_s11, %s16626_s11, %s16627_s21  }
  0x5f   : > { %179 = sbr.rel (%p16692_p8) target bundleno = 5334 (0x14d6), region = 32 }
  0x66   : > { %s16824_s28 = sand.u32 1, %s16611_s13   ;;  %p19841_p4 = scmp.ne.s32.totalorder %s19834_s18, 0 }
  0x67   : > { %s12410_s22 = sshll.u32 %s16824_s28, 7  ;;  %s182_s29 = scalar_lea.sflag [#allocation4], %s16824_s28 }
  0x68   : > { %s16828_s30 = scalar_lea.vmem [#allocation3], %s12410_s22 }
  0x69   : > { %16594 = dma.done.wait (%p19841_p4), %s182_s29, 2048  }
  0x6a   : > { %16596 = vsyncadd (%p19841_p4), %s182_s29, 4294965248  ;;  %p19842_p5 = scmp.eq.s32.totalorder %s16673_s16, 0 }
  0x6c   : > { %16598 = dma.done.wait (%p19842_p5), [#allocation7], 44160   ;;  %p19843_p8 = pmov %p19842_p5 }
  0x6d   : > { %vm233_vm0 = vcmask 130048   ;;  %v19795_v0 = vmov 0.0   ;;  %v16088_v1 = vld [vmem:[#allocation6 + $0x18] sm:$0xff]   ;;  %v217_v2 = vld [vmem:[%s16828_s30] sm:$0xff]  ;;  %v218_v5 = vld [vmem:[%s16828_s30 + $0x8] sm:$0xff]  ;;  %v254_v9 = vlaneseq  ;;  %s12413_s18 = sshll.u32 %s16824_s28, 3 }
  0x6e   : > { %16600 = vsyncadd (%p19843_p8), [#allocation7], 4294923136  ;;  %234 = vst.msk [vmem:[#allocation2] sm:$0xff] %vm233_vm0, %v19795_v0  ;;  %13697 = vmatprep.subr.bf16.mxu0 %v16088_v1  ;;  %v16089_v4 = vld [vmem:[#allocation6] sm:$0xff]   ;;  %v219_v6 = vld [vmem:[%s16828_s30 + $0x10] sm:$0xff]  ;;  %s13063_s20 = sshll.u32 %s16673_s16, 7 }
  0x6f   : > { %236 = vst.msk [vmem:[#allocation2 + $0x88] sm:$0xff] %vm233_vm0, %v19795_v0  ;;  %238 = vst.msk [vmem:[#allocation2 + $0x8] sm:$0xff] %vm233_vm0, %v217_v2  ;;  %13698 = vmatpush3.bf16.msra.mxu0 %v16088_v1  ;;  %v220_v7 = vld [vmem:[%s16828_s30 + $0x18] sm:$0xff]  ;;  %v221_v8 = vld [vmem:[%s16828_s30 + $0x20] sm:$0xff]  ;;  %v16875_v20 = vshrl.u32 %v254_v9, 7  ;;  %s215_s17 = scalar_lea.vmem [#allocation9], %s12413_s18  ;;  %s19744_s23 = scalar_lea.hbm %s19791_s3, %s13063_s20 }
  0x70   : > { %239 = vst.msk [vmem:[#allocation2 + $0x10] sm:$0xff] %vm233_vm0, %v218_v5  ;;  %13715 = vmatprep.subr.bf16.mxu0 %v16089_v4  ;;  %240 = vst.msk [vmem:[#allocation2 + $0x18] sm:$0xff] %vm233_vm0, %v219_v6  ;;  %v222_v10 = vld [vmem:[%s16828_s30 + $0x28] sm:$0xff]  ;;  %v223_v11 = vld [vmem:[%s16828_s30 + $0x30] sm:$0xff]  ;;  %s12312_s24 = sshll.u32 %s215_s17, 4  ;;  %s12299_s5 = scalar_lea.sflag [#allocation5], %s16824_s28  ;;  %s19746_s24 = int_to_ptr.vmem [resolvable:$true] %s12312_s24 }
  0x71   : > { %241 = vst.msk [vmem:[#allocation2 + $0x20] sm:$0xff] %vm233_vm0, %v220_v7  ;;  %242 = vst.msk [vmem:[#allocation2 + $0x28] sm:$0xff] %vm233_vm0, %v221_v8  ;;  %v224_v12 = vld [vmem:[%s16828_s30 + $0x38] sm:$0xff]  ;;  %v225_v13 = vld [vmem:[%s16828_s30 + $0x40] sm:$0xff]  ;;  %vm256_vm1 = vcmp.gt.s32.totalorder %v16875_v20, 0  ;;  %vm257_vm2 = vcmp.lt.s32.totalorder %v16875_v20, 7 }
  0x72   : > { %243 = vst.msk [vmem:[#allocation2 + $0x30] sm:$0xff] %vm233_vm0, %v222_v10  ;;  %244 = vst.msk [vmem:[#allocation2 + $0x38] sm:$0xff] %vm233_vm0, %v223_v11  ;;  %v226_v14 = vld [vmem:[%s16828_s30 + $0x48] sm:$0xff]  ;;  %v227_v15 = vld [vmem:[%s16828_s30 + $0x50] sm:$0xff]  ;;  %s16549_s8 = scalar_lea.vmem %s19746_s24, 128  ;;  %p19933_p0 = scmp.ne.s32.totalorder %s19839_s6, 0 }
  0x73   : > { %245 = vst.msk [vmem:[#allocation2 + $0x40] sm:$0xff] %vm233_vm0, %v224_v12  ;;  %246 = vst.msk [vmem:[#allocation2 + $0x48] sm:$0xff] %vm233_vm0, %v225_v13  ;;  %v228_v16 = vld [vmem:[%s16828_s30 + $0x58] sm:$0xff]  ;;  %v229_v17 = vld [vmem:[%s16828_s30 + $0x60] sm:$0xff]  ;;  %p16550_p11 = scmp.ne.s32.totalorder %s19746_s24, %s16549_s8  ;;  %s16631_s16 = smov [#allocation9]  }
  0x74   : > { %247 = vst.msk [vmem:[#allocation2 + $0x50] sm:$0xff] %vm233_vm0, %v226_v14  ;;  %248 = vst.msk [vmem:[#allocation2 + $0x58] sm:$0xff] %vm233_vm0, %v227_v15  ;;  %v230_v18 = vld [vmem:[%s16828_s30 + $0x68] sm:$0xff]  ;;  %v231_v19 = vld [vmem:[%s16828_s30 + $0x70] sm:$0xff]  ;;  %s16553_s9 = sshll.u32 %s16631_s16, 4  ;;  %s16554_s9 = int_to_ptr.vmem [resolvable:$false] %s16553_s9 }
  0x75   : > { %v16843_v3 = vld [vmem:[#allocation2] sm:$0xff]  ;;  %249 = vst.msk [vmem:[#allocation2 + $0x60] sm:$0xff] %vm233_vm0, %v228_v16  ;;  %250 = vst.msk [vmem:[#allocation2 + $0x68] sm:$0xff] %vm233_vm0, %v229_v17  ;;  %v232_v36 = vld [vmem:[%s16828_s30 + $0x78] sm:$0xff]  ;;  %p16551_p1 = pnand %p16550_p11, %p19933_p0  ;;  %s16555_s25 = scalar_lea.vmem %s16554_s9, 256 }
  0x76   : > { %2033 = vst.msk [vmem:[#allocation2] sm:$0xff] %vm233_vm0, %v19795_v0  ;;  %251 = vst.msk [vmem:[#allocation2 + $0x70] sm:$0xff] %vm233_vm0, %v230_v18  ;;  %v16878_v21 = vld [vmem:[#allocation2 + $0x8] sm:$0xff]  ;;  %v274_v24 = vrot.slane %v16843_v3, 7  ;;  %v16901_v30 = vld [vmem:[#allocation6 + $0x30] sm:$0xff]   ;;  %v580_v31 = vrot.slane %v16843_v3, 1  ;;  %p16556_p7 = scmp.lt.s32.totalorder %s19746_s24, %s16554_s9  ;;  %p16557_p9 = scmp.lt.s32.totalorder %s16555_s25, %s16549_s8 }
  0x77   : > { %252 = vst.msk [vmem:[#allocation2 + $0x78] sm:$0xff] %vm233_vm0, %v231_v19  ;;  %v316_v22 = vpack.c.bf16 %v16878_v21, %v16843_v3  ;;  %v16882_v23 = vld [vmem:[#allocation2 + $0x10] sm:$0xff]  ;;  %v16885_v25 = vld [vmem:[#allocation2 + $0x18] sm:$0xff]  ;;  %v275_v37 = vrot.slane %v16878_v21, 7  ;;  %253 = vst.msk [vmem:[#allocation2 + $0x80] sm:$0xff] %vm233_vm0, %v232_v36  ;;  %v581_v41 = vrot.slane %v16878_v21, 1  ;;  %p16552_p3 = pneg %p16551_p1 }
  0x78   : > { %v16887_v26 = vld [vmem:[#allocation2 + $0x20] sm:$0xff]  ;;  %v16889_v27 = vld [vmem:[#allocation2 + $0x28] sm:$0xff]  ;;  %v16895_v28 = vpack.c.bf16 %v16885_v25, %v16882_v23  ;;  %v276_v32 = vrot.slane %v16882_v23, 7  ;;  %v16916_v35 = vsel %vm256_vm1, %v274_v24, 0.0  ;;  %v582_v38 = vrot.slane %v16882_v23, 1  ;;  %p16558_p12 = por %p16557_p9, %p16556_p7 }
  0x79   : > { %13699 = vmatprep.mubr.msk.bf16.mxu0 %vm233_vm0, %v316_v22  ;;  %v16899_v29 = vpack.c.bf16 %v16889_v27, %v16887_v26  ;;  %v16908_v33 = vld [vmem:[#allocation2 + $0x30] sm:$0xff]  ;;  %v16912_v34 = vld [vmem:[#allocation2 + $0x38] sm:$0xff]  ;;  %v277_v42 = vrot.slane %v16885_v25, 7  ;;  %v583_v43 = vrot.slane %v16885_v25, 1  ;;  %v16932_v44 = vsel %vm257_vm2, %v580_v31, 0.0  ;;  %v17201_v0 = vld [vmem:[#allocation2 + $0x88] sm:$0xff] }
  0x7a   : > { %13700 = vmatmul.mubr.msk.bf16.vlgmr.msra.gmra.mrb[0].mxu0 %vm233_vm0, %v16895_v28  ;;  %v16921_v39 = vld [vmem:[#allocation2 + $0x40] sm:$0xff]  ;;  %v16923_v40 = vld [vmem:[#allocation2 + $0x48] sm:$0xff]  ;;  %v16936_v45 = vsel %vm256_vm1, %v276_v32, 0.0  ;;  %v16940_v46 = vpack.c.bf16 %v16912_v34, %v16908_v33  ;;  %v278_v48 = vrot.slane %v16887_v26, 7  ;;  %v279_v49 = vrot.slane %v16889_v27, 7  ;;  %19850 = vst [vmem:[#allocation19_spill] sm:$0xff] %v17201_v0  ;;  %p16559_p2 = pnand %p16558_p12, %p16552_p3 }
  0x7b   : > { %13716 = vmatpush3.bf16.msra.mxu0 %v16089_v4  ;;  %13703 = vmatprep.mubr.msk.bf16.mxu0 %vm233_vm0, %v16899_v29  ;;  %v16942_v47 = vld [vmem:[#allocation2 + $0x50] sm:$0xff]  ;;  %v16948_v50 = vpack.c.bf16 %v16923_v40, %v16921_v39  ;;  %v280_v51 = vrot.slane %v16908_v33, 7  ;;  %v281_v52 = vrot.slane %v16912_v34, 7  ;;  %v16954_v53 = vsel %vm257_vm2, %v582_v38, 0.0  ;;  %v269_v54 = vld [vmem:[#allocation2 + $0x58] sm:$0xff] }
  0x7c   : > { %13733 = vmatprep.subr.bf16.mxu0 %v16901_v30  ;;  %v270_v55 = vld [vmem:[#allocation2 + $0x60] sm:$0xff]  ;;  %v16958_v56 = vsel %vm256_vm1, %v275_v37, 0.0  ;;  %v271_v57 = vld [vmem:[#allocation2 + $0x68] sm:$0xff]  ;;  %v282_v58 = vrot.slane %v16921_v39, 7  ;;  %v283_v59 = vrot.slane %v16923_v40, 7  ;;  %v284_v60 = vrot.slane %v16942_v47, 7 }
  0x7d   : > { %v16965_v61 = vsel %vm256_vm1, %v277_v42, 0.0  ;;  %v16969_v62 = vsel %vm257_vm2, %v583_v43, 0.0  ;;  %v16975_v63 = vsel %vm256_vm1, %v278_v48, 0.0  ;;  %v285_v1 = vrot.slane %v269_v54, 7  ;;  %v16979_v2 = vld [vmem:[#allocation2 + $0x70] sm:$0xff] }
  0x7e   : > { %v16981_v3 = vld [vmem:[#allocation2 + $0x78] sm:$0xff]  ;;  %v16985_v4 = vsel %vm256_vm1, %v279_v49, 0.0  ;;  %v16989_v5 = vsel %vm256_vm1, %v280_v51, 0.0  ;;  %v16993_v6 = vsel %vm256_vm1, %v281_v52, 0.0  ;;  %v286_v7 = vrot.slane %v270_v55, 7 }
  0x7f   : > { %v16996_v8 = vpack.c.bf16 %v269_v54, %v16942_v47  ;;  %v16998_v9 = vpack.c.bf16 %v271_v57, %v270_v55  ;;  %v287_v10 = vrot.slane %v271_v57, 7  ;;  %v584_v11 = vrot.slane %v16887_v26, 1 }
  0x80   : > { %v17003_v12 = vsel %vm256_vm1, %v282_v58, 0.0  ;;  %v17007_v13 = vsel %vm256_vm1, %v283_v59, 0.0  ;;  %v17011_v14 = vsel %vm256_vm1, %v284_v60, 0.0  ;;  %v585_v15 = vrot.slane %v16889_v27, 1 }
  0x81   : > { %v17016_v16 = vsel %vm256_vm1, %v285_v1, 0.0  ;;  %v288_v17 = vrot.slane %v16979_v2, 7  ;;  %v289_v18 = vrot.slane %v16981_v3, 7  ;;  %v586_v19 = vrot.slane %v16908_v33, 1 }
  0x82   : > { %13704 = vmatmul.mubr.msk.bf16.gmra.mrb[4].mxu0 %vm233_vm0, %v16940_v46  ;;  %v17023_v22 = vsel %vm256_vm1, %v286_v7, 0.0  ;;  %v17027_v24 = vsel %vm257_vm2, %v581_v41, 0.0  ;;  %v587_v31 = vrot.slane %v16912_v34, 1  ;;  %v588_v32 = vrot.slane %v16921_v39, 1 }
  0x83   : > { %13707 = vmatprep.mubr.msk.bf16.mxu0 %vm233_vm0, %v16948_v50  ;;  %v17033_v36 = vsel %vm256_vm1, %v287_v10, 0.0  ;;  %v17037_v37 = vsel %vm257_vm2, %v584_v11, 0.0  ;;  %v589_v38 = vrot.slane %v16923_v40, 1  ;;  %v590_v42 = vrot.slane %v16942_v47, 1  ;;  %v16091_v11 = vld [vmem:[#allocation6 + $0x8] sm:$0xff]  }
  0x84   : > { %v17043_v41 = vsel %vm257_vm2, %v585_v15, 0.0  ;;  %v591_v43 = vrot.slane %v269_v54, 1  ;;  %v17049_v34 = vsel %vm257_vm2, %v586_v19, 0.0  ;;  %v592_v39 = vrot.slane %v270_v55, 1 }
  0x85   : > { %v17055_v40 = vsel %vm257_vm2, %v587_v31, 0.0  ;;  %v17059_v48 = vsel %vm257_vm2, %v588_v32, 0.0  ;;  %v17063_v49 = vsel %vm257_vm2, %v589_v38, 0.0  ;;  %v17067_v51 = vsel %vm257_vm2, %v590_v42, 0.0 }
  0x86   : > { %v17071_v52 = vsel %vm257_vm2, %v591_v43, 0.0  ;;  %v593_v54 = vrot.slane %v271_v57, 1  ;;  %v17075_v55 = vpack.c.bf16 %v16981_v3, %v16979_v2  ;;  %v306_v58 = vpack.c.bf16 %v16958_v56, %v16916_v35 }
  0x87   : > { %v17081_v59 = vsel %vm257_vm2, %v592_v39, 0.0  ;;  %v594_v60 = vrot.slane %v16979_v2, 1  ;;  %v17101_v10 = vpack.c.bf16 %v16965_v61, %v16936_v45  ;;  %v17105_v15 = vpack.c.bf16 %v16985_v4, %v16975_v63 }
  0x88   : > { %v17091_v57 = vsel %vm257_vm2, %v593_v54, 0.0  ;;  %v17118_v32 = vpack.c.bf16 %v16993_v6, %v16989_v5  ;;  %v17122_v38 = vpack.c.bf16 %v17007_v13, %v17003_v12  ;;  %v17134_v43 = vpack.c.bf16 %v17016_v16, %v17011_v14 }
  0x89   : > { %v17095_v35 = vsel %vm257_vm2, %v594_v60, 0.0  ;;  %v17138_v39 = vpack.c.bf16 %v17033_v36, %v17023_v22  ;;  %v305_v60 = vsel %vm256_vm1, %v289_v18, 0.0  ;;  %v612_v31 = vpack.c.bf16 %v17027_v24, %v16932_v44  ;;  %v16092_v18 = vld [vmem:[#allocation6 + $0x20] sm:$0xff]  }
  0x8a   : > { %13708 = vmatmul.mubr.msk.bf16.gmra.mrb[8].mxu0 %vm233_vm0, %v16996_v8  ;;  %v595_v54 = vrot.slane %v16981_v3, 1  ;;  %v17167_v7 = vpack.c.bf16 %v17043_v41, %v17037_v37  ;;  %v17175_v44 = vpack.c.bf16 %v17055_v40, %v17049_v34  ;;  %v17179_v3 = vpack.c.bf16 %v17063_v49, %v17059_v48 }
  0x8b   : > { %13711 = vmatprep.mubr.msk.bf16.mxu0 %vm233_vm0, %v16998_v9 }
  0x8c   : > { %19845 = vst [vmem:[#allocation14_spill] sm:$0xff] %v17167_v7  ;;  %19846 = vst [vmem:[#allocation15_spill] sm:$0xff] %v17175_v44  ;;  %v17199_v1 = vsel %vm257_vm2, %v595_v54, 0.0  ;;  %v813_v54 = vpack.c.bf16 %v16936_v45, %v16958_v56  ;;  %v816_v45 = vpack.c.bf16 %v17003_v12, %v16993_v6  ;;  %v817_v56 = vpack.c.bf16 %v17011_v14, %v17007_v13  ;;  %v16094_v12 = vld [vmem:[#allocation6 + $0x10] sm:$0xff]   ;;  %v16454_v14 = vld [vmem:[#allocation2 + $0x38] sm:$0xff] }
  0x8d   : > { %19847 = vst [vmem:[#allocation16_spill] sm:$0xff] %v17179_v3  ;;  %v967_v6 = vpack.c.bf16 %v16887_v26, %v16885_v25  ;;  %v968_v13 = vpack.c.bf16 %v16908_v33, %v16889_v27  ;;  %v16457_v25 = vld [vmem:[#allocation2 + $0x58] sm:$0xff]  ;;  %v16458_v26 = vld [vmem:[#allocation2 + $0x60] sm:$0xff]  ;;  %v16459_v27 = vld [vmem:[#allocation2 + $0x68] sm:$0xff] }
  0x8e   : > { %v972_v33 = vpack.c.bf16 %v16979_v2, %v16459_v27  ;;  %v19853_v2 = vpack.c.bf16 %v17037_v37, %v16969_v62 }
  0x92   : > { %13712 = vmatmul.mubr.msk.bf16.gmra.mrb[12].mxu0 %vm233_vm0, %v17075_v55 }
  0x93   : > { %13717 = vmatprep.mubr.msk.bf16.mxu0 %vm233_vm0, %v306_v58  ;;  %v304_v58 = vsel %vm256_vm1, %v288_v17, 0.0  ;;  %v17163_v17 = vpack.c.bf16 %v16969_v62, %v16954_v53  ;;  %v19857_v62 = vpack.c.bf16 %v17081_v59, %v17071_v52 }
  0x94   : > { %v17150_v42 = vpack.c.bf16 %v305_v60, %v304_v58 }
  0x95   : > { %19844 = vst [vmem:[#allocation13_spill] sm:$0xff] %v17163_v17 }
  0x9a   : > { %13718 = vmatmul.mubr.msk.bf16.vlgmr.msra.gmra.mrb[0].mxu0 %vm233_vm0, %v17101_v10 }
  0x9b   : > { %13734 = vmatpush3.bf16.msra.mxu0 %v16901_v30  ;;  %13721 = vmatprep.mubr.msk.bf16.mxu0 %vm233_vm0, %v17105_v15  ;;  %v17152_v30 = vld [vmem:[#allocation2 + $0x80] sm:$0xff] }
  0x9c   : > { %13751 = vmatprep.subr.bf16.mxu0 %v16091_v11  ;;  %v796_v19 = vrot.slane %v17152_v30, 7 }
  0xa2   : > { %13722 = vmatmul.mubr.msk.bf16.gmra.mrb[4].mxu0 %vm233_vm0, %v17118_v32 }
  0xa3   : > { %13725 = vmatprep.mubr.msk.bf16.mxu0 %vm233_vm0, %v17122_v38 }
  0xaa   : > { %13726 = vmatmul.mubr.msk.bf16.gmra.mrb[8].mxu0 %vm233_vm0, %v17134_v43 }
  0xab   : > { %13729 = vmatprep.mubr.msk.bf16.mxu0 %vm233_vm0, %v17138_v39 }
  0xb2   : > { %13730 = vmatmul.mubr.msk.bf16.gmra.mrb[12].mxu0 %vm233_vm0, %v17150_v42 }
  0xb3   : > { %13735 = vmatprep.mubr.msk.bf16.mxu0 %vm233_vm0, %v612_v31  ;;  %v17191_v31 = vpack.c.bf16 %v17091_v57, %v17081_v59  ;;  %v17346_v59 = vld [vmem:[#allocation6 + $0x48] sm:$0xff]  }
  0xb4   : > { %15245 = vmatprep.subr.bf16.mxu1 %v17346_v59 }
  0xb5   : > { %19849 = vst [vmem:[#allocation18_spill] sm:$0xff] %v17191_v31  ;;  %15246 = vmatpush3.bf16.msra.mxu1 %v17346_v59 }
  0xba   : > { %13736 = vmatmul.mubr.msk.bf16.vlgmr.msra.gmra.mrb[0].mxu0 %vm233_vm0, %v17163_v17 }
  0xbb   : > { %13752 = vmatpush3.bf16.msra.mxu0 %v16091_v11  ;;  %13739 = vmatprep.mubr.msk.bf16.mxu0 %vm233_vm0, %v17167_v7  ;;  %v17187_v11 = vpack.c.bf16 %v17071_v52, %v17067_v51  ;;  %v17208_v7 = vpack.c.bf16 %v17199_v1, %v17095_v35 }
  0xbc   : > { %13769 = vmatprep.subr.bf16.mxu0 %v16092_v18 }
  0xbd   : > { %19848 = vst [vmem:[#allocation17_spill] sm:$0xff] %v17187_v11 }
  0xc2   : > { %13740 = vmatmul.mubr.msk.bf16.gmra.mrb[4].mxu0 %vm233_vm0, %v17175_v44  ;;  %v19851_v44 = vmov 0.0  }
  0xc3   : > { %13743 = vmatprep.mubr.msk.bf16.mxu0 %vm233_vm0, %v17179_v3  ;;  %v1336_v3 = vrot.slane %v17201_v0, 7  ;;  %2034 = vst.msk [vmem:[#allocation2 + $0x88] sm:$0xff] %vm233_vm0, %v19851_v44  ;;  %v1134_v44 = vrot.slane %v17152_v30, 1  ;;  %v16093_v0 = vld [vmem:[#allocation6 + $0x38] sm:$0xff]  }
  0xca   : > { %13744 = vmatmul.mubr.msk.bf16.gmra.mrb[8].mxu0 %vm233_vm0, %v17187_v11  ;;  %v17212_v11 = vsel %vm256_vm1, %v796_v19, 0.0  ;;  %v814_v19 = vpack.c.bf16 %v16975_v63, %v16965_v61  ;;  %v818_v61 = vpack.c.bf16 %v17023_v22, %v17016_v16  ;;  %v819_v63 = vpack.c.bf16 %v304_v58, %v17033_v36  ;;  %v16455_v16 = vld [vmem:[#allocation2 + $0x40] sm:$0xff]  ;;  %v16460_v58 = vld [vmem:[#allocation2 + $0x78] sm:$0xff] }
  0xcb   : > { %13747 = vmatprep.mubr.msk.bf16.mxu0 %vm233_vm0, %v17191_v31  ;;  %v17216_v31 = vsel %vm256_vm1, %v1336_v3, 0.0  ;;  %v815_v3 = vpack.c.bf16 %v16989_v5, %v16985_v4  ;;  %v820_v4 = vpack.c.bf16 %v17212_v11, %v305_v60  ;;  %v966_v5 = vpack.c.bf16 %v16882_v23, %v16878_v21  ;;  %v16456_v23 = vld [vmem:[#allocation2 + $0x48] sm:$0xff] }
  0xcc   : > { %v1360_v17 = vpack.c.bf16 %v17216_v31, %v17212_v11  ;;  %v969_v21 = vpack.c.bf16 %v16455_v16, %v16454_v14  ;;  %v970_v22 = vpack.c.bf16 %v16942_v47, %v16456_v23  ;;  %v971_v36 = vpack.c.bf16 %v16458_v26, %v16457_v25 }
  0xcd   : > { %v973_v47 = vpack.c.bf16 %v17152_v30, %v16460_v58  ;;  %v19852_v60 = vpack.c.bf16 %v16954_v53, %v17027_v24  ;;  %v19855_v30 = vpack.c.bf16 %v17059_v48, %v17055_v40  ;;  %v19856_v53 = vpack.c.bf16 %v17067_v51, %v17063_v49  ;;  %v19865_v49 = vld [vmem:[#allocation18_spill] sm:$0xff] }
  0xce   : > { %v19858_v24 = vpack.c.bf16 %v17095_v35, %v17091_v57  ;;  %v19866_v57 = vmov 0.0   ;;  %v17355_v35 = vld [vmem:[#allocation6 + $0x78] sm:$0xff]  }
  0xcf   : > { %13895 = vmatprep.subr.bf16.mxu1 %v17355_v35 }
  0xd2   : > { %13748 = vmatmul.mubr.msk.bf16.gmra.mrb[12].mxu0 %vm233_vm0, %v17208_v7 }
  0xd3   : > { %13753 = vmatprep.mubr.msk.bf16.mxu0 %vm233_vm0, %v813_v54 }
  0xda   : > { %13754 = vmatmul.mubr.msk.bf16.vlgmr.msra.gmra.mrb[0].mxu0 %vm233_vm0, %v814_v19 }
  0xdb   : > { %13770 = vmatpush3.bf16.msra.mxu0 %v16092_v18  ;;  %13757 = vmatprep.mubr.msk.bf16.mxu0 %vm233_vm0, %v815_v3  ;;  %v16095_v18 = vld [vmem:[#allocation6 + $0x28] sm:$0xff]  }
  0xdc   : > { %13787 = vmatprep.subr.bf16.mxu0 %v16093_v0 }
  0xe2   : > { %13758 = vmatmul.mubr.msk.bf16.gmra.mrb[4].mxu0 %vm233_vm0, %v816_v45 }
  0xe3   : > { %13761 = vmatprep.mubr.msk.bf16.mxu0 %vm233_vm0, %v817_v56 }
  0xea   : > { %13762 = vmatmul.mubr.msk.bf16.gmra.mrb[8].mxu0 %vm233_vm0, %v818_v61 }
  0xeb   : > { %13765 = vmatprep.mubr.msk.bf16.mxu0 %vm233_vm0, %v819_v63 }
  0xf2   : > { %13766 = vmatmul.mubr.msk.bf16.gmra.mrb[12].mxu0 %vm233_vm0, %v820_v4 }
  0xf3   : > { %13771 = vmatprep.mubr.msk.bf16.mxu0 %vm233_vm0, %v966_v5 }
  0xfa   : > { %13772 = vmatmul.mubr.msk.bf16.vlgmr.msra.gmra.mrb[0].mxu0 %vm233_vm0, %v967_v6 }
  0xfb   : > { %13788 = vmatpush3.bf16.msra.mxu0 %v16093_v0  ;;  %13775 = vmatprep.mubr.msk.bf16.mxu0 %vm233_vm0, %v968_v13  ;;  %v1150_v0 = vsel %vm257_vm2, %v1134_v44, 0.0  ;;  %v19854_v44 = vpack.c.bf16 %v17049_v34, %v17043_v41  ;;  %v16096_v41 = vld [vmem:[#allocation6 + $0x40] sm:$0xff]   ;;  %v19859_v34 = vld [vmem:[#allocation19_spill] sm:$0xff] }
  0xfc   : > { %13805 = vmatprep.subr.bf16.mxu0 %v16094_v12  ;;  %v1158_v37 = vpack.c.bf16 %v1150_v0, %v17199_v1  ;;  %v1674_v48 = vrot.slane %v19859_v34, 1  ;;  %v17348_v1 = vld [vmem:[#allocation2] sm:$0xff] }
  0xfd   : > { %3841 = vst.msk [vmem:[#allocation2] sm:$0xff] %vm233_vm0, %v19866_v57 }
  0xfe   : > { %v1690_v51 = vsel %vm257_vm2, %v1674_v48, 0.0 }
  0xff   : > { %v1698_v52 = vpack.c.bf16 %v1690_v51, %v1150_v0 }
 0x102   : > { %13776 = vmatmul.mubr.msk.bf16.gmra.mrb[4].mxu0 %vm233_vm0, %v969_v21 }
 0x103   : > { %13779 = vmatprep.mubr.msk.bf16.mxu0 %vm233_vm0, %v970_v22 }
 0x10a   : > { %13780 = vmatmul.mubr.msk.bf16.gmra.mrb[8].mxu0 %vm233_vm0, %v971_v36 }
 0x10b   : > { %13783 = vmatprep.mubr.msk.bf16.mxu0 %vm233_vm0, %v972_v33 }
 0x112   : > { %13784 = vmatmul.mubr.msk.bf16.gmra.mrb[12].mxu0 %vm233_vm0, %v973_v47 }
 0x113   : > { %13789 = vmatprep.mubr.msk.bf16.mxu0 %vm233_vm0, %v19852_v60 }
 0x11a   : > { %13790 = vmatmul.mubr.msk.bf16.vlgmr.msra.gmra.mrb[0].mxu0 %vm233_vm0, %v19853_v2 }
 0x11b   : > { %13806 = vmatpush3.bf16.msra.mxu0 %v16094_v12  ;;  %13793 = vmatprep.mubr.msk.bf16.mxu0 %vm233_vm0, %v19854_v44 }
 0x11c   : > { %13823 = vmatprep.subr.bf16.mxu0 %v16095_v18 }
 0x122   : > { %13794 = vmatmul.mubr.msk.bf16.gmra.mrb[4].mxu0 %vm233_vm0, %v19855_v30 }
 0x123   : > { %13797 = vmatprep.mubr.msk.bf16.mxu0 %vm233_vm0, %v19856_v53 }
 0x12a   : > { %13798 = vmatmul.mubr.msk.bf16.gmra.mrb[8].mxu0 %vm233_vm0, %v19857_v62 }
 0x12b   : > { %13801 = vmatprep.mubr.msk.bf16.mxu0 %vm233_vm0, %v19858_v24 }
 0x132   : > { %13802 = vmatmul.mubr.msk.bf16.gmra.mrb[12].mxu0 %vm233_vm0, %v1158_v37 }
 0x133   : > { %13807 = vmatprep.mubr.msk.bf16.mxu0 %vm233_vm0, %v17101_v10 }
 0x13a   : > { %13808 = vmatmul.mubr.msk.bf16.vlgmr.msra.gmra.mrb[0].mxu0 %vm233_vm0, %v17105_v15 }
 0x13b   : > { %13824 = vmatpush3.bf16.msra.mxu0 %v16095_v18  ;;  %13811 = vmatprep.mubr.msk.bf16.mxu0 %vm233_vm0, %v17118_v32 }
 0x13c   : > { %13841 = vmatprep.subr.bf16.mxu0 %v16096_v41 }
 0x142   : > { %13812 = vmatmul.mubr.msk.bf16.gmra.mrb[4].mxu0 %vm233_vm0, %v17122_v38 }
 0x143   : > { %13815 = vmatprep.mubr.msk.bf16.mxu0 %vm233_vm0, %v17134_v43 }
 0x14a   : > { %13816 = vmatmul.mubr.msk.bf16.gmra.mrb[8].mxu0 %vm233_vm0, %v17138_v39 }
 0x14b   : > { %13819 = vmatprep.mubr.msk.bf16.mxu0 %vm233_vm0, %v17150_v42 }
 0x152   : > { %13820 = vmatmul.mubr.msk.bf16.gmra.mrb[12].mxu0 %vm233_vm0, %v1360_v17 }
 0x153   : > { %13825 = vmatprep.mubr.msk.bf16.mxu0 %vm233_vm0, %v16895_v28  ;;  %v16461_v28 = vld [vmem:[#allocation2 + $0x80] sm:$0xff] }
 0x154   : > { %v1513_v40 = vpack.c.bf16 %v19859_v34, %v16461_v28 }
 0x15a   : > { %13826 = vmatmul.mubr.msk.bf16.vlgmr.msra.gmra.mrb[0].mxu0 %vm233_vm0, %v16899_v29  ;;  %v19860_v29 = vld [vmem:[#allocation13_spill] sm:$0xff] }
 0x15b   : > { %13842 = vmatpush3.bf16.msra.mxu0 %v16096_v41  ;;  %13829 = vmatprep.mubr.msk.bf16.mxu0 %vm233_vm0, %v16940_v46  ;;  %v19861_v46 = vld [vmem:[#allocation14_spill] sm:$0xff] }
 0x162   : > { %13830 = vmatmul.mubr.msk.bf16.gmra.mrb[4].mxu0 %vm233_vm0, %v16948_v50  ;;  %v19862_v50 = vld [vmem:[#allocation15_spill] sm:$0xff] }
 0x163   : > { %13833 = vmatprep.mubr.msk.bf16.mxu0 %vm233_vm0, %v16996_v8  ;;  %v19863_v8 = vld [vmem:[#allocation16_spill] sm:$0xff] }
 0x16a   : > { %13834 = vmatmul.mubr.msk.bf16.gmra.mrb[8].mxu0 %vm233_vm0, %v16998_v9  ;;  %v19864_v9 = vld [vmem:[#allocation17_spill] sm:$0xff] }
 0x16b   : > { %13837 = vmatprep.mubr.msk.bf16.mxu0 %vm233_vm0, %v17075_v55  ;;  %v16097_v55 = vld [vmem:[#allocation6 + $0x60] sm:$0xff]  }
 0x16c   : > { %13859 = vmatprep.subr.bf16.mxu0 %v16097_v55 }
 0x172   : > { %13838 = vmatmul.mubr.msk.bf16.gmra.mrb[12].mxu0 %vm233_vm0, %v1513_v40 }
 0x173   : > { %13843 = vmatprep.mubr.msk.bf16.mxu0 %vm233_vm0, %v19860_v29 }
 0x17a   : > { %13844 = vmatmul.mubr.msk.bf16.vlgmr.msra.gmra.mrb[0].mxu0 %vm233_vm0, %v19861_v46 }
 0x17b   : > { %13847 = vmatprep.mubr.msk.bf16.mxu0 %vm233_vm0, %v19862_v50  ;;  %13860 = vmatpush3.bf16.msra.mxu0 %v16097_v55 }
 0x17c   : > { %13877 = vmatprep.subr.bf16.mxu0 %v17346_v59 }
 0x182   : > { %13848 = vmatmul.mubr.msk.bf16.gmra.mrb[4].mxu0 %vm233_vm0, %v19863_v8 }
 0x183   : > { %13851 = vmatprep.mubr.msk.bf16.mxu0 %vm233_vm0, %v19864_v9 }
 0x18a   : > { %13852 = vmatmul.mubr.msk.bf16.gmra.mrb[8].mxu0 %vm233_vm0, %v19865_v49 }
 0x18b   : > { %13855 = vmatprep.mubr.msk.bf16.mxu0 %vm233_vm0, %v17208_v7  ;;  %v17358_v7 = vld [vmem:[#allocation2 + $0x88] sm:$0xff] }
 0x18c   : > { %3842 = vst.msk [vmem:[#allocation2 + $0x88] sm:$0xff] %vm233_vm0, %v19866_v57 }
 0x192   : > { %13856 = vmatmul.mubr.msk.bf16.gmra.mrb[12].mxu0 %vm233_vm0, %v1698_v52 }
 0x24d   : > { %v17362_v10 = vpop.f32.mrb[0].mxu0 }
 0x24e   : > { %v17364_v15 = vpop.f32.mrb[1].mxu0  ;;  %v1884_v43 = vmul.f32 %v17362_v10, %v17362_v10  ;;  %v1847_v54 = vsel %vm233_vm0, %v17362_v10, 0.0 }
 0x24f   : > { %v1882_v32 = vmul.f32 %v17364_v15, %v17364_v15  ;;  %v17368_v38 = vpop.f32.mrb[2].mxu0  ;;  %v1844_v39 = vsel %vm233_vm0, %v17364_v15, 0.0 }
 0x250   : > { %v17370_v42 = vpop.f32.mrb[3].mxu0  ;;  %v1885_v3 = vmul.f32 %v17368_v38, %v17368_v38  ;;  %v1901_v63 = vsel %vm233_vm0, %v1884_v43, 0.0  ;;  %v1849_v4 = vsel %vm233_vm0, %v17368_v38, 0.0 }
 0x251   : > { %v1845_v17 = vsel %vm233_vm0, %v17370_v42, 0.0  ;;  %v1883_v11 = vmul.f32 %v17370_v42, %v17370_v42  ;;  %v1898_v19 = vsel %vm233_vm0, %v1882_v32, 0.0 }
 0x252   : > { %v1846_v31 = vadd.f32 %v1845_v17, %v1844_v39  ;;  %v1903_v14 = vsel %vm233_vm0, %v1885_v3, 0.0 }
 0x253   : > { %v1899_v45 = vsel %vm233_vm0, %v1883_v11, 0.0 }
 0x254   : > { %v1848_v56 = vadd.f32 %v1847_v54, %v1846_v31  ;;  %v1900_v61 = vadd.f32 %v1899_v45, %v1898_v19 }
 0x255   : > { %v17389_v5 = vpop.f32.mrb[4].mxu0 }
 0x256   : > { %v1902_v6 = vadd.f32 %v1901_v63, %v1900_v61  ;;  %v17391_v12 = vpop.f32.mrb[5].mxu0  ;;  %v1850_v13 = vadd.f32 %v1849_v4, %v1848_v56  ;;  %v1888_v36 = vmul.f32 %v17389_v5, %v17389_v5  ;;  %v1855_v60 = vsel %vm233_vm0, %v17389_v5, 0.0 }
 0x257   : > { %v1851_v16 = vsel %vm233_vm0, %v17391_v12, 0.0  ;;  %v1886_v21 = vmul.f32 %v17391_v12, %v17391_v12  ;;  %v17398_v23 = vpop.f32.mrb[6].mxu0 }
 0x258   : > { %v1852_v22 = vadd.f32 %v1851_v16, %v1850_v13  ;;  %v1904_v25 = vadd.f32 %v1903_v14, %v1902_v6  ;;  %v17400_v26 = vpop.f32.mrb[7].mxu0  ;;  %v1889_v18 = vmul.f32 %v17398_v23, %v17398_v23  ;;  %v1909_v53 = vsel %vm233_vm0, %v1888_v36, 0.0 }
 0x259   : > { %v1905_v27 = vsel %vm233_vm0, %v1886_v21, 0.0  ;;  %v1853_v33 = vsel %vm233_vm0, %v17400_v26, 0.0  ;;  %v1887_v0 = vmul.f32 %v17400_v26, %v17400_v26  ;;  %v1857_v62 = vsel %vm233_vm0, %v17398_v23, 0.0 }
 0x25a   : > { %v1906_v58 = vadd.f32 %v1905_v27, %v1904_v25  ;;  %v1854_v47 = vadd.f32 %v1853_v33, %v1852_v22  ;;  %v1911_v34 = vsel %vm233_vm0, %v1889_v18, 0.0 }
 0x25b   : > { %v1907_v2 = vsel %vm233_vm0, %v1887_v0, 0.0 }
 0x25c   : > { %v1856_v44 = vadd.f32 %v1855_v60, %v1854_v47  ;;  %v1908_v30 = vadd.f32 %v1907_v2, %v1906_v58 }
 0x25d   : > { %v17417_v24 = vpop.f32.mrb[8].mxu0 }
 0x25e   : > { %v1910_v37 = vadd.f32 %v1909_v53, %v1908_v30  ;;  %v17419_v41 = vpop.f32.mrb[9].mxu0  ;;  %v1858_v28 = vadd.f32 %v1857_v62, %v1856_v44  ;;  %v1892_v48 = vmul.f32 %v17417_v24, %v17417_v24  ;;  %v1863_v43 = vsel %vm233_vm0, %v17417_v24, 0.0 }
 0x25f   : > { %v1859_v40 = vsel %vm233_vm0, %v17419_v41, 0.0  ;;  %v1890_v29 = vmul.f32 %v17419_v41, %v17419_v41  ;;  %v17426_v46 = vpop.f32.mrb[10].mxu0 }
 0x260   : > { %v1860_v50 = vadd.f32 %v1859_v40, %v1858_v28  ;;  %v1912_v8 = vadd.f32 %v1911_v34, %v1910_v37  ;;  %v17428_v9 = vpop.f32.mrb[11].mxu0  ;;  %v1893_v39 = vmul.f32 %v17426_v46, %v17426_v46  ;;  %v1917_v54 = vsel %vm233_vm0, %v1892_v48, 0.0 }
 0x261   : > { %v1913_v49 = vsel %vm233_vm0, %v1890_v29, 0.0  ;;  %v1861_v51 = vsel %vm233_vm0, %v17428_v9, 0.0  ;;  %v1891_v52 = vmul.f32 %v17428_v9, %v17428_v9  ;;  %v1865_v19 = vsel %vm233_vm0, %v17426_v46, 0.0 }
 0x262   : > { %v1914_v55 = vadd.f32 %v1913_v49, %v1912_v8  ;;  %v1862_v32 = vadd.f32 %v1861_v51, %v1860_v50  ;;  %v1919_v63 = vsel %vm233_vm0, %v1893_v39, 0.0 }
 0x263   : > { %v1915_v17 = vsel %vm233_vm0, %v1891_v52, 0.0 }
 0x264   : > { %v1864_v11 = vadd.f32 %v1863_v43, %v1862_v32  ;;  %v1916_v31 = vadd.f32 %v1915_v17, %v1914_v55 }
 0x265   : > { %v17445_v3 = vpop.f32.mrb[12].mxu0 }
 0x266   : > { %v1918_v45 = vadd.f32 %v1917_v54, %v1916_v31  ;;  %v17447_v56 = vpop.f32.mrb[13].mxu0  ;;  %v1866_v61 = vadd.f32 %v1865_v19, %v1864_v11  ;;  %v1896_v22 = vmul.f32 %v17445_v3, %v17445_v3  ;;  %v1871_v58 = vsel %vm233_vm0, %v17445_v3, 0.0  ;;  %v1938_v19 = vld [vmem:[#allocation8] sm:$0x1] }
 0x267   : > { %v1867_v4 = vsel %vm233_vm0, %v17447_v56, 0.0  ;;  %v1894_v6 = vmul.f32 %v17447_v56, %v17447_v56  ;;  %v17454_v13 = vpop.f32.mrb[14].mxu0 }
 0x268   : > { %v1868_v14 = vadd.f32 %v1867_v4, %v1866_v61  ;;  %v1920_v16 = vadd.f32 %v1919_v63, %v1918_v45  ;;  %v1816_v21 = vpop.f32.mrb[15].mxu0  ;;  %v1897_v47 = vmul.f32 %v17454_v13, %v17454_v13  ;;  %v1925_v44 = vsel %vm233_vm0, %v1896_v22, 0.0  ;;  %v1939_v4 = vld [vmem:[#allocation8 + $0x1] sm:$0x1] }
 0x269   : > { %v1921_v25 = vsel %vm233_vm0, %v1894_v6, 0.0  ;;  %v1869_v36 = vsel %vm233_vm0, %v1816_v21, 0.0  ;;  %v1895_v27 = vmul.f32 %v1816_v21, %v1816_v21  ;;  %v1873_v30 = vsel %vm233_vm0, %v17454_v13, 0.0 }
 0x26a   : > { %v1922_v33 = vadd.f32 %v1921_v25, %v1920_v16  ;;  %v1870_v0 = vadd.f32 %v1869_v36, %v1868_v14  ;;  %v1927_v37 = vsel %vm233_vm0, %v1897_v47, 0.0  ;;  %v17470_v45 = vsub.s32 0, %v16875_v20  ;;  %v16313_v20 = vld [vmem:[#allocation6 + $0x688] sm:$0xff]  }
 0x26b   : > { %v1923_v60 = vsel %vm233_vm0, %v1895_v27, 0.0 }
 0x26c   : > { %v1872_v18 = vadd.f32 %v1871_v58, %v1870_v0  ;;  %v1924_v2 = vadd.f32 %v1923_v60, %v1922_v33  ;;  %19867 = vst [vmem:[#allocation19_spill] sm:$0xff] %v17470_v45 }
 0x26e   : > { %v1874_v53 = vadd.f32 %v1873_v30, %v1872_v18  ;;  %v1926_v62 = vadd.f32 %v1925_v44, %v1924_v2 }
 0x270   : > { %v1875_v28 = vrot.slane %v1874_v53, 4  ;;  %v1928_v34 = vadd.f32 %v1927_v37, %v1926_v62 }
 0x272   : > { %v1876_v40 = vadd.f32 %v1875_v28, %v1874_v53  ;;  %v1929_v29 = vrot.slane %v1928_v34, 4 }
 0x274   : > { %v1877_v50 = vrot.slane %v1876_v40, 2  ;;  %v1930_v8 = vadd.f32 %v1929_v29, %v1928_v34 }
 0x276   : > { %v1878_v48 = vadd.f32 %v1877_v50, %v1876_v40  ;;  %v1931_v49 = vrot.slane %v1930_v8, 2 }
 0x278   : > { %v1879_v51 = vrot.slane %v1878_v48, 1  ;;  %v1932_v52 = vadd.f32 %v1931_v49, %v1930_v8 }
 0x27a   : > { %v1880_v55 = vadd.f32 %v1879_v51, %v1878_v48  ;;  %v1933_v32 = vrot.slane %v1932_v52, 1 }
 0x27c   : > { %v1881_v43 = vmul.f32 0.0078125, %v1880_v55  ;;  %v1934_v39 = vadd.f32 %v1933_v32, %v1932_v52 }
 0x27e   : > { %v1935_v17 = vmul.f32 0.0078125, %v1934_v39  ;;  %v1936_v11 = vmul.f32 %v1881_v43, %v1881_v43 }
 0x280   : > { %v1937_v31 = vsub.f32 %v1935_v17, %v1936_v11 }
 0x282   : > { %v1940_v54 = vadd.f32 1e-05, %v1937_v31 }
 0x284   : > { %16430 = vrsqrt.f32 %v1940_v54 }
 0x28e   : > { %v16431_v61 = vpop.eup %16430 }
 0x28f   : > { %v1942_v63 = vmul.f32 %v16431_v61, %v1938_v19 }
 0x291   : > { %v17473_v6 = vrot.slane %v1942_v63, %v17470_v45  ;;  %v1963_v14 = vmul.f32 %v1942_v63, %v1881_v43 }
 0x293   : > { %v1960_v16 = vmul.f32 %v17473_v6, %v1816_v21  ;;  %v1964_v22 = vsub.f32 %v1939_v4, %v1963_v14  ;;  %v1947_v25 = vmul.f32 %v17473_v6, %v17364_v15  ;;  %v1948_v36 = vmul.f32 %v17473_v6, %v17370_v42 }
 0x294   : > { %v1949_v27 = vmul.f32 %v17362_v10, %v17473_v6  ;;  %v1950_v33 = vmul.f32 %v17368_v38, %v17473_v6  ;;  %v1951_v0 = vmul.f32 %v17473_v6, %v17391_v12  ;;  %v1952_v58 = vmul.f32 %v17473_v6, %v17400_v26 }
 0x295   : > { %v17489_v21 = vrot.slane %v1964_v22, %v17470_v45  ;;  %v1953_v15 = vmul.f32 %v17389_v5, %v17473_v6  ;;  %v1954_v42 = vmul.f32 %v17398_v23, %v17473_v6  ;;  %v1955_v10 = vmul.f32 %v17473_v6, %v17419_v41 }
 0x296   : > { %v1956_v38 = vmul.f32 %v17473_v6, %v17428_v9  ;;  %v1957_v12 = vmul.f32 %v17417_v24, %v17473_v6  ;;  %v1958_v26 = vmul.f32 %v17426_v46, %v17473_v6  ;;  %v1959_v47 = vmul.f32 %v17473_v6, %v17447_v56 }
 0x297   : > { %v1982_v5 = vadd.f32 %v17489_v21, %v1960_v16  ;;  %v1969_v60 = vadd.f32 %v17489_v21, %v1947_v25  ;;  %v1970_v23 = vadd.f32 %v17489_v21, %v1948_v36  ;;  %v1971_v41 = vadd.f32 %v17489_v21, %v1949_v27 }
 0x298   : > { %v1972_v18 = vadd.f32 %v17489_v21, %v1950_v33  ;;  %v1973_v9 = vadd.f32 %v17489_v21, %v1951_v0  ;;  %v1974_v24 = vadd.f32 %v17489_v21, %v1952_v58  ;;  %v1975_v2 = vadd.f32 %v17489_v21, %v1953_v15 }
 0x299   : > { %vm1998_vm3 = vcmp.ge.f32.partialorder %v1982_v5, 0.0  ;;  %v2014_v46 = vmul.f32 0.3, %v1982_v5  ;;  %vm1985_vm4 = vcmp.ge.f32.partialorder %v1969_v60, 0.0  ;;  %v2001_v56 = vmul.f32 0.3, %v1969_v60 }
 0x29a   : > { %vm1986_vm5 = vcmp.ge.f32.partialorder %v1970_v23, 0.0  ;;  %vm1987_vm6 = vcmp.ge.f32.partialorder %v1971_v41, 0.0  ;;  %v2002_v44 = vmul.f32 0.3, %v1970_v23  ;;  %v2003_v30 = vmul.f32 0.3, %v1971_v41 }
 0x29b   : > { %v17513_v53 = vsel %vm1998_vm3, %v1982_v5, %v2014_v46  ;;  %v17515_v62 = vsel %vm1985_vm4, %v1969_v60, %v2001_v56  ;;  %vm1988_vm7 = vcmp.ge.f32.partialorder %v1972_v18, 0.0  ;;  %vm1989_vm8 = vcmp.ge.f32.partialorder %v1973_v9, 0.0 }
 0x29c   : > { %19868 = vst [vmem:[#allocation13_spill] sm:$0xff] %v17513_v53  ;;  %19869 = vst [vmem:[#allocation14_spill] sm:$0xff] %v17515_v62  ;;  %v17521_v37 = vsel %vm1986_vm5, %v1970_v23, %v2002_v44  ;;  %v17523_v28 = vsel %vm1987_vm6, %v1971_v41, %v2003_v30  ;;  %v2004_v34 = vmul.f32 0.3, %v1972_v18  ;;  %v2005_v40 = vmul.f32 0.3, %v1973_v9 }
 0x29d   : > { %2048 = vst.msk [vmem:[#allocation2 + $0x70] sm:$0xff] %vm233_vm0, %v17513_v53  ;;  %2035 = vst.msk [vmem:[#allocation2 + $0x8] sm:$0xff] %vm233_vm0, %v17515_v62  ;;  %vm1990_vm9 = vcmp.ge.f32.partialorder %v1974_v24, 0.0  ;;  %vm1991_vm10 = vcmp.ge.f32.partialorder %v1975_v2, 0.0  ;;  %v2006_v29 = vmul.f32 0.3, %v1974_v24  ;;  %v1976_v49 = vadd.f32 %v17489_v21, %v1954_v42 }
 0x29e   : > { %19870 = vst [vmem:[#allocation15_spill] sm:$0xff] %v17521_v37  ;;  %19871 = vst [vmem:[#allocation16_spill] sm:$0xff] %v17523_v28  ;;  %v2007_v50 = vmul.f32 0.3, %v1975_v2  ;;  %v17529_v8 = vsel %vm1988_vm7, %v1972_v18, %v2004_v34  ;;  %v17531_v48 = vsel %vm1989_vm8, %v1973_v9, %v2005_v40  ;;  %v1977_v51 = vadd.f32 %v17489_v21, %v1955_v10 }
 0x29f   : > { %2036 = vst.msk [vmem:[#allocation2 + $0x10] sm:$0xff] %vm233_vm0, %v17521_v37  ;;  %2037 = vst.msk [vmem:[#allocation2 + $0x18] sm:$0xff] %vm233_vm0, %v17523_v28  ;;  %v17539_v52 = vsel %vm1990_vm9, %v1974_v24, %v2006_v29  ;;  %v1978_v32 = vadd.f32 %v17489_v21, %v1956_v38  ;;  %v1979_v43 = vadd.f32 %v17489_v21, %v1957_v12  ;;  %vm1992_vm11 = vcmp.ge.f32.partialorder %v1976_v49, 0.0 }
 0x2a0   : > { %19872 = vst [vmem:[#allocation17_spill] sm:$0xff] %v17529_v8  ;;  %19873 = vst [vmem:[#allocation18_spill] sm:$0xff] %v17531_v48  ;;  %v17541_v55 = vsel %vm1991_vm10, %v1975_v2, %v2007_v50  ;;  %vm1993_vm12 = vcmp.ge.f32.partialorder %v1977_v51, 0.0  ;;  %v2008_v39 = vmul.f32 0.3, %v1976_v49  ;;  %v1980_v61 = vadd.f32 %v17489_v21, %v1958_v26  ;;  %v17651_v50 = vld [vmem:[#allocation6 + $0x50] sm:$0xff]  }
 0x2a1   : > { %2038 = vst.msk [vmem:[#allocation2 + $0x20] sm:$0xff] %vm233_vm0, %v17529_v8  ;;  %2039 = vst.msk [vmem:[#allocation2 + $0x28] sm:$0xff] %vm233_vm0, %v17531_v48  ;;  %v2009_v17 = vmul.f32 0.3, %v1977_v51  ;;  %vm1994_vm13 = vcmp.ge.f32.partialorder %v1978_v32, 0.0  ;;  %vm1995_vm14 = vcmp.ge.f32.partialorder %v1979_v43, 0.0  ;;  %v1981_v63 = vadd.f32 %v17489_v21, %v1959_v47 }
 0x2a2   : > { %19874 = vst [vmem:[#allocation20_spill] sm:$0xff] %v17539_v52  ;;  %19875 = vst [vmem:[#allocation21_spill] sm:$0xff] %v17541_v55  ;;  %v2010_v11 = vmul.f32 0.3, %v1978_v32  ;;  %v2011_v31 = vmul.f32 0.3, %v1979_v43  ;;  %v17549_v54 = vsel %vm1992_vm11, %v1976_v49, %v2008_v39  ;;  %v1961_v22 = vmul.f32 %v17445_v3, %v17473_v6 }
 0x2a3   : > { %2040 = vst.msk [vmem:[#allocation2 + $0x30] sm:$0xff] %vm233_vm0, %v17539_v52  ;;  %2041 = vst.msk [vmem:[#allocation2 + $0x38] sm:$0xff] %vm233_vm0, %v17541_v55  ;;  %v17551_v19 = vsel %vm1993_vm12, %v1977_v51, %v2009_v17  ;;  %v17569_v25 = vmul.f32 %v17454_v13, %v17473_v6  ;;  %vm1996_vm15 = vcmp.ge.f32.partialorder %v1980_v61, 0.0  ;;  %vm1997_vm3 = vcmp.ge.f32.partialorder %v1981_v63, 0.0 }
 0x2a4   : > { %19876 = vst [vmem:[#allocation22_spill] sm:$0xff] %v17549_v54  ;;  %19877 = vst [vmem:[#allocation23_spill] sm:$0xff] %v17551_v19  ;;  %v17555_v4 = vld [vmem:[#allocation2 + $0x8] sm:$0xff]  ;;  %v17561_v14 = vsel %vm1994_vm13, %v1978_v32, %v2010_v11  ;;  %v17563_v16 = vsel %vm1995_vm14, %v1979_v43, %v2011_v31  ;;  %v2012_v3 = vmul.f32 0.3, %v1980_v61  ;;  %v1983_v0 = vadd.f32 %v17489_v21, %v1961_v22 }
 0x2a5   : > { %2042 = vst.msk [vmem:[#allocation2 + $0x40] sm:$0xff] %vm233_vm0, %v17549_v54  ;;  %2043 = vst.msk [vmem:[#allocation2 + $0x48] sm:$0xff] %vm233_vm0, %v17551_v19  ;;  %v2109_v36 = vpack.c.bf16 %v17555_v4, %v17348_v1  ;;  %v2013_v6 = vmul.f32 0.3, %v1981_v63  ;;  %vm16629_vm6 = vmmov 0  }
 0x2a6   : > { %19878 = vst [vmem:[#allocation24_spill] sm:$0xff] %v17561_v14  ;;  %19879 = vst [vmem:[#allocation25_spill] sm:$0xff] %v17563_v16  ;;  %v17573_v27 = vld [vmem:[#allocation2 + $0x10] sm:$0xff]  ;;  %v17575_v33 = vld [vmem:[#allocation2 + $0x18] sm:$0xff]  ;;  %v17591_v42 = vsel %vm1996_vm15, %v1980_v61, %v2012_v3  ;;  %vm1999_vm4 = vcmp.ge.f32.partialorder %v1983_v0, 0.0  ;;  %v2374_v3 = vrot.slane %v17555_v4, 1 }
 0x2a7   : > { %2044 = vst.msk [vmem:[#allocation2 + $0x50] sm:$0xff] %vm233_vm0, %v17561_v14  ;;  %2045 = vst.msk [vmem:[#allocation2 + $0x58] sm:$0xff] %vm233_vm0, %v17563_v16  ;;  %v17583_v13 = vpack.c.bf16 %v17575_v33, %v17573_v27  ;;  %13861 = vmatprep.mubr.msk.bf16.mxu0 %vm233_vm0, %v2109_v36  ;;  %v17605_v5 = vsel %vm1997_vm3, %v1981_v63, %v2013_v6  ;;  %v2015_v9 = vmul.f32 0.3, %v1983_v0  ;;  %v17692_v36 = vld [vmem:[#allocation2 + $0x70] sm:$0xff]  ;;  %v2067_v6 = vrot.slane %v17348_v1, 7 }
 0x2a8   : > { %v17587_v58 = vld [vmem:[#allocation2 + $0x20] sm:$0xff]  ;;  %v17589_v15 = vld [vmem:[#allocation2 + $0x28] sm:$0xff]  ;;  %19880 = vst [vmem:[#allocation26_spill] sm:$0xff] %v17591_v42  ;;  %19882 = vst [vmem:[#allocation28_spill] sm:$0xff] %v17605_v5  ;;  %v2376_v37 = vrot.slane %v17575_v33, 1  ;;  %v2387_v28 = vrot.slane %v17692_v36, 1 }
 0x2a9   : > { %13862 = vmatmul.mubr.msk.bf16.vlgmr.msra.gmra.mrb[16].mxu0 %vm233_vm0, %v17583_v13  ;;  %v17597_v10 = vpack.c.bf16 %v17589_v15, %v17587_v58  ;;  %v2071_v38 = vrot.slane %v17587_v58, 7  ;;  %v2072_v12 = vrot.slane %v17589_v15, 7  ;;  %2046 = vst.msk [vmem:[#allocation2 + $0x60] sm:$0xff] %vm233_vm0, %v17591_v42  ;;  %2047 = vst.msk [vmem:[#allocation2 + $0x68] sm:$0xff] %vm233_vm0, %v17605_v5  ;;  %v17658_v32 = vsel %vm1999_vm4, %v1983_v0, %v2015_v9 }
 0x2aa   : > { %v17601_v26 = vld [vmem:[#allocation2 + $0x30] sm:$0xff]  ;;  %v17603_v47 = vld [vmem:[#allocation2 + $0x38] sm:$0xff]  ;;  %13878 = vmatpush3.bf16.msra.mxu0 %v17346_v59  ;;  %19883 = vst [vmem:[#allocation29_spill] sm:$0xff] %v17658_v32  ;;  %2049 = vst.msk [vmem:[#allocation2 + $0x78] sm:$0xff] %vm233_vm0, %v17658_v32  ;;  %v2081_v9 = vrot.slane %v17692_v36, 7  ;;  %v2083_v16 = vsel %vm256_vm1, %v2067_v6, 0.0 }
 0x2ab   : > { %19881 = vst [vmem:[#allocation27_spill] sm:$0xff] %v17597_v10  ;;  %v2073_v60 = vrot.slane %v17601_v26, 7  ;;  %v2074_v23 = vrot.slane %v17603_v47, 7  ;;  %13865 = vmatprep.mubr.msk.bf16.mxu0 %vm233_vm0, %v17597_v10  ;;  %v17618_v41 = vsel %vm256_vm1, %v2071_v38, 0.0  ;;  %v17622_v18 = vsel %vm256_vm1, %v2072_v12, 0.0  ;;  %14021 = vmatprep.subr.bf16.mxu0 %v19866_v57 }
 0x2ac   : > { %v17627_v24 = vpack.c.bf16 %v17622_v18, %v17618_v41  ;;  %v17637_v46 = vld [vmem:[#allocation2 + $0x40] sm:$0xff]  ;;  %v17639_v56 = vld [vmem:[#allocation2 + $0x48] sm:$0xff]  ;;  %v17672_v17 = vpack.c.bf16 %v17603_v47, %v17601_v26  ;;  %v17760_v6 = vsel %vm256_vm1, %v2081_v9, 0.0  ;;  %v2377_v55 = vrot.slane %v17587_v58, 1 }
 0x2ad   : > { %v17631_v59 = vsel %vm256_vm1, %v2073_v60, 0.0  ;;  %v17635_v2 = vsel %vm256_vm1, %v2074_v23, 0.0  ;;  %v2075_v30 = vrot.slane %v17637_v46, 7  ;;  %v2076_v34 = vrot.slane %v17639_v56, 7 }
 0x2ae   : > { %v17643_v44 = vpack.c.bf16 %v17635_v2, %v17631_v59  ;;  %v17647_v40 = vld [vmem:[#allocation2 + $0x50] sm:$0xff]  ;;  %v17649_v29 = vld [vmem:[#allocation2 + $0x58] sm:$0xff]  ;;  %13883 = vmatprep.mubr.msk.bf16.mxu1 %vm233_vm0, %v17627_v24  ;;  %19884 = vst [vmem:[#allocation30_spill] sm:$0xff] %v17672_v17  ;;  %v17683_v31 = vpack.c.bf16 %v17639_v56, %v17637_v46  ;;  %v2378_v8 = vrot.slane %v17589_v15, 1  ;;  %v2379_v62 = vrot.slane %v17601_v26, 1 }
 0x2af   : > { %v2077_v49 = vrot.slane %v17647_v40, 7  ;;  %v2078_v51 = vrot.slane %v17649_v29, 7  ;;  %v17664_v43 = vsel %vm256_vm1, %v2075_v30, 0.0  ;;  %v17668_v39 = vsel %vm256_vm1, %v2076_v34, 0.0 }
 0x2b0   : > { %13884 = vmatmul.mubr.msk.bf16.vlgmr.msra.gmra.mrb[0].mxu1 %vm233_vm0, %v17643_v44  ;;  %v17679_v11 = vpack.c.bf16 %v17668_v39, %v17664_v43  ;;  %19885 = vst [vmem:[#allocation31_spill] sm:$0xff] %v17683_v31  ;;  %v17685_v61 = vld [vmem:[#allocation2 + $0x60] sm:$0xff]  ;;  %v17689_v63 = vld [vmem:[#allocation2 + $0x68] sm:$0xff]  ;;  %v2382_v32 = vrot.slane %v17639_v56, 1  ;;  %v2383_v42 = vrot.slane %v17647_v40, 1  ;;  %v2384_v19 = vrot.slane %v17649_v29, 1 }
 0x2b1   : > { %13896 = vmatpush3.bf16.msra.mxu1 %v17355_v35  ;;  %13866 = vmatmul.mubr.msk.bf16.gmra.mrb[20].mxu0 %vm233_vm0, %v17672_v17  ;;  %v2079_v22 = vrot.slane %v17685_v61, 7  ;;  %v2373_v35 = vrot.slane %v17348_v1, 1  ;;  %v17704_v0 = vsel %vm256_vm1, %v2077_v49, 0.0  ;;  %v17708_v38 = vsel %vm256_vm1, %v2078_v51, 0.0 }
 0x2b2   : > { %13913 = vmatprep.subr.bf16.mxu1 %v17651_v50  ;;  %13887 = vmatprep.mubr.msk.bf16.mxu1 %vm233_vm0, %v17679_v11  ;;  %v2080_v12 = vrot.slane %v17689_v63, 7  ;;  %v2068_v1 = vrot.slane %v17555_v4, 7  ;;  %v17723_v30 = vpack.c.bf16 %v17708_v38, %v17704_v0  ;;  %v2375_v49 = vrot.slane %v17573_v27, 1 }
 0x2b3   : > { %13869 = vmatprep.mubr.msk.bf16.mxu0 %vm233_vm0, %v17683_v31  ;;  %v17714_v60 = vsel %vm256_vm1, %v2079_v22, 0.0  ;;  %v2389_v34 = vsel %vm257_vm2, %v2373_v35, 0.0  ;;  %v17732_v22 = vld [vmem:[#allocation2 + $0x78] sm:$0xff]  ;;  %v17748_v35 = vpack.c.bf16 %v17649_v29, %v17647_v40  ;;  %v2386_v52 = vrot.slane %v17689_v63, 1 }
 0x2b4   : > { %v17718_v23 = vsel %vm256_vm1, %v2080_v12, 0.0  ;;  %v17736_v12 = vsel %vm257_vm2, %v2374_v3, 0.0  ;;  %v17742_v54 = vsel %vm256_vm1, %v2068_v1, 0.0  ;;  %v2082_v48 = vrot.slane %v17732_v22, 7 }
 0x2b5   : > { %v17730_v51 = vpack.c.bf16 %v17718_v23, %v17714_v60  ;;  %19886 = vst [vmem:[#allocation32_spill] sm:$0xff] %v17748_v35  ;;  %v17756_v3 = vpack.c.bf16 %v17689_v63, %v17685_v61  ;;  %v2405_v1 = vpack.c.bf16 %v17736_v12, %v2389_v34  ;;  %v2099_v5 = vpack.c.bf16 %v17742_v54, %v2083_v16 }
 0x2b6   : > { %v17768_v14 = vsel %vm257_vm2, %v2375_v49, 0.0  ;;  %v17775_v9 = vsel %vm256_vm1, %v2082_v48, 0.0  ;;  %v2380_v34 = vrot.slane %v17603_v47, 1  ;;  %v17782_v16 = vsel %vm257_vm2, %v2376_v37, 0.0 }
 0x2b7   : > { %19887 = vst [vmem:[#allocation33_spill] sm:$0xff] %v17756_v3  ;;  %v2381_v49 = vrot.slane %v17637_v46, 1  ;;  %v2385_v48 = vrot.slane %v17685_v61, 1  ;;  %v17793_v53 = vpack.c.bf16 %v17775_v9, %v17760_v6  ;;  %v17797_v37 = vsel %vm257_vm2, %v2377_v55, 0.0 }
 0x2b8   : > { %13888 = vmatmul.mubr.msk.bf16.gmra.mrb[4].mxu1 %vm233_vm0, %v17723_v30  ;;  %v2069_v45 = vrot.slane %v17573_v27, 7  ;;  %v17807_v31 = vsel %vm257_vm2, %v2378_v8, 0.0  ;;  %v17811_v57 = vsel %vm257_vm2, %v2379_v62, 0.0  ;;  %v17815_v55 = vsel %vm257_vm2, %v2380_v34, 0.0 }
 0x2b9   : > { %13891 = vmatprep.mubr.msk.bf16.mxu1 %vm233_vm0, %v17730_v51  ;;  %13870 = vmatmul.mubr.msk.bf16.gmra.mrb[24].mxu0 %vm233_vm0, %v17748_v35  ;;  %v17803_v35 = vpack.c.bf16 %v17732_v22, %v17692_v36  ;;  %v17821_v17 = vsel %vm257_vm2, %v2381_v49, 0.0  ;;  %v17825_v10 = vsel %vm257_vm2, %v2382_v32, 0.0  ;;  %v17829_v8 = vsel %vm257_vm2, %v2383_v42, 0.0 }
 0x2ba   : > { %13873 = vmatprep.mubr.msk.bf16.mxu0 %vm233_vm0, %v17756_v3  ;;  %v2070_v3 = vrot.slane %v17575_v33, 7  ;;  %v1984_v62 = vadd.f32 %v17489_v21, %v17569_v25  ;;  %v17836_v34 = vsel %vm257_vm2, %v2384_v19, 0.0  ;;  %v17840_v49 = vsel %vm257_vm2, %v2385_v48, 0.0 }
 0x2bb   : > { %19888 = vst [vmem:[#allocation34_spill] sm:$0xff] %v17803_v35  ;;  %v17844_v32 = vsel %vm257_vm2, %v2386_v52, 0.0  ;;  %v17848_v42 = vsel %vm257_vm2, %v2387_v28, 0.0  ;;  %v2085_v25 = vsel %vm256_vm1, %v2069_v45, 0.0  ;;  %v17894_v45 = vpack.c.bf16 %v17815_v55, %v17811_v57 }
 0x2bc   : > { %vm2000_vm5 = vcmp.ge.f32.partialorder %v1984_v62, 0.0  ;;  %v2016_v21 = vmul.f32 0.3, %v1984_v62  ;;  %v2086_v52 = vsel %vm256_vm1, %v2070_v3, 0.0  ;;  %v17898_v3 = vpack.c.bf16 %v17825_v10, %v17821_v17 }
 0x2bd   : > { %19891 = vst [vmem:[#allocation37_spill] sm:$0xff] %v17894_v45  ;;  %v2388_v28 = vrot.slane %v17732_v22, 1 }
 0x2be   : > { %v17863_v48 = vsel %vm2000_vm5, %v1984_v62, %v2016_v21  ;;  %v16101_v62 = vld [vmem:[#allocation6 + $0x68] sm:$0xff]   ;;  %v17881_v21 = vpack.c.bf16 %v17807_v31, %v17797_v37  ;;  %19892 = vst [vmem:[#allocation38_spill] sm:$0xff] %v17898_v3 }
 0x2bf   : > { %19889 = vst [vmem:[#allocation35_spill] sm:$0xff] %v17863_v48  ;;  %2050 = vst.msk [vmem:[#allocation2 + $0x80] sm:$0xff] %vm233_vm0, %v17863_v48  ;;  %v2404_v19 = vsel %vm257_vm2, %v2388_v28, 0.0 }
 0x2c0   : > { %13892 = vmatmul.mubr.msk.bf16.gmra.mrb[8].mxu1 %vm233_vm0, %v17793_v53  ;;  %19890 = vst [vmem:[#allocation36_spill] sm:$0xff] %v17881_v21  ;;  %v17920_v48 = vpack.c.bf16 %v2404_v19, %v17848_v42 }
 0x2c1   : > { %13897 = vmatprep.mubr.msk.bf16.mxu1 %vm233_vm0, %v2405_v1  ;;  %13874 = vmatmul.mubr.msk.bf16.gmra.mrb[28].mxu0 %vm233_vm0, %v17803_v35  ;;  %v17877_v1 = vpack.c.bf16 %v17782_v16, %v17768_v14  ;;  %v17910_v35 = vpack.c.bf16 %v17844_v32, %v17840_v49 }
 0x2c2   : > { %13879 = vmatprep.mubr.msk.bf16.mxu0 %vm233_vm0, %v2099_v5  ;;  %v17885_v5 = vpack.c.bf16 %v2086_v52, %v2085_v25 }
 0x2c8   : > { %13898 = vmatmul.mubr.msk.bf16.vlgmr.msra.gmra.mrb[12].mxu1 %vm233_vm0, %v17877_v1 }
 0x2c9   : > { %13914 = vmatpush3.bf16.msra.mxu1 %v17651_v50  ;;  %13901 = vmatprep.mubr.msk.bf16.mxu1 %vm233_vm0, %v17881_v21  ;;  %v17906_v50 = vpack.c.bf16 %v17836_v34, %v17829_v8  ;;  %v16102_v21 = vld [vmem:[#allocation6 + $0x80] sm:$0xff]  }
 0x2ca   : > { %13880 = vmatmul.mubr.msk.bf16.vlgmr.msra.gmra.mrb[16].mxu0 %vm233_vm0, %v17885_v5  ;;  %13931 = vmatprep.subr.bf16.mxu1 %v16101_v62 }
 0x2cb   : > { %19893 = vst [vmem:[#allocation39_spill] sm:$0xff] %v17906_v50 }
 0x2d0   : > { %13902 = vmatmul.mubr.msk.bf16.gmra.mrb[0].mxu1 %vm233_vm0, %v17894_v45  ;;  %v2607_v45 = vpack.c.bf16 %v17618_v41, %v2086_v52  ;;  %v17937_v41 = vld [vmem:[#allocation2 + $0x80] sm:$0xff] }
 0x2d1   : > { %13905 = vmatprep.mubr.msk.bf16.mxu1 %vm233_vm0, %v17898_v3  ;;  %v2606_v3 = vpack.c.bf16 %v2085_v25, %v17742_v54  ;;  %v2609_v54 = vpack.c.bf16 %v17664_v43, %v17635_v2  ;;  %v2610_v25 = vpack.c.bf16 %v17704_v0, %v17668_v39  ;;  %v2589_v52 = vrot.slane %v17937_v41, 7 }
 0x2d2   : > { %v2759_v39 = vpack.c.bf16 %v17573_v27, %v17555_v4  ;;  %v2760_v0 = vpack.c.bf16 %v17587_v58, %v17575_v33  ;;  %v2762_v4 = vpack.c.bf16 %v17637_v46, %v17603_v47  ;;  %v2763_v27 = vpack.c.bf16 %v17647_v40, %v17639_v56  ;;  %v16104_v47 = vld [vmem:[#allocation6 + $0x70] sm:$0xff]  }
 0x2d3   : > { %v2605_v2 = vsel %vm256_vm1, %v2589_v52, 0.0  ;;  %v2764_v33 = vpack.c.bf16 %v17685_v61, %v17649_v29  ;;  %v2765_v58 = vpack.c.bf16 %v17692_v36, %v17689_v63  ;;  %v19895_v46 = vpack.c.bf16 %v17797_v37, %v17782_v16  ;;  %v19908_v16 = vld [vmem:[#allocation36_spill] sm:$0xff] }
 0x2d4   : > { %v2613_v43 = vpack.c.bf16 %v2605_v2, %v17775_v9  ;;  %v19896_v56 = vpack.c.bf16 %v17811_v57, %v17807_v31  ;;  %v19897_v40 = vpack.c.bf16 %v17821_v17, %v17815_v55  ;;  %v2927_v29 = vrot.slane %v17937_v41, 1  ;;  %v19909_v55 = vld [vmem:[#allocation37_spill] sm:$0xff] }
 0x2d5   : > { %v19899_v61 = vpack.c.bf16 %v17840_v49, %v17836_v34  ;;  %v19900_v57 = vpack.c.bf16 %v17848_v42, %v17844_v32  ;;  %v3128_v63 = vrot.slane %v17358_v7, 7  ;;  %v19910_v32 = vld [vmem:[#allocation38_spill] sm:$0xff] }
 0x2d6   : > { %v2943_v17 = vsel %vm257_vm2, %v2927_v29, 0.0 }
 0x2d7   : > { %v2951_v31 = vpack.c.bf16 %v2943_v17, %v2404_v19  ;;  %v19911_v19 = vld [vmem:[#allocation39_spill] sm:$0xff] }
 0x2d8   : > { %13906 = vmatmul.mubr.msk.bf16.gmra.mrb[4].mxu1 %vm233_vm0, %v17906_v50  ;;  %v2608_v50 = vpack.c.bf16 %v17631_v59, %v17622_v18  ;;  %v2611_v18 = vpack.c.bf16 %v17714_v60, %v17708_v38  ;;  %v2612_v59 = vpack.c.bf16 %v17760_v6, %v17718_v23  ;;  %v16103_v38 = vld [vmem:[#allocation6 + $0x58] sm:$0xff]   ;;  %v2761_v60 = vpack.c.bf16 %v17601_v26, %v17589_v15 }
 0x2d9   : > { %13909 = vmatprep.mubr.msk.bf16.mxu1 %vm233_vm0, %v17910_v35  ;;  %v2766_v15 = vpack.c.bf16 %v17937_v41, %v17732_v22  ;;  %v19894_v26 = vpack.c.bf16 %v17768_v14, %v17736_v12  ;;  %v19898_v14 = vpack.c.bf16 %v17829_v8, %v17825_v10  ;;  %v16105_v10 = vld [vmem:[#allocation6 + $0x88] sm:$0xff]   ;;  %v19903_v23 = vmov 0.0   ;;  %v19907_v22 = vld [vmem:[#allocation34_spill] sm:$0xff] }
 0x2da   : > { %14023 = vmatprep.mubr.msk.bf16.mxu0 %vm16629_vm6, %v19903_v23 }
 0x2e0   : > { %13910 = vmatmul.mubr.msk.bf16.gmra.mrb[8].mxu1 %vm233_vm0, %v17920_v48 }
 0x2e1   : > { %13915 = vmatprep.mubr.msk.bf16.mxu1 %vm233_vm0, %v2606_v3 }
 0x2e8   : > { %13916 = vmatmul.mubr.msk.bf16.vlgmr.msra.gmra.mrb[12].mxu1 %vm233_vm0, %v2607_v45 }
 0x2e9   : > { %13932 = vmatpush3.bf16.msra.mxu1 %v16101_v62  ;;  %13919 = vmatprep.mubr.msk.bf16.mxu1 %vm233_vm0, %v2608_v50  ;;  %v3466_v62 = vrot.slane %v17358_v7, 1 }
 0x2ea   : > { %13949 = vmatprep.subr.bf16.mxu1 %v16102_v21 }
 0x2eb   : > { %v3482_v45 = vsel %vm257_vm2, %v3466_v62, 0.0 }
 0x2ec   : > { %v3490_v50 = vpack.c.bf16 %v3482_v45, %v2943_v17 }
 0x2f0   : > { %13920 = vmatmul.mubr.msk.bf16.gmra.mrb[0].mxu1 %vm233_vm0, %v2609_v54 }
 0x2f1   : > { %13923 = vmatprep.mubr.msk.bf16.mxu1 %vm233_vm0, %v2610_v25 }
 0x2f8   : > { %13924 = vmatmul.mubr.msk.bf16.gmra.mrb[4].mxu1 %vm233_vm0, %v2611_v18  ;;  %v16106_v18 = vld [vmem:[#allocation6 + $0xa8] sm:$0xff]  }
 0x2f9   : > { %13927 = vmatprep.mubr.msk.bf16.mxu1 %vm233_vm0, %v2612_v59  ;;  %14022 = vmatpush3.bf16.msra.mxu0 %v16106_v18 }
 0x2fa   : > { %14035 = vmatprep.subr.bf16.mxu0 %v19903_v23 }
 0x300   : > { %13928 = vmatmul.mubr.msk.bf16.gmra.mrb[8].mxu1 %vm233_vm0, %v2613_v43 }
 0x301   : > { %13933 = vmatprep.mubr.msk.bf16.mxu1 %vm233_vm0, %v2759_v39 }
 0x308   : > { %13934 = vmatmul.mubr.msk.bf16.vlgmr.msra.gmra.mrb[12].mxu1 %vm233_vm0, %v2760_v0 }
 0x309   : > { %13950 = vmatpush3.bf16.msra.mxu1 %v16102_v21  ;;  %13937 = vmatprep.mubr.msk.bf16.mxu1 %vm233_vm0, %v2761_v60 }
 0x30a   : > { %13967 = vmatprep.subr.bf16.mxu1 %v16103_v38 }
 0x310   : > { %13938 = vmatmul.mubr.msk.bf16.gmra.mrb[0].mxu1 %vm233_vm0, %v2762_v4 }
 0x311   : > { %13941 = vmatprep.mubr.msk.bf16.mxu1 %vm233_vm0, %v2763_v27 }
 0x318   : > { %13942 = vmatmul.mubr.msk.bf16.gmra.mrb[4].mxu1 %vm233_vm0, %v2764_v33 }
 0x319   : > { %13945 = vmatprep.mubr.msk.bf16.mxu1 %vm233_vm0, %v2765_v58 }
 0x320   : > { %13946 = vmatmul.mubr.msk.bf16.gmra.mrb[8].mxu1 %vm233_vm0, %v2766_v15 }
 0x321   : > { %13951 = vmatprep.mubr.msk.bf16.mxu1 %vm233_vm0, %v19894_v26 }
 0x328   : > { %13952 = vmatmul.mubr.msk.bf16.vlgmr.msra.gmra.mrb[12].mxu1 %vm233_vm0, %v19895_v46 }
 0x329   : > { %13968 = vmatpush3.bf16.msra.mxu1 %v16103_v38  ;;  %13955 = vmatprep.mubr.msk.bf16.mxu1 %vm233_vm0, %v19896_v56 }
 0x32a   : > { %13985 = vmatprep.subr.bf16.mxu1 %v16104_v47 }
 0x330   : > { %13956 = vmatmul.mubr.msk.bf16.gmra.mrb[0].mxu1 %vm233_vm0, %v19897_v40 }
 0x331   : > { %13959 = vmatprep.mubr.msk.bf16.mxu1 %vm233_vm0, %v19898_v14 }
 0x338   : > { %13960 = vmatmul.mubr.msk.bf16.gmra.mrb[4].mxu1 %vm233_vm0, %v19899_v61 }
 0x339   : > { %13963 = vmatprep.mubr.msk.bf16.mxu1 %vm233_vm0, %v19900_v57 }
 0x340   : > { %13964 = vmatmul.mubr.msk.bf16.gmra.mrb[8].mxu1 %vm233_vm0, %v2951_v31 }
 0x341   : > { %13969 = vmatprep.mubr.msk.bf16.mxu1 %vm233_vm0, %v17885_v5 }
 0x348   : > { %13970 = vmatmul.mubr.msk.bf16.vlgmr.msra.gmra.mrb[12].mxu1 %vm233_vm0, %v17627_v24  ;;  %v3144_v24 = vsel %vm256_vm1, %v3128_v63, 0.0 }
 0x349   : > { %13986 = vmatpush3.bf16.msra.mxu1 %v16104_v47  ;;  %13973 = vmatprep.mubr.msk.bf16.mxu1 %vm233_vm0, %v17643_v44  ;;  %v3152_v36 = vpack.c.bf16 %v3144_v24, %v2605_v2  ;;  %v19901_v44 = vld [vmem:[#allocation27_spill] sm:$0xff] }
 0x34a   : > { %14003 = vmatprep.subr.bf16.mxu1 %v16105_v10 }
 0x350   : > { %13974 = vmatmul.mubr.msk.bf16.gmra.mrb[0].mxu1 %vm233_vm0, %v17679_v11  ;;  %v19902_v11 = vld [vmem:[#allocation30_spill] sm:$0xff] }
 0x351   : > { %13977 = vmatprep.mubr.msk.bf16.mxu1 %vm233_vm0, %v17723_v30  ;;  %v19904_v30 = vld [vmem:[#allocation31_spill] sm:$0xff] }
 0x358   : > { %13978 = vmatmul.mubr.msk.bf16.gmra.mrb[4].mxu1 %vm233_vm0, %v17730_v51  ;;  %v19906_v51 = vld [vmem:[#allocation33_spill] sm:$0xff] }
 0x359   : > { %13981 = vmatprep.mubr.msk.bf16.mxu1 %vm233_vm0, %v17793_v53  ;;  %v19905_v53 = vld [vmem:[#allocation32_spill] sm:$0xff] }
 0x360   : > { %13982 = vmatmul.mubr.msk.bf16.gmra.mrb[8].mxu1 %vm233_vm0, %v3152_v36 }
 0x361   : > { %13987 = vmatprep.mubr.msk.bf16.mxu1 %vm233_vm0, %v17583_v13  ;;  %v3305_v13 = vpack.c.bf16 %v17358_v7, %v17937_v41  ;;  %v18080_v7 = vld [vmem:[#allocation2] sm:$0xff] }
 0x362   : > { %4773 = vst.msk [vmem:[#allocation2] sm:$0xff] %vm233_vm0, %v19903_v23 }
 0x368   : > { %13988 = vmatmul.mubr.msk.bf16.vlgmr.msra.gmra.mrb[12].mxu1 %vm233_vm0, %v19901_v44 }
 0x369   : > { %14004 = vmatpush3.bf16.msra.mxu1 %v16105_v10  ;;  %13991 = vmatprep.mubr.msk.bf16.mxu1 %vm233_vm0, %v19902_v11 }
 0x36a   : > { %14147 = vmatprep.subr.bf16.mxu1 %v19903_v23 }
 0x370   : > { %13992 = vmatmul.mubr.msk.bf16.gmra.mrb[0].mxu1 %vm233_vm0, %v19904_v30 }
 0x371   : > { %13995 = vmatprep.mubr.msk.bf16.mxu1 %vm233_vm0, %v19905_v53 }
 0x378   : > { %13996 = vmatmul.mubr.msk.bf16.gmra.mrb[4].mxu1 %vm233_vm0, %v19906_v51 }
 0x379   : > { %13999 = vmatprep.mubr.msk.bf16.mxu1 %vm233_vm0, %v19907_v22 }
 0x380   : > { %14000 = vmatmul.mubr.msk.bf16.gmra.mrb[8].mxu1 %vm233_vm0, %v3305_v13 }
 0x381   : > { %14005 = vmatprep.mubr.msk.bf16.mxu1 %vm233_vm0, %v17877_v1 }
 0x384   : > { %v13867_v12 = vpop.f32.mrb[20].mxu0 }
 0x385   : > { %v2199_v6 = vpop.f32.mrb[21].mxu0 }
 0x386   : > { %v18044_v9 = vpop.f32.mrb[22].mxu0 }
 0x387   : > { %v18048_v37 = vpop.f32.mrb[23].mxu0 }
 0x388   : > { %14006 = vmatmul.mubr.msk.bf16.vlgmr.msra.gmra.mrb[12].mxu1 %vm233_vm0, %v19908_v16 }
 0x389   : > { %14009 = vmatprep.mubr.msk.bf16.mxu1 %vm233_vm0, %v19909_v55 }
 0x38c   : > { %v18052_v8 = vpop.f32.mrb[24].mxu0 }
 0x38d   : > { %v18054_v34 = vpop.f32.mrb[25].mxu0 }
 0x38e   : > { %v18056_v49 = vpop.f32.mrb[26].mxu0 }
 0x38f   : > { %v18060_v42 = vpop.f32.mrb[27].mxu0 }
 0x390   : > { %14010 = vmatmul.mubr.msk.bf16.gmra.mrb[0].mxu1 %vm233_vm0, %v19910_v32 }
 0x391   : > { %14013 = vmatprep.mubr.msk.bf16.mxu1 %vm233_vm0, %v19911_v19 }
 0x394   : > { %v18064_v28 = vpop.f32.mrb[28].mxu0 }
 0x395   : > { %v18066_v1 = vpop.f32.mrb[29].mxu0 }
 0x396   : > { %v18068_v5 = vpop.f32.mrb[30].mxu0 }
 0x397   : > { %v18073_v21 = vpop.f32.mrb[31].mxu0 }
 0x398   : > { %14014 = vmatmul.mubr.msk.bf16.gmra.mrb[4].mxu1 %vm233_vm0, %v17910_v35 }
 0x399   : > { %14017 = vmatprep.mubr.msk.bf16.mxu1 %vm233_vm0, %v17920_v48 }
 0x39d   : > { %v13881_v3 = vpop.f32.mrb[16].mxu0 }
 0x39e   : > { %v2310_v54 = vpop.f32.mrb[17].mxu0 }
 0x39f   : > { %v13882_v25 = vpop.f32.mrb[18].mxu0 }
 0x3a0   : > { %14018 = vmatmul.mubr.msk.bf16.gmra.mrb[8].mxu1 %vm233_vm0, %v3490_v50  ;;  %v2313_v41 = vpop.f32.mrb[19].mxu0 }
 0x3a1   : > { %14149 = vmatprep.mubr.msk.bf16.mxu1 %vm16629_vm6, %v19903_v23 }
 0x45b   : > { %v14007_v35 = vpop.f32.mrb[12].mxu1 }
 0x45c   : > { %v18089_v48 = vadd.f32 %v14007_v35, %v13881_v3  ;;  %v3557_v59 = vpop.f32.mrb[13].mxu1 }
 0x45d   : > { %v18091_v52 = vadd.f32 %v3557_v59, %v2310_v54  ;;  %v14008_v2 = vpop.f32.mrb[14].mxu1 }
 0x45e   : > { %v18093_v43 = vadd.f32 %v14008_v2, %v13882_v25  ;;  %v3560_v39 = vpop.f32.mrb[15].mxu1  ;;  %v3676_v60 = vmul.f32 %v18089_v48, %v18089_v48  ;;  %v3639_v26 = vsel %vm233_vm0, %v18089_v48, 0.0 }
 0x45f   : > { %v3674_v0 = vmul.f32 %v18091_v52, %v18091_v52  ;;  %v18097_v38 = vadd.f32 %v3560_v39, %v2313_v41  ;;  %v3636_v4 = vsel %vm233_vm0, %v18091_v52, 0.0 }
 0x460   : > { %v3677_v58 = vmul.f32 %v18093_v43, %v18093_v43  ;;  %v3693_v57 = vsel %vm233_vm0, %v3676_v60, 0.0  ;;  %v3641_v17 = vsel %vm233_vm0, %v18093_v43, 0.0 }
 0x461   : > { %v3637_v27 = vsel %vm233_vm0, %v18097_v38, 0.0  ;;  %v3675_v33 = vmul.f32 %v18097_v38, %v18097_v38  ;;  %v3690_v47 = vsel %vm233_vm0, %v3674_v0, 0.0 }
 0x462   : > { %v3638_v15 = vadd.f32 %v3637_v27, %v3636_v4  ;;  %v3695_v63 = vsel %vm233_vm0, %v3677_v58, 0.0 }
 0x463   : > { %v3691_v46 = vsel %vm233_vm0, %v3675_v33, 0.0  ;;  %v14011_v56 = vpop.f32.mrb[0].mxu1 }
 0x464   : > { %v3640_v40 = vadd.f32 %v3639_v26, %v3638_v15  ;;  %v3692_v14 = vadd.f32 %v3691_v46, %v3690_v47  ;;  %v18113_v29 = vadd.f32 %v14011_v56, %v13867_v12  ;;  %v3573_v61 = vpop.f32.mrb[1].mxu1 }
 0x465   : > { %v18118_v31 = vadd.f32 %v3573_v61, %v2199_v6  ;;  %v14012_v10 = vpop.f32.mrb[2].mxu1 }
 0x466   : > { %v3694_v24 = vadd.f32 %v3693_v57, %v3692_v14  ;;  %v3642_v36 = vadd.f32 %v3641_v17, %v3640_v40  ;;  %v3576_v44 = vpop.f32.mrb[3].mxu1  ;;  %v18126_v53 = vadd.f32 %v14012_v10, %v18044_v9  ;;  %v3680_v16 = vmul.f32 %v18113_v29, %v18113_v29 }
 0x467   : > { %v3643_v11 = vsel %vm233_vm0, %v18118_v31, 0.0  ;;  %v3678_v30 = vmul.f32 %v18118_v31, %v18118_v31  ;;  %v18129_v51 = vadd.f32 %v3576_v44, %v18048_v37  ;;  %v3647_v9 = vsel %vm233_vm0, %v18113_v29, 0.0 }
 0x468   : > { %v3644_v22 = vadd.f32 %v3643_v11, %v3642_v36  ;;  %v3696_v13 = vadd.f32 %v3695_v63, %v3694_v24  ;;  %v3681_v62 = vmul.f32 %v18126_v53, %v18126_v53  ;;  %v3649_v25 = vsel %vm233_vm0, %v18126_v53, 0.0 }
 0x469   : > { %v3697_v12 = vsel %vm233_vm0, %v3678_v30, 0.0  ;;  %v3645_v6 = vsel %vm233_vm0, %v18129_v51, 0.0  ;;  %v3679_v19 = vmul.f32 %v18129_v51, %v18129_v51  ;;  %v3701_v59 = vsel %vm233_vm0, %v3680_v16, 0.0 }
 0x46a   : > { %v3698_v55 = vadd.f32 %v3697_v12, %v3696_v13  ;;  %v3646_v32 = vadd.f32 %v3645_v6, %v3644_v22 }
 0x46b   : > { %v14015_v37 = vpop.f32.mrb[4].mxu1  ;;  %v3699_v3 = vsel %vm233_vm0, %v3679_v19, 0.0 }
 0x46c   : > { %v3648_v45 = vadd.f32 %v3647_v9, %v3646_v32  ;;  %v18144_v50 = vadd.f32 %v14015_v37, %v18052_v8  ;;  %v3589_v54 = vpop.f32.mrb[5].mxu1  ;;  %v3700_v41 = vadd.f32 %v3699_v3, %v3698_v55 }
 0x46d   : > { %v18149_v18 = vadd.f32 %v3589_v54, %v18054_v34  ;;  %v14016_v35 = vpop.f32.mrb[6].mxu1  ;;  %v3703_v34 = vsel %vm233_vm0, %v3681_v62, 0.0 }
 0x46e   : > { %v3650_v2 = vadd.f32 %v3649_v25, %v3648_v45  ;;  %v18153_v39 = vadd.f32 %v14016_v35, %v18056_v49  ;;  %v3592_v0 = vpop.f32.mrb[7].mxu1  ;;  %v3702_v60 = vadd.f32 %v3701_v59, %v3700_v41  ;;  %v3684_v47 = vmul.f32 %v18144_v50, %v18144_v50 }
 0x46f   : > { %v3651_v8 = vsel %vm233_vm0, %v18149_v18, 0.0  ;;  %v3682_v4 = vmul.f32 %v18149_v18, %v18149_v18  ;;  %v18160_v27 = vadd.f32 %v3592_v0, %v18060_v42  ;;  %v3655_v42 = vsel %vm233_vm0, %v18144_v50, 0.0 }
 0x470   : > { %v3652_v33 = vadd.f32 %v3651_v8, %v3650_v2  ;;  %v3704_v58 = vadd.f32 %v3703_v34, %v3702_v60  ;;  %v3685_v61 = vmul.f32 %v18153_v39, %v18153_v39  ;;  %v3657_v63 = vsel %vm233_vm0, %v18153_v39, 0.0 }
 0x471   : > { %v3705_v15 = vsel %vm233_vm0, %v3682_v4, 0.0  ;;  %v3653_v49 = vsel %vm233_vm0, %v18160_v27, 0.0  ;;  %v3683_v26 = vmul.f32 %v18160_v27, %v18160_v27  ;;  %v3709_v11 = vsel %vm233_vm0, %v3684_v47, 0.0 }
 0x472   : > { %v3654_v46 = vadd.f32 %v3653_v49, %v3652_v33  ;;  %v3706_v56 = vadd.f32 %v3705_v15, %v3704_v58 }
 0x473   : > { %v3707_v40 = vsel %vm233_vm0, %v3683_v26, 0.0  ;;  %v14019_v14 = vpop.f32.mrb[8].mxu1 }
 0x474   : > { %v3656_v57 = vadd.f32 %v3655_v42, %v3654_v46  ;;  %v18176_v17 = vadd.f32 %v14019_v14, %v18064_v28  ;;  %v3605_v10 = vpop.f32.mrb[9].mxu1  ;;  %v3708_v24 = vadd.f32 %v3707_v40, %v3706_v56 }
 0x475   : > { %v18181_v36 = vadd.f32 %v3605_v10, %v18066_v1  ;;  %v14020_v44 = vpop.f32.mrb[10].mxu1  ;;  %v3711_v1 = vsel %vm233_vm0, %v3685_v61, 0.0 }
 0x476   : > { %v3658_v30 = vadd.f32 %v3657_v63, %v3656_v57  ;;  %v18185_v22 = vadd.f32 %v14020_v44, %v18068_v5  ;;  %v3608_v13 = vpop.f32.mrb[11].mxu1  ;;  %v3710_v12 = vadd.f32 %v3709_v11, %v3708_v24  ;;  %v3688_v37 = vmul.f32 %v18176_v17, %v18176_v17  ;;  %v3730_v24 = vld [vmem:[#allocation8 + $0x2] sm:$0x1] }
 0x477   : > { %v3659_v28 = vsel %vm233_vm0, %v18181_v36, 0.0  ;;  %v3686_v6 = vmul.f32 %v18181_v36, %v18181_v36  ;;  %v15262_v16 = vadd.f32 %v3608_v13, %v18073_v21  ;;  %v3663_v45 = vsel %vm233_vm0, %v18176_v17, 0.0  ;;  %v19912_v13 = vld [vmem:[#allocation19_spill] sm:$0xff] }
 0x478   : > { %v3660_v55 = vadd.f32 %v3659_v28, %v3658_v30  ;;  %v3712_v32 = vadd.f32 %v3711_v1, %v3710_v12  ;;  %v3689_v21 = vmul.f32 %v18185_v22, %v18185_v22  ;;  %v3665_v41 = vsel %vm233_vm0, %v18185_v22, 0.0  ;;  %v3731_v30 = vld [vmem:[#allocation8 + $0x3] sm:$0x1] }
 0x479   : > { %v3713_v19 = vsel %vm233_vm0, %v3686_v6, 0.0  ;;  %v3661_v9 = vsel %vm233_vm0, %v15262_v16, 0.0  ;;  %v3687_v5 = vmul.f32 %v15262_v16, %v15262_v16  ;;  %v3717_v59 = vsel %vm233_vm0, %v3688_v37, 0.0 }
 0x47a   : > { %v3662_v62 = vadd.f32 %v3661_v9, %v3660_v55  ;;  %v3714_v3 = vadd.f32 %v3713_v19, %v3712_v32  ;;  %v3719_v60 = vsel %vm233_vm0, %v3689_v21, 0.0 }
 0x47b   : > { %v3715_v54 = vsel %vm233_vm0, %v3687_v5, 0.0 }
 0x47c   : > { %v3664_v25 = vadd.f32 %v3663_v45, %v3662_v62  ;;  %v3716_v35 = vadd.f32 %v3715_v54, %v3714_v3 }
 0x47e   : > { %v3666_v2 = vadd.f32 %v3665_v41, %v3664_v25  ;;  %v3718_v0 = vadd.f32 %v3717_v59, %v3716_v35  ;;  %v19913_v59 = vld [vmem:[#allocation13_spill] sm:$0xff] }
 0x480   : > { %v3667_v8 = vrot.slane %v3666_v2, 4  ;;  %v3720_v4 = vadd.f32 %v3719_v60, %v3718_v0  ;;  %v19914_v0 = vld [vmem:[#allocation16_spill] sm:$0xff] }
 0x482   : > { %v3668_v34 = vadd.f32 %v3667_v8, %v3666_v2  ;;  %v3721_v33 = vrot.slane %v3720_v4, 4 }
 0x484   : > { %v3669_v58 = vrot.slane %v3668_v34, 2  ;;  %v3722_v15 = vadd.f32 %v3721_v33, %v3720_v4 }
 0x486   : > { %v3670_v49 = vadd.f32 %v3669_v58, %v3668_v34  ;;  %v3723_v26 = vrot.slane %v3722_v15, 2  ;;  %v19915_v34 = vld [vmem:[#allocation20_spill] sm:$0xff]  ;;  %v19916_v58 = vld [vmem:[#allocation23_spill] sm:$0xff] }
 0x488   : > { %v3671_v47 = vrot.slane %v3670_v49, 1  ;;  %v3724_v46 = vadd.f32 %v3723_v26, %v3722_v15 }
 0x48a   : > { %v3672_v42 = vadd.f32 %v3671_v47, %v3670_v49  ;;  %v3725_v56 = vrot.slane %v3724_v46, 1 }
 0x48c   : > { %v3673_v40 = vmul.f32 0.0078125, %v3672_v42  ;;  %v3726_v14 = vadd.f32 %v3725_v56, %v3724_v46 }
 0x48e   : > { %v3728_v61 = vmul.f32 %v3673_v40, %v3673_v40  ;;  %v3727_v57 = vmul.f32 0.0078125, %v3726_v14 }
 0x490   : > { %v3729_v10 = vsub.f32 %v3727_v57, %v3728_v61  ;;  %v19917_v61 = vld [vmem:[#allocation26_spill] sm:$0xff] }
 0x492   : > { %v3732_v63 = vadd.f32 1e-05, %v3729_v10  ;;  %v19918_v10 = vld [vmem:[#allocation29_spill] sm:$0xff] }
 0x494   : > { %16432 = vrsqrt.f32 %v3732_v63 }
 0x49e   : > { %v16433_v44 = vpop.eup %16432 }
 0x49f   : > { %v3734_v11 = vmul.f32 %v16433_v44, %v3730_v24 }
 0x4a1   : > { %v18207_v12 = vrot.slane %v3734_v11, %v19912_v13  ;;  %v3755_v28 = vmul.f32 %v3734_v11, %v3673_v40  ;;  %v19919_v11 = vld [vmem:[#allocation14_spill] sm:$0xff] }
 0x4a3   : > { %v3752_v6 = vmul.f32 %v15262_v16, %v18207_v12  ;;  %v3756_v1 = vsub.f32 %v3731_v30, %v3755_v28  ;;  %v3741_v55 = vmul.f32 %v18089_v48, %v18207_v12  ;;  %v3744_v32 = vmul.f32 %v18129_v51, %v18207_v12  ;;  %v19920_v28 = vld [vmem:[#allocation17_spill] sm:$0xff] }
 0x4a4   : > { %v3747_v19 = vmul.f32 %v18149_v18, %v18207_v12  ;;  %v3750_v9 = vmul.f32 %v18153_v39, %v18207_v12  ;;  %v3753_v5 = vmul.f32 %v18176_v17, %v18207_v12  ;;  %v3739_v37 = vmul.f32 %v18091_v52, %v18207_v12 }
 0x4a5   : > { %v18223_v16 = vrot.slane %v3756_v1, %v19912_v13  ;;  %v3742_v48 = vmul.f32 %v18093_v43, %v18207_v12  ;;  %v3745_v51 = vmul.f32 %v18113_v29, %v18207_v12  ;;  %v3748_v18 = vmul.f32 %v18160_v27, %v18207_v12 }
 0x4a6   : > { %v3751_v39 = vmul.f32 %v18181_v36, %v18207_v12  ;;  %v3754_v17 = vmul.f32 %v18185_v22, %v18207_v12  ;;  %v3740_v52 = vmul.f32 %v18097_v38, %v18207_v12  ;;  %v3743_v62 = vmul.f32 %v18118_v31, %v18207_v12 }
 0x4a7   : > { %v3774_v43 = vadd.f32 %v18223_v16, %v3752_v6  ;;  %v3763_v45 = vadd.f32 %v18223_v16, %v3741_v55  ;;  %v3766_v29 = vadd.f32 %v18223_v16, %v3744_v32  ;;  %v3769_v27 = vadd.f32 %v18223_v16, %v3747_v19 }
 0x4a8   : > { %v3772_v3 = vadd.f32 %v18223_v16, %v3750_v9  ;;  %v3775_v36 = vadd.f32 %v18223_v16, %v3753_v5  ;;  %v3761_v22 = vadd.f32 %v18223_v16, %v3739_v37  ;;  %v3764_v54 = vadd.f32 %v18223_v16, %v3742_v48 }
 0x4a9   : > { %vm3790_vm7 = vcmp.ge.f32.partialorder %v3774_v43, 0.0  ;;  %v3806_v38 = vmul.f32 0.3, %v3774_v43  ;;  %vm3779_vm8 = vcmp.ge.f32.partialorder %v3763_v45, 0.0  ;;  %v3795_v31 = vmul.f32 0.3, %v3763_v45 }
 0x4aa   : > { %vm3782_vm9 = vcmp.ge.f32.partialorder %v3766_v29, 0.0  ;;  %vm3785_vm10 = vcmp.ge.f32.partialorder %v3769_v27, 0.0  ;;  %v3798_v21 = vmul.f32 0.3, %v3766_v29  ;;  %v3801_v25 = vmul.f32 0.3, %v3769_v27 }
 0x4ab   : > { %v3822_v41 = vsel %vm3790_vm7, %v3774_v43, %v3806_v38  ;;  %v3811_v35 = vsel %vm3779_vm8, %v3763_v45, %v3795_v31  ;;  %vm3788_vm11 = vcmp.ge.f32.partialorder %v3772_v3, 0.0  ;;  %vm3791_vm12 = vcmp.ge.f32.partialorder %v3775_v36, 0.0  ;;  %v19921_v43 = vld [vmem:[#allocation21_spill] sm:$0xff]  ;;  %v19923_v31 = vld [vmem:[#allocation28_spill] sm:$0xff] }
 0x4ac   : > { %v3838_v2 = vadd.f32 %v3822_v41, %v19913_v59  ;;  %v3827_v60 = vadd.f32 %v3811_v35, %v19914_v0  ;;  %v3814_v8 = vsel %vm3782_vm9, %v3766_v29, %v3798_v21  ;;  %v3817_v4 = vsel %vm3785_vm10, %v3769_v27, %v3801_v25  ;;  %v19922_v29 = vld [vmem:[#allocation24_spill] sm:$0xff]  ;;  %v19924_v25 = vld [vmem:[#allocation35_spill] sm:$0xff] }
 0x4ad   : > { %v3830_v33 = vadd.f32 %v3814_v8, %v19915_v34  ;;  %v3833_v15 = vadd.f32 %v3817_v4, %v19916_v58  ;;  %v3804_v49 = vmul.f32 0.3, %v3772_v3  ;;  %v3807_v26 = vmul.f32 0.3, %v3775_v36 }
 0x4ae   : > { %3856 = vst.msk [vmem:[#allocation2 + $0x70] sm:$0xff] %vm233_vm0, %v3838_v2  ;;  %3845 = vst.msk [vmem:[#allocation2 + $0x18] sm:$0xff] %vm233_vm0, %v3827_v60  ;;  %vm3777_vm13 = vcmp.ge.f32.partialorder %v3761_v22, 0.0  ;;  %vm3780_vm14 = vcmp.ge.f32.partialorder %v3764_v54, 0.0  ;;  %v3793_v47 = vmul.f32 0.3, %v3761_v22  ;;  %v3767_v40 = vadd.f32 %v18223_v16, %v3745_v51 }
 0x4af   : > { %v3796_v46 = vmul.f32 0.3, %v3764_v54  ;;  %3848 = vst.msk [vmem:[#allocation2 + $0x30] sm:$0xff] %vm233_vm0, %v3830_v33  ;;  %3851 = vst.msk [vmem:[#allocation2 + $0x48] sm:$0xff] %vm233_vm0, %v3833_v15  ;;  %v3820_v42 = vsel %vm3788_vm11, %v3772_v3, %v3804_v49  ;;  %v3823_v56 = vsel %vm3791_vm12, %v3775_v36, %v3807_v26  ;;  %v3770_v14 = vadd.f32 %v18223_v16, %v3748_v18  ;;  %v16107_v18 = vld [vmem:[#allocation6 + $0x90] sm:$0xff]   ;;  %v19925_v49 = vld [vmem:[#allocation15_spill] sm:$0xff] }
 0x4b0   : > { %v3836_v57 = vadd.f32 %v3820_v42, %v19917_v61  ;;  %v3839_v63 = vadd.f32 %v3823_v56, %v19918_v10  ;;  %v3809_v24 = vsel %vm3777_vm13, %v3761_v22, %v3793_v47  ;;  %vm3783_vm15 = vcmp.ge.f32.partialorder %v3767_v40, 0.0  ;;  %v19928_v10 = vld [vmem:[#allocation25_spill] sm:$0xff] }
 0x4b1   : > { %v3812_v44 = vsel %vm3780_vm14, %v3764_v54, %v3796_v46  ;;  %v3825_v30 = vadd.f32 %v3809_v24, %v19919_v11  ;;  %vm3786_vm3 = vcmp.ge.f32.partialorder %v3770_v14, 0.0  ;;  %v3799_v1 = vmul.f32 0.3, %v3767_v40  ;;  %v16108_v24 = vld [vmem:[#allocation6 + $0xc0] sm:$0xff]  }
 0x4b2   : > { %v3828_v6 = vadd.f32 %v3812_v44, %v19920_v28  ;;  %3854 = vst.msk [vmem:[#allocation2 + $0x60] sm:$0xff] %vm233_vm0, %v3836_v57  ;;  %3857 = vst.msk [vmem:[#allocation2 + $0x78] sm:$0xff] %vm233_vm0, %v3839_v63  ;;  %v3802_v55 = vmul.f32 0.3, %v3770_v14  ;;  %v3773_v32 = vadd.f32 %v18223_v16, %v3751_v39  ;;  %v3776_v19 = vadd.f32 %v18223_v16, %v3754_v17 }
 0x4b3   : > { %3843 = vst.msk [vmem:[#allocation2 + $0x8] sm:$0xff] %vm233_vm0, %v3825_v30  ;;  %v3762_v9 = vadd.f32 %v18223_v16, %v3740_v52  ;;  %v3765_v5 = vadd.f32 %v18223_v16, %v3743_v62  ;;  %v3815_v37 = vsel %vm3783_vm15, %v3767_v40, %v3799_v1  ;;  %v3746_v35 = vmul.f32 %v18126_v53, %v18207_v12  ;;  %v19927_v40 = vld [vmem:[#allocation22_spill] sm:$0xff] }
 0x4b4   : > { %3846 = vst.msk [vmem:[#allocation2 + $0x20] sm:$0xff] %vm233_vm0, %v3828_v6  ;;  %v3818_v48 = vsel %vm3786_vm3, %v3770_v14, %v3802_v55  ;;  %v3831_v45 = vadd.f32 %v3815_v37, %v19921_v43  ;;  %v3805_v17 = vmul.f32 0.3, %v3773_v32  ;;  %vm3789_vm4 = vcmp.ge.f32.partialorder %v3773_v32, 0.0 }
 0x4b5   : > { %v18271_v51 = vld [vmem:[#allocation2 + $0x18] sm:$0xff]  ;;  %v3834_v27 = vadd.f32 %v3818_v48, %v19922_v29  ;;  %v3808_v52 = vmul.f32 0.3, %v3776_v19  ;;  %vm3792_vm5 = vcmp.ge.f32.partialorder %v3776_v19, 0.0  ;;  %vm3778_vm7 = vcmp.ge.f32.partialorder %v3762_v9, 0.0 }
 0x4b6   : > { %v3882_v39 = vpack.c.bf16 %v18271_v51, %v18080_v7  ;;  %3849 = vst.msk [vmem:[#allocation2 + $0x38] sm:$0xff] %vm233_vm0, %v3831_v45  ;;  %v18283_v62 = vld [vmem:[#allocation2 + $0x30] sm:$0xff]  ;;  %v18285_v3 = vld [vmem:[#allocation2 + $0x48] sm:$0xff]  ;;  %v3821_v36 = vsel %vm3789_vm4, %v3773_v32, %v3805_v17  ;;  %vm3781_vm8 = vcmp.ge.f32.partialorder %v3765_v5, 0.0  ;;  %v3749_v59 = vmul.f32 %v18144_v50, %v18207_v12 }
 0x4b7   : > { %3852 = vst.msk [vmem:[#allocation2 + $0x50] sm:$0xff] %vm233_vm0, %v3834_v27  ;;  %v3883_v22 = vpack.c.bf16 %v18285_v3, %v18283_v62  ;;  %v3824_v38 = vsel %vm3792_vm5, %v3776_v19, %v3808_v52  ;;  %v3837_v21 = vadd.f32 %v3821_v36, %v19923_v31  ;;  %v3794_v60 = vmul.f32 0.3, %v3762_v9  ;;  %v19926_v50 = vld [vmem:[#allocation18_spill] sm:$0xff]  ;;  %v16109_v45 = vld [vmem:[#allocation6 + $0x98] sm:$0xff]  }
 0x4b8   : > { %14024 = vmatmul.mubr.msk.bf16.vlgmr.msra.gmra.mrb[32].mxu0 %vm233_vm0, %v3882_v39  ;;  %v3840_v41 = vadd.f32 %v3824_v38, %v19924_v25  ;;  %v3797_v8 = vmul.f32 0.3, %v3765_v5  ;;  %v3768_v4 = vadd.f32 %v18223_v16, %v3746_v35  ;;  %v3771_v34 = vadd.f32 %v18223_v16, %v3749_v59 }
 0x4b9   : > { %14036 = vmatpush3.bf16.msra.mxu0 %v16107_v18  ;;  %14027 = vmatprep.mubr.msk.bf16.mxu0 %vm16629_vm6, %v19903_v23  ;;  %3855 = vst.msk [vmem:[#allocation2 + $0x68] sm:$0xff] %vm233_vm0, %v3837_v21  ;;  %v18304_v2 = vld [vmem:[#allocation2 + $0x60] sm:$0xff]  ;;  %v18306_v0 = vld [vmem:[#allocation2 + $0x78] sm:$0xff]  ;;  %v3865_v33 = vrot.slane %v18080_v7, 7  ;;  %v3810_v58 = vsel %vm3778_vm7, %v3762_v9, %v3794_v60  ;;  %v3866_v47 = vrot.slane %v18271_v51, 7  ;;  %v3867_v11 = vrot.slane %v18283_v62, 7 }
 0x4ba   : > { %14049 = vmatprep.subr.bf16.mxu0 %v19903_v23  ;;  %3858 = vst.msk [vmem:[#allocation2 + $0x80] sm:$0xff] %vm233_vm0, %v3840_v41  ;;  %v3813_v15 = vsel %vm3781_vm8, %v3765_v5, %v3797_v8  ;;  %v3884_v53 = vpack.c.bf16 %v18306_v0, %v18304_v2  ;;  %v3826_v26 = vadd.f32 %v3810_v58, %v19925_v49  ;;  %vm3784_vm9 = vcmp.ge.f32.partialorder %v3768_v4, 0.0 }
 0x4bb   : > { %v3829_v12 = vadd.f32 %v3813_v15, %v19926_v50  ;;  %vm3787_vm10 = vcmp.ge.f32.partialorder %v3771_v34, 0.0  ;;  %v3800_v46 = vmul.f32 0.3, %v3768_v4  ;;  %v3803_v42 = vmul.f32 0.3, %v3771_v34  ;;  %v4127_v38 = vld [vmem:[#allocation2 + $0x20] sm:$0xff] }
 0x4bc   : > { %3844 = vst.msk [vmem:[#allocation2 + $0x10] sm:$0xff] %vm233_vm0, %v3826_v26  ;;  %v3871_v61 = vsel %vm256_vm1, %v3865_v33, 0.0  ;;  %v3872_v57 = vsel %vm256_vm1, %v3866_v47, 0.0  ;;  %v3868_v30 = vrot.slane %v18285_v3, 7  ;;  %v3873_v28 = vsel %vm256_vm1, %v3867_v11, 0.0  ;;  %v16111_v47 = vld [vmem:[#allocation6 + $0xc8] sm:$0xff]  }
 0x4bd   : > { %v18289_v54 = vld [vmem:[#allocation2 + $0x38] sm:$0xff]  ;;  %3847 = vst.msk [vmem:[#allocation2 + $0x28] sm:$0xff] %vm233_vm0, %v3829_v12  ;;  %v3816_v16 = vsel %vm3784_vm9, %v3768_v4, %v3800_v46  ;;  %v3819_v56 = vsel %vm3787_vm10, %v3771_v34, %v3803_v42  ;;  %v3877_v44 = vpack.c.bf16 %v3872_v57, %v3871_v61  ;;  %v3869_v55 = vrot.slane %v18304_v2, 7  ;;  %v16112_v57 = vld [vmem:[#allocation6 + $0xa0] sm:$0xff]  }
 0x4be   : > { %4775 = vst.msk [vmem:[#allocation2 + $0x38] sm:$0xff] %vm233_vm0, %v19903_v23  ;;  %v3832_v14 = vadd.f32 %v3816_v16, %v19927_v40  ;;  %v3835_v63 = vadd.f32 %v3819_v56, %v19928_v10  ;;  %v3874_v6 = vsel %vm256_vm1, %v3868_v30, 0.0  ;;  %v3870_v32 = vrot.slane %v18306_v0, 7  ;;  %v4129_v59 = vld [vmem:[#allocation2 + $0x50] sm:$0xff] }
 0x4bf   : > { %v3878_v1 = vpack.c.bf16 %v3874_v6, %v3873_v28  ;;  %v3875_v19 = vsel %vm256_vm1, %v3869_v55, 0.0  ;;  %v4031_v37 = vrot.slane %v18080_v7, 1  ;;  %v4032_v48 = vrot.slane %v18271_v51, 1 }
 0x4c0   : > { %14028 = vmatmul.mubr.msk.bf16.gmra.mrb[36].mxu0 %vm233_vm0, %v3883_v22  ;;  %3850 = vst.msk [vmem:[#allocation2 + $0x40] sm:$0xff] %vm233_vm0, %v3832_v14  ;;  %3853 = vst.msk [vmem:[#allocation2 + $0x58] sm:$0xff] %vm233_vm0, %v3835_v63  ;;  %v3876_v9 = vsel %vm256_vm1, %v3870_v32, 0.0  ;;  %v4033_v27 = vrot.slane %v18283_v62, 1  ;;  %v4034_v39 = vrot.slane %v18285_v3, 1  ;;  %v4035_v52 = vrot.slane %v18304_v2, 1 }
 0x4c1   : > { %14031 = vmatprep.mubr.msk.bf16.mxu0 %vm16629_vm6, %v19903_v23  ;;  %v3879_v5 = vpack.c.bf16 %v3876_v9, %v3875_v19  ;;  %v4037_v18 = vsel %vm257_vm2, %v4031_v37, 0.0  ;;  %v4038_v43 = vsel %vm257_vm2, %v4032_v48, 0.0  ;;  %v4036_v62 = vrot.slane %v18306_v0, 1  ;;  %v4126_v22 = vld [vmem:[#allocation2 + $0x8] sm:$0xff]  ;;  %v16110_v2 = vld [vmem:[#allocation6 + $0xb0] sm:$0xff]  }
 0x4c2   : > { %v4043_v29 = vpack.c.bf16 %v4038_v43, %v4037_v18  ;;  %v4039_v7 = vsel %vm257_vm2, %v4033_v27, 0.0  ;;  %v4040_v51 = vsel %vm257_vm2, %v4034_v39, 0.0  ;;  %v4041_v3 = vsel %vm257_vm2, %v4035_v52, 0.0  ;;  %v4130_v33 = vld [vmem:[#allocation2 + $0x68] sm:$0xff]  ;;  %v4131_v58 = vld [vmem:[#allocation2 + $0x80] sm:$0xff] }
 0x4c3   : > { %v4044_v17 = vpack.c.bf16 %v4040_v51, %v4039_v7  ;;  %v4042_v36 = vsel %vm257_vm2, %v4036_v62, 0.0  ;;  %v4132_v21 = vrot.slane %v4126_v22, 7  ;;  %v4133_v25 = vrot.slane %v4127_v38, 7  ;;  %v4405_v55 = vld [vmem:[#allocation2 + $0x10] sm:$0xff]  ;;  %v4410_v52 = vld [vmem:[#allocation2 + $0x88] sm:$0xff] }
 0x4c4   : > { %v4045_v31 = vpack.c.bf16 %v4042_v36, %v4041_v3  ;;  %v4134_v60 = vrot.slane %v18289_v54, 7  ;;  %v4135_v8 = vrot.slane %v4129_v59, 7  ;;  %v4137_v49 = vrot.slane %v4131_v58, 7  ;;  %v4406_v32 = vld [vmem:[#allocation2 + $0x28] sm:$0xff] }
 0x4c5   : > { %v4138_v41 = vsel %vm256_vm1, %v4132_v21, 0.0  ;;  %v4139_v35 = vsel %vm256_vm1, %v4133_v25, 0.0  ;;  %v4227_v46 = vpack.c.bf16 %v4127_v38, %v4126_v22  ;;  %v4228_v42 = vpack.c.bf16 %v4129_v59, %v18289_v54  ;;  %v16114_v21 = vld [vmem:[#allocation6 + $0xd0] sm:$0xff]  }
 0x4c6   : > { %v4144_v0 = vpack.c.bf16 %v4139_v35, %v4138_v41  ;;  %v4140_v4 = vsel %vm256_vm1, %v4134_v60, 0.0  ;;  %v4141_v34 = vsel %vm256_vm1, %v4135_v8, 0.0  ;;  %v4143_v50 = vsel %vm256_vm1, %v4137_v49, 0.0 }
 0x4c7   : > { %v4145_v15 = vpack.c.bf16 %v4141_v34, %v4140_v4  ;;  %v4229_v16 = vpack.c.bf16 %v4131_v58, %v4130_v33  ;;  %v4310_v56 = vrot.slane %v4126_v22, 1  ;;  %v4311_v40 = vrot.slane %v4127_v38, 1  ;;  %v4407_v18 = vld [vmem:[#allocation2 + $0x40] sm:$0xff]  ;;  %v4408_v43 = vld [vmem:[#allocation2 + $0x58] sm:$0xff] }
 0x4c8   : > { %14032 = vmatmul.mubr.msk.bf16.gmra.mrb[40].mxu0 %vm233_vm0, %v3884_v53  ;;  %v4136_v53 = vrot.slane %v4130_v33, 7  ;;  %v4312_v63 = vrot.slane %v18289_v54, 1  ;;  %v4314_v28 = vrot.slane %v4130_v33, 1  ;;  %v4315_v6 = vrot.slane %v4131_v58, 1 }
 0x4c9   : > { %14037 = vmatprep.mubr.msk.bf16.mxu0 %vm16629_vm6, %v19903_v23  ;;  %v4316_v14 = vsel %vm257_vm2, %v4310_v56, 0.0  ;;  %v4317_v61 = vsel %vm257_vm2, %v4311_v40, 0.0  ;;  %v4411_v9 = vrot.slane %v4405_v55, 7  ;;  %v4413_v27 = vrot.slane %v4407_v18, 7 }
 0x4ca   : > { %v4142_v26 = vsel %vm256_vm1, %v4136_v53, 0.0  ;;  %v4322_v10 = vpack.c.bf16 %v4317_v61, %v4316_v14  ;;  %v4320_v54 = vsel %vm257_vm2, %v4314_v28, 0.0  ;;  %v4414_v39 = vrot.slane %v4408_v43, 7 }
 0x4cb   : > { %v4146_v12 = vpack.c.bf16 %v4143_v50, %v4142_v26  ;;  %v4417_v37 = vsel %vm256_vm1, %v4411_v9, 0.0  ;;  %v4419_v7 = vsel %vm256_vm1, %v4413_v27, 0.0  ;;  %v4416_v36 = vrot.slane %v4410_v52, 7 }
 0x4cc   : > { %v4420_v51 = vsel %vm256_vm1, %v4414_v39, 0.0  ;;  %v4506_v25 = vpack.c.bf16 %v4406_v32, %v4405_v55  ;;  %v4507_v41 = vpack.c.bf16 %v4408_v43, %v4407_v18  ;;  %v4591_v4 = vrot.slane %v4407_v18, 1 }
 0x4cd   : > { %v4424_v62 = vpack.c.bf16 %v4420_v51, %v4419_v7  ;;  %v4422_v38 = vsel %vm256_vm1, %v4416_v36, 0.0  ;;  %v4592_v34 = vrot.slane %v4408_v43, 1  ;;  %v4594_v49 = vrot.slane %v4410_v52, 1 }
 0x4ce   : > { %v4597_v33 = vsel %vm257_vm2, %v4591_v4, 0.0  ;;  %vm5607_vm11 = vcmask 261120  }
 0x4cf   : > { %v4598_v58 = vsel %vm257_vm2, %v4592_v34, 0.0  ;;  %v4600_v50 = vsel %vm257_vm2, %v4594_v49, 0.0 }
 0x4d0   : > { %14038 = vmatmul.mubr.msk.bf16.vlgmr.msra.gmra.mrb[32].mxu0 %vm233_vm0, %v3877_v44  ;;  %v4318_v44 = vsel %vm257_vm2, %v4312_v63, 0.0 }
 0x4d1   : > { %14050 = vmatpush3.bf16.msra.mxu0 %v16108_v24  ;;  %14041 = vmatprep.mubr.msk.bf16.mxu0 %vm16629_vm6, %v19903_v23  ;;  %v4313_v24 = vrot.slane %v4129_v59, 1  ;;  %v4589_v59 = vrot.slane %v4405_v55, 1 }
 0x4d2   : > { %14063 = vmatprep.subr.bf16.mxu0 %v19903_v23 }
 0x4d3   : > { %v4319_v11 = vsel %vm257_vm2, %v4313_v24, 0.0 }
 0x4d4   : > { %v4323_v30 = vpack.c.bf16 %v4319_v11, %v4318_v44 }
 0x4d8   : > { %14042 = vmatmul.mubr.msk.bf16.gmra.mrb[36].mxu0 %vm233_vm0, %v3878_v1  ;;  %v4321_v1 = vsel %vm257_vm2, %v4315_v6, 0.0 }
 0x4d9   : > { %14045 = vmatprep.mubr.msk.bf16.mxu0 %vm16629_vm6, %v19903_v23  ;;  %v4324_v19 = vpack.c.bf16 %v4321_v1, %v4320_v54 }
 0x4e0   : > { %14046 = vmatmul.mubr.msk.bf16.gmra.mrb[40].mxu0 %vm233_vm0, %v3879_v5  ;;  %v4412_v5 = vrot.slane %v4406_v32, 7 }
 0x4e1   : > { %14051 = vmatprep.mubr.msk.bf16.mxu0 %vm16629_vm6, %v19903_v23 }
 0x4e2   : > { %v4418_v48 = vsel %vm256_vm1, %v4412_v5, 0.0 }
 0x4e8   : > { %14052 = vmatmul.mubr.msk.bf16.vlgmr.msra.gmra.mrb[32].mxu0 %vm233_vm0, %v4043_v29  ;;  %v4423_v29 = vpack.c.bf16 %v4418_v48, %v4417_v37 }
 0x4e9   : > { %14064 = vmatpush3.bf16.msra.mxu0 %v16109_v45  ;;  %14055 = vmatprep.mubr.msk.bf16.mxu0 %vm16629_vm6, %v19903_v23  ;;  %v16113_v45 = vld [vmem:[#allocation6 + $0xb8] sm:$0xff]  }
 0x4ea   : > { %14077 = vmatprep.subr.bf16.mxu0 %v19903_v23 }
 0x4f0   : > { %14056 = vmatmul.mubr.msk.bf16.gmra.mrb[36].mxu0 %vm233_vm0, %v4044_v17  ;;  %v4409_v17 = vld [vmem:[#allocation2 + $0x70] sm:$0xff] }
 0x4f1   : > { %14059 = vmatprep.mubr.msk.bf16.mxu0 %vm16629_vm6, %v19903_v23  ;;  %v4415_v3 = vrot.slane %v4409_v17, 7  ;;  %v4508_v35 = vpack.c.bf16 %v4410_v52, %v4409_v17  ;;  %v4593_v53 = vrot.slane %v4409_v17, 1 }
 0x4f3   : > { %v4421_v22 = vsel %vm256_vm1, %v4415_v3, 0.0  ;;  %v4599_v26 = vsel %vm257_vm2, %v4593_v53, 0.0 }
 0x4f8   : > { %14060 = vmatmul.mubr.msk.bf16.gmra.mrb[40].mxu0 %vm233_vm0, %v4045_v31  ;;  %v4425_v31 = vpack.c.bf16 %v4422_v38, %v4421_v22 }
 0x4f9   : > { %14065 = vmatprep.mubr.msk.bf16.mxu0 %vm16629_vm6, %v19903_v23 }
 0x500   : > { %14066 = vmatmul.mubr.msk.bf16.vlgmr.msra.gmra.mrb[32].mxu0 %vm233_vm0, %v4144_v0  ;;  %v4595_v0 = vsel %vm257_vm2, %v4589_v59, 0.0 }
 0x501   : > { %14078 = vmatpush3.bf16.msra.mxu0 %v16110_v2  ;;  %14069 = vmatprep.mubr.msk.bf16.mxu0 %vm16629_vm6, %v19903_v23  ;;  %v4590_v2 = vrot.slane %v4406_v32, 1 }
 0x502   : > { %14091 = vmatprep.subr.bf16.mxu0 %v19903_v23 }
 0x503   : > { %v4596_v60 = vsel %vm257_vm2, %v4590_v2, 0.0 }
 0x504   : > { %v4601_v8 = vpack.c.bf16 %v4596_v60, %v4595_v0 }
 0x508   : > { %14070 = vmatmul.mubr.msk.bf16.gmra.mrb[36].mxu0 %vm233_vm0, %v4145_v15  ;;  %v4602_v15 = vpack.c.bf16 %v4598_v58, %v4597_v33 }
 0x509   : > { %14073 = vmatprep.mubr.msk.bf16.mxu0 %vm16629_vm6, %v19903_v23 }
 0x510   : > { %14074 = vmatmul.mubr.msk.bf16.gmra.mrb[40].mxu0 %vm233_vm0, %v4146_v12  ;;  %v4603_v12 = vpack.c.bf16 %v4600_v50, %v4599_v26 }
 0x511   : > { %14079 = vmatprep.mubr.msk.bf16.mxu0 %vm16629_vm6, %v19903_v23 }
 0x518   : > { %14080 = vmatmul.mubr.msk.bf16.vlgmr.msra.gmra.mrb[32].mxu0 %vm233_vm0, %v4227_v46  ;;  %v18490_v46 = vld [vmem:[#allocation2] sm:$0xff] }
 0x519   : > { %14092 = vmatpush3.bf16.msra.mxu0 %v16111_v47  ;;  %14083 = vmatprep.mubr.msk.bf16.mxu0 %vm16629_vm6, %v19903_v23  ;;  %v16115_v47 = vld [vmem:[#allocation6 + $0xf0] sm:$0xff]   ;;  %5697 = vst.msk [vmem:[#allocation2] sm:$0xff] %vm5607_vm11, %v19903_v23 }
 0x51a   : > { %14105 = vmatprep.subr.bf16.mxu0 %v19903_v23  ;;  %14148 = vmatpush3.bf16.msra.mxu1 %v16115_v47 }
 0x51b   : > { %14161 = vmatprep.subr.bf16.mxu1 %v19903_v23 }
 0x520   : > { %14084 = vmatmul.mubr.msk.bf16.gmra.mrb[36].mxu0 %vm233_vm0, %v4228_v42  ;;  %v18494_v42 = vld [vmem:[#allocation2 + $0x38] sm:$0xff] }
 0x521   : > { %14087 = vmatprep.mubr.msk.bf16.mxu0 %vm16629_vm6, %v19903_v23  ;;  %5698 = vst.msk [vmem:[#allocation2 + $0x38] sm:$0xff] %vm5607_vm11, %v19903_v23 }
 0x528   : > { %14088 = vmatmul.mubr.msk.bf16.gmra.mrb[40].mxu0 %vm233_vm0, %v4229_v16 }
 0x529   : > { %14093 = vmatprep.mubr.msk.bf16.mxu0 %vm16629_vm6, %v19903_v23 }
 0x530   : > { %14094 = vmatmul.mubr.msk.bf16.vlgmr.msra.gmra.mrb[32].mxu0 %vm233_vm0, %v4322_v10 }
 0x531   : > { %14106 = vmatpush3.bf16.msra.mxu0 %v16112_v57  ;;  %14097 = vmatprep.mubr.msk.bf16.mxu0 %vm16629_vm6, %v19903_v23 }
 0x532   : > { %14119 = vmatprep.subr.bf16.mxu0 %v19903_v23 }
 0x538   : > { %14098 = vmatmul.mubr.msk.bf16.gmra.mrb[36].mxu0 %vm233_vm0, %v4323_v30 }
 0x539   : > { %14101 = vmatprep.mubr.msk.bf16.mxu0 %vm16629_vm6, %v19903_v23 }
 0x540   : > { %14102 = vmatmul.mubr.msk.bf16.gmra.mrb[40].mxu0 %vm233_vm0, %v4324_v19 }
 0x541   : > { %14107 = vmatprep.mubr.msk.bf16.mxu0 %vm16629_vm6, %v19903_v23 }
 0x548   : > { %14108 = vmatmul.mubr.msk.bf16.vlgmr.msra.gmra.mrb[32].mxu0 %vm233_vm0, %v4423_v29 }
 0x549   : > { %14120 = vmatpush3.bf16.msra.mxu0 %v16113_v45  ;;  %14111 = vmatprep.mubr.msk.bf16.mxu0 %vm16629_vm6, %v19903_v23 }
 0x54a   : > { %14133 = vmatprep.subr.bf16.mxu0 %v19903_v23 }
 0x550   : > { %14112 = vmatmul.mubr.msk.bf16.gmra.mrb[36].mxu0 %vm233_vm0, %v4424_v62 }
 0x551   : > { %14115 = vmatprep.mubr.msk.bf16.mxu0 %vm16629_vm6, %v19903_v23 }
 0x558   : > { %14116 = vmatmul.mubr.msk.bf16.gmra.mrb[40].mxu0 %vm233_vm0, %v4425_v31 }
 0x559   : > { %14121 = vmatprep.mubr.msk.bf16.mxu0 %vm16629_vm6, %v19903_v23 }
 0x560   : > { %14122 = vmatmul.mubr.msk.bf16.vlgmr.msra.gmra.mrb[32].mxu0 %vm233_vm0, %v4506_v25 }
 0x561   : > { %14134 = vmatpush3.bf16.msra.mxu0 %v16114_v21  ;;  %14125 = vmatprep.mubr.msk.bf16.mxu0 %vm16629_vm6, %v19903_v23 }
 0x562   : > { %14273 = vmatprep.subr.bf16.mxu0 %v19903_v23 }
 0x568   : > { %14126 = vmatmul.mubr.msk.bf16.gmra.mrb[36].mxu0 %vm233_vm0, %v4507_v41 }
 0x569   : > { %14129 = vmatprep.mubr.msk.bf16.mxu0 %vm16629_vm6, %v19903_v23 }
 0x570   : > { %14130 = vmatmul.mubr.msk.bf16.gmra.mrb[40].mxu0 %vm233_vm0, %v4508_v35 }
 0x571   : > { %14135 = vmatprep.mubr.msk.bf16.mxu0 %vm16629_vm6, %v19903_v23 }
 0x578   : > { %14136 = vmatmul.mubr.msk.bf16.vlgmr.msra.gmra.mrb[32].mxu0 %vm233_vm0, %v4601_v8 }
 0x579   : > { %14139 = vmatprep.mubr.msk.bf16.mxu0 %vm16629_vm6, %v19903_v23 }
 0x580   : > { %14140 = vmatmul.mubr.msk.bf16.gmra.mrb[36].mxu0 %vm233_vm0, %v4602_v15 }
 0x581   : > { %14143 = vmatprep.mubr.msk.bf16.mxu0 %vm16629_vm6, %v19903_v23 }
 0x588   : > { %14144 = vmatmul.mubr.msk.bf16.gmra.mrb[40].mxu0 %vm233_vm0, %v4603_v12  ;;  %v4728_v12 = vld [vmem:[#allocation8 + $0x4] sm:$0x1] }
 0x589   : > { %14277 = vmatprep.mubr.msk.bf16.mxu0 %vm16629_vm6, %v19903_v23 }
 0x64b   : > { %v18498_v16 = vpop.f32.mrb[32].mxu0 }
 0x64c   : > { %v4702_v56 = vmul.f32 %v18498_v16, %v18498_v16  ;;  %v14137_v40 = vpop.f32.mrb[33].mxu0  ;;  %v4684_v61 = vsel %vm233_vm0, %v18498_v16, 0.0 }
 0x64d   : > { %v4658_v14 = vpop.f32.mrb[34].mxu0  ;;  %v4729_v40 = vld [vmem:[#allocation8 + $0x5] sm:$0x1] }
 0x64e   : > { %v4685_v57 = vsel %vm233_vm0, %v4658_v14, 0.0  ;;  %v4703_v10 = vmul.f32 %v4658_v14, %v4658_v14  ;;  %v14138_v63 = vpop.f32.mrb[35].mxu0  ;;  %v4708_v44 = vsel %vm233_vm0, %v4702_v56, 0.0 }
 0x64f   : > { %v4686_v24 = vadd.f32 %v4685_v57, %v4684_v61 }
 0x650   : > { %v4709_v11 = vsel %vm233_vm0, %v4703_v10, 0.0 }
 0x651   : > { %v4710_v30 = vadd.f32 %v4709_v11, %v4708_v44 }
 0x653   : > { %v4663_v28 = vpop.f32.mrb[36].mxu0 }
 0x654   : > { %v4687_v6 = vsel %vm233_vm0, %v4663_v28, 0.0  ;;  %v4704_v54 = vmul.f32 %v4663_v28, %v4663_v28  ;;  %v14141_v1 = vpop.f32.mrb[37].mxu0 }
 0x655   : > { %v4688_v55 = vadd.f32 %v4687_v6, %v4686_v24  ;;  %v4666_v32 = vpop.f32.mrb[38].mxu0 }
 0x656   : > { %v4711_v19 = vsel %vm233_vm0, %v4704_v54, 0.0  ;;  %v4689_v9 = vsel %vm233_vm0, %v4666_v32, 0.0  ;;  %v4705_v5 = vmul.f32 %v4666_v32, %v4666_v32  ;;  %v14142_v37 = vpop.f32.mrb[39].mxu0 }
 0x657   : > { %v4712_v48 = vadd.f32 %v4711_v19, %v4710_v30  ;;  %v4690_v18 = vadd.f32 %v4689_v9, %v4688_v55 }
 0x658   : > { %v4713_v43 = vsel %vm233_vm0, %v4705_v5, 0.0 }
 0x659   : > { %v4714_v45 = vadd.f32 %v4713_v43, %v4712_v48 }
 0x65b   : > { %v4671_v29 = vpop.f32.mrb[40].mxu0 }
 0x65c   : > { %v4691_v27 = vsel %vm233_vm0, %v4671_v29, 0.0  ;;  %v4706_v39 = vmul.f32 %v4671_v29, %v4671_v29  ;;  %v14145_v7 = vpop.f32.mrb[41].mxu0 }
 0x65d   : > { %v4692_v51 = vadd.f32 %v4691_v27, %v4690_v18  ;;  %v4674_v17 = vpop.f32.mrb[42].mxu0 }
 0x65e   : > { %v4715_v52 = vsel %vm233_vm0, %v4706_v39, 0.0  ;;  %v4693_v62 = vsel %vm233_vm0, %v4674_v17, 0.0  ;;  %v4707_v3 = vmul.f32 %v4674_v17, %v4674_v17  ;;  %v14146_v36 = vpop.f32.mrb[43].mxu0 }
 0x65f   : > { %v4716_v22 = vadd.f32 %v4715_v52, %v4714_v45  ;;  %v4694_v38 = vadd.f32 %v4693_v62, %v4692_v51 }
 0x660   : > { %v4717_v31 = vsel %vm233_vm0, %v4707_v3, 0.0 }
 0x661   : > { %v4695_v21 = vrot.slane %v4694_v38, 4  ;;  %v4718_v25 = vadd.f32 %v4717_v31, %v4716_v22 }
 0x663   : > { %v4696_v41 = vadd.f32 %v4695_v21, %v4694_v38  ;;  %v4719_v35 = vrot.slane %v4718_v25, 4 }
 0x665   : > { %v4697_v59 = vrot.slane %v4696_v41, 2  ;;  %v4720_v2 = vadd.f32 %v4719_v35, %v4718_v25 }
 0x667   : > { %v4698_v0 = vadd.f32 %v4697_v59, %v4696_v41  ;;  %v4721_v60 = vrot.slane %v4720_v2, 2 }
 0x669   : > { %v4699_v8 = vrot.slane %v4698_v0, 1  ;;  %v4722_v4 = vadd.f32 %v4721_v60, %v4720_v2 }
 0x66b   : > { %v4700_v34 = vadd.f32 %v4699_v8, %v4698_v0  ;;  %v4723_v33 = vrot.slane %v4722_v4, 1 }
 0x66d   : > { %v4701_v58 = vmul.f32 0.020833334, %v4700_v34  ;;  %v4724_v15 = vadd.f32 %v4723_v33, %v4722_v4  ;;  %v4788_v34 = vrot.slane %v18490_v46, 7 }
 0x66f   : > { %v4725_v53 = vmul.f32 0.020833334, %v4724_v15  ;;  %v4726_v49 = vmul.f32 %v4701_v58, %v4701_v58 }
 0x671   : > { %v4727_v26 = vsub.f32 %v4725_v53, %v4726_v49  ;;  %v16117_v53 = vld [vmem:[#allocation6 + $0x108] sm:$0xff]  }
 0x673   : > { %v4730_v50 = vadd.f32 1e-05, %v4727_v26 }
 0x675   : > { %16434 = vrsqrt.f32 %v4730_v50 }
 0x67f   : > { %v16435_v47 = vpop.eup %16434 }
 0x680   : > { %v4732_v56 = vmul.f32 %v16435_v47, %v4728_v12 }
 0x682   : > { %v4736_v61 = vrot.slane %v4732_v56, %v19912_v13  ;;  %v4743_v57 = vmul.f32 %v4732_v56, %v4701_v58  ;;  %v4794_v58 = vsel %vm256_vm1, %v4788_v34, 0.0 }
 0x684   : > { %v4737_v10 = vmul.f32 %v4736_v61, %v18498_v16  ;;  %v4738_v63 = vmul.f32 %v4736_v61, %v4658_v14  ;;  %v4739_v24 = vmul.f32 %v4736_v61, %v4663_v28  ;;  %v4740_v44 = vmul.f32 %v4736_v61, %v4666_v32 }
 0x685   : > { %v4741_v11 = vmul.f32 %v4736_v61, %v4671_v29  ;;  %v4742_v30 = vmul.f32 %v4736_v61, %v4674_v17  ;;  %v4744_v6 = vsub.f32 %v4729_v40, %v4743_v57  ;;  %v16116_v17 = vld [vmem:[#allocation6 + $0xd8] sm:$0xff]  }
 0x687   : > { %v4748_v54 = vrot.slane %v4744_v6, %v19912_v13 }
 0x689   : > { %v4749_v1 = vadd.f32 %v4748_v54, %v4737_v10  ;;  %v4750_v55 = vadd.f32 %v4748_v54, %v4738_v63  ;;  %v4751_v19 = vadd.f32 %v4748_v54, %v4739_v24  ;;  %v4752_v9 = vadd.f32 %v4748_v54, %v4740_v44 }
 0x68a   : > { %v4753_v5 = vadd.f32 %v4748_v54, %v4741_v11  ;;  %v4754_v37 = vadd.f32 %v4748_v54, %v4742_v30  ;;  %v4954_v24 = vrot.slane %v18490_v46, 1  ;;  %v16118_v11 = vld [vmem:[#allocation6 + $0xe0] sm:$0xff]  }
 0x68b   : > { %vm4755_vm12 = vcmp.ge.f32.partialorder %v4749_v1, 0.0  ;;  %vm4756_vm13 = vcmp.ge.f32.partialorder %v4750_v55, 0.0  ;;  %vm4757_vm14 = vcmp.ge.f32.partialorder %v4751_v19, 0.0  ;;  %vm4758_vm15 = vcmp.ge.f32.partialorder %v4752_v9, 0.0 }
 0x68c   : > { %vm4759_vm3 = vcmp.ge.f32.partialorder %v4753_v5, 0.0  ;;  %vm4760_vm4 = vcmp.ge.f32.partialorder %v4754_v37, 0.0  ;;  %v4761_v16 = vmul.f32 0.3, %v4749_v1  ;;  %v4762_v14 = vmul.f32 0.3, %v4750_v55 }
 0x68d   : > { %v4763_v28 = vmul.f32 0.3, %v4751_v19  ;;  %v4764_v32 = vmul.f32 0.3, %v4752_v9  ;;  %v4765_v48 = vmul.f32 0.3, %v4753_v5 }
 0x68e   : > { %v4766_v18 = vmul.f32 0.3, %v4754_v37  ;;  %v4767_v43 = vsel %vm4755_vm12, %v4749_v1, %v4761_v16  ;;  %v4768_v45 = vsel %vm4756_vm13, %v4750_v55, %v4762_v14  ;;  %v4960_v44 = vsel %vm257_vm2, %v4954_v24, 0.0  ;;  %v16119_v55 = vld [vmem:[#allocation6 + $0xf8] sm:$0xff]  }
 0x68f   : > { %v4769_v29 = vsel %vm4757_vm14, %v4751_v19, %v4763_v28  ;;  %v4770_v27 = vsel %vm4758_vm15, %v4752_v9, %v4764_v32  ;;  %v4771_v39 = vsel %vm4759_vm3, %v4753_v5, %v4765_v48  ;;  %4776 = vst.msk [vmem:[#allocation2 + $0x8] sm:$0xff] %vm233_vm0, %v4767_v43  ;;  %4777 = vst.msk [vmem:[#allocation2 + $0x10] sm:$0xff] %vm233_vm0, %v4768_v45  ;;  %v16120_v28 = vld [vmem:[#allocation6 + $0x110] sm:$0xff]   ;;  %v16121_v43 = vld [vmem:[#allocation6 + $0xe8] sm:$0xff]  }
 0x690   : > { %v4772_v7 = vsel %vm4760_vm4, %v4754_v37, %v4766_v18  ;;  %4778 = vst.msk [vmem:[#allocation2 + $0x18] sm:$0xff] %vm233_vm0, %v4769_v29  ;;  %4779 = vst.msk [vmem:[#allocation2 + $0x20] sm:$0xff] %vm233_vm0, %v4770_v27 }
 0x691   : > { %4780 = vst.msk [vmem:[#allocation2 + $0x28] sm:$0xff] %vm233_vm0, %v4771_v39  ;;  %4781 = vst.msk [vmem:[#allocation2 + $0x30] sm:$0xff] %vm233_vm0, %v4772_v7  ;;  %v16122_v39 = vld [vmem:[#allocation6 + $0x100] sm:$0xff]   ;;  %v5339_v7 = vrot.slane %v18494_v42, 7 }
 0x696   : > { %v18524_v51 = vld [vmem:[#allocation2 + $0x8] sm:$0xff]  ;;  %v18528_v62 = vld [vmem:[#allocation2 + $0x10] sm:$0xff] }
 0x697   : > { %v4805_v52 = vpack.c.bf16 %v18524_v51, %v18490_v46  ;;  %v18530_v3 = vld [vmem:[#allocation2 + $0x18] sm:$0xff]  ;;  %v18533_v36 = vld [vmem:[#allocation2 + $0x20] sm:$0xff]  ;;  %v4955_v22 = vrot.slane %v18524_v51, 1  ;;  %v4956_v38 = vrot.slane %v18528_v62, 1  ;;  %v4789_v33 = vrot.slane %v18524_v51, 7 }
 0x698   : > { %v4957_v31 = vrot.slane %v18530_v3, 1  ;;  %v4958_v21 = vrot.slane %v18533_v36, 1  ;;  %v18560_v2 = vpack.c.bf16 %v18530_v3, %v18528_v62  ;;  %v18570_v8 = vld [vmem:[#allocation2 + $0x28] sm:$0xff]  ;;  %v4790_v26 = vrot.slane %v18528_v62, 7  ;;  %v5054_v9 = vld [vmem:[#allocation2 + $0x30] sm:$0xff] }
 0x699   : > { %14150 = vmatmul.mubr.msk.bf16.vlgmr.msra.gmra.mrb[16].mxu1 %vm233_vm0, %v4805_v52  ;;  %v18544_v25 = vsel %vm257_vm2, %v4955_v22, 0.0  ;;  %v18548_v41 = vsel %vm257_vm2, %v4956_v38, 0.0  ;;  %v18574_v4 = vpack.c.bf16 %v18570_v8, %v18533_v36  ;;  %v4795_v15 = vsel %vm256_vm1, %v4789_v33, 0.0  ;;  %v16123_v52 = vld [vmem:[#allocation6 + $0x118] sm:$0xff]   ;;  %v16124_v38 = vld [vmem:[#allocation6 + $0x150] sm:$0xff]  }
 0x69a   : > { %14162 = vmatpush3.bf16.msra.mxu1 %v16116_v17  ;;  %14153 = vmatprep.mubr.msk.bf16.mxu1 %vm16629_vm6, %v19903_v23  ;;  %v18552_v35 = vsel %vm257_vm2, %v4957_v31, 0.0  ;;  %v18556_v59 = vsel %vm257_vm2, %v4958_v21, 0.0  ;;  %v5245_v0 = vpack.c.bf16 %v18548_v41, %v18544_v25  ;;  %v4800_v49 = vpack.c.bf16 %v4795_v15, %v4794_v58  ;;  %v18727_v31 = vld [vmem:[#allocation2] sm:$0xff]  ;;  %v18733_v21 = vld [vmem:[#allocation2 + $0x38] sm:$0xff] }
 0x69b   : > { %14175 = vmatprep.subr.bf16.mxu1 %v19903_v23  ;;  %v5246_v60 = vpack.c.bf16 %v18556_v59, %v18552_v35  ;;  %v4791_v50 = vrot.slane %v18530_v3, 7  ;;  %v4796_v12 = vsel %vm256_vm1, %v4790_v26, 0.0  ;;  %v4792_v40 = vrot.slane %v18533_v36, 7  ;;  %6697 = vst.msk [vmem:[#allocation2] sm:$0xff] %vm5607_vm11, %v19903_v23  ;;  %14274 = vmatpush3.bf16.msra.mxu0 %v16124_v38  ;;  %6698 = vst.msk [vmem:[#allocation2 + $0x38] sm:$0xff] %vm5607_vm11, %v19903_v23 }
 0x69c   : > { %v4793_v61 = vrot.slane %v18570_v8, 7  ;;  %v4966_v30 = vpack.c.bf16 %v18544_v25, %v4960_v44  ;;  %v18624_v46 = vpack.c.bf16 %v18552_v35, %v18548_v41  ;;  %v4959_v6 = vrot.slane %v18570_v8, 1  ;;  %14275 = vmatprep.subr.bf16.mxu0 %v19903_v23  ;;  %v5652_v38 = vld [vmem:[#allocation8 + $0x6] sm:$0x1] }
 0x69d   : > { %v4797_v47 = vsel %vm256_vm1, %v4791_v50, 0.0  ;;  %v4798_v57 = vsel %vm256_vm1, %v4792_v40, 0.0  ;;  %v5067_v19 = vpack.c.bf16 %v4796_v12, %v4795_v15  ;;  %v5060_v37 = vrot.slane %v5054_v9, 7 }
 0x69e   : > { %v18596_v56 = vpack.c.bf16 %v4797_v47, %v4796_v12  ;;  %v4799_v10 = vsel %vm256_vm1, %v4793_v61, 0.0  ;;  %v4965_v54 = vsel %vm257_vm2, %v4959_v6, 0.0  ;;  %v5068_v5 = vpack.c.bf16 %v4798_v57, %v4797_v47 }
 0x69f   : > { %v18608_v63 = vpack.c.bf16 %v4799_v10, %v4798_v57  ;;  %v18634_v1 = vpack.c.bf16 %v4965_v54, %v18556_v59  ;;  %v5066_v16 = vsel %vm256_vm1, %v5060_v37, 0.0  ;;  %v5150_v32 = vpack.c.bf16 %v18528_v62, %v18524_v51 }
 0x6a0   : > { %v5069_v14 = vpack.c.bf16 %v5066_v16, %v4799_v10  ;;  %v5151_v48 = vpack.c.bf16 %v18533_v36, %v18530_v3  ;;  %v5152_v18 = vpack.c.bf16 %v5054_v9, %v18570_v8  ;;  %v5238_v45 = vrot.slane %v5054_v9, 1 }
 0x6a1   : > { %14154 = vmatmul.mubr.msk.bf16.gmra.mrb[20].mxu1 %vm233_vm0, %v18560_v2  ;;  %v5345_v51 = vsel %vm256_vm1, %v5339_v7, 0.0  ;;  %v5431_v62 = vpack.c.bf16 %v18494_v42, %v5054_v9  ;;  %v5517_v3 = vrot.slane %v18494_v42, 1  ;;  %v16125_v42 = vld [vmem:[#allocation6 + $0x158] sm:$0xff]  }
 0x6a2   : > { %14157 = vmatprep.mubr.msk.bf16.mxu1 %vm16629_vm6, %v19903_v23  ;;  %v5244_v29 = vsel %vm257_vm2, %v5238_v45, 0.0  ;;  %v5348_v17 = vpack.c.bf16 %v5345_v51, %v5066_v16  ;;  %14276 = vmatpush3.bf16.msra.mxu0 %v16125_v42 }
 0x6a3   : > { %v5247_v27 = vpack.c.bf16 %v5244_v29, %v4965_v54  ;;  %v5523_v36 = vsel %vm257_vm2, %v5517_v3, 0.0  ;;  %14289 = vmatprep.subr.bf16.mxu0 %v19903_v23 }
 0x6a4   : > { %v5526_v22 = vpack.c.bf16 %v5523_v36, %v5244_v29 }
 0x6a9   : > { %14158 = vmatmul.mubr.msk.bf16.gmra.mrb[24].mxu1 %vm233_vm0, %v18574_v4 }
 0x6aa   : > { %14163 = vmatprep.mubr.msk.bf16.mxu1 %vm16629_vm6, %v19903_v23 }
 0x6b1   : > { %14164 = vmatmul.mubr.msk.bf16.vlgmr.msra.gmra.mrb[16].mxu1 %vm233_vm0, %v4800_v49 }
 0x6b2   : > { %14176 = vmatpush3.bf16.msra.mxu1 %v16117_v53  ;;  %14167 = vmatprep.mubr.msk.bf16.mxu1 %vm16629_vm6, %v19903_v23 }
 0x6b3   : > { %14189 = vmatprep.subr.bf16.mxu1 %v19903_v23 }
 0x6b9   : > { %14168 = vmatmul.mubr.msk.bf16.gmra.mrb[20].mxu1 %vm233_vm0, %v18596_v56 }
 0x6ba   : > { %14171 = vmatprep.mubr.msk.bf16.mxu1 %vm16629_vm6, %v19903_v23 }
 0x6c1   : > { %14172 = vmatmul.mubr.msk.bf16.gmra.mrb[24].mxu1 %vm233_vm0, %v18608_v63 }
 0x6c2   : > { %14177 = vmatprep.mubr.msk.bf16.mxu1 %vm16629_vm6, %v19903_v23 }
 0x6c9   : > { %14178 = vmatmul.mubr.msk.bf16.vlgmr.msra.gmra.mrb[16].mxu1 %vm233_vm0, %v4966_v30 }
 0x6ca   : > { %14190 = vmatpush3.bf16.msra.mxu1 %v16118_v11  ;;  %14181 = vmatprep.mubr.msk.bf16.mxu1 %vm16629_vm6, %v19903_v23 }
 0x6cb   : > { %14203 = vmatprep.subr.bf16.mxu1 %v19903_v23 }
 0x6d1   : > { %14182 = vmatmul.mubr.msk.bf16.gmra.mrb[20].mxu1 %vm233_vm0, %v18624_v46 }
 0x6d2   : > { %14185 = vmatprep.mubr.msk.bf16.mxu1 %vm16629_vm6, %v19903_v23 }
 0x6d9   : > { %14186 = vmatmul.mubr.msk.bf16.gmra.mrb[24].mxu1 %vm233_vm0, %v18634_v1 }
 0x6da   : > { %14191 = vmatprep.mubr.msk.bf16.mxu1 %vm16629_vm6, %v19903_v23 }
 0x6e1   : > { %14192 = vmatmul.mubr.msk.bf16.vlgmr.msra.gmra.mrb[16].mxu1 %vm233_vm0, %v5067_v19 }
 0x6e2   : > { %14204 = vmatpush3.bf16.msra.mxu1 %v16119_v55  ;;  %14195 = vmatprep.mubr.msk.bf16.mxu1 %vm16629_vm6, %v19903_v23 }
 0x6e3   : > { %14217 = vmatprep.subr.bf16.mxu1 %v19903_v23 }
 0x6e9   : > { %14196 = vmatmul.mubr.msk.bf16.gmra.mrb[20].mxu1 %vm233_vm0, %v5068_v5 }
 0x6ea   : > { %14199 = vmatprep.mubr.msk.bf16.mxu1 %vm16629_vm6, %v19903_v23 }
 0x6f1   : > { %14200 = vmatmul.mubr.msk.bf16.gmra.mrb[24].mxu1 %vm233_vm0, %v5069_v14 }
 0x6f2   : > { %14205 = vmatprep.mubr.msk.bf16.mxu1 %vm16629_vm6, %v19903_v23 }
 0x6f9   : > { %14206 = vmatmul.mubr.msk.bf16.vlgmr.msra.gmra.mrb[16].mxu1 %vm233_vm0, %v5150_v32 }
 0x6fa   : > { %14218 = vmatpush3.bf16.msra.mxu1 %v16120_v28  ;;  %14209 = vmatprep.mubr.msk.bf16.mxu1 %vm16629_vm6, %v19903_v23 }
 0x6fb   : > { %14231 = vmatprep.subr.bf16.mxu1 %v19903_v23 }
 0x701   : > { %14210 = vmatmul.mubr.msk.bf16.gmra.mrb[20].mxu1 %vm233_vm0, %v5151_v48 }
 0x702   : > { %14213 = vmatprep.mubr.msk.bf16.mxu1 %vm16629_vm6, %v19903_v23 }
 0x709   : > { %14214 = vmatmul.mubr.msk.bf16.gmra.mrb[24].mxu1 %vm233_vm0, %v5152_v18 }
 0x70a   : > { %14219 = vmatprep.mubr.msk.bf16.mxu1 %vm16629_vm6, %v19903_v23 }
 0x711   : > { %14220 = vmatmul.mubr.msk.bf16.vlgmr.msra.gmra.mrb[16].mxu1 %vm233_vm0, %v5245_v0 }
 0x712   : > { %14232 = vmatpush3.bf16.msra.mxu1 %v16121_v43  ;;  %14223 = vmatprep.mubr.msk.bf16.mxu1 %vm16629_vm6, %v19903_v23 }
 0x713   : > { %14245 = vmatprep.subr.bf16.mxu1 %v19903_v23 }
 0x719   : > { %14224 = vmatmul.mubr.msk.bf16.gmra.mrb[20].mxu1 %vm233_vm0, %v5246_v60 }
 0x71a   : > { %14227 = vmatprep.mubr.msk.bf16.mxu1 %vm16629_vm6, %v19903_v23 }
 0x721   : > { %14228 = vmatmul.mubr.msk.bf16.gmra.mrb[24].mxu1 %vm233_vm0, %v5247_v27 }
 0x722   : > { %14233 = vmatprep.mubr.msk.bf16.mxu1 %vm16629_vm6, %v19903_v23 }
 0x729   : > { %14234 = vmatmul.mubr.msk.bf16.vlgmr.msra.gmra.mrb[16].mxu1 %vm233_vm0, %v18596_v56 }
 0x72a   : > { %14246 = vmatpush3.bf16.msra.mxu1 %v16122_v39  ;;  %14237 = vmatprep.mubr.msk.bf16.mxu1 %vm16629_vm6, %v19903_v23 }
 0x72b   : > { %14259 = vmatprep.subr.bf16.mxu1 %v19903_v23 }
 0x731   : > { %14238 = vmatmul.mubr.msk.bf16.gmra.mrb[20].mxu1 %vm233_vm0, %v18608_v63 }
 0x732   : > { %14241 = vmatprep.mubr.msk.bf16.mxu1 %vm16629_vm6, %v19903_v23 }
 0x739   : > { %14242 = vmatmul.mubr.msk.bf16.gmra.mrb[24].mxu1 %vm233_vm0, %v5348_v17 }
 0x73a   : > { %14247 = vmatprep.mubr.msk.bf16.mxu1 %vm16629_vm6, %v19903_v23 }
 0x741   : > { %14248 = vmatmul.mubr.msk.bf16.vlgmr.msra.gmra.mrb[16].mxu1 %vm233_vm0, %v18560_v2 }
 0x742   : > { %14260 = vmatpush3.bf16.msra.mxu1 %v16123_v52  ;;  %14251 = vmatprep.mubr.msk.bf16.mxu1 %vm16629_vm6, %v19903_v23 }
 0x743   : > { %14417 = vmatprep.subr.bf16.mxu1 %v19903_v23 }
 0x749   : > { %14252 = vmatmul.mubr.msk.bf16.gmra.mrb[20].mxu1 %vm233_vm0, %v18574_v4 }
 0x74a   : > { %14255 = vmatprep.mubr.msk.bf16.mxu1 %vm16629_vm6, %v19903_v23 }
 0x751   : > { %14256 = vmatmul.mubr.msk.bf16.gmra.mrb[24].mxu1 %vm233_vm0, %v5431_v62 }
 0x752   : > { %14261 = vmatprep.mubr.msk.bf16.mxu1 %vm16629_vm6, %v19903_v23 }
 0x759   : > { %14262 = vmatmul.mubr.msk.bf16.vlgmr.msra.gmra.mrb[16].mxu1 %vm233_vm0, %v18624_v46 }
 0x75a   : > { %14265 = vmatprep.mubr.msk.bf16.mxu1 %vm16629_vm6, %v19903_v23 }
 0x761   : > { %14266 = vmatmul.mubr.msk.bf16.gmra.mrb[20].mxu1 %vm233_vm0, %v18634_v1 }
 0x762   : > { %14269 = vmatprep.mubr.msk.bf16.mxu1 %vm16629_vm6, %v19903_v23 }
 0x769   : > { %14270 = vmatmul.mubr.msk.bf16.gmra.mrb[24].mxu1 %vm233_vm0, %v5526_v22 }
 0x76a   : > { %14421 = vmatprep.mubr.msk.bf16.mxu1 %vm16629_vm6, %v19903_v23 }
 0x82c   : > { %v18737_v25 = vpop.f32.mrb[16].mxu1 }
 0x82d   : > { %v5626_v41 = vmul.f32 %v18737_v25, %v18737_v25  ;;  %v14263_v35 = vpop.f32.mrb[17].mxu1  ;;  %v5608_v2 = vsel %vm5607_vm11, %v18737_v25, 0.0 }
 0x82e   : > { %v5581_v59 = vpop.f32.mrb[18].mxu1  ;;  %v5653_v35 = vld [vmem:[#allocation8 + $0x7] sm:$0x1] }
 0x82f   : > { %v5609_v0 = vsel %vm5607_vm11, %v5581_v59, 0.0  ;;  %v5627_v60 = vmul.f32 %v5581_v59, %v5581_v59  ;;  %v14264_v8 = vpop.f32.mrb[19].mxu1  ;;  %v5632_v34 = vsel %vm5607_vm11, %v5626_v41, 0.0 }
 0x830   : > { %v5610_v4 = vadd.f32 %v5609_v0, %v5608_v2 }
 0x831   : > { %v5633_v33 = vsel %vm5607_vm11, %v5627_v60, 0.0 }
 0x832   : > { %v5634_v58 = vadd.f32 %v5633_v33, %v5632_v34 }
 0x834   : > { %v5586_v15 = vpop.f32.mrb[20].mxu1 }
 0x835   : > { %v5611_v53 = vsel %vm5607_vm11, %v5586_v15, 0.0  ;;  %v5628_v49 = vmul.f32 %v5586_v15, %v5586_v15  ;;  %v14267_v26 = vpop.f32.mrb[21].mxu1 }
 0x836   : > { %v5612_v50 = vadd.f32 %v5611_v53, %v5610_v4  ;;  %v5589_v12 = vpop.f32.mrb[22].mxu1 }
 0x837   : > { %v5635_v47 = vsel %vm5607_vm11, %v5628_v49, 0.0  ;;  %v5613_v56 = vsel %vm5607_vm11, %v5589_v12, 0.0  ;;  %v5629_v40 = vmul.f32 %v5589_v12, %v5589_v12  ;;  %v14268_v61 = vpop.f32.mrb[23].mxu1 }
 0x838   : > { %v5636_v57 = vadd.f32 %v5635_v47, %v5634_v58  ;;  %v5614_v10 = vadd.f32 %v5613_v56, %v5612_v50 }
 0x839   : > { %v5637_v63 = vsel %vm5607_vm11, %v5629_v40, 0.0 }
 0x83a   : > { %v5638_v24 = vadd.f32 %v5637_v63, %v5636_v57 }
 0x83c   : > { %v5594_v44 = vpop.f32.mrb[24].mxu1 }
 0x83d   : > { %v5615_v11 = vsel %vm5607_vm11, %v5594_v44, 0.0  ;;  %v5630_v30 = vmul.f32 %v5594_v44, %v5594_v44  ;;  %v14271_v46 = vpop.f32.mrb[25].mxu1 }
 0x83e   : > { %v5616_v6 = vadd.f32 %v5615_v11, %v5614_v10  ;;  %v5597_v54 = vpop.f32.mrb[26].mxu1 }
 0x83f   : > { %v5639_v1 = vsel %vm5607_vm11, %v5630_v30, 0.0  ;;  %v5617_v55 = vsel %vm5607_vm11, %v5597_v54, 0.0  ;;  %v5631_v19 = vmul.f32 %v5597_v54, %v5597_v54  ;;  %v14272_v9 = vpop.f32.mrb[27].mxu1 }
 0x840   : > { %v5640_v5 = vadd.f32 %v5639_v1, %v5638_v24  ;;  %v5618_v37 = vadd.f32 %v5617_v55, %v5616_v6 }
 0x841   : > { %v5641_v16 = vsel %vm5607_vm11, %v5631_v19, 0.0 }
 0x842   : > { %v5619_v14 = vrot.slane %v5618_v37, 4  ;;  %v5642_v28 = vadd.f32 %v5641_v16, %v5640_v5 }
 0x844   : > { %v5620_v32 = vadd.f32 %v5619_v14, %v5618_v37  ;;  %v5643_v48 = vrot.slane %v5642_v28, 4  ;;  %v16127_v37 = vld [vmem:[#allocation6 + $0x128] sm:$0xff]  }
 0x846   : > { %v5621_v18 = vrot.slane %v5620_v32, 2  ;;  %v5644_v43 = vadd.f32 %v5643_v48, %v5642_v28 }
 0x848   : > { %v5622_v45 = vadd.f32 %v5621_v18, %v5620_v32  ;;  %v5645_v29 = vrot.slane %v5644_v43, 2 }
 0x84a   : > { %v5623_v27 = vrot.slane %v5622_v45, 1  ;;  %v5646_v39 = vadd.f32 %v5645_v29, %v5644_v43 }
 0x84c   : > { %v5624_v7 = vadd.f32 %v5623_v27, %v5622_v45  ;;  %v5647_v51 = vrot.slane %v5646_v39, 1 }
 0x84e   : > { %v5625_v17 = vmul.f32 0.020833334, %v5624_v7  ;;  %v5648_v52 = vadd.f32 %v5647_v51, %v5646_v39  ;;  %v5711_v51 = vrot.slane %v18727_v31, 7 }
 0x850   : > { %v5649_v62 = vmul.f32 0.020833334, %v5648_v52  ;;  %v5650_v3 = vmul.f32 %v5625_v17, %v5625_v17  ;;  %v5717_v52 = vsel %vm256_vm1, %v5711_v51, 0.0 }
 0x852   : > { %v5651_v36 = vsub.f32 %v5649_v62, %v5650_v3  ;;  %v16128_v3 = vld [vmem:[#allocation6 + $0x180] sm:$0xff]  }
 0x854   : > { %v5654_v22 = vadd.f32 1e-05, %v5651_v36 }
 0x856   : > { %16436 = vrsqrt.f32 %v5654_v22 }
 0x860   : > { %v16437_v42 = vpop.eup %16436 }
 0x861   : > { %v5656_v41 = vmul.f32 %v16437_v42, %v5652_v38  ;;  %v16129_v42 = vld [vmem:[#allocation6 + $0x188] sm:$0xff]  }
 0x863   : > { %v5660_v2 = vrot.slane %v5656_v41, %v19912_v13  ;;  %v5667_v0 = vmul.f32 %v5656_v41, %v5625_v17 }
 0x865   : > { %v5661_v60 = vmul.f32 %v5660_v2, %v18737_v25  ;;  %v5662_v8 = vmul.f32 %v5660_v2, %v5581_v59  ;;  %v5663_v4 = vmul.f32 %v5660_v2, %v5586_v15  ;;  %v5664_v34 = vmul.f32 %v5660_v2, %v5589_v12 }
 0x866   : > { %v5665_v33 = vmul.f32 %v5660_v2, %v5594_v44  ;;  %v5666_v58 = vmul.f32 %v5660_v2, %v5597_v54  ;;  %v5668_v53 = vsub.f32 %v5653_v35, %v5667_v0  ;;  %v16126_v54 = vld [vmem:[#allocation6 + $0x120] sm:$0xff]  }
 0x868   : > { %v5672_v49 = vrot.slane %v5668_v53, %v19912_v13  ;;  %v16130_v53 = vld [vmem:[#allocation6 + $0x130] sm:$0xff]  }
 0x86a   : > { %v5673_v26 = vadd.f32 %v5672_v49, %v5661_v60  ;;  %v5674_v50 = vadd.f32 %v5672_v49, %v5662_v8  ;;  %v5675_v47 = vadd.f32 %v5672_v49, %v5663_v4  ;;  %v5676_v56 = vadd.f32 %v5672_v49, %v5664_v34 }
 0x86b   : > { %v5677_v40 = vadd.f32 %v5672_v49, %v5665_v33  ;;  %v5678_v61 = vadd.f32 %v5672_v49, %v5666_v58  ;;  %v5893_v33 = vrot.slane %v18727_v31, 1 }
 0x86c   : > { %vm5679_vm0 = vcmp.ge.f32.partialorder %v5673_v26, 0.0  ;;  %vm5680_vm5 = vcmp.ge.f32.partialorder %v5674_v50, 0.0  ;;  %vm5681_vm7 = vcmp.ge.f32.partialorder %v5675_v47, 0.0  ;;  %vm5682_vm8 = vcmp.ge.f32.partialorder %v5676_v56, 0.0 }
 0x86d   : > { %vm5683_vm9 = vcmp.ge.f32.partialorder %v5677_v40, 0.0  ;;  %vm5684_vm10 = vcmp.ge.f32.partialorder %v5678_v61, 0.0  ;;  %v5685_v25 = vmul.f32 0.3, %v5673_v26  ;;  %v5686_v59 = vmul.f32 0.3, %v5674_v50 }
 0x86e   : > { %v5687_v15 = vmul.f32 0.3, %v5675_v47  ;;  %v5688_v12 = vmul.f32 0.3, %v5676_v56  ;;  %v5689_v57 = vmul.f32 0.3, %v5677_v40 }
 0x86f   : > { %v5690_v10 = vmul.f32 0.3, %v5678_v61  ;;  %v18757_v63 = vsel %vm5679_vm0, %v5673_v26, %v5685_v25  ;;  %v18759_v24 = vsel %vm5680_vm5, %v5674_v50, %v5686_v59  ;;  %v5899_v58 = vsel %vm257_vm2, %v5893_v33, 0.0  ;;  %v16131_v26 = vld [vmem:[#allocation6 + $0x138] sm:$0xff]   ;;  %v16133_v25 = vld [vmem:[#allocation6 + $0x168] sm:$0xff]  }
 0x870   : > { %v18761_v44 = vsel %vm5681_vm7, %v5675_v47, %v5687_v15  ;;  %v18763_v11 = vsel %vm5682_vm8, %v5676_v56, %v5688_v12  ;;  %v18765_v30 = vsel %vm5683_vm9, %v5677_v40, %v5689_v57  ;;  %5699 = vst.msk [vmem:[#allocation2 + $0x8] sm:$0xff] %vm5607_vm11, %v18757_v63  ;;  %5700 = vst.msk [vmem:[#allocation2 + $0x10] sm:$0xff] %vm5607_vm11, %v18759_v24  ;;  %v16132_v40 = vld [vmem:[#allocation6 + $0x160] sm:$0xff]   ;;  %vm7945_vm0 = vcmask 523264  }
 0x871   : > { %v18771_v46 = vsel %vm5684_vm10, %v5678_v61, %v5690_v10  ;;  %5701 = vst.msk [vmem:[#allocation2 + $0x18] sm:$0xff] %vm5607_vm11, %v18761_v44  ;;  %5702 = vst.msk [vmem:[#allocation2 + $0x20] sm:$0xff] %vm5607_vm11, %v18763_v11 }
 0x872   : > { %5703 = vst.msk [vmem:[#allocation2 + $0x28] sm:$0xff] %vm5607_vm11, %v18765_v30  ;;  %5704 = vst.msk [vmem:[#allocation2 + $0x30] sm:$0xff] %vm5607_vm11, %v18771_v46 }
 0x877   : > { %v18781_v6 = vld [vmem:[#allocation2 + $0x8] sm:$0xff]  ;;  %v18785_v55 = vld [vmem:[#allocation2 + $0x10] sm:$0xff] }
 0x878   : > { %v5730_v1 = vpack.c.bf16 %v18781_v6, %v18727_v31  ;;  %v18787_v19 = vld [vmem:[#allocation2 + $0x18] sm:$0xff]  ;;  %v18790_v9 = vld [vmem:[#allocation2 + $0x20] sm:$0xff]  ;;  %v5894_v5 = vrot.slane %v18781_v6, 1  ;;  %v5895_v16 = vrot.slane %v18785_v55, 1  ;;  %v5712_v17 = vrot.slane %v18781_v6, 7 }
 0x879   : > { %v5896_v14 = vrot.slane %v18787_v19, 1  ;;  %v5897_v28 = vrot.slane %v18790_v9, 1  ;;  %v18817_v45 = vpack.c.bf16 %v18787_v19, %v18785_v55  ;;  %v18828_v39 = vld [vmem:[#allocation2 + $0x28] sm:$0xff]  ;;  %v5713_v22 = vrot.slane %v18785_v55, 7  ;;  %v18904_v59 = vld [vmem:[#allocation2 + $0x30] sm:$0xff] }
 0x87a   : > { %14278 = vmatmul.mubr.msk.bf16.vlgmr.msra.gmra.mrb[44].mxu0 %vm5607_vm11, %v5730_v1  ;;  %v18801_v32 = vsel %vm257_vm2, %v5894_v5, 0.0  ;;  %v18805_v48 = vsel %vm257_vm2, %v5895_v16, 0.0  ;;  %v18832_v7 = vpack.c.bf16 %v18828_v39, %v18790_v9  ;;  %v5718_v62 = vsel %vm256_vm1, %v5712_v17, 0.0  ;;  %v16135_v5 = vld [vmem:[#allocation6 + $0x198] sm:$0xff]   ;;  %v16142_v17 = vld [vmem:[#allocation6 + $0x1e0] sm:$0xff]  }
 0x87b   : > { %14290 = vmatpush3.bf16.msra.mxu0 %v16126_v54  ;;  %14281 = vmatprep.mubr.msk.bf16.mxu0 %vm16629_vm6, %v19903_v23  ;;  %v18809_v18 = vsel %vm257_vm2, %v5896_v14, 0.0  ;;  %v18813_v43 = vsel %vm257_vm2, %v5897_v28, 0.0  ;;  %v6208_v29 = vpack.c.bf16 %v18805_v48, %v18801_v32  ;;  %v5723_v36 = vpack.c.bf16 %v5718_v62, %v5717_v52  ;;  %v16134_v54 = vld [vmem:[#allocation6 + $0x190] sm:$0xff]  }
 0x87c   : > { %14291 = vmatprep.subr.bf16.mxu0 %v19903_v23  ;;  %v6209_v27 = vpack.c.bf16 %v18813_v43, %v18809_v18  ;;  %v5714_v38 = vrot.slane %v18787_v19, 7  ;;  %v5719_v41 = vsel %vm256_vm1, %v5713_v22, 0.0  ;;  %v5715_v0 = vrot.slane %v18790_v9, 7  ;;  %v16138_v28 = vld [vmem:[#allocation6 + $0x170] sm:$0xff]   ;;  %14418 = vmatpush3.bf16.msra.mxu1 %v16142_v17 }
 0x87d   : > { %v5716_v60 = vrot.slane %v18828_v39, 7  ;;  %v5905_v49 = vpack.c.bf16 %v18801_v32, %v5899_v58  ;;  %v18883_v31 = vpack.c.bf16 %v18809_v18, %v18805_v48  ;;  %v5898_v50 = vrot.slane %v18828_v39, 1  ;;  %v16139_v32 = vld [vmem:[#allocation6 + $0x178] sm:$0xff]   ;;  %v18998_v52 = vld [vmem:[#allocation2] sm:$0xff]  ;;  %14419 = vmatprep.subr.bf16.mxu1 %v19903_v23 }
 0x87e   : > { %v5720_v35 = vsel %vm256_vm1, %v5714_v38, 0.0  ;;  %v5721_v8 = vsel %vm256_vm1, %v5715_v0, 0.0  ;;  %v6014_v61 = vpack.c.bf16 %v5719_v41, %v5718_v62  ;;  %v6007_v12 = vrot.slane %v18904_v59, 7  ;;  %7347 = vst.msk [vmem:[#allocation2] sm:$0xff] %vm5607_vm11, %v19903_v23 }
 0x87f   : > { %14292 = vmatpush3.bf16.msra.mxu0 %v16127_v37  ;;  %v18854_v2 = vpack.c.bf16 %v5720_v35, %v5719_v41  ;;  %v5722_v4 = vsel %vm256_vm1, %v5716_v60, 0.0  ;;  %v5904_v47 = vsel %vm257_vm2, %v5898_v50, 0.0  ;;  %v6015_v15 = vpack.c.bf16 %v5721_v8, %v5720_v35 }
 0x880   : > { %14305 = vmatprep.subr.bf16.mxu0 %v19903_v23  ;;  %v18867_v34 = vpack.c.bf16 %v5722_v4, %v5721_v8  ;;  %v18894_v56 = vpack.c.bf16 %v5904_v47, %v18813_v43  ;;  %v6013_v57 = vsel %vm256_vm1, %v6007_v12, 0.0  ;;  %v6105_v1 = vpack.c.bf16 %v18785_v55, %v18781_v6  ;;  %v16136_v55 = vld [vmem:[#allocation6 + $0x140] sm:$0xff]  }
 0x881   : > { %v6016_v10 = vpack.c.bf16 %v6013_v57, %v5722_v4  ;;  %v6106_v37 = vpack.c.bf16 %v18790_v9, %v18787_v19  ;;  %v6107_v6 = vpack.c.bf16 %v18904_v59, %v18828_v39  ;;  %v16137_v19 = vld [vmem:[#allocation6 + $0x148] sm:$0xff]   ;;  %v6201_v9 = vrot.slane %v18904_v59, 1 }
 0x882   : > { %14282 = vmatmul.mubr.msk.bf16.gmra.mrb[48].mxu0 %vm5607_vm11, %v18817_v45  ;;  %v6310_v48 = vrot.slane %v18733_v21, 7  ;;  %v6410_v39 = vpack.c.bf16 %v18733_v21, %v18904_v59 }
 0x883   : > { %14285 = vmatprep.mubr.msk.bf16.mxu0 %vm16629_vm6, %v19903_v23  ;;  %v6207_v16 = vsel %vm257_vm2, %v6201_v9, 0.0 }
 0x884   : > { %v6210_v14 = vpack.c.bf16 %v6207_v16, %v5904_v47  ;;  %v6316_v18 = vsel %vm256_vm1, %v6310_v48, 0.0 }
 0x885   : > { %v6319_v43 = vpack.c.bf16 %v6316_v18, %v6013_v57 }
 0x88a   : > { %14286 = vmatmul.mubr.msk.bf16.gmra.mrb[52].mxu0 %vm5607_vm11, %v18832_v7 }
 0x88b   : > { %14293 = vmatprep.mubr.msk.bf16.mxu0 %vm16629_vm6, %v19903_v23 }
 0x892   : > { %14294 = vmatmul.mubr.msk.bf16.vlgmr.msra.gmra.mrb[44].mxu0 %vm5607_vm11, %v5723_v36 }
 0x893   : > { %14306 = vmatpush3.bf16.msra.mxu0 %v16128_v3  ;;  %14297 = vmatprep.mubr.msk.bf16.mxu0 %vm16629_vm6, %v19903_v23 }
 0x894   : > { %14307 = vmatprep.subr.bf16.mxu0 %v19903_v23 }
 0x897   : > { %14308 = vmatpush3.bf16.msra.mxu0 %v16129_v42 }
 0x898   : > { %14321 = vmatprep.subr.bf16.mxu0 %v19903_v23 }
 0x89a   : > { %14298 = vmatmul.mubr.msk.bf16.gmra.mrb[48].mxu0 %vm5607_vm11, %v18854_v2 }
 0x89b   : > { %14301 = vmatprep.mubr.msk.bf16.mxu0 %vm16629_vm6, %v19903_v23 }
 0x8a2   : > { %14302 = vmatmul.mubr.msk.bf16.gmra.mrb[52].mxu0 %vm5607_vm11, %v18867_v34 }
 0x8a3   : > { %14309 = vmatprep.mubr.msk.bf16.mxu0 %vm16629_vm6, %v19903_v23 }
 0x8aa   : > { %14310 = vmatmul.mubr.msk.bf16.vlgmr.msra.gmra.mrb[44].mxu0 %vm5607_vm11, %v5905_v49 }
 0x8ab   : > { %14322 = vmatpush3.bf16.msra.mxu0 %v16130_v53  ;;  %14313 = vmatprep.mubr.msk.bf16.mxu0 %vm16629_vm6, %v19903_v23 }
 0x8ac   : > { %14323 = vmatprep.subr.bf16.mxu0 %v19903_v23 }
 0x8af   : > { %14324 = vmatpush3.bf16.msra.mxu0 %v16131_v26 }
 0x8b0   : > { %14337 = vmatprep.subr.bf16.mxu0 %v19903_v23 }
 0x8b2   : > { %14314 = vmatmul.mubr.msk.bf16.gmra.mrb[48].mxu0 %vm5607_vm11, %v18883_v31 }
 0x8b3   : > { %14317 = vmatprep.mubr.msk.bf16.mxu0 %vm16629_vm6, %v19903_v23 }
 0x8ba   : > { %14318 = vmatmul.mubr.msk.bf16.gmra.mrb[52].mxu0 %vm5607_vm11, %v18894_v56 }
 0x8bb   : > { %14325 = vmatprep.mubr.msk.bf16.mxu0 %vm16629_vm6, %v19903_v23 }
 0x8c2   : > { %14326 = vmatmul.mubr.msk.bf16.vlgmr.msra.gmra.mrb[44].mxu0 %vm5607_vm11, %v6014_v61 }
 0x8c3   : > { %14338 = vmatpush3.bf16.msra.mxu0 %v16132_v40  ;;  %14329 = vmatprep.mubr.msk.bf16.mxu0 %vm16629_vm6, %v19903_v23 }
 0x8c4   : > { %14339 = vmatprep.subr.bf16.mxu0 %v19903_v23 }
 0x8c7   : > { %14340 = vmatpush3.bf16.msra.mxu0 %v16133_v25 }
 0x8c8   : > { %14353 = vmatprep.subr.bf16.mxu0 %v19903_v23 }
 0x8ca   : > { %14330 = vmatmul.mubr.msk.bf16.gmra.mrb[48].mxu0 %vm5607_vm11, %v6015_v15 }
 0x8cb   : > { %14333 = vmatprep.mubr.msk.bf16.mxu0 %vm16629_vm6, %v19903_v23 }
 0x8d2   : > { %14334 = vmatmul.mubr.msk.bf16.gmra.mrb[52].mxu0 %vm5607_vm11, %v6016_v10 }
 0x8d3   : > { %14341 = vmatprep.mubr.msk.bf16.mxu0 %vm16629_vm6, %v19903_v23 }
 0x8da   : > { %14342 = vmatmul.mubr.msk.bf16.vlgmr.msra.gmra.mrb[44].mxu0 %vm5607_vm11, %v6105_v1 }
 0x8db   : > { %14354 = vmatpush3.bf16.msra.mxu0 %v16134_v54  ;;  %14345 = vmatprep.mubr.msk.bf16.mxu0 %vm16629_vm6, %v19903_v23 }
 0x8dc   : > { %14355 = vmatprep.subr.bf16.mxu0 %v19903_v23 }
 0x8df   : > { %14356 = vmatpush3.bf16.msra.mxu0 %v16135_v5 }
 0x8e0   : > { %14369 = vmatprep.subr.bf16.mxu0 %v19903_v23 }
 0x8e2   : > { %14346 = vmatmul.mubr.msk.bf16.gmra.mrb[48].mxu0 %vm5607_vm11, %v6106_v37 }
 0x8e3   : > { %14349 = vmatprep.mubr.msk.bf16.mxu0 %vm16629_vm6, %v19903_v23 }
 0x8ea   : > { %14350 = vmatmul.mubr.msk.bf16.gmra.mrb[52].mxu0 %vm5607_vm11, %v6107_v6 }
 0x8eb   : > { %14357 = vmatprep.mubr.msk.bf16.mxu0 %vm16629_vm6, %v19903_v23 }
 0x8f2   : > { %14358 = vmatmul.mubr.msk.bf16.vlgmr.msra.gmra.mrb[44].mxu0 %vm5607_vm11, %v6208_v29  ;;  %v16140_v29 = vld [vmem:[#allocation6 + $0x1a0] sm:$0xff]  }
 0x8f3   : > { %14370 = vmatpush3.bf16.msra.mxu0 %v16136_v55  ;;  %14361 = vmatprep.mubr.msk.bf16.mxu0 %vm16629_vm6, %v19903_v23 }
 0x8f4   : > { %14371 = vmatprep.subr.bf16.mxu0 %v19903_v23 }
 0x8f7   : > { %14372 = vmatpush3.bf16.msra.mxu0 %v16137_v19 }
 0x8f8   : > { %14385 = vmatprep.subr.bf16.mxu0 %v19903_v23 }
 0x8fa   : > { %14362 = vmatmul.mubr.msk.bf16.gmra.mrb[48].mxu0 %vm5607_vm11, %v6209_v27  ;;  %v16141_v27 = vld [vmem:[#allocation6 + $0x1a8] sm:$0xff]  }
 0x8fb   : > { %14365 = vmatprep.mubr.msk.bf16.mxu0 %vm16629_vm6, %v19903_v23 }
 0x902   : > { %14366 = vmatmul.mubr.msk.bf16.gmra.mrb[52].mxu0 %vm5607_vm11, %v6210_v14 }
 0x903   : > { %14373 = vmatprep.mubr.msk.bf16.mxu0 %vm16629_vm6, %v19903_v23 }
 0x90a   : > { %14374 = vmatmul.mubr.msk.bf16.vlgmr.msra.gmra.mrb[44].mxu0 %vm5607_vm11, %v18854_v2 }
 0x90b   : > { %14386 = vmatpush3.bf16.msra.mxu0 %v16138_v28  ;;  %14377 = vmatprep.mubr.msk.bf16.mxu0 %vm16629_vm6, %v19903_v23 }
 0x90c   : > { %14387 = vmatprep.subr.bf16.mxu0 %v19903_v23 }
 0x90f   : > { %14388 = vmatpush3.bf16.msra.mxu0 %v16139_v32 }
 0x910   : > { %14401 = vmatprep.subr.bf16.mxu0 %v19903_v23 }
 0x912   : > { %14378 = vmatmul.mubr.msk.bf16.gmra.mrb[48].mxu0 %vm5607_vm11, %v18867_v34 }
 0x913   : > { %14381 = vmatprep.mubr.msk.bf16.mxu0 %vm16629_vm6, %v19903_v23 }
 0x91a   : > { %14382 = vmatmul.mubr.msk.bf16.gmra.mrb[52].mxu0 %vm5607_vm11, %v6319_v43 }
 0x91b   : > { %14389 = vmatprep.mubr.msk.bf16.mxu0 %vm16629_vm6, %v19903_v23 }
 0x922   : > { %14390 = vmatmul.mubr.msk.bf16.vlgmr.msra.gmra.mrb[44].mxu0 %vm5607_vm11, %v18817_v45  ;;  %v6504_v45 = vrot.slane %v18733_v21, 1  ;;  %v16143_v21 = vld [vmem:[#allocation6 + $0x1e8] sm:$0xff]  }
 0x923   : > { %14402 = vmatpush3.bf16.msra.mxu0 %v16140_v29  ;;  %14393 = vmatprep.mubr.msk.bf16.mxu0 %vm16629_vm6, %v19903_v23 }
 0x924   : > { %14403 = vmatprep.subr.bf16.mxu0 %v19903_v23  ;;  %14420 = vmatpush3.bf16.msra.mxu1 %v16143_v21 }
 0x925   : > { %14425 = vmatprep.subr.bf16.mxu1 %v19903_v23 }
 0x927   : > { %14404 = vmatpush3.bf16.msra.mxu0 %v16141_v27 }
 0x928   : > { %14669 = vmatprep.subr.bf16.mxu0 %v19903_v23 }
 0x92a   : > { %14394 = vmatmul.mubr.msk.bf16.gmra.mrb[48].mxu0 %vm5607_vm11, %v18832_v7  ;;  %v6510_v7 = vsel %vm257_vm2, %v6504_v45, 0.0 }
 0x92b   : > { %14397 = vmatprep.mubr.msk.bf16.mxu0 %vm16629_vm6, %v19903_v23  ;;  %v6513_v51 = vpack.c.bf16 %v6510_v7, %v6207_v16 }
 0x932   : > { %14398 = vmatmul.mubr.msk.bf16.gmra.mrb[52].mxu0 %vm5607_vm11, %v6410_v39 }
 0x933   : > { %14405 = vmatprep.mubr.msk.bf16.mxu0 %vm16629_vm6, %v19903_v23 }
 0x93a   : > { %14406 = vmatmul.mubr.msk.bf16.vlgmr.msra.gmra.mrb[44].mxu0 %vm5607_vm11, %v18883_v31 }
 0x93b   : > { %14409 = vmatprep.mubr.msk.bf16.mxu0 %vm16629_vm6, %v19903_v23 }
 0x942   : > { %14410 = vmatmul.mubr.msk.bf16.gmra.mrb[48].mxu0 %vm5607_vm11, %v18894_v56 }
 0x943   : > { %14413 = vmatprep.mubr.msk.bf16.mxu0 %vm16629_vm6, %v19903_v23 }
 0x94a   : > { %14414 = vmatmul.mubr.msk.bf16.gmra.mrb[52].mxu0 %vm5607_vm11, %v6513_v51 }
 0x94b   : > { %14677 = vmatprep.mubr.msk.bf16.mxu0 %vm16629_vm6, %v19903_v23 }
 0xa0d   : > { %v19004_v62 = vpop.f32.mrb[44].mxu0 }
 0xa0e   : > { %v6620_v3 = vmul.f32 %v19004_v62, %v19004_v62  ;;  %v14407_v36 = vpop.f32.mrb[45].mxu0  ;;  %v6602_v38 = vsel %vm5607_vm11, %v19004_v62, 0.0 }
 0xa0f   : > { %v6576_v22 = vpop.f32.mrb[46].mxu0 }
 0xa10   : > { %v6603_v42 = vsel %vm5607_vm11, %v6576_v22, 0.0  ;;  %v6621_v41 = vmul.f32 %v6576_v22, %v6576_v22  ;;  %v14408_v35 = vpop.f32.mrb[47].mxu0  ;;  %v6626_v0 = vsel %vm5607_vm11, %v6620_v3, 0.0 }
 0xa11   : > { %v6604_v2 = vadd.f32 %v6603_v42, %v6602_v38  ;;  %v6646_v42 = vld [vmem:[#allocation8 + $0x8] sm:$0x1] }
 0xa12   : > { %v6627_v60 = vsel %vm5607_vm11, %v6621_v41, 0.0 }
 0xa13   : > { %v6628_v8 = vadd.f32 %v6627_v60, %v6626_v0 }
 0xa15   : > { %v6581_v4 = vpop.f32.mrb[48].mxu0 }
 0xa16   : > { %v6605_v34 = vsel %vm5607_vm11, %v6581_v4, 0.0  ;;  %v6622_v33 = vmul.f32 %v6581_v4, %v6581_v4  ;;  %v14411_v58 = vpop.f32.mrb[49].mxu0 }
 0xa17   : > { %v6606_v53 = vadd.f32 %v6605_v34, %v6604_v2  ;;  %v6584_v49 = vpop.f32.mrb[50].mxu0  ;;  %v6647_v2 = vld [vmem:[#allocation8 + $0x9] sm:$0x1] }
 0xa18   : > { %v6629_v26 = vsel %vm5607_vm11, %v6622_v33, 0.0  ;;  %v6607_v31 = vsel %vm5607_vm11, %v6584_v49, 0.0  ;;  %v6623_v50 = vmul.f32 %v6584_v49, %v6584_v49  ;;  %v14412_v47 = vpop.f32.mrb[51].mxu0 }
 0xa19   : > { %v6630_v56 = vadd.f32 %v6629_v26, %v6628_v8  ;;  %v6608_v40 = vadd.f32 %v6607_v31, %v6606_v53 }
 0xa1a   : > { %v6631_v61 = vsel %vm5607_vm11, %v6623_v50, 0.0 }
 0xa1b   : > { %v6632_v25 = vadd.f32 %v6631_v61, %v6630_v56 }
 0xa1d   : > { %v6589_v59 = vpop.f32.mrb[52].mxu0 }
 0xa1e   : > { %v6609_v15 = vsel %vm5607_vm11, %v6589_v59, 0.0  ;;  %v6624_v12 = vmul.f32 %v6589_v59, %v6589_v59  ;;  %v14415_v57 = vpop.f32.mrb[53].mxu0 }
 0xa1f   : > { %v6610_v10 = vadd.f32 %v6609_v15, %v6608_v40  ;;  %v6592_v54 = vpop.f32.mrb[54].mxu0 }
 0xa20   : > { %v6633_v1 = vsel %vm5607_vm11, %v6624_v12, 0.0  ;;  %v6611_v5 = vsel %vm5607_vm11, %v6592_v54, 0.0  ;;  %v6625_v37 = vmul.f32 %v6592_v54, %v6592_v54  ;;  %v14416_v6 = vpop.f32.mrb[55].mxu0 }
 0xa21   : > { %v6634_v55 = vadd.f32 %v6633_v1, %v6632_v25  ;;  %v6612_v19 = vadd.f32 %v6611_v5, %v6610_v10 }
 0xa22   : > { %v6635_v9 = vsel %vm5607_vm11, %v6625_v37, 0.0 }
 0xa23   : > { %v6613_v16 = vrot.slane %v6612_v19, 4  ;;  %v6636_v14 = vadd.f32 %v6635_v9, %v6634_v55 }
 0xa25   : > { %v6614_v28 = vadd.f32 %v6613_v16, %v6612_v19  ;;  %v6637_v32 = vrot.slane %v6636_v14, 4 }
 0xa27   : > { %v6615_v48 = vrot.slane %v6614_v28, 2  ;;  %v6638_v18 = vadd.f32 %v6637_v32, %v6636_v14 }
 0xa29   : > { %v6616_v43 = vadd.f32 %v6615_v48, %v6614_v28  ;;  %v6639_v29 = vrot.slane %v6638_v18, 2  ;;  %v16146_v48 = vld [vmem:[#allocation6 + $0x210] sm:$0xff]  }
 0xa2b   : > { %v6617_v27 = vrot.slane %v6616_v43, 1  ;;  %v6640_v39 = vadd.f32 %v6639_v29, %v6638_v18  ;;  %v6833_v29 = vrot.slane %v18998_v52, 1 }
 0xa2d   : > { %v6618_v45 = vadd.f32 %v6617_v27, %v6616_v43  ;;  %v6641_v7 = vrot.slane %v6640_v39, 1  ;;  %v16147_v43 = vld [vmem:[#allocation6 + $0x218] sm:$0xff]  }
 0xa2f   : > { %v6619_v51 = vmul.f32 0.020833334, %v6618_v45  ;;  %v6642_v17 = vadd.f32 %v6641_v7, %v6640_v39  ;;  %v6835_v39 = vsel %vm257_vm2, %v6833_v29, 0.0  ;;  %v16148_v7 = vld [vmem:[#allocation6 + $0x1c0] sm:$0xff]  }
 0xa31   : > { %v6643_v21 = vmul.f32 0.020833334, %v6642_v17  ;;  %v6644_v3 = vmul.f32 %v6619_v51, %v6619_v51 }
 0xa33   : > { %v6645_v36 = vsub.f32 %v6643_v21, %v6644_v3  ;;  %v16149_v3 = vld [vmem:[#allocation6 + $0x1c8] sm:$0xff]  }
 0xa35   : > { %v6648_v38 = vadd.f32 1e-05, %v6645_v36 }
 0xa37   : > { %16438 = vrsqrt.f32 %v6648_v38 }
 0xa41   : > { %v16439_v41 = vpop.eup %16438 }
 0xa42   : > { %v6650_v35 = vmul.f32 %v16439_v41, %v6646_v42  ;;  %v16150_v41 = vld [vmem:[#allocation6 + $0x1f0] sm:$0xff]  }
 0xa44   : > { %v6654_v0 = vrot.slane %v6650_v35, %v19912_v13  ;;  %v6661_v60 = vmul.f32 %v6650_v35, %v6619_v51 }
 0xa46   : > { %v6655_v8 = vmul.f32 %v6654_v0, %v19004_v62  ;;  %v6656_v34 = vmul.f32 %v6654_v0, %v6576_v22  ;;  %v6657_v33 = vmul.f32 %v6654_v0, %v6581_v4  ;;  %v6658_v58 = vmul.f32 %v6654_v0, %v6584_v49 }
 0xa47   : > { %v6659_v53 = vmul.f32 %v6654_v0, %v6589_v59  ;;  %v6660_v26 = vmul.f32 %v6654_v0, %v6592_v54  ;;  %v6662_v31 = vsub.f32 %v6647_v2, %v6661_v60  ;;  %v16151_v2 = vld [vmem:[#allocation6 + $0x1f8] sm:$0xff]   ;;  %v16152_v0 = vld [vmem:[#allocation6 + $0x220] sm:$0xff]  }
 0xa49   : > { %v6666_v50 = vrot.slane %v6662_v31, %v19912_v13 }
 0xa4b   : > { %v6667_v47 = vadd.f32 %v6666_v50, %v6655_v8  ;;  %v6668_v56 = vadd.f32 %v6666_v50, %v6656_v34  ;;  %v6669_v40 = vadd.f32 %v6666_v50, %v6657_v33  ;;  %v6670_v61 = vadd.f32 %v6666_v50, %v6658_v58  ;;  %v16153_v8 = vld [vmem:[#allocation6 + $0x228] sm:$0xff]  }
 0xa4c   : > { %v6671_v25 = vadd.f32 %v6666_v50, %v6659_v53  ;;  %v6672_v15 = vadd.f32 %v6666_v50, %v6660_v26  ;;  %v16154_v26 = vld [vmem:[#allocation6 + $0x1d0] sm:$0xff]  }
 0xa4d   : > { %vm6673_vm12 = vcmp.ge.f32.partialorder %v6667_v47, 0.0  ;;  %vm6674_vm13 = vcmp.ge.f32.partialorder %v6668_v56, 0.0  ;;  %vm6675_vm14 = vcmp.ge.f32.partialorder %v6669_v40, 0.0  ;;  %vm6676_vm15 = vcmp.ge.f32.partialorder %v6670_v61, 0.0 }
 0xa4e   : > { %vm6677_vm3 = vcmp.ge.f32.partialorder %v6671_v25, 0.0  ;;  %vm6678_vm4 = vcmp.ge.f32.partialorder %v6672_v15, 0.0  ;;  %v6679_v62 = vmul.f32 0.3, %v6667_v47  ;;  %v6680_v22 = vmul.f32 0.3, %v6668_v56 }
 0xa4f   : > { %v6681_v4 = vmul.f32 0.3, %v6669_v40  ;;  %v6682_v49 = vmul.f32 0.3, %v6670_v61  ;;  %v6683_v59 = vmul.f32 0.3, %v6671_v25 }
 0xa50   : > { %v6684_v12 = vmul.f32 0.3, %v6672_v15  ;;  %v6685_v57 = vsel %vm6673_vm12, %v6667_v47, %v6679_v62  ;;  %v6686_v10 = vsel %vm6674_vm13, %v6668_v56, %v6680_v22  ;;  %v16155_v56 = vld [vmem:[#allocation6 + $0x1d8] sm:$0xff]   ;;  %v16156_v62 = vld [vmem:[#allocation6 + $0x200] sm:$0xff]   ;;  %vm19477_vm13 = vmpackc.low %vm256_vm1, %vm256_vm1 }
 0xa51   : > { %v6687_v54 = vsel %vm6675_vm14, %v6669_v40, %v6681_v4  ;;  %v6688_v1 = vsel %vm6676_vm15, %v6670_v61, %v6682_v49  ;;  %v6689_v5 = vsel %vm6677_vm3, %v6671_v25, %v6683_v59  ;;  %v6691_v37 = vadd.f32 %v6685_v57, %v18757_v63  ;;  %v16157_v4 = vld [vmem:[#allocation6 + $0x208] sm:$0xff]   ;;  %v16158_v49 = vld [vmem:[#allocation6 + $0x230] sm:$0xff]  }
 0xa52   : > { %v6690_v6 = vsel %vm6678_vm4, %v6672_v15, %v6684_v12  ;;  %v6692_v55 = vadd.f32 %v6686_v10, %v18759_v24  ;;  %v6693_v19 = vadd.f32 %v6687_v54, %v18761_v44  ;;  %v6694_v9 = vadd.f32 %v6688_v1, %v18763_v11  ;;  %v16144_v24 = vld [vmem:[#allocation6 + $0x1b0] sm:$0xff]   ;;  %v16145_v11 = vld [vmem:[#allocation6 + $0x1b8] sm:$0xff]  }
 0xa53   : > { %v6695_v16 = vadd.f32 %v6689_v5, %v18765_v30  ;;  %v6696_v14 = vadd.f32 %v6690_v6, %v18771_v46  ;;  %6699 = vst.msk [vmem:[#allocation2 + $0x8] sm:$0xff] %vm5607_vm11, %v6691_v37  ;;  %v6707_v30 = vrot.slane %v18998_v52, 7  ;;  %v16159_v12 = vld [vmem:[#allocation6 + $0x238] sm:$0xff]   ;;  %v16160_v37 = vld [vmem:[#allocation6 + $0x270] sm:$0xff]  }
 0xa54   : > { %6700 = vst.msk [vmem:[#allocation2 + $0x10] sm:$0xff] %vm5607_vm11, %v6692_v55  ;;  %6701 = vst.msk [vmem:[#allocation2 + $0x18] sm:$0xff] %vm5607_vm11, %v6693_v19  ;;  %v16161_v6 = vld [vmem:[#allocation6 + $0x278] sm:$0xff]   ;;  %v19110_v55 = vld [vmem:[#allocation2] sm:$0xff] }
 0xa55   : > { %6702 = vst.msk [vmem:[#allocation2 + $0x20] sm:$0xff] %vm5607_vm11, %v6694_v9  ;;  %6704 = vst.msk [vmem:[#allocation2 + $0x30] sm:$0xff] %vm5607_vm11, %v6696_v14  ;;  %v6709_v28 = vsel %vm256_vm1, %v6707_v30, 0.0 }
 0xa56   : > { %6703 = vst.msk [vmem:[#allocation2 + $0x28] sm:$0xff] %vm5607_vm11, %v6695_v16 }
 0xa57   : > { %7995 = vst.msk [vmem:[#allocation2] sm:$0xff] %vm7945_vm0, %v19903_v23 }
 0xa5a   : > { %v6900_v17 = vld [vmem:[#allocation2 + $0x8] sm:$0xff] }
 0xa5b   : > { %v6706_v63 = vld [vmem:[#allocation2 + $0x18] sm:$0xff]  ;;  %v7032_v34 = vrot.slane %v6900_v17, 1  ;;  %v7099_v50 = vld [vmem:[#allocation2 + $0x10] sm:$0xff] }
 0xa5c   : > { %v6716_v44 = vpack.c.bf16 %v6706_v63, %v18998_v52  ;;  %7349 = vst.msk [vmem:[#allocation2 + $0x18] sm:$0xff] %vm5607_vm11, %v19903_v23  ;;  %v6708_v46 = vrot.slane %v6706_v63, 7  ;;  %v6834_v27 = vrot.slane %v6706_v63, 1  ;;  %v6901_v21 = vld [vmem:[#allocation2 + $0x20] sm:$0xff]  ;;  %v6902_v52 = vrot.slane %v6900_v17, 7 }
 0xa5d   : > { %v6903_v36 = vrot.slane %v6901_v21, 7  ;;  %v6969_v60 = vpack.c.bf16 %v6901_v21, %v6900_v17  ;;  %v7033_v33 = vrot.slane %v6901_v21, 1  ;;  %v7034_v58 = vsel %vm257_vm2, %v7032_v34, 0.0  ;;  %v7100_v47 = vld [vmem:[#allocation2 + $0x28] sm:$0xff] }
 0xa5e   : > { %14422 = vmatmul.mubr.msk.bf16.vlgmr.msra.gmra.mrb[28].mxu1 %vm5607_vm11, %v6716_v44  ;;  %v6710_v32 = vsel %vm256_vm1, %v6708_v46, 0.0  ;;  %v6836_v45 = vsel %vm257_vm2, %v6834_v27, 0.0  ;;  %v6904_v38 = vsel %vm256_vm1, %v6902_v52, 0.0  ;;  %v7101_v40 = vrot.slane %v7099_v50, 7 }
 0xa5f   : > { %14426 = vmatpush3.bf16.msra.mxu1 %v16144_v24  ;;  %14429 = vmatprep.mubr.msk.bf16.mxu1 %vm16629_vm6, %v19903_v23  ;;  %v6711_v18 = vpack.c.bf16 %v6710_v32, %v6709_v28  ;;  %v6837_v51 = vpack.c.bf16 %v6836_v45, %v6835_v39  ;;  %v6905_v42 = vsel %vm256_vm1, %v6903_v36, 0.0  ;;  %v7035_v53 = vsel %vm257_vm2, %v7033_v33, 0.0 }
 0xa60   : > { %14427 = vmatprep.subr.bf16.mxu1 %v19903_v23  ;;  %v6906_v35 = vpack.c.bf16 %v6905_v42, %v6904_v38  ;;  %v7036_v31 = vpack.c.bf16 %v7035_v53, %v7034_v58  ;;  %v7102_v61 = vrot.slane %v7100_v47, 7  ;;  %v7103_v25 = vsel %vm256_vm1, %v7101_v40, 0.0 }
 0xa61   : > { %v7168_v59 = vpack.c.bf16 %v7100_v47, %v7099_v50  ;;  %v7231_v57 = vrot.slane %v7099_v50, 1  ;;  %v7232_v10 = vrot.slane %v7100_v47, 1 }
 0xa62   : > { %v7104_v15 = vsel %vm256_vm1, %v7102_v61, 0.0 }
 0xa63   : > { %14428 = vmatpush3.bf16.msra.mxu1 %v16145_v11  ;;  %v7105_v22 = vpack.c.bf16 %v7104_v15, %v7103_v25  ;;  %v7233_v54 = vsel %vm257_vm2, %v7231_v57, 0.0  ;;  %v7234_v1 = vsel %vm257_vm2, %v7232_v10, 0.0  ;;  %v19114_v19 = vld [vmem:[#allocation2 + $0x18] sm:$0xff]  ;;  %v16164_v10 = vld [vmem:[#allocation6 + $0x2a0] sm:$0xff]  }
 0xa64   : > { %14433 = vmatprep.subr.bf16.mxu1 %v19903_v23  ;;  %v7235_v5 = vpack.c.bf16 %v7234_v1, %v7233_v54  ;;  %7996 = vst.msk [vmem:[#allocation2 + $0x18] sm:$0xff] %vm7945_vm0, %v19903_v23  ;;  %v16165_v1 = vld [vmem:[#allocation6 + $0x2a8] sm:$0xff]  }
 0xa6a   : > { %14430 = vmatmul.mubr.msk.bf16.vlgmr.msra.gmra.mrb[28].mxu1 %vm5607_vm11, %v6711_v18 }
 0xa6b   : > { %14434 = vmatpush3.bf16.msra.mxu1 %v16146_v48  ;;  %14437 = vmatprep.mubr.msk.bf16.mxu1 %vm16629_vm6, %v19903_v23 }
 0xa6c   : > { %14435 = vmatprep.subr.bf16.mxu1 %v19903_v23 }
 0xa6f   : > { %14436 = vmatpush3.bf16.msra.mxu1 %v16147_v43 }
 0xa70   : > { %14441 = vmatprep.subr.bf16.mxu1 %v19903_v23 }
 0xa76   : > { %14438 = vmatmul.mubr.msk.bf16.vlgmr.msra.gmra.mrb[28].mxu1 %vm5607_vm11, %v6837_v51 }
 0xa77   : > { %14442 = vmatpush3.bf16.msra.mxu1 %v16148_v7  ;;  %14445 = vmatprep.mubr.msk.bf16.mxu1 %vm16629_vm6, %v19903_v23 }
 0xa78   : > { %14443 = vmatprep.subr.bf16.mxu1 %v19903_v23 }
 0xa7b   : > { %14444 = vmatpush3.bf16.msra.mxu1 %v16149_v3 }
 0xa7c   : > { %14449 = vmatprep.subr.bf16.mxu1 %v19903_v23 }
 0xa82   : > { %14446 = vmatmul.mubr.msk.bf16.vlgmr.msra.gmra.mrb[28].mxu1 %vm5607_vm11, %v6906_v35 }
 0xa83   : > { %14450 = vmatpush3.bf16.msra.mxu1 %v16150_v41  ;;  %14453 = vmatprep.mubr.msk.bf16.mxu1 %vm16629_vm6, %v19903_v23 }
 0xa84   : > { %14451 = vmatprep.subr.bf16.mxu1 %v19903_v23 }
 0xa87   : > { %14452 = vmatpush3.bf16.msra.mxu1 %v16151_v2  ;;  %v7322_v2 = vld [vmem:[#allocation8 + $0xa] sm:$0x1] }
 0xa88   : > { %14457 = vmatprep.subr.bf16.mxu1 %v19903_v23 }
 0xa8e   : > { %14454 = vmatmul.mubr.msk.bf16.vlgmr.msra.gmra.mrb[28].mxu1 %vm5607_vm11, %v6969_v60 }
 0xa8f   : > { %14458 = vmatpush3.bf16.msra.mxu1 %v16152_v0  ;;  %14461 = vmatprep.mubr.msk.bf16.mxu1 %vm16629_vm6, %v19903_v23 }
 0xa90   : > { %14459 = vmatprep.subr.bf16.mxu1 %v19903_v23 }
 0xa93   : > { %14460 = vmatpush3.bf16.msra.mxu1 %v16153_v8  ;;  %v7323_v8 = vld [vmem:[#allocation8 + $0xb] sm:$0x1] }
 0xa94   : > { %14465 = vmatprep.subr.bf16.mxu1 %v19903_v23 }
 0xa9a   : > { %14462 = vmatmul.mubr.msk.bf16.vlgmr.msra.gmra.mrb[28].mxu1 %vm5607_vm11, %v7036_v31 }
 0xa9b   : > { %14466 = vmatpush3.bf16.msra.mxu1 %v16154_v26  ;;  %14469 = vmatprep.mubr.msk.bf16.mxu1 %vm16629_vm6, %v19903_v23 }
 0xa9c   : > { %14467 = vmatprep.subr.bf16.mxu1 %v19903_v23 }
 0xa9f   : > { %14468 = vmatpush3.bf16.msra.mxu1 %v16155_v56 }
 0xaa0   : > { %14473 = vmatprep.subr.bf16.mxu1 %v19903_v23 }
 0xaa6   : > { %14470 = vmatmul.mubr.msk.bf16.vlgmr.msra.gmra.mrb[28].mxu1 %vm5607_vm11, %v7105_v22 }
 0xaa7   : > { %14474 = vmatpush3.bf16.msra.mxu1 %v16156_v62  ;;  %14477 = vmatprep.mubr.msk.bf16.mxu1 %vm16629_vm6, %v19903_v23  ;;  %v16162_v62 = vld [vmem:[#allocation6 + $0x240] sm:$0xff]  }
 0xaa8   : > { %14475 = vmatprep.subr.bf16.mxu1 %v19903_v23 }
 0xaab   : > { %14476 = vmatpush3.bf16.msra.mxu1 %v16157_v4  ;;  %v16163_v4 = vld [vmem:[#allocation6 + $0x248] sm:$0xff]  }
 0xaac   : > { %14481 = vmatprep.subr.bf16.mxu1 %v19903_v23 }
 0xab2   : > { %14478 = vmatmul.mubr.msk.bf16.vlgmr.msra.gmra.mrb[28].mxu1 %vm5607_vm11, %v7168_v59 }
 0xab3   : > { %14482 = vmatpush3.bf16.msra.mxu1 %v16158_v49  ;;  %14485 = vmatprep.mubr.msk.bf16.mxu1 %vm16629_vm6, %v19903_v23  ;;  %v7354_v49 = vrot.slane %v19110_v55, 7 }
 0xab4   : > { %14483 = vmatprep.subr.bf16.mxu1 %v19903_v23 }
 0xab7   : > { %14484 = vmatpush3.bf16.msra.mxu1 %v16159_v12  ;;  %v7356_v12 = vsel %vm256_vm1, %v7354_v49, 0.0 }
 0xab8   : > { %14489 = vmatprep.subr.bf16.mxu1 %v19903_v23 }
 0xabe   : > { %14486 = vmatmul.mubr.msk.bf16.vlgmr.msra.gmra.mrb[28].mxu1 %vm5607_vm11, %v7235_v5  ;;  %v7480_v5 = vrot.slane %v19110_v55, 1 }
 0xabf   : > { %14493 = vmatprep.mubr.msk.bf16.mxu1 %vm16629_vm6, %v19903_v23  ;;  %14490 = vmatpush3.bf16.msra.mxu1 %v16160_v37 }
 0xac0   : > { %14491 = vmatprep.subr.bf16.mxu1 %v19903_v23 }
 0xac3   : > { %14492 = vmatpush3.bf16.msra.mxu1 %v16161_v6  ;;  %v7482_v6 = vsel %vm257_vm2, %v7480_v5, 0.0 }
 0xac4   : > { %14497 = vmatprep.subr.bf16.mxu1 %v19903_v23 }
 0xb91   : > { %v7289_v9 = vpop.f32.mrb[28].mxu1 }
 0xb92   : > { %v7308_v16 = vmul.f32 %v7289_v9, %v7289_v9  ;;  %v14487_v14 = vpop.f32.mrb[29].mxu1  ;;  %v7298_v24 = vsel %vm5607_vm11, %v7289_v9, 0.0 }
 0xb93   : > { %v7292_v63 = vpop.f32.mrb[30].mxu1 }
 0xb94   : > { %v7299_v44 = vsel %vm5607_vm11, %v7292_v63, 0.0  ;;  %v7309_v11 = vmul.f32 %v7292_v63, %v7292_v63  ;;  %v14488_v30 = vpop.f32.mrb[31].mxu1  ;;  %v7310_v28 = vsel %vm5607_vm11, %v7308_v16, 0.0  ;;  %v16166_v16 = vld [vmem:[#allocation6 + $0x250] sm:$0xff]  }
 0xb95   : > { %v7300_v46 = vadd.f32 %v7299_v44, %v7298_v24  ;;  %v16167_v24 = vld [vmem:[#allocation6 + $0x258] sm:$0xff]  }
 0xb96   : > { %v7311_v32 = vsel %vm5607_vm11, %v7309_v11, 0.0  ;;  %v16168_v11 = vld [vmem:[#allocation6 + $0x280] sm:$0xff]  }
 0xb97   : > { %v7301_v48 = vrot.slane %v7300_v46, 4  ;;  %v7312_v18 = vadd.f32 %v7311_v32, %v7310_v28  ;;  %v16170_v28 = vld [vmem:[#allocation6 + $0x2b0] sm:$0xff]  }
 0xb99   : > { %v7302_v43 = vadd.f32 %v7301_v48, %v7300_v46  ;;  %v7313_v29 = vrot.slane %v7312_v18, 4  ;;  %v16169_v46 = vld [vmem:[#allocation6 + $0x288] sm:$0xff]   ;;  %v16171_v48 = vld [vmem:[#allocation6 + $0x2b8] sm:$0xff]  }
 0xb9b   : > { %v7303_v27 = vrot.slane %v7302_v43, 2  ;;  %v7314_v39 = vadd.f32 %v7313_v29, %v7312_v18  ;;  %v16172_v29 = vld [vmem:[#allocation6 + $0x260] sm:$0xff]  }
 0xb9d   : > { %v7304_v45 = vadd.f32 %v7303_v27, %v7302_v43  ;;  %v7315_v7 = vrot.slane %v7314_v39, 2 }
 0xb9f   : > { %v7305_v51 = vrot.slane %v7304_v45, 1  ;;  %v7316_v17 = vadd.f32 %v7315_v7, %v7314_v39  ;;  %v16173_v39 = vld [vmem:[#allocation6 + $0x268] sm:$0xff]  }
 0xba1   : > { %v7306_v21 = vadd.f32 %v7305_v51, %v7304_v45  ;;  %v7317_v3 = vrot.slane %v7316_v17, 1  ;;  %v7749_v45 = vrot.slane %v19114_v19, 7  ;;  %v16174_v51 = vld [vmem:[#allocation6 + $0x290] sm:$0xff]  }
 0xba3   : > { %v7307_v52 = vmul.f32 0.0625, %v7306_v21  ;;  %v7318_v36 = vadd.f32 %v7317_v3, %v7316_v17  ;;  %v7751_v7 = vsel %vm256_vm1, %v7749_v45, 0.0  ;;  %v16175_v21 = vld [vmem:[#allocation6 + $0x298] sm:$0xff]   ;;  %v16176_v3 = vld [vmem:[#allocation6 + $0x2c0] sm:$0xff]  }
 0xba5   : > { %v7319_v38 = vmul.f32 0.0625, %v7318_v36  ;;  %v7320_v42 = vmul.f32 %v7307_v52, %v7307_v52  ;;  %v16177_v36 = vld [vmem:[#allocation6 + $0x2c8] sm:$0xff]  }
 0xba7   : > { %v7321_v41 = vsub.f32 %v7319_v38, %v7320_v42  ;;  %v7879_v38 = vrot.slane %v19114_v19, 1 }
 0xba9   : > { %v7324_v35 = vadd.f32 1e-05, %v7321_v41  ;;  %v7881_v42 = vsel %vm257_vm2, %v7879_v38, 0.0 }
 0xbab   : > { %16440 = vrsqrt.f32 %v7324_v35  ;;  %v16178_v35 = vld [vmem:[#allocation6 + $0x330] sm:$0xff]  }
 0xbb5   : > { %v16441_v0 = vpop.eup %16440 }
 0xbb6   : > { %v7326_v60 = vmul.f32 %v16441_v0, %v7322_v2  ;;  %v19191_v2 = vld [vmem:[#allocation2] sm:$0xff]  ;;  %v16179_v0 = vld [vmem:[#allocation6 + $0x338] sm:$0xff]  }
 0xbb7   : > { %8787 = vst.msk [vmem:[#allocation2] sm:$0xff] %vm7945_vm0, %v19903_v23  ;;  %v8001_v38 = vrot.slane %v19191_v2, 7 }
 0xbb8   : > { %v7330_v34 = vrot.slane %v7326_v60, %v19912_v13  ;;  %v7333_v33 = vmul.f32 %v7326_v60, %v7307_v52  ;;  %v16181_v60 = vld [vmem:[#allocation6 + $0x348] sm:$0xff]  }
 0xbba   : > { %v7331_v58 = vmul.f32 %v7330_v34, %v7289_v9  ;;  %v7332_v53 = vmul.f32 %v7330_v34, %v7292_v63  ;;  %v7334_v26 = vsub.f32 %v7323_v8, %v7333_v33  ;;  %v19199_v8 = vld [vmem:[#allocation2 + $0x18] sm:$0xff] }
 0xbbb   : > { %8788 = vst.msk [vmem:[#allocation2 + $0x18] sm:$0xff] %vm7945_vm0, %v19903_v23 }
 0xbbc   : > { %v7338_v31 = vrot.slane %v7334_v26, %v19912_v13 }
 0xbbe   : > { %v7339_v50 = vadd.f32 %v7338_v31, %v7331_v58  ;;  %v7340_v47 = vadd.f32 %v7338_v31, %v7332_v53 }
 0xbc0   : > { %vm7341_vm5 = vcmp.ge.f32.partialorder %v7339_v50, 0.0  ;;  %vm7342_vm7 = vcmp.ge.f32.partialorder %v7340_v47, 0.0  ;;  %v7343_v56 = vmul.f32 0.3, %v7339_v50  ;;  %v7344_v40 = vmul.f32 0.3, %v7340_v47 }
 0xbc2   : > { %v7345_v61 = vsel %vm7341_vm5, %v7339_v50, %v7343_v56  ;;  %v7346_v25 = vsel %vm7342_vm7, %v7340_v47, %v7344_v40 }
 0xbc3   : > { %7350 = vst.msk [vmem:[#allocation2 + $0x8] sm:$0xff] %vm5607_vm11, %v7345_v61  ;;  %7351 = vst.msk [vmem:[#allocation2 + $0x10] sm:$0xff] %vm5607_vm11, %v7346_v25 }
 0xbca   : > { %v7353_v15 = vld [vmem:[#allocation2 + $0x8] sm:$0xff]  ;;  %v7548_v63 = vld [vmem:[#allocation2 + $0x10] sm:$0xff] }
 0xbcb   : > { %v7363_v22 = vpack.c.bf16 %v7353_v15, %v19110_v55  ;;  %v7355_v59 = vrot.slane %v7353_v15, 7  ;;  %v7481_v37 = vrot.slane %v7353_v15, 1  ;;  %v7550_v55 = vrot.slane %v7548_v63, 7 }
 0xbcc   : > { %v7616_v32 = vpack.c.bf16 %v7548_v63, %v7353_v15  ;;  %v7680_v18 = vrot.slane %v7548_v63, 1  ;;  %v7815_v52 = vpack.c.bf16 %v19114_v19, %v7548_v63  ;;  %v16180_v19 = vld [vmem:[#allocation6 + $0x340] sm:$0xff]   ;;  %v7970_v63 = vld [vmem:[#allocation8 + $0xc] sm:$0x1] }
 0xbcd   : > { %14494 = vmatmul.mubr.msk.bf16.vlgmr.msra.gmra.mrb[32].mxu1 %vm5607_vm11, %v7363_v22  ;;  %v7357_v57 = vsel %vm256_vm1, %v7355_v59, 0.0  ;;  %v7483_v9 = vsel %vm257_vm2, %v7481_v37, 0.0  ;;  %v7552_v44 = vsel %vm256_vm1, %v7550_v55, 0.0 }
 0xbce   : > { %14498 = vmatpush3.bf16.msra.mxu1 %v16162_v62  ;;  %14501 = vmatprep.mubr.msk.bf16.mxu1 %vm16629_vm6, %v19903_v23  ;;  %v7358_v54 = vpack.c.bf16 %v7357_v57, %v7356_v12  ;;  %v7484_v14 = vpack.c.bf16 %v7483_v9, %v7482_v6  ;;  %v7553_v30 = vpack.c.bf16 %v7552_v44, %v7357_v57  ;;  %v7682_v43 = vsel %vm257_vm2, %v7680_v18, 0.0 }
 0xbcf   : > { %14499 = vmatprep.subr.bf16.mxu1 %v19903_v23  ;;  %v7683_v27 = vpack.c.bf16 %v7682_v43, %v7483_v9  ;;  %v7752_v17 = vpack.c.bf16 %v7751_v7, %v7552_v44  ;;  %v7882_v41 = vpack.c.bf16 %v7881_v42, %v7682_v43  ;;  %v7971_v44 = vld [vmem:[#allocation8 + $0xd] sm:$0x1] }
 0xbd2   : > { %14500 = vmatpush3.bf16.msra.mxu1 %v16163_v4 }
 0xbd3   : > { %14505 = vmatprep.subr.bf16.mxu1 %v19903_v23 }
 0xbd9   : > { %14502 = vmatmul.mubr.msk.bf16.vlgmr.msra.gmra.mrb[32].mxu1 %vm5607_vm11, %v7358_v54 }
 0xbda   : > { %14506 = vmatpush3.bf16.msra.mxu1 %v16164_v10  ;;  %14509 = vmatprep.mubr.msk.bf16.mxu1 %vm16629_vm6, %v19903_v23 }
 0xbdb   : > { %14507 = vmatprep.subr.bf16.mxu1 %v19903_v23 }
 0xbde   : > { %14508 = vmatpush3.bf16.msra.mxu1 %v16165_v1 }
 0xbdf   : > { %14513 = vmatprep.subr.bf16.mxu1 %v19903_v23 }
 0xbe5   : > { %14510 = vmatmul.mubr.msk.bf16.vlgmr.msra.gmra.mrb[32].mxu1 %vm5607_vm11, %v7484_v14 }
 0xbe6   : > { %14514 = vmatpush3.bf16.msra.mxu1 %v16166_v16  ;;  %14517 = vmatprep.mubr.msk.bf16.mxu1 %vm16629_vm6, %v19903_v23 }
 0xbe7   : > { %14515 = vmatprep.subr.bf16.mxu1 %v19903_v23 }
 0xbea   : > { %14516 = vmatpush3.bf16.msra.mxu1 %v16167_v24 }
 0xbeb   : > { %14521 = vmatprep.subr.bf16.mxu1 %v19903_v23 }
 0xbf1   : > { %14518 = vmatmul.mubr.msk.bf16.vlgmr.msra.gmra.mrb[32].mxu1 %vm5607_vm11, %v7553_v30 }
 0xbf2   : > { %14522 = vmatpush3.bf16.msra.mxu1 %v16168_v11  ;;  %14525 = vmatprep.mubr.msk.bf16.mxu1 %vm16629_vm6, %v19903_v23 }
 0xbf3   : > { %14523 = vmatprep.subr.bf16.mxu1 %v19903_v23 }
 0xbf6   : > { %14524 = vmatpush3.bf16.msra.mxu1 %v16169_v46 }
 0xbf7   : > { %14529 = vmatprep.subr.bf16.mxu1 %v19903_v23 }
 0xbfd   : > { %14526 = vmatmul.mubr.msk.bf16.vlgmr.msra.gmra.mrb[32].mxu1 %vm5607_vm11, %v7616_v32 }
 0xbfe   : > { %14530 = vmatpush3.bf16.msra.mxu1 %v16170_v28  ;;  %14533 = vmatprep.mubr.msk.bf16.mxu1 %vm16629_vm6, %v19903_v23 }
 0xbff   : > { %14531 = vmatprep.subr.bf16.mxu1 %v19903_v23 }
 0xc02   : > { %14532 = vmatpush3.bf16.msra.mxu1 %v16171_v48 }
 0xc03   : > { %14537 = vmatprep.subr.bf16.mxu1 %v19903_v23 }
 0xc09   : > { %14534 = vmatmul.mubr.msk.bf16.vlgmr.msra.gmra.mrb[32].mxu1 %vm5607_vm11, %v7683_v27 }
 0xc0a   : > { %14538 = vmatpush3.bf16.msra.mxu1 %v16172_v29  ;;  %14541 = vmatprep.mubr.msk.bf16.mxu1 %vm16629_vm6, %v19903_v23 }
 0xc0b   : > { %14539 = vmatprep.subr.bf16.mxu1 %v19903_v23 }
 0xc0e   : > { %14540 = vmatpush3.bf16.msra.mxu1 %v16173_v39 }
 0xc0f   : > { %14545 = vmatprep.subr.bf16.mxu1 %v19903_v23 }
 0xc15   : > { %14542 = vmatmul.mubr.msk.bf16.vlgmr.msra.gmra.mrb[32].mxu1 %vm5607_vm11, %v7752_v17 }
 0xc16   : > { %14546 = vmatpush3.bf16.msra.mxu1 %v16174_v51  ;;  %14549 = vmatprep.mubr.msk.bf16.mxu1 %vm16629_vm6, %v19903_v23  ;;  %v16182_v51 = vld [vmem:[#allocation6 + $0x2d0] sm:$0xff]  }
 0xc17   : > { %14547 = vmatprep.subr.bf16.mxu1 %v19903_v23 }
 0xc1a   : > { %14548 = vmatpush3.bf16.msra.mxu1 %v16175_v21  ;;  %v16214_v21 = vld [vmem:[#allocation6 + $0x450] sm:$0xff]  }
 0xc1b   : > { %14553 = vmatprep.subr.bf16.mxu1 %v19903_v23  ;;  %14670 = vmatpush3.bf16.msra.mxu0 %v16214_v21  ;;  %v16216_v21 = vld [vmem:[#allocation6 + $0x460] sm:$0xff]  }
 0xc1c   : > { %14671 = vmatprep.subr.bf16.mxu0 %v19903_v23 }
 0xc21   : > { %14550 = vmatmul.mubr.msk.bf16.vlgmr.msra.gmra.mrb[32].mxu1 %vm5607_vm11, %v7815_v52  ;;  %v16215_v52 = vld [vmem:[#allocation6 + $0x458] sm:$0xff]  }
 0xc22   : > { %14554 = vmatpush3.bf16.msra.mxu1 %v16176_v3  ;;  %14557 = vmatprep.mubr.msk.bf16.mxu1 %vm16629_vm6, %v19903_v23  ;;  %v16183_v3 = vld [vmem:[#allocation6 + $0x2d8] sm:$0xff]  }
 0xc23   : > { %14555 = vmatprep.subr.bf16.mxu1 %v19903_v23  ;;  %14672 = vmatpush3.bf16.msra.mxu0 %v16215_v52 }
 0xc24   : > { %14673 = vmatprep.subr.bf16.mxu0 %v19903_v23 }
 0xc26   : > { %14556 = vmatpush3.bf16.msra.mxu1 %v16177_v36  ;;  %v16184_v36 = vld [vmem:[#allocation6 + $0x2e0] sm:$0xff]  }
 0xc27   : > { %14561 = vmatprep.subr.bf16.mxu1 %v19903_v23  ;;  %14674 = vmatpush3.bf16.msra.mxu0 %v16216_v21 }
 0xc28   : > { %14675 = vmatprep.subr.bf16.mxu0 %v19903_v23 }
 0xc2d   : > { %14558 = vmatmul.mubr.msk.bf16.vlgmr.msra.gmra.mrb[32].mxu1 %vm5607_vm11, %v7882_v41  ;;  %v16185_v41 = vld [vmem:[#allocation6 + $0x2e8] sm:$0xff]  }
 0xc2e   : > { %14569 = vmatprep.mubr.msk.bf16.mxu1 %vm16629_vm6, %v19903_v23  ;;  %14562 = vmatpush3.bf16.msra.mxu1 %v16178_v35  ;;  %v8003_v35 = vsel %vm256_vm1, %v8001_v38, 0.0  ;;  %v16219_v38 = vld [vmem:[#allocation6 + $0x3f8] sm:$0xff]  }
 0xc2f   : > { %14563 = vmatprep.subr.bf16.mxu1 %v19903_v23 }
 0xc32   : > { %14564 = vmatpush3.bf16.msra.mxu1 %v16179_v0 }
 0xc33   : > { %14565 = vmatprep.subr.bf16.mxu1 %v19903_v23 }
 0xc36   : > { %14566 = vmatpush3.bf16.msra.mxu1 %v16180_v19  ;;  %v16186_v19 = vld [vmem:[#allocation6 + $0x390] sm:$0xff]  }
 0xc37   : > { %14567 = vmatprep.subr.bf16.mxu1 %v19903_v23 }
 0xc3a   : > { %14568 = vmatpush3.bf16.msra.mxu1 %v16181_v60 }
 0xc3b   : > { %14573 = vmatprep.subr.bf16.mxu1 %v19903_v23 }
 0xd00   : > { %v7936_v34 = vpop.f32.mrb[32].mxu1 }
 0xd01   : > { %v7956_v33 = vmul.f32 %v7936_v34, %v7936_v34  ;;  %v14559_v58 = vpop.f32.mrb[33].mxu1  ;;  %v7946_v26 = vsel %vm7945_vm0, %v7936_v34, 0.0 }
 0xd02   : > { %v7939_v53 = vpop.f32.mrb[34].mxu1  ;;  %v8159_v58 = vrot.slane %v19191_v2, 1 }
 0xd03   : > { %v7947_v31 = vsel %vm7945_vm0, %v7939_v53, 0.0  ;;  %v7957_v50 = vmul.f32 %v7939_v53, %v7939_v53  ;;  %v14560_v47 = vpop.f32.mrb[35].mxu1  ;;  %v7958_v40 = vsel %vm7945_vm0, %v7956_v33, 0.0  ;;  %v16188_v33 = vld [vmem:[#allocation6 + $0x3a0] sm:$0xff]  }
 0xd04   : > { %v7948_v56 = vadd.f32 %v7947_v31, %v7946_v26  ;;  %v16189_v26 = vld [vmem:[#allocation6 + $0x3a8] sm:$0xff]   ;;  %v8161_v31 = vsel %vm257_vm2, %v8159_v58, 0.0  ;;  %v16190_v47 = vld [vmem:[#allocation6 + $0x2f0] sm:$0xff]  }
 0xd05   : > { %v7959_v61 = vsel %vm7945_vm0, %v7957_v50, 0.0 }
 0xd06   : > { %v7949_v25 = vrot.slane %v7948_v56, 4  ;;  %v7960_v15 = vadd.f32 %v7959_v61, %v7958_v40  ;;  %v16192_v61 = vld [vmem:[#allocation6 + $0x300] sm:$0xff]  }
 0xd08   : > { %v7950_v62 = vadd.f32 %v7949_v25, %v7948_v56  ;;  %v7961_v22 = vrot.slane %v7960_v15, 4 }
 0xd0a   : > { %v7951_v4 = vrot.slane %v7950_v62, 2  ;;  %v7962_v49 = vadd.f32 %v7961_v22, %v7960_v15  ;;  %v16193_v15 = vld [vmem:[#allocation6 + $0x308] sm:$0xff]   ;;  %v16194_v22 = vld [vmem:[#allocation6 + $0x350] sm:$0xff]  }
 0xd0c   : > { %v7952_v59 = vadd.f32 %v7951_v4, %v7950_v62  ;;  %v7963_v12 = vrot.slane %v7962_v49, 2 }
 0xd0e   : > { %v7953_v57 = vrot.slane %v7952_v59, 1  ;;  %v7964_v10 = vadd.f32 %v7963_v12, %v7962_v49  ;;  %v16195_v49 = vld [vmem:[#allocation6 + $0x358] sm:$0xff]   ;;  %v16197_v12 = vld [vmem:[#allocation6 + $0x368] sm:$0xff]  }
 0xd10   : > { %v7954_v54 = vadd.f32 %v7953_v57, %v7952_v59  ;;  %v7965_v1 = vrot.slane %v7964_v10, 1  ;;  %v16196_v59 = vld [vmem:[#allocation6 + $0x360] sm:$0xff]   ;;  %v16198_v57 = vld [vmem:[#allocation6 + $0x3b0] sm:$0xff]  }
 0xd12   : > { %v7955_v5 = vmul.f32 0.0625, %v7954_v54  ;;  %v7966_v37 = vadd.f32 %v7965_v1, %v7964_v10  ;;  %v16199_v54 = vld [vmem:[#allocation6 + $0x3b8] sm:$0xff]   ;;  %v16200_v1 = vld [vmem:[#allocation6 + $0x3c0] sm:$0xff]  }
 0xd14   : > { %v7967_v6 = vmul.f32 0.0625, %v7966_v37  ;;  %v7968_v9 = vmul.f32 %v7955_v5, %v7955_v5  ;;  %v16201_v37 = vld [vmem:[#allocation6 + $0x3c8] sm:$0xff]  }
 0xd16   : > { %v7969_v16 = vsub.f32 %v7967_v6, %v7968_v9  ;;  %v16202_v9 = vld [vmem:[#allocation6 + $0x310] sm:$0xff]  }
 0xd18   : > { %v7972_v14 = vadd.f32 1e-05, %v7969_v16 }
 0xd1a   : > { %16442 = vrsqrt.f32 %v7972_v14  ;;  %v16203_v14 = vld [vmem:[#allocation6 + $0x318] sm:$0xff]  }
 0xd24   : > { %v16443_v24 = vpop.eup %16442 }
 0xd25   : > { %v7974_v55 = vmul.f32 %v16443_v24, %v7970_v63  ;;  %v16204_v63 = vld [vmem:[#allocation6 + $0x320] sm:$0xff]   ;;  %v8492_v24 = vrot.slane %v19199_v8, 7 }
 0xd27   : > { %v7978_v11 = vrot.slane %v7974_v55, %v19912_v13  ;;  %v7981_v30 = vmul.f32 %v7974_v55, %v7955_v5  ;;  %v16205_v55 = vld [vmem:[#allocation6 + $0x328] sm:$0xff]  }
 0xd29   : > { %v7979_v46 = vmul.f32 %v7978_v11, %v7936_v34  ;;  %v7980_v28 = vmul.f32 %v7978_v11, %v7939_v53  ;;  %v7982_v32 = vsub.f32 %v7971_v44, %v7981_v30  ;;  %v16187_v34 = vld [vmem:[#allocation6 + $0x398] sm:$0xff]   ;;  %v8494_v44 = vsel %vm256_vm1, %v8492_v24, 0.0  ;;  %v16206_v11 = vld [vmem:[#allocation6 + $0x370] sm:$0xff]  }
 0xd2b   : > { %v7986_v48 = vrot.slane %v7982_v32, %v19912_v13  ;;  %v16209_v32 = vld [vmem:[#allocation6 + $0x388] sm:$0xff]  }
 0xd2d   : > { %v7987_v18 = vadd.f32 %v7986_v48, %v7979_v46  ;;  %v7988_v43 = vadd.f32 %v7986_v48, %v7980_v28  ;;  %v16207_v46 = vld [vmem:[#allocation6 + $0x378] sm:$0xff]   ;;  %v16208_v28 = vld [vmem:[#allocation6 + $0x380] sm:$0xff]   ;;  %v16210_v48 = vld [vmem:[#allocation6 + $0x3d0] sm:$0xff]  }
 0xd2f   : > { %vm7989_vm11 = vcmp.ge.f32.partialorder %v7987_v18, 0.0  ;;  %vm7990_vm8 = vcmp.ge.f32.partialorder %v7988_v43, 0.0  ;;  %v7991_v29 = vmul.f32 0.3, %v7987_v18  ;;  %v7992_v27 = vmul.f32 0.3, %v7988_v43 }
 0xd31   : > { %v19209_v39 = vsel %vm7989_vm11, %v7987_v18, %v7991_v29  ;;  %v19211_v45 = vsel %vm7990_vm8, %v7988_v43, %v7992_v27  ;;  %v16211_v43 = vld [vmem:[#allocation6 + $0x3d8] sm:$0xff]   ;;  %v16212_v29 = vld [vmem:[#allocation6 + $0x3e0] sm:$0xff]   ;;  %v8654_v27 = vrot.slane %v19199_v8, 1 }
 0xd32   : > { %7997 = vst.msk [vmem:[#allocation2 + $0x8] sm:$0xff] %vm7945_vm0, %v19209_v39  ;;  %7998 = vst.msk [vmem:[#allocation2 + $0x10] sm:$0xff] %vm7945_vm0, %v19211_v45 }
 0xd39   : > { %v19217_v7 = vld [vmem:[#allocation2 + $0x8] sm:$0xff]  ;;  %v19253_v40 = vld [vmem:[#allocation2 + $0x10] sm:$0xff] }
 0xd3a   : > { %v8014_v17 = vpack.c.bf16 %v19217_v7, %v19191_v2  ;;  %v8002_v42 = vrot.slane %v19217_v7, 7  ;;  %v8160_v53 = vrot.slane %v19217_v7, 1  ;;  %v16191_v2 = vld [vmem:[#allocation6 + $0x2f8] sm:$0xff]   ;;  %v8245_v25 = vrot.slane %v19253_v40, 7 }
 0xd3b   : > { %v8327_v10 = vpack.c.bf16 %v19253_v40, %v19217_v7  ;;  %v8407_v5 = vrot.slane %v19253_v40, 1  ;;  %v8574_v18 = vpack.c.bf16 %v19199_v8, %v19253_v40  ;;  %v16213_v7 = vld [vmem:[#allocation6 + $0x3e8] sm:$0xff]  }
 0xd3c   : > { %14570 = vmatmul.mubr.msk.bf16.vlgmr.msra.gmra.mrb[36].mxu1 %vm7945_vm0, %v8014_v17  ;;  %v8004_v0 = vsel %vm256_vm1, %v8002_v42, 0.0  ;;  %v8162_v50 = vsel %vm257_vm2, %v8160_v53, 0.0  ;;  %v8247_v62 = vsel %vm256_vm1, %v8245_v25, 0.0  ;;  %v16217_v8 = vld [vmem:[#allocation6 + $0x468] sm:$0xff]   ;;  %v16220_v42 = vld [vmem:[#allocation6 + $0x400] sm:$0xff]  }
 0xd3d   : > { %14574 = vmatpush3.bf16.msra.mxu1 %v16182_v51  ;;  %14581 = vmatprep.mubr.msk.bf16.mxu1 %vm16629_vm6, %v19903_v23  ;;  %v8005_v60 = vpack.c.bf16 %v8004_v0, %v8003_v35  ;;  %v8163_v56 = vpack.c.bf16 %v8162_v50, %v8161_v31  ;;  %v8248_v4 = vpack.c.bf16 %v8247_v62, %v8004_v0  ;;  %v8409_v6 = vsel %vm257_vm2, %v8407_v5, 0.0  ;;  %v16225_v53 = vld [vmem:[#allocation6 + $0x4c8] sm:$0xff]  }
 0xd3e   : > { %14575 = vmatprep.subr.bf16.mxu1 %v19903_v23  ;;  %v8410_v16 = vpack.c.bf16 %v8409_v6, %v8162_v50  ;;  %v8495_v30 = vpack.c.bf16 %v8494_v44, %v8247_v62  ;;  %v8656_v51 = vsel %vm257_vm2, %v8654_v27, 0.0  ;;  %14676 = vmatpush3.bf16.msra.mxu0 %v16217_v8  ;;  %v16226_v50 = vld [vmem:[#allocation6 + $0x410] sm:$0xff]  }
 0xd3f   : > { %v8657_v17 = vpack.c.bf16 %v8656_v51, %v8409_v6  ;;  %14681 = vmatprep.subr.bf16.mxu0 %v19903_v23  ;;  %v16250_v44 = vld [vmem:[#allocation6 + $0x570] sm:$0xff]  }
 0xd41   : > { %14576 = vmatpush3.bf16.msra.mxu1 %v16183_v3  ;;  %v8791_v3 = vld [vmem:[#allocation2] sm:$0xff] }
 0xd42   : > { %14577 = vmatprep.subr.bf16.mxu1 %v19903_v23  ;;  %v8803_v52 = vpack.c.bf16 %v8791_v3, %v8791_v3  ;;  %9536 = vst.msk [vmem:[#allocation2] sm:$0xff] %vm7945_vm0, %v19903_v23  ;;  %v8792_v35 = vrot.slane %v8791_v3, 7  ;;  %v8946_v58 = vrot.slane %v8791_v3, 1 }
 0xd44   : > { %14678 = vmatmul.mubr.msk.bf16.vlgmr.msra.gmra.mrb[56].mxu0 %vm7945_vm0, %v8803_v52  ;;  %v8793_v0 = vsel %vm256_vm1, %v8792_v35, 0.0 }
 0xd45   : > { %14578 = vmatpush3.bf16.msra.mxu1 %v16184_v36  ;;  %v16218_v36 = vld [vmem:[#allocation6 + $0x3f0] sm:$0xff]   ;;  %14689 = vmatprep.mubr.msk.bf16.mxu0 %vm16629_vm6, %v19903_v23 }
 0xd46   : > { %14579 = vmatprep.subr.bf16.mxu1 %v19903_v23  ;;  %14682 = vmatpush3.bf16.msra.mxu0 %v16218_v36 }
 0xd47   : > { %14683 = vmatprep.subr.bf16.mxu0 %v19903_v23 }
 0xd49   : > { %14580 = vmatpush3.bf16.msra.mxu1 %v16185_v41  ;;  %v16221_v41 = vld [vmem:[#allocation6 + $0x408] sm:$0xff]  }
 0xd4a   : > { %14585 = vmatprep.subr.bf16.mxu1 %v19903_v23  ;;  %14684 = vmatpush3.bf16.msra.mxu0 %v16219_v38 }
 0xd4b   : > { %14685 = vmatprep.subr.bf16.mxu0 %v19903_v23 }
 0xd4c   : > { %14582 = vmatmul.mubr.msk.bf16.vlgmr.msra.gmra.mrb[36].mxu1 %vm7945_vm0, %v8005_v60  ;;  %v16222_v60 = vld [vmem:[#allocation6 + $0x4b0] sm:$0xff]  }
 0xd4d   : > { %14586 = vmatpush3.bf16.msra.mxu1 %v16186_v19  ;;  %14593 = vmatprep.mubr.msk.bf16.mxu1 %vm16629_vm6, %v19903_v23  ;;  %v8794_v19 = vpack.c.bf16 %v8793_v0, %v8793_v0 }
 0xd4e   : > { %14587 = vmatprep.subr.bf16.mxu1 %v19903_v23  ;;  %14686 = vmatpush3.bf16.msra.mxu0 %v16220_v42 }
 0xd4f   : > { %14687 = vmatprep.subr.bf16.mxu0 %v19903_v23 }
 0xd51   : > { %14588 = vmatpush3.bf16.msra.mxu1 %v16187_v34  ;;  %v16223_v34 = vld [vmem:[#allocation6 + $0x4b8] sm:$0xff]  }
 0xd52   : > { %14589 = vmatprep.subr.bf16.mxu1 %v19903_v23  ;;  %14688 = vmatpush3.bf16.msra.mxu0 %v16221_v41 }
 0xd53   : > { %14693 = vmatprep.subr.bf16.mxu0 %v19903_v23 }
 0xd55   : > { %14590 = vmatpush3.bf16.msra.mxu1 %v16188_v33  ;;  %14690 = vmatmul.mubr.msk.bf16.vlgmr.msra.gmra.mrb[56].mxu0 %vm7945_vm0, %v8794_v19  ;;  %v16224_v33 = vld [vmem:[#allocation6 + $0x4c0] sm:$0xff]  }
 0xd56   : > { %14591 = vmatprep.subr.bf16.mxu1 %v19903_v23  ;;  %14694 = vmatpush3.bf16.msra.mxu0 %v16222_v60 }
 0xd57   : > { %14701 = vmatprep.mubr.msk.bf16.mxu0 %vm16629_vm6, %v19903_v23  ;;  %14695 = vmatprep.subr.bf16.mxu0 %v19903_v23 }
 0xd59   : > { %14592 = vmatpush3.bf16.msra.mxu1 %v16189_v26  ;;  %v8947_v26 = vsel %vm257_vm2, %v8946_v58, 0.0 }
 0xd5a   : > { %14597 = vmatprep.subr.bf16.mxu1 %v19903_v23  ;;  %14696 = vmatpush3.bf16.msra.mxu0 %v16223_v34  ;;  %v8948_v31 = vpack.c.bf16 %v8947_v26, %v8947_v26  ;;  %v16230_v26 = vld [vmem:[#allocation6 + $0x470] sm:$0xff]  }
 0xd5b   : > { %14697 = vmatprep.subr.bf16.mxu0 %v19903_v23 }
 0xd5c   : > { %14594 = vmatmul.mubr.msk.bf16.vlgmr.msra.gmra.mrb[36].mxu1 %vm7945_vm0, %v8163_v56  ;;  %v16228_v56 = vld [vmem:[#allocation6 + $0x420] sm:$0xff]  }
 0xd5d   : > { %14598 = vmatpush3.bf16.msra.mxu1 %v16190_v47  ;;  %14605 = vmatprep.mubr.msk.bf16.mxu1 %vm16629_vm6, %v19903_v23  ;;  %v16227_v47 = vld [vmem:[#allocation6 + $0x418] sm:$0xff]  }
 0xd5e   : > { %14599 = vmatprep.subr.bf16.mxu1 %v19903_v23  ;;  %14698 = vmatpush3.bf16.msra.mxu0 %v16224_v33 }
 0xd5f   : > { %14699 = vmatprep.subr.bf16.mxu0 %v19903_v23 }
 0xd61   : > { %14600 = vmatpush3.bf16.msra.mxu1 %v16191_v2  ;;  %v16229_v2 = vld [vmem:[#allocation6 + $0x428] sm:$0xff]  }
 0xd62   : > { %14601 = vmatprep.subr.bf16.mxu1 %v19903_v23  ;;  %14700 = vmatpush3.bf16.msra.mxu0 %v16225_v53 }
 0xd63   : > { %14705 = vmatprep.subr.bf16.mxu0 %v19903_v23 }
 0xd65   : > { %14602 = vmatpush3.bf16.msra.mxu1 %v16192_v61  ;;  %14702 = vmatmul.mubr.msk.bf16.vlgmr.msra.gmra.mrb[56].mxu0 %vm7945_vm0, %v8948_v31 }
 0xd66   : > { %14603 = vmatprep.subr.bf16.mxu1 %v19903_v23  ;;  %14706 = vmatpush3.bf16.msra.mxu0 %v16226_v50  ;;  %v16233_v50 = vld [vmem:[#allocation6 + $0x488] sm:$0xff]  }
 0xd67   : > { %14713 = vmatprep.mubr.msk.bf16.mxu0 %vm16629_vm6, %v19903_v23  ;;  %14707 = vmatprep.subr.bf16.mxu0 %v19903_v23 }
 0xd69   : > { %14604 = vmatpush3.bf16.msra.mxu1 %v16193_v15 }
 0xd6a   : > { %14609 = vmatprep.subr.bf16.mxu1 %v19903_v23  ;;  %14708 = vmatpush3.bf16.msra.mxu0 %v16227_v47  ;;  %v16234_v47 = vld [vmem:[#allocation6 + $0x4d0] sm:$0xff]  }
 0xd6b   : > { %14709 = vmatprep.subr.bf16.mxu0 %v19903_v23 }
 0xd6c   : > { %14606 = vmatmul.mubr.msk.bf16.vlgmr.msra.gmra.mrb[36].mxu1 %vm7945_vm0, %v8248_v4 }
 0xd6d   : > { %14610 = vmatpush3.bf16.msra.mxu1 %v16194_v22  ;;  %14617 = vmatprep.mubr.msk.bf16.mxu1 %vm16629_vm6, %v19903_v23 }
 0xd6e   : > { %14611 = vmatprep.subr.bf16.mxu1 %v19903_v23  ;;  %14710 = vmatpush3.bf16.msra.mxu0 %v16228_v56 }
 0xd6f   : > { %14711 = vmatprep.subr.bf16.mxu0 %v19903_v23 }
 0xd71   : > { %14612 = vmatpush3.bf16.msra.mxu1 %v16195_v49 }
 0xd72   : > { %14613 = vmatprep.subr.bf16.mxu1 %v19903_v23  ;;  %14712 = vmatpush3.bf16.msra.mxu0 %v16229_v2  ;;  %v16235_v2 = vld [vmem:[#allocation6 + $0x4d8] sm:$0xff]  }
 0xd73   : > { %14717 = vmatprep.subr.bf16.mxu0 %v19903_v23 }
 0xd75   : > { %14614 = vmatpush3.bf16.msra.mxu1 %v16196_v59 }
 0xd76   : > { %14615 = vmatprep.subr.bf16.mxu1 %v19903_v23 }
 0xd79   : > { %14616 = vmatpush3.bf16.msra.mxu1 %v16197_v12 }
 0xd7a   : > { %14621 = vmatprep.subr.bf16.mxu1 %v19903_v23 }
 0xd7c   : > { %14618 = vmatmul.mubr.msk.bf16.vlgmr.msra.gmra.mrb[36].mxu1 %vm7945_vm0, %v8327_v10 }
 0xd7d   : > { %14622 = vmatpush3.bf16.msra.mxu1 %v16198_v57  ;;  %14629 = vmatprep.mubr.msk.bf16.mxu1 %vm16629_vm6, %v19903_v23 }
 0xd7e   : > { %14623 = vmatprep.subr.bf16.mxu1 %v19903_v23 }
 0xd81   : > { %14624 = vmatpush3.bf16.msra.mxu1 %v16199_v54 }
 0xd82   : > { %14625 = vmatprep.subr.bf16.mxu1 %v19903_v23 }
 0xd85   : > { %14626 = vmatpush3.bf16.msra.mxu1 %v16200_v1 }
 0xd86   : > { %14627 = vmatprep.subr.bf16.mxu1 %v19903_v23 }
 0xd89   : > { %14628 = vmatpush3.bf16.msra.mxu1 %v16201_v37 }
 0xd8a   : > { %14633 = vmatprep.subr.bf16.mxu1 %v19903_v23 }
 0xd8c   : > { %14630 = vmatmul.mubr.msk.bf16.vlgmr.msra.gmra.mrb[36].mxu1 %vm7945_vm0, %v8410_v16 }
 0xd8d   : > { %14634 = vmatpush3.bf16.msra.mxu1 %v16202_v9  ;;  %14641 = vmatprep.mubr.msk.bf16.mxu1 %vm16629_vm6, %v19903_v23 }
 0xd8e   : > { %14635 = vmatprep.subr.bf16.mxu1 %v19903_v23 }
 0xd91   : > { %14636 = vmatpush3.bf16.msra.mxu1 %v16203_v14 }
 0xd92   : > { %14637 = vmatprep.subr.bf16.mxu1 %v19903_v23 }
 0xd95   : > { %14638 = vmatpush3.bf16.msra.mxu1 %v16204_v63 }
 0xd96   : > { %14639 = vmatprep.subr.bf16.mxu1 %v19903_v23 }
 0xd99   : > { %14640 = vmatpush3.bf16.msra.mxu1 %v16205_v55 }
 0xd9a   : > { %14645 = vmatprep.subr.bf16.mxu1 %v19903_v23 }
 0xd9c   : > { %14642 = vmatmul.mubr.msk.bf16.vlgmr.msra.gmra.mrb[36].mxu1 %vm7945_vm0, %v8495_v30 }
 0xd9d   : > { %14646 = vmatpush3.bf16.msra.mxu1 %v16206_v11  ;;  %14653 = vmatprep.mubr.msk.bf16.mxu1 %vm16629_vm6, %v19903_v23 }
 0xd9e   : > { %14647 = vmatprep.subr.bf16.mxu1 %v19903_v23 }
 0xda1   : > { %14648 = vmatpush3.bf16.msra.mxu1 %v16207_v46  ;;  %v16251_v46 = vld [vmem:[#allocation6 + $0x578] sm:$0xff]  }
 0xda2   : > { %14649 = vmatprep.subr.bf16.mxu1 %v19903_v23 }
 0xda5   : > { %14650 = vmatpush3.bf16.msra.mxu1 %v16208_v28 }
 0xda6   : > { %14651 = vmatprep.subr.bf16.mxu1 %v19903_v23 }
 0xda9   : > { %14652 = vmatpush3.bf16.msra.mxu1 %v16209_v32 }
 0xdaa   : > { %14657 = vmatprep.subr.bf16.mxu1 %v19903_v23 }
 0xdac   : > { %14654 = vmatmul.mubr.msk.bf16.vlgmr.msra.gmra.mrb[36].mxu1 %vm7945_vm0, %v8574_v18 }
 0xdad   : > { %14658 = vmatpush3.bf16.msra.mxu1 %v16210_v48  ;;  %14665 = vmatprep.mubr.msk.bf16.mxu1 %vm16629_vm6, %v19903_v23 }
 0xdae   : > { %14659 = vmatprep.subr.bf16.mxu1 %v19903_v23 }
 0xdb1   : > { %14660 = vmatpush3.bf16.msra.mxu1 %v16211_v43  ;;  %v8760_v43 = vld [vmem:[#allocation8 + $0xe] sm:$0x1] }
 0xdb2   : > { %14661 = vmatprep.subr.bf16.mxu1 %v19903_v23 }
 0xdb5   : > { %14662 = vmatpush3.bf16.msra.mxu1 %v16212_v29 }
 0xdb6   : > { %14663 = vmatprep.subr.bf16.mxu1 %v19903_v23 }
 0xdb9   : > { %14664 = vmatpush3.bf16.msra.mxu1 %v16213_v7  ;;  %v8761_v7 = vld [vmem:[#allocation8 + $0xf] sm:$0x1] }
 0xdba   : > { %14777 = vmatprep.subr.bf16.mxu1 %v19903_v23 }
 0xdbc   : > { %14666 = vmatmul.mubr.msk.bf16.vlgmr.msra.gmra.mrb[36].mxu1 %vm7945_vm0, %v8657_v17 }
 0xdbd   : > { %14785 = vmatprep.mubr.msk.bf16.mxu1 %vm16629_vm6, %v19903_v23  ;;  %14778 = vmatpush3.bf16.msra.mxu1 %v16250_v44 }
 0xdbe   : > { %14779 = vmatprep.subr.bf16.mxu1 %v19903_v23 }
 0xdc1   : > { %14780 = vmatpush3.bf16.msra.mxu1 %v16251_v46  ;;  %v9539_v46 = vld [vmem:[#allocation2] sm:$0xff] }
 0xdc2   : > { %14781 = vmatprep.subr.bf16.mxu1 %v19903_v23  ;;  %11290 = vst [vmem:[#allocation2] sm:$0xff] %v19903_v23 }
 0xe8f   : > { %v8727_v40 = vpop.f32.mrb[36].mxu1 }
 0xe90   : > { %v8746_v61 = vmul.f32 %v8727_v40, %v8727_v40  ;;  %v14667_v25 = vpop.f32.mrb[37].mxu1  ;;  %v8736_v62 = vsel %vm7945_vm0, %v8727_v40, 0.0 }
 0xe91   : > { %v8730_v15 = vpop.f32.mrb[38].mxu1  ;;  %v16237_v25 = vld [vmem:[#allocation6 + $0x4e8] sm:$0xff]  }
 0xe92   : > { %v8737_v22 = vsel %vm7945_vm0, %v8730_v15, 0.0  ;;  %v8747_v4 = vmul.f32 %v8730_v15, %v8730_v15  ;;  %v14668_v49 = vpop.f32.mrb[39].mxu1  ;;  %v8748_v12 = vsel %vm7945_vm0, %v8746_v61, 0.0 }
 0xe93   : > { %v8738_v59 = vadd.f32 %v8737_v22, %v8736_v62  ;;  %v16238_v62 = vld [vmem:[#allocation6 + $0x430] sm:$0xff]   ;;  %v16240_v49 = vld [vmem:[#allocation6 + $0x440] sm:$0xff]  }
 0xe94   : > { %v8749_v57 = vsel %vm7945_vm0, %v8747_v4, 0.0  ;;  %v16239_v4 = vld [vmem:[#allocation6 + $0x438] sm:$0xff]  }
 0xe95   : > { %v8739_v10 = vrot.slane %v8738_v59, 4  ;;  %v8750_v54 = vadd.f32 %v8749_v57, %v8748_v12  ;;  %v16241_v12 = vld [vmem:[#allocation6 + $0x448] sm:$0xff]  }
 0xe97   : > { %v8740_v1 = vadd.f32 %v8739_v10, %v8738_v59  ;;  %v8751_v5 = vrot.slane %v8750_v54, 4  ;;  %v16242_v10 = vld [vmem:[#allocation6 + $0x490] sm:$0xff]  }
 0xe99   : > { %v8741_v37 = vrot.slane %v8740_v1, 2  ;;  %v8752_v6 = vadd.f32 %v8751_v5, %v8750_v54  ;;  %v16244_v5 = vld [vmem:[#allocation6 + $0x4a0] sm:$0xff]  }
 0xe9b   : > { %v8742_v9 = vadd.f32 %v8741_v37, %v8740_v1  ;;  %v8753_v16 = vrot.slane %v8752_v6, 2  ;;  %v16243_v1 = vld [vmem:[#allocation6 + $0x498] sm:$0xff]   ;;  %v16245_v37 = vld [vmem:[#allocation6 + $0x4a8] sm:$0xff]  }
 0xe9d   : > { %v8743_v14 = vrot.slane %v8742_v9, 1  ;;  %v8754_v63 = vadd.f32 %v8753_v16, %v8752_v6  ;;  %v16246_v6 = vld [vmem:[#allocation6 + $0x4f0] sm:$0xff]   ;;  %v16247_v16 = vld [vmem:[#allocation6 + $0x4f8] sm:$0xff]  }
 0xe9f   : > { %v8744_v24 = vadd.f32 %v8743_v14, %v8742_v9  ;;  %v8755_v55 = vrot.slane %v8754_v63, 1  ;;  %v16248_v14 = vld [vmem:[#allocation6 + $0x500] sm:$0xff]  }
 0xea1   : > { %v8745_v11 = vmul.f32 0.0625, %v8744_v24  ;;  %v8756_v30 = vadd.f32 %v8755_v55, %v8754_v63  ;;  %v16249_v24 = vld [vmem:[#allocation6 + $0x508] sm:$0xff]  }
 0xea3   : > { %v8757_v28 = vmul.f32 0.0625, %v8756_v30  ;;  %v8758_v32 = vmul.f32 %v8745_v11, %v8745_v11  ;;  %v16253_v30 = vld [vmem:[#allocation6 + $0x588] sm:$0xff]  }
 0xea5   : > { %v8759_v48 = vsub.f32 %v8757_v28, %v8758_v32  ;;  %v9551_v28 = vpack.c.bf16 %v9539_v46, %v9539_v46  ;;  %v16254_v32 = vld [vmem:[#allocation6 + $0x510] sm:$0xff]  }
 0xea7   : > { %v8762_v18 = vadd.f32 1e-05, %v8759_v48  ;;  %v16255_v48 = vld [vmem:[#allocation6 + $0x518] sm:$0xff]  }
 0xea9   : > { %16444 = vrsqrt.f32 %v8762_v18  ;;  %v16256_v18 = vld [vmem:[#allocation6 + $0x520] sm:$0xff]  }
 0xeb3   : > { %v16445_v29 = vpop.eup %16444 }
 0xeb4   : > { %v8764_v27 = vmul.f32 %v16445_v29, %v8760_v43  ;;  %v16257_v43 = vld [vmem:[#allocation6 + $0x528] sm:$0xff]   ;;  %v9540_v29 = vrot.slane %v9539_v46, 7 }
 0xeb6   : > { %v8768_v51 = vrot.slane %v8764_v27, %v19912_v13  ;;  %v8771_v17 = vmul.f32 %v8764_v27, %v8745_v11  ;;  %v16252_v11 = vld [vmem:[#allocation6 + $0x580] sm:$0xff]   ;;  %v9541_v27 = vsel %vm256_vm1, %v9540_v29, 0.0  ;;  %v16295_v29 = vld [vmem:[#allocation6 + $0x638] sm:$0xff]  }
 0xeb7   : > { %14782 = vmatpush3.bf16.msra.mxu1 %v16252_v11  ;;  %v16293_v11 = vld [vmem:[#allocation6 + $0x728] sm:$0xff]  }
 0xeb8   : > { %v8769_v21 = vmul.f32 %v8768_v51, %v8727_v40  ;;  %v8770_v8 = vmul.f32 %v8768_v51, %v8730_v15  ;;  %v8772_v3 = vsub.f32 %v8761_v7, %v8771_v17  ;;  %v16236_v40 = vld [vmem:[#allocation6 + $0x4e0] sm:$0xff]   ;;  %14783 = vmatprep.subr.bf16.mxu1 %v19903_v23  ;;  %v9542_v7 = vpack.c.bf16 %v9541_v27, %v9541_v27  ;;  %v16258_v51 = vld [vmem:[#allocation6 + $0x5d0] sm:$0xff]   ;;  %v16259_v17 = vld [vmem:[#allocation6 + $0x5d8] sm:$0xff]  }
 0xeb9   : > { %v16296_v27 = vld [vmem:[#allocation6 + $0x640] sm:$0xff]  }
 0xeba   : > { %v8776_v52 = vrot.slane %v8772_v3, %v19912_v13  ;;  %v16261_v3 = vld [vmem:[#allocation6 + $0x5e8] sm:$0xff]  }
 0xebb   : > { %14784 = vmatpush3.bf16.msra.mxu1 %v16253_v30 }
 0xebc   : > { %v8777_v36 = vadd.f32 %v8776_v52, %v8769_v21  ;;  %v8778_v38 = vadd.f32 %v8776_v52, %v8770_v8  ;;  %14789 = vmatprep.subr.bf16.mxu1 %v19903_v23  ;;  %v16260_v21 = vld [vmem:[#allocation6 + $0x5e0] sm:$0xff]   ;;  %v9694_v8 = vrot.slane %v9539_v46, 1 }
 0xebe   : > { %vm8779_vm9 = vcmp.ge.f32.partialorder %v8777_v36, 0.0  ;;  %vm8780_vm10 = vcmp.ge.f32.partialorder %v8778_v38, 0.0  ;;  %v8781_v42 = vmul.f32 0.3, %v8777_v36  ;;  %v8782_v41 = vmul.f32 0.3, %v8778_v38  ;;  %14786 = vmatmul.mubr.msk.bf16.vlgmr.msra.gmra.mrb[40].mxu1 %vm7945_vm0, %v9551_v28 }
 0xebf   : > { %14790 = vmatpush3.bf16.msra.mxu1 %v16254_v32  ;;  %14797 = vmatprep.mubr.msk.bf16.mxu1 %vm16629_vm6, %v19903_v23  ;;  %v9695_v52 = vsel %vm257_vm2, %v9694_v8, 0.0  ;;  %v16294_v32 = vld [vmem:[#allocation6 + $0x630] sm:$0xff]  }
 0xec0   : > { %v8783_v35 = vsel %vm8779_vm9, %v8777_v36, %v8781_v42  ;;  %v8784_v0 = vsel %vm8780_vm10, %v8778_v38, %v8782_v41  ;;  %14791 = vmatprep.subr.bf16.mxu1 %v19903_v23  ;;  %v9696_v36 = vpack.c.bf16 %v9695_v52, %v9695_v52  ;;  %v16262_v38 = vld [vmem:[#allocation6 + $0x530] sm:$0xff]   ;;  %v16263_v42 = vld [vmem:[#allocation6 + $0x538] sm:$0xff]   ;;  %v16264_v41 = vld [vmem:[#allocation6 + $0x540] sm:$0xff]  }
 0xec1   : > { %v8785_v19 = vadd.f32 %v8783_v35, %v19209_v39  ;;  %v8786_v60 = vadd.f32 %v8784_v0, %v19211_v45  ;;  %v16231_v39 = vld [vmem:[#allocation6 + $0x478] sm:$0xff]   ;;  %v16232_v45 = vld [vmem:[#allocation6 + $0x480] sm:$0xff]   ;;  %v16265_v35 = vld [vmem:[#allocation6 + $0x548] sm:$0xff]  }
 0xec2   : > { %v16266_v8 = vld [vmem:[#allocation6 + $0x590] sm:$0xff]  }
 0xec3   : > { %8789 = vst.msk [vmem:[#allocation2 + $0x8] sm:$0xff] %vm7945_vm0, %v8785_v19  ;;  %8790 = vst.msk [vmem:[#allocation2 + $0x10] sm:$0xff] %vm7945_vm0, %v8786_v60  ;;  %14792 = vmatpush3.bf16.msra.mxu1 %v16255_v48  ;;  %v16298_v52 = vld [vmem:[#allocation6 + $0x650] sm:$0xff]  }
 0xec4   : > { %14793 = vmatprep.subr.bf16.mxu1 %v19903_v23 }
 0xec7   : > { %14794 = vmatpush3.bf16.msra.mxu1 %v16256_v18  ;;  %v16630_v18 = vmov 0.0|0.0  }
 0xec8   : > { %14795 = vmatprep.subr.bf16.mxu1 %v19903_v23 }
 0xeca   : > { %v9025_v34 = vld [vmem:[#allocation2 + $0x8] sm:$0xff]  ;;  %v19353_v33 = vld [vmem:[#allocation2 + $0x10] sm:$0xff] }
 0xecb   : > { %v9026_v58 = vrot.slane %v9025_v34, 7  ;;  %9537 = vst.msk [vmem:[#allocation2 + $0x10] sm:$0xff] %vm7945_vm0, %v19903_v23  ;;  %v9105_v56 = vpack.c.bf16 %v9025_v34, %v9025_v34  ;;  %v9182_v61 = vrot.slane %v9025_v34, 1  ;;  %v9262_v59 = vrot.slane %v19353_v33, 7  ;;  %14796 = vmatpush3.bf16.msra.mxu1 %v16257_v43 }
 0xecc   : > { %v9341_v9 = vpack.c.bf16 %v19353_v33, %v19353_v33  ;;  %v9418_v63 = vrot.slane %v19353_v33, 1  ;;  %14801 = vmatprep.subr.bf16.mxu1 %v19903_v23 }
 0xecd   : > { %v9027_v53 = vsel %vm256_vm1, %v9026_v58, 0.0  ;;  %v9183_v15 = vsel %vm257_vm2, %v9182_v61, 0.0  ;;  %v9263_v57 = vsel %vm256_vm1, %v9262_v59, 0.0 }
 0xece   : > { %v9028_v31 = vpack.c.bf16 %v9027_v53, %v9027_v53  ;;  %v9184_v22 = vpack.c.bf16 %v9183_v15, %v9183_v15  ;;  %v9264_v54 = vpack.c.bf16 %v9263_v57, %v9263_v57  ;;  %v9419_v55 = vsel %vm257_vm2, %v9418_v63, 0.0  ;;  %14798 = vmatmul.mubr.msk.bf16.vlgmr.msra.gmra.mrb[40].mxu1 %vm7945_vm0, %v9542_v7  ;;  %v16288_v57 = vld [vmem:[#allocation6 + $0x700] sm:$0xff]  }
 0xecf   : > { %v9420_v44 = vpack.c.bf16 %v9419_v55, %v9419_v55  ;;  %14802 = vmatpush3.bf16.msra.mxu1 %v16258_v51  ;;  %14809 = vmatprep.mubr.msk.bf16.mxu1 %vm16629_vm6, %v19903_v23  ;;  %v9517_v63 = vld [vmem:[#allocation8 + $0x11] sm:$0x1]  ;;  %v16297_v51 = vld [vmem:[#allocation6 + $0x648] sm:$0xff]  }
 0xed0   : > { %14714 = vmatmul.mubr.msk.bf16.vlgmr.msra.gmra.mrb[56].mxu0 %vm7945_vm0, %v9028_v31  ;;  %14803 = vmatprep.subr.bf16.mxu1 %v19903_v23 }
 0xed1   : > { %14718 = vmatpush3.bf16.msra.mxu0 %v16230_v26  ;;  %14725 = vmatprep.mubr.msk.bf16.mxu0 %vm16629_vm6, %v19903_v23 }
 0xed2   : > { %14719 = vmatprep.subr.bf16.mxu0 %v19903_v23  ;;  %v19435_v0 = vld [vmem:[#allocation2 + $0x10] sm:$0xff] }
 0xed3   : > { %14804 = vmatpush3.bf16.msra.mxu1 %v16259_v17  ;;  %11291 = vst [vmem:[#allocation2 + $0x10] sm:$0xff] %v19903_v23 }
 0xed4   : > { %14805 = vmatprep.subr.bf16.mxu1 %v19903_v23 }
 0xed5   : > { %14720 = vmatpush3.bf16.msra.mxu0 %v16231_v39 }
 0xed6   : > { %14721 = vmatprep.subr.bf16.mxu0 %v19903_v23 }
 0xed7   : > { %14806 = vmatpush3.bf16.msra.mxu1 %v16260_v21 }
 0xed8   : > { %14807 = vmatprep.subr.bf16.mxu1 %v19903_v23 }
 0xed9   : > { %14722 = vmatpush3.bf16.msra.mxu0 %v16232_v45 }
 0xeda   : > { %14723 = vmatprep.subr.bf16.mxu0 %v19903_v23 }
 0xedb   : > { %14808 = vmatpush3.bf16.msra.mxu1 %v16261_v3 }
 0xedc   : > { %14813 = vmatprep.subr.bf16.mxu1 %v19903_v23 }
 0xedd   : > { %14724 = vmatpush3.bf16.msra.mxu0 %v16233_v50 }
 0xede   : > { %14729 = vmatprep.subr.bf16.mxu0 %v19903_v23  ;;  %14810 = vmatmul.mubr.msk.bf16.vlgmr.msra.gmra.mrb[40].mxu1 %vm7945_vm0, %v9696_v36  ;;  %v16267_v36 = vld [vmem:[#allocation6 + $0x598] sm:$0xff]  }
 0xedf   : > { %14814 = vmatpush3.bf16.msra.mxu1 %v16262_v38  ;;  %14821 = vmatprep.mubr.msk.bf16.mxu1 %vm16629_vm6, %v19903_v23  ;;  %v16299_v38 = vld [vmem:[#allocation6 + $0x658] sm:$0xff]  }
 0xee0   : > { %14726 = vmatmul.mubr.msk.bf16.vlgmr.msra.gmra.mrb[56].mxu0 %vm7945_vm0, %v9105_v56  ;;  %14815 = vmatprep.subr.bf16.mxu1 %v19903_v23 }
 0xee1   : > { %14730 = vmatpush3.bf16.msra.mxu0 %v16234_v47  ;;  %14737 = vmatprep.mubr.msk.bf16.mxu0 %vm16629_vm6, %v19903_v23 }
 0xee2   : > { %14731 = vmatprep.subr.bf16.mxu0 %v19903_v23 }
 0xee3   : > { %14816 = vmatpush3.bf16.msra.mxu1 %v16263_v42  ;;  %v16268_v42 = vld [vmem:[#allocation6 + $0x5a0] sm:$0xff]  }
 0xee4   : > { %14817 = vmatprep.subr.bf16.mxu1 %v19903_v23 }
 0xee5   : > { %14732 = vmatpush3.bf16.msra.mxu0 %v16235_v2 }
 0xee6   : > { %14733 = vmatprep.subr.bf16.mxu0 %v19903_v23 }
 0xee7   : > { %14818 = vmatpush3.bf16.msra.mxu1 %v16264_v41  ;;  %v16300_v41 = vld [vmem:[#allocation6 + $0x660] sm:$0xff]  }
 0xee8   : > { %14819 = vmatprep.subr.bf16.mxu1 %v19903_v23 }
 0xee9   : > { %14734 = vmatpush3.bf16.msra.mxu0 %v16236_v40 }
 0xeea   : > { %14735 = vmatprep.subr.bf16.mxu0 %v19903_v23 }
 0xeeb   : > { %14820 = vmatpush3.bf16.msra.mxu1 %v16265_v35  ;;  %v16269_v35 = vld [vmem:[#allocation6 + $0x5a8] sm:$0xff]  }
 0xeec   : > { %14825 = vmatprep.subr.bf16.mxu1 %v19903_v23 }
 0xeed   : > { %14736 = vmatpush3.bf16.msra.mxu0 %v16237_v25  ;;  %v16286_v25 = vld [vmem:[#allocation6 + $0x6f0] sm:$0xff]  }
 0xeee   : > { %14741 = vmatprep.subr.bf16.mxu0 %v19903_v23 }
 0xef0   : > { %14738 = vmatmul.mubr.msk.bf16.vlgmr.msra.gmra.mrb[56].mxu0 %vm7945_vm0, %v9184_v22  ;;  %v16287_v22 = vld [vmem:[#allocation6 + $0x6f8] sm:$0xff]  }
 0xef1   : > { %14742 = vmatpush3.bf16.msra.mxu0 %v16238_v62  ;;  %14749 = vmatprep.mubr.msk.bf16.mxu0 %vm16629_vm6, %v19903_v23 }
 0xef2   : > { %14743 = vmatprep.subr.bf16.mxu0 %v19903_v23 }
 0xef5   : > { %14744 = vmatpush3.bf16.msra.mxu0 %v16239_v4 }
 0xef6   : > { %14745 = vmatprep.subr.bf16.mxu0 %v19903_v23 }
 0xef9   : > { %14746 = vmatpush3.bf16.msra.mxu0 %v16240_v49 }
 0xefa   : > { %14747 = vmatprep.subr.bf16.mxu0 %v19903_v23 }
 0xefd   : > { %14748 = vmatpush3.bf16.msra.mxu0 %v16241_v12 }
 0xefe   : > { %14753 = vmatprep.subr.bf16.mxu0 %v19903_v23 }
 0xf00   : > { %14750 = vmatmul.mubr.msk.bf16.vlgmr.msra.gmra.mrb[56].mxu0 %vm7945_vm0, %v9264_v54 }
 0xf01   : > { %14754 = vmatpush3.bf16.msra.mxu0 %v16242_v10  ;;  %14761 = vmatprep.mubr.msk.bf16.mxu0 %vm16629_vm6, %v19903_v23 }
 0xf02   : > { %14755 = vmatprep.subr.bf16.mxu0 %v19903_v23 }
 0xf05   : > { %14756 = vmatpush3.bf16.msra.mxu0 %v16243_v1  ;;  %v16289_v1 = vld [vmem:[#allocation6 + $0x708] sm:$0xff]  }
 0xf06   : > { %14757 = vmatprep.subr.bf16.mxu0 %v19903_v23 }
 0xf09   : > { %14758 = vmatpush3.bf16.msra.mxu0 %v16244_v5  ;;  %v16290_v5 = vld [vmem:[#allocation6 + $0x710] sm:$0xff]  }
 0xf0a   : > { %14759 = vmatprep.subr.bf16.mxu0 %v19903_v23 }
 0xf0d   : > { %14760 = vmatpush3.bf16.msra.mxu0 %v16245_v37  ;;  %v16291_v37 = vld [vmem:[#allocation6 + $0x718] sm:$0xff]  }
 0xf0e   : > { %14765 = vmatprep.subr.bf16.mxu0 %v19903_v23 }
 0xf10   : > { %14762 = vmatmul.mubr.msk.bf16.vlgmr.msra.gmra.mrb[56].mxu0 %vm7945_vm0, %v9341_v9 }
 0xf11   : > { %14766 = vmatpush3.bf16.msra.mxu0 %v16246_v6  ;;  %14773 = vmatprep.mubr.msk.bf16.mxu0 %vm16629_vm6, %v19903_v23  ;;  %v9516_v6 = vld [vmem:[#allocation8 + $0x10] sm:$0x1] }
 0xf12   : > { %14767 = vmatprep.subr.bf16.mxu0 %v19903_v23 }
 0xf15   : > { %14768 = vmatpush3.bf16.msra.mxu0 %v16247_v16 }
 0xf16   : > { %14769 = vmatprep.subr.bf16.mxu0 %v19903_v23 }
 0xf19   : > { %14770 = vmatpush3.bf16.msra.mxu0 %v16248_v14  ;;  %v16292_v14 = vld [vmem:[#allocation6 + $0x720] sm:$0xff]  }
 0xf1a   : > { %14771 = vmatprep.subr.bf16.mxu0 %v19903_v23 }
 0xf1d   : > { %14772 = vmatpush3.bf16.msra.mxu0 %v16249_v24 }
 0xf1e   : > { %14885 = vmatprep.subr.bf16.mxu0 %v19903_v23 }
 0xf20   : > { %14774 = vmatmul.mubr.msk.bf16.vlgmr.msra.gmra.mrb[56].mxu0 %vm7945_vm0, %v9420_v44 }
 0xf21   : > { %14901 = vmatprep.mubr.msk.bf16.mxu0 %vm16629_vm6, %v19903_v23  ;;  %14886 = vmatpush3.bf16.msra.mxu0 %v16286_v25  ;;  %v16276_v25 = vld [vmem:[#allocation6 + $0x560] sm:$0xff]  }
 0xf22   : > { %14887 = vmatprep.subr.bf16.mxu0 %v19903_v23 }
 0xf25   : > { %14888 = vmatpush3.bf16.msra.mxu0 %v16287_v22 }
 0xf26   : > { %14889 = vmatprep.subr.bf16.mxu0 %v19903_v23 }
 0xf29   : > { %14890 = vmatpush3.bf16.msra.mxu0 %v16288_v57  ;;  %v16281_v57 = vld [vmem:[#allocation6 + $0x5c8] sm:$0xff]  }
 0xf2a   : > { %14891 = vmatprep.subr.bf16.mxu0 %v19903_v23 }
 0xf2d   : > { %14892 = vmatpush3.bf16.msra.mxu0 %v16289_v1  ;;  %v16283_v1 = vld [vmem:[#allocation6 + $0x618] sm:$0xff]  }
 0xf2e   : > { %14893 = vmatprep.subr.bf16.mxu0 %v19903_v23 }
 0xf31   : > { %14894 = vmatpush3.bf16.msra.mxu0 %v16290_v5  ;;  %v16284_v5 = vld [vmem:[#allocation6 + $0x620] sm:$0xff]  }
 0xf32   : > { %14895 = vmatprep.subr.bf16.mxu0 %v19903_v23 }
 0xf35   : > { %14896 = vmatpush3.bf16.msra.mxu0 %v16291_v37  ;;  %v10166_v37 = vrot.slane %v19435_v0, 1 }
 0xf36   : > { %14897 = vmatprep.subr.bf16.mxu0 %v19903_v23 }
 0xf39   : > { %14898 = vmatpush3.bf16.msra.mxu0 %v16292_v14  ;;  %v16304_v14 = vld [vmem:[#allocation6 + $0x7c0] sm:$0xff]  }
 0xf3a   : > { %14899 = vmatprep.subr.bf16.mxu0 %v19903_v23 }
 0xf3d   : > { %14900 = vmatpush3.bf16.msra.mxu0 %v16293_v11  ;;  %v10498_v11 = vrot.slane %v19903_v23, 1 }
 0xf3e   : > { %14905 = vmatprep.subr.bf16.mxu0 %v19903_v23 }
 0xf40   : > { %14902 = vmatmul.mubr.bf16.vlgmr.msra.gmra.mrb[60].mxu0 %v16630_v18 }
 0xf41   : > { %14906 = vmatpush3.bf16.msra.mxu0 %v16294_v32  ;;  %14921 = vmatprep.mubr.msk.bf16.mxu0 %vm16629_vm6, %v19903_v23  ;;  %v16311_v32 = vld [vmem:[#allocation6 + $0x678] sm:$0xff]  }
 0xf42   : > { %14907 = vmatprep.subr.bf16.mxu0 %v19903_v23 }
 0xf45   : > { %14908 = vmatpush3.bf16.msra.mxu0 %v16295_v29  ;;  %v16315_v29 = vld [vmem:[#allocation6 + $0x698] sm:$0xff]  }
 0xf46   : > { %14909 = vmatprep.subr.bf16.mxu0 %v19903_v23 }
 0xf49   : > { %14910 = vmatpush3.bf16.msra.mxu0 %v16296_v27  ;;  %v16316_v27 = vld [vmem:[#allocation6 + $0x6a0] sm:$0xff]  }
 0xf4a   : > { %14911 = vmatprep.subr.bf16.mxu0 %v19903_v23 }
 0xf4d   : > { %14912 = vmatpush3.bf16.msra.mxu0 %v16297_v51 }
 0xf4e   : > { %14913 = vmatprep.subr.bf16.mxu0 %v19903_v23 }
 0xf51   : > { %14914 = vmatpush3.bf16.msra.mxu0 %v16298_v52 }
 0xf52   : > { %14915 = vmatprep.subr.bf16.mxu0 %v19903_v23 }
 0xf55   : > { %14916 = vmatpush3.bf16.msra.mxu0 %v16299_v38 }
 0xf56   : > { %14917 = vmatprep.subr.bf16.mxu0 %v19903_v23 }
 0xf59   : > { %14918 = vmatpush3.bf16.msra.mxu0 %v16300_v41 }
 0xf5a   : > { %14919 = vmatprep.subr.bf16.mxu0 %v19903_v23 }
 0xff3   : > { %v9490_v19 = vpop.f32.mrb[56].mxu0 }
 0xff4   : > { %v9497_v60 = vsel %vm7945_vm0, %v9490_v19, 0.0  ;;  %v9505_v34 = vmul.f32 %v9490_v19, %v9490_v19  ;;  %v14775_v33 = vpop.f32.mrb[57].mxu0 }
 0xff5   : > { %v9498_v58 = vrot.slane %v9497_v60, 4  ;;  %v9493_v53 = vpop.f32.mrb[58].mxu0 }
 0xff6   : > { %v9506_v26 = vsel %vm7945_vm0, %v9505_v34, 0.0  ;;  %v14776_v31 = vpop.f32.mrb[59].mxu0  ;;  %v16270_v34 = vld [vmem:[#allocation6 + $0x5f0] sm:$0xff]   ;;  %v16419_v53 = vld [vmem:[#allocation6 + $0x9d8] sm:$0xff]  }
 0xff7   : > { %v9499_v39 = vadd.f32 %v9498_v58, %v9497_v60  ;;  %v9507_v45 = vrot.slane %v9506_v26, 4  ;;  %v10286_v60 = vrot.slane %v19903_v23, 7  ;;  %v16271_v31 = vld [vmem:[#allocation6 + $0x5f8] sm:$0xff]  }
 0xff9   : > { %v9500_v50 = vrot.slane %v9499_v39, 2  ;;  %v9508_v47 = vadd.f32 %v9507_v45, %v9506_v26  ;;  %v19471_v58 = vpack.c.bf16 %v10286_v60, %v10286_v60  ;;  %v16302_v26 = vld [vmem:[#allocation6 + $0x7b0] sm:$0xff]   ;;  %v16272_v45 = vld [vmem:[#allocation6 + $0x600] sm:$0xff]  }
 0xffb   : > { %v9501_v56 = vadd.f32 %v9500_v50, %v9499_v39  ;;  %v9509_v2 = vrot.slane %v9508_v47, 2  ;;  %v16303_v39 = vld [vmem:[#allocation6 + $0x7b8] sm:$0xff]  }
 0xffd   : > { %v9502_v40 = vrot.slane %v9501_v56, 1  ;;  %v9510_v61 = vadd.f32 %v9509_v2, %v9508_v47  ;;  %v16273_v47 = vld [vmem:[#allocation6 + $0x608] sm:$0xff]   ;;  %v16274_v2 = vld [vmem:[#allocation6 + $0x550] sm:$0xff]  }
 0xfff   : > { %v9503_v15 = vadd.f32 %v9502_v40, %v9501_v56  ;;  %v9511_v62 = vrot.slane %v9510_v61, 1 }
0x1001   : > { %v9504_v4 = vmul.f32 0.125, %v9503_v15  ;;  %v9512_v49 = vadd.f32 %v9511_v62, %v9510_v61  ;;  %v16275_v61 = vld [vmem:[#allocation6 + $0x558] sm:$0xff]   ;;  %v10010_v15 = vrot.slane %v19435_v0, 7  ;;  %v16277_v62 = vld [vmem:[#allocation6 + $0x568] sm:$0xff]  }
0x1003   : > { %v9513_v59 = vmul.f32 0.125, %v9512_v49  ;;  %v9514_v12 = vmul.f32 %v9504_v4, %v9504_v4  ;;  %v10011_v22 = vsel %vm256_vm1, %v10010_v15, 0.0  ;;  %v16278_v49 = vld [vmem:[#allocation6 + $0x5b0] sm:$0xff]  }
0x1005   : > { %v9515_v10 = vsub.f32 %v9513_v59, %v9514_v12  ;;  %v16279_v59 = vld [vmem:[#allocation6 + $0x5b8] sm:$0xff]   ;;  %v16280_v12 = vld [vmem:[#allocation6 + $0x5c0] sm:$0xff]  }
0x1007   : > { %v9518_v54 = vadd.f32 1e-05, %v9515_v10  ;;  %v10089_v10 = vpack.c.bf16 %v19435_v0, %v19435_v0  ;;  %v16305_v0 = vld [vmem:[#allocation6 + $0x7c8] sm:$0xff]  }
0x1009   : > { %16446 = vrsqrt.f32 %v9518_v54  ;;  %v16282_v54 = vld [vmem:[#allocation6 + $0x610] sm:$0xff]  }
0x1013   : > { %v16447_v9 = vpop.eup %16446 }
0x1014   : > { %v9520_v16 = vmul.f32 %v16447_v9, %v9516_v6  ;;  %v16285_v6 = vld [vmem:[#allocation6 + $0x628] sm:$0xff]   ;;  %v10167_v9 = vsel %vm257_vm2, %v10166_v37, 0.0  ;;  %v16320_v37 = vld [vmem:[#allocation6 + $0x740] sm:$0xff]  }
0x1016   : > { %v9524_v24 = vrot.slane %v9520_v16, %v19912_v13  ;;  %v9526_v55 = vmul.f32 %v9520_v16, %v9504_v4  ;;  %v10012_v4 = vpack.c.bf16 %v10011_v22, %v10011_v22  ;;  %v10168_v16 = vpack.c.bf16 %v10167_v9, %v10167_v9  ;;  %v16322_v9 = vld [vmem:[#allocation6 + $0x750] sm:$0xff]  }
0x1018   : > { %v9527_v44 = vsub.f32 %v9517_v63, %v9526_v55  ;;  %v9525_v30 = vmul.f32 %v9524_v24, %v9490_v19  ;;  %v16301_v19 = vld [vmem:[#allocation6 + $0x668] sm:$0xff]   ;;  %v16306_v63 = vld [vmem:[#allocation6 + $0x7d0] sm:$0xff]   ;;  %v16307_v24 = vld [vmem:[#allocation6 + $0x7d8] sm:$0xff]  }
0x1019   : > { %14920 = vmatpush3.bf16.msra.mxu0 %v16301_v19  ;;  %v16308_v55 = vld [vmem:[#allocation6 + $0x7e0] sm:$0xff]  }
0x101a   : > { %v9531_v46 = vrot.slane %v9527_v44, %v19912_v13  ;;  %14925 = vmatprep.subr.bf16.mxu0 %v19903_v23  ;;  %v16309_v44 = vld [vmem:[#allocation6 + $0x7e8] sm:$0xff]  }
0x101c   : > { %v9532_v28 = vadd.f32 %v9531_v46, %v9525_v30  ;;  %14922 = vmatmul.mubr.msk.bf16.vlgmr.msra.gmra.mrb[60].mxu0 %vm19477_vm13, %v19471_v58  ;;  %v19536_v30 = vpack.c.bf16 %v10498_v11, %v10498_v11  ;;  %v16310_v46 = vld [vmem:[#allocation6 + $0x670] sm:$0xff]   ;;  %v16359_v11 = vld [vmem:[#allocation6 + $0x938] sm:$0xff]  }
0x101d   : > { %14926 = vmatpush3.bf16.msra.mxu0 %v16302_v26  ;;  %14941 = vmatprep.mubr.msk.bf16.mxu0 %vm16629_vm6, %v19903_v23 }
0x101e   : > { %vm9533_vm12 = vcmp.ge.f32.partialorder %v9532_v28, 0.0  ;;  %v9534_v48 = vmul.f32 0.3, %v9532_v28  ;;  %14927 = vmatprep.subr.bf16.mxu0 %v19903_v23 }
0x1020   : > { %v9535_v43 = vsel %vm9533_vm12, %v9532_v28, %v9534_v48  ;;  %v16312_v48 = vld [vmem:[#allocation6 + $0x680] sm:$0xff]  }
0x1021   : > { %9538 = vst.msk [vmem:[#allocation2 + $0x8] sm:$0xff] %vm7945_vm0, %v9535_v43  ;;  %14928 = vmatpush3.bf16.msra.mxu0 %v16303_v39  ;;  %v16314_v43 = vld [vmem:[#allocation6 + $0x690] sm:$0xff]  }
0x1022   : > { %14929 = vmatprep.subr.bf16.mxu0 %v19903_v23 }
0x1025   : > { %14930 = vmatpush3.bf16.msra.mxu0 %v16304_v14  ;;  %v16324_v14 = vld [vmem:[#allocation6 + $0x760] sm:$0xff]  }
0x1026   : > { %14931 = vmatprep.subr.bf16.mxu0 %v19903_v23 }
0x1028   : > { %v9773_v7 = vld [vmem:[#allocation2 + $0x8] sm:$0xff] }
0x1029   : > { %v9774_v17 = vrot.slane %v9773_v7, 7  ;;  %v9853_v33 = vpack.c.bf16 %v9773_v7, %v9773_v7  ;;  %v9930_v50 = vrot.slane %v9773_v7, 1  ;;  %14932 = vmatpush3.bf16.msra.mxu0 %v16305_v0  ;;  %v16317_v7 = vld [vmem:[#allocation6 + $0x6a8] sm:$0xff]  }
0x102a   : > { %14933 = vmatprep.subr.bf16.mxu0 %v19903_v23  ;;  %v16325_v0 = vld [vmem:[#allocation6 + $0x768] sm:$0xff]  }
0x102b   : > { %v9775_v21 = vsel %vm256_vm1, %v9774_v17, 0.0  ;;  %v9931_v56 = vsel %vm257_vm2, %v9930_v50, 0.0  ;;  %vm19541_vm1 = vmpackc.low %vm257_vm2, %vm257_vm2 }
0x102c   : > { %v9776_v3 = vpack.c.bf16 %v9775_v21, %v9775_v21  ;;  %v9932_v40 = vpack.c.bf16 %v9931_v56, %v9931_v56 }
0x102d   : > { %14934 = vmatpush3.bf16.msra.mxu0 %v16306_v63  ;;  %v16326_v63 = vld [vmem:[#allocation6 + $0x7f0] sm:$0xff]  }
0x102e   : > { %14822 = vmatmul.mubr.msk.bf16.vlgmr.msra.gmra.mrb[40].mxu1 %vm7945_vm0, %v9776_v3  ;;  %14935 = vmatprep.subr.bf16.mxu0 %v19903_v23 }
0x102f   : > { %14826 = vmatpush3.bf16.msra.mxu1 %v16266_v8  ;;  %14833 = vmatprep.mubr.msk.bf16.mxu1 %vm16629_vm6, %v19903_v23 }
0x1030   : > { %14827 = vmatprep.subr.bf16.mxu1 %v19903_v23 }
0x1031   : > { %14936 = vmatpush3.bf16.msra.mxu0 %v16307_v24 }
0x1032   : > { %14937 = vmatprep.subr.bf16.mxu0 %v19903_v23 }
0x1033   : > { %14828 = vmatpush3.bf16.msra.mxu1 %v16267_v36 }
0x1034   : > { %14829 = vmatprep.subr.bf16.mxu1 %v19903_v23 }
0x1035   : > { %14938 = vmatpush3.bf16.msra.mxu0 %v16308_v55  ;;  %v16358_v55 = vld [vmem:[#allocation6 + $0x930] sm:$0xff]  }
0x1036   : > { %14939 = vmatprep.subr.bf16.mxu0 %v19903_v23 }
0x1037   : > { %14830 = vmatpush3.bf16.msra.mxu1 %v16268_v42 }
0x1038   : > { %14831 = vmatprep.subr.bf16.mxu1 %v19903_v23 }
0x1039   : > { %14940 = vmatpush3.bf16.msra.mxu0 %v16309_v44  ;;  %v16327_v44 = vld [vmem:[#allocation6 + $0x7f8] sm:$0xff]  }
0x103a   : > { %14945 = vmatprep.subr.bf16.mxu0 %v19903_v23 }
0x103b   : > { %14832 = vmatpush3.bf16.msra.mxu1 %v16269_v35 }
0x103c   : > { %14837 = vmatprep.subr.bf16.mxu1 %v19903_v23  ;;  %14942 = vmatmul.mubr.msk.bf16.vlgmr.msra.gmra.mrb[60].mxu0 %vm19541_vm1, %v19536_v30 }
0x103d   : > { %14946 = vmatpush3.bf16.msra.mxu0 %v16310_v46  ;;  %14961 = vmatprep.mubr.msk.bf16.mxu0 %vm16629_vm6, %v19903_v23  ;;  %v16328_v46 = vld [vmem:[#allocation6 + $0x800] sm:$0xff]  }
0x103e   : > { %14834 = vmatmul.mubr.msk.bf16.vlgmr.msra.gmra.mrb[40].mxu1 %vm7945_vm0, %v9853_v33  ;;  %14947 = vmatprep.subr.bf16.mxu0 %v19903_v23 }
0x103f   : > { %14838 = vmatpush3.bf16.msra.mxu1 %v16270_v34  ;;  %14845 = vmatprep.mubr.msk.bf16.mxu1 %vm16629_vm6, %v19903_v23 }
0x1040   : > { %14839 = vmatprep.subr.bf16.mxu1 %v19903_v23 }
0x1041   : > { %14948 = vmatpush3.bf16.msra.mxu0 %v16311_v32  ;;  %v16360_v32 = vld [vmem:[#allocation6 + $0x940] sm:$0xff]  }
0x1042   : > { %14949 = vmatprep.subr.bf16.mxu0 %v19903_v23 }
0x1043   : > { %14840 = vmatpush3.bf16.msra.mxu1 %v16271_v31 }
0x1044   : > { %14841 = vmatprep.subr.bf16.mxu1 %v19903_v23 }
0x1045   : > { %14950 = vmatpush3.bf16.msra.mxu0 %v16312_v48  ;;  %v16329_v48 = vld [vmem:[#allocation6 + $0x808] sm:$0xff]  }
0x1046   : > { %14951 = vmatprep.subr.bf16.mxu0 %v19903_v23 }
0x1047   : > { %14842 = vmatpush3.bf16.msra.mxu1 %v16272_v45 }
0x1048   : > { %14843 = vmatprep.subr.bf16.mxu1 %v19903_v23 }
0x1049   : > { %14952 = vmatpush3.bf16.msra.mxu0 %v16313_v20  ;;  %v16361_v20 = vld [vmem:[#allocation6 + $0x948] sm:$0xff]  }
0x104a   : > { %14953 = vmatprep.subr.bf16.mxu0 %v19903_v23 }
0x104b   : > { %14844 = vmatpush3.bf16.msra.mxu1 %v16273_v47 }
0x104c   : > { %14849 = vmatprep.subr.bf16.mxu1 %v19903_v23 }
0x104d   : > { %14954 = vmatpush3.bf16.msra.mxu0 %v16314_v43  ;;  %v16330_v43 = vld [vmem:[#allocation6 + $0x810] sm:$0xff]  }
0x104e   : > { %14846 = vmatmul.mubr.msk.bf16.vlgmr.msra.gmra.mrb[40].mxu1 %vm7945_vm0, %v9932_v40  ;;  %14955 = vmatprep.subr.bf16.mxu0 %v19903_v23 }
0x104f   : > { %14850 = vmatpush3.bf16.msra.mxu1 %v16274_v2  ;;  %14857 = vmatprep.mubr.msk.bf16.mxu1 %vm16629_vm6, %v19903_v23  ;;  %v10262_v2 = vld [vmem:[#allocation8 + $0x12] sm:$0x1] }
0x1050   : > { %14851 = vmatprep.subr.bf16.mxu1 %v19903_v23 }
0x1051   : > { %14956 = vmatpush3.bf16.msra.mxu0 %v16315_v29  ;;  %v16362_v29 = vld [vmem:[#allocation6 + $0x950] sm:$0xff]  }
0x1052   : > { %14957 = vmatprep.subr.bf16.mxu0 %v19903_v23 }
0x1053   : > { %14852 = vmatpush3.bf16.msra.mxu1 %v16275_v61 }
0x1054   : > { %14853 = vmatprep.subr.bf16.mxu1 %v19903_v23 }
0x1055   : > { %14958 = vmatpush3.bf16.msra.mxu0 %v16316_v27  ;;  %v16331_v27 = vld [vmem:[#allocation6 + $0x818] sm:$0xff]  }
0x1056   : > { %14959 = vmatprep.subr.bf16.mxu0 %v19903_v23 }
0x1057   : > { %14854 = vmatpush3.bf16.msra.mxu1 %v16276_v25  ;;  %v10263_v25 = vld [vmem:[#allocation8 + $0x13] sm:$0x1] }
0x1058   : > { %14855 = vmatprep.subr.bf16.mxu1 %v19903_v23 }
0x1059   : > { %14960 = vmatpush3.bf16.msra.mxu0 %v16317_v7  ;;  %v16363_v7 = vld [vmem:[#allocation6 + $0x958] sm:$0xff]  }
0x105a   : > { %14965 = vmatprep.subr.bf16.mxu0 %v19903_v23 }
0x105b   : > { %14856 = vmatpush3.bf16.msra.mxu1 %v16277_v62 }
0x105c   : > { %14861 = vmatprep.subr.bf16.mxu1 %v19903_v23 }
0x105e   : > { %14858 = vmatmul.mubr.msk.bf16.vlgmr.msra.gmra.mrb[40].mxu1 %vm7945_vm0, %v10012_v4 }
0x105f   : > { %14862 = vmatpush3.bf16.msra.mxu1 %v16278_v49  ;;  %14869 = vmatprep.mubr.msk.bf16.mxu1 %vm16629_vm6, %v19903_v23 }
0x1060   : > { %14863 = vmatprep.subr.bf16.mxu1 %v19903_v23 }
0x1063   : > { %14864 = vmatpush3.bf16.msra.mxu1 %v16279_v59 }
0x1064   : > { %14865 = vmatprep.subr.bf16.mxu1 %v19903_v23 }
0x1067   : > { %14866 = vmatpush3.bf16.msra.mxu1 %v16280_v12 }
0x1068   : > { %14867 = vmatprep.subr.bf16.mxu1 %v19903_v23 }
0x106b   : > { %14868 = vmatpush3.bf16.msra.mxu1 %v16281_v57 }
0x106c   : > { %14873 = vmatprep.subr.bf16.mxu1 %v19903_v23 }
0x106e   : > { %14870 = vmatmul.mubr.msk.bf16.vlgmr.msra.gmra.mrb[40].mxu1 %vm7945_vm0, %v10089_v10 }
0x106f   : > { %14874 = vmatpush3.bf16.msra.mxu1 %v16282_v54  ;;  %14881 = vmatprep.mubr.msk.bf16.mxu1 %vm16629_vm6, %v19903_v23  ;;  %v16318_v54 = vld [vmem:[#allocation6 + $0x730] sm:$0xff]  }
0x1070   : > { %14875 = vmatprep.subr.bf16.mxu1 %v19903_v23 }
0x1073   : > { %14876 = vmatpush3.bf16.msra.mxu1 %v16283_v1 }
0x1074   : > { %14877 = vmatprep.subr.bf16.mxu1 %v19903_v23 }
0x1077   : > { %14878 = vmatpush3.bf16.msra.mxu1 %v16284_v5  ;;  %v16319_v5 = vld [vmem:[#allocation6 + $0x738] sm:$0xff]  }
0x1078   : > { %14879 = vmatprep.subr.bf16.mxu1 %v19903_v23 }
0x107b   : > { %14880 = vmatpush3.bf16.msra.mxu1 %v16285_v6  ;;  %v16321_v6 = vld [vmem:[#allocation6 + $0x748] sm:$0xff]  }
0x107c   : > { %15065 = vmatprep.subr.bf16.mxu1 %v19903_v23 }
0x107e   : > { %14882 = vmatmul.mubr.msk.bf16.vlgmr.msra.gmra.mrb[40].mxu1 %vm7945_vm0, %v10168_v16  ;;  %v16323_v16 = vld [vmem:[#allocation6 + $0x758] sm:$0xff]  }
0x107f   : > { %15081 = vmatprep.mubr.msk.bf16.mxu1 %vm16629_vm6, %v19903_v23  ;;  %15066 = vmatpush3.bf16.msra.mxu1 %v16358_v55  ;;  %v16383_v55 = vld [vmem:[#allocation6 + $0x8b8] sm:$0xff]  }
0x1080   : > { %15067 = vmatprep.subr.bf16.mxu1 %v19903_v23 }
0x1083   : > { %15068 = vmatpush3.bf16.msra.mxu1 %v16359_v11  ;;  %v16385_v11 = vld [vmem:[#allocation6 + $0x8c8] sm:$0xff]  }
0x1084   : > { %15069 = vmatprep.subr.bf16.mxu1 %v19903_v23 }
0x1087   : > { %15070 = vmatpush3.bf16.msra.mxu1 %v16360_v32  ;;  %v16388_v32 = vld [vmem:[#allocation6 + $0x8e0] sm:$0xff]  }
0x1088   : > { %15071 = vmatprep.subr.bf16.mxu1 %v19903_v23 }
0x108b   : > { %15072 = vmatpush3.bf16.msra.mxu1 %v16361_v20 }
0x108c   : > { %15073 = vmatprep.subr.bf16.mxu1 %v19903_v23 }
0x108f   : > { %15074 = vmatpush3.bf16.msra.mxu1 %v16362_v29 }
0x1090   : > { %15075 = vmatprep.subr.bf16.mxu1 %v19903_v23 }
0x1093   : > { %15076 = vmatpush3.bf16.msra.mxu1 %v16363_v7 }
0x1094   : > { %15077 = vmatprep.subr.bf16.mxu1 %v19903_v23 }
0x1151   : > { %v10238_v51 = vpop.f32.mrb[40].mxu1 }
0x1152   : > { %v10245_v17 = vrot.slane %v10238_v51, 4  ;;  %v10252_v21 = vmul.f32 %v10238_v51, %v10238_v51  ;;  %v14883_v8 = vpop.f32.mrb[41].mxu1 }
0x1153   : > { %v10241_v3 = vpop.f32.mrb[42].mxu1 }
0x1154   : > { %v10246_v52 = vadd.f32 %v10245_v17, %v10238_v51  ;;  %v10253_v36 = vrot.slane %v10252_v21, 4  ;;  %v14884_v38 = vpop.f32.mrb[43].mxu1  ;;  %v16364_v17 = vld [vmem:[#allocation6 + $0x960] sm:$0xff]   ;;  %v16365_v3 = vld [vmem:[#allocation6 + $0x968] sm:$0xff]  }
0x1155   : > { %15078 = vmatpush3.bf16.msra.mxu1 %v16364_v17  ;;  %v16366_v38 = vld [vmem:[#allocation6 + $0x870] sm:$0xff]  }
0x1156   : > { %v10247_v42 = vrot.slane %v10246_v52, 2  ;;  %v10254_v41 = vadd.f32 %v10253_v36, %v10252_v21  ;;  %v16333_v21 = vld [vmem:[#allocation6 + $0x828] sm:$0xff]   ;;  %15079 = vmatprep.subr.bf16.mxu1 %v19903_v23 }
0x1158   : > { %v10248_v35 = vadd.f32 %v10247_v42, %v10246_v52  ;;  %v10255_v19 = vrot.slane %v10254_v41, 2  ;;  %v16334_v52 = vld [vmem:[#allocation6 + $0x6b0] sm:$0xff]   ;;  %v16335_v42 = vld [vmem:[#allocation6 + $0x6b8] sm:$0xff]  }
0x1159   : > { %15080 = vmatpush3.bf16.msra.mxu1 %v16365_v3 }
0x115a   : > { %v10249_v60 = vrot.slane %v10248_v35, 1  ;;  %v10256_v34 = vadd.f32 %v10255_v19, %v10254_v41  ;;  %15085 = vmatprep.subr.bf16.mxu1 %v19903_v23  ;;  %v16367_v41 = vld [vmem:[#allocation6 + $0x878] sm:$0xff]   ;;  %v16368_v19 = vld [vmem:[#allocation6 + $0x880] sm:$0xff]  }
0x115c   : > { %v10250_v33 = vadd.f32 %v10249_v60, %v10248_v35  ;;  %v10257_v26 = vrot.slane %v10256_v34, 1  ;;  %15082 = vmatmul.mubr.bf16.vlgmr.msra.gmra.mrb[44].mxu1 %v16630_v18  ;;  %v16336_v35 = vld [vmem:[#allocation6 + $0x6c0] sm:$0xff]   ;;  %v16337_v60 = vld [vmem:[#allocation6 + $0x6c8] sm:$0xff]  }
0x115d   : > { %15086 = vmatpush3.bf16.msra.mxu1 %v16366_v38  ;;  %15101 = vmatprep.mubr.msk.bf16.mxu1 %vm16629_vm6, %v19903_v23 }
0x115e   : > { %v10251_v31 = vmul.f32 0.125, %v10250_v33  ;;  %v10258_v39 = vadd.f32 %v10257_v26, %v10256_v34  ;;  %15087 = vmatprep.subr.bf16.mxu1 %v19903_v23  ;;  %v16369_v34 = vld [vmem:[#allocation6 + $0x888] sm:$0xff]   ;;  %v16338_v33 = vld [vmem:[#allocation6 + $0x6d0] sm:$0xff]  }
0x115f   : > { %v16370_v26 = vld [vmem:[#allocation6 + $0x890] sm:$0xff]  }
0x1160   : > { %v10259_v45 = vmul.f32 0.125, %v10258_v39  ;;  %v10260_v50 = vmul.f32 %v10251_v31, %v10251_v31  ;;  %v16371_v39 = vld [vmem:[#allocation6 + $0x898] sm:$0xff]  }
0x1161   : > { %15088 = vmatpush3.bf16.msra.mxu1 %v16367_v41 }
0x1162   : > { %v10261_v47 = vsub.f32 %v10259_v45, %v10260_v50  ;;  %15089 = vmatprep.subr.bf16.mxu1 %v19903_v23  ;;  %v16340_v45 = vld [vmem:[#allocation6 + $0x6e0] sm:$0xff]  }
0x1163   : > { %v16372_v50 = vld [vmem:[#allocation6 + $0x8a0] sm:$0xff]  }
0x1164   : > { %v10264_v56 = vadd.f32 1e-05, %v10261_v47  ;;  %v16341_v47 = vld [vmem:[#allocation6 + $0x6e8] sm:$0xff]  }
0x1165   : > { %15090 = vmatpush3.bf16.msra.mxu1 %v16368_v19 }
0x1166   : > { %16448 = vrsqrt.f32 %v10264_v56  ;;  %15091 = vmatprep.subr.bf16.mxu1 %v19903_v23  ;;  %v16373_v56 = vld [vmem:[#allocation6 + $0x8a8] sm:$0xff]  }
0x1169   : > { %15092 = vmatpush3.bf16.msra.mxu1 %v16369_v34 }
0x116a   : > { %15093 = vmatprep.subr.bf16.mxu1 %v19903_v23 }
0x116d   : > { %15094 = vmatpush3.bf16.msra.mxu1 %v16370_v26 }
0x116e   : > { %15095 = vmatprep.subr.bf16.mxu1 %v19903_v23 }
0x1170   : > { %v16449_v40 = vpop.eup %16448 }
0x1171   : > { %v10266_v61 = vmul.f32 %v16449_v40, %v10262_v2  ;;  %15096 = vmatpush3.bf16.msra.mxu1 %v16371_v39  ;;  %v16342_v2 = vld [vmem:[#allocation6 + $0x770] sm:$0xff]   ;;  %v11269_v39 = vld [vmem:[#allocation8 + $0x14] sm:$0x1] }
0x1172   : > { %15097 = vmatprep.subr.bf16.mxu1 %v19903_v23  ;;  %v16374_v40 = vld [vmem:[#allocation6 + $0x9f0] sm:$0xff]  }
0x1173   : > { %v10270_v15 = vrot.slane %v10266_v61, %v19912_v13  ;;  %v10272_v62 = vmul.f32 %v10266_v61, %v10251_v31  ;;  %v16339_v31 = vld [vmem:[#allocation6 + $0x6d8] sm:$0xff]  }
0x1174   : > { %v16343_v61 = vld [vmem:[#allocation6 + $0x778] sm:$0xff]  }
0x1175   : > { %v10273_v22 = vsub.f32 %v10263_v25, %v10272_v62  ;;  %v10271_v4 = vmul.f32 %v10270_v15, %v10238_v51  ;;  %v16332_v51 = vld [vmem:[#allocation6 + $0x820] sm:$0xff]   ;;  %15098 = vmatpush3.bf16.msra.mxu1 %v16372_v50  ;;  %v16375_v25 = vld [vmem:[#allocation6 + $0x9f8] sm:$0xff]   ;;  %v16345_v62 = vld [vmem:[#allocation6 + $0x788] sm:$0xff]  }
0x1176   : > { %15099 = vmatprep.subr.bf16.mxu1 %v19903_v23  ;;  %v16344_v15 = vld [vmem:[#allocation6 + $0x780] sm:$0xff]  }
0x1177   : > { %v10277_v49 = vrot.slane %v10273_v22, %v19912_v13  ;;  %v16347_v22 = vld [vmem:[#allocation6 + $0x798] sm:$0xff]  }
0x1179   : > { %v10278_v59 = vadd.f32 %v10277_v49, %v10271_v4  ;;  %15100 = vmatpush3.bf16.msra.mxu1 %v16373_v56  ;;  %v16348_v4 = vld [vmem:[#allocation6 + $0x7a0] sm:$0xff]   ;;  %v16349_v49 = vld [vmem:[#allocation6 + $0x7a8] sm:$0xff]  }
0x117a   : > { %15105 = vmatprep.subr.bf16.mxu1 %v19903_v23 }
0x117b   : > { %vm10279_vm2 = vcmp.ge.f32.partialorder %v10278_v59, 0.0  ;;  %v10280_v12 = vmul.f32 0.3, %v10278_v59 }
0x117c   : > { %15102 = vmatmul.mubr.msk.bf16.vlgmr.msra.gmra.mrb[44].mxu1 %vm19477_vm13, %v19471_v58 }
0x117d   : > { %v19560_v57 = vsel %vm10279_vm2, %v10278_v59, %v10280_v12  ;;  %15106 = vmatpush3.bf16.msra.mxu1 %v16374_v40  ;;  %15121 = vmatprep.mubr.msk.bf16.mxu1 %vm16629_vm6, %v19903_v23  ;;  %v16350_v59 = vld [vmem:[#allocation6 + $0x830] sm:$0xff]   ;;  %v16351_v12 = vld [vmem:[#allocation6 + $0x838] sm:$0xff]  }
0x117e   : > { %v10607_v10 = vrot.slane %v19560_v57, 7  ;;  %v10715_v24 = vpack.c.bf16 %v19560_v57, %v19560_v57  ;;  %v10821_v8 = vrot.slane %v19560_v57, 1  ;;  %15107 = vmatprep.subr.bf16.mxu1 %v19903_v23 }
0x1180   : > { %v12921_v1 = vpack.c.bf16 %v10607_v10, %v10607_v10  ;;  %v12940_v36 = vpack.c.bf16 %v10821_v8, %v10821_v8  ;;  %v16352_v10 = vld [vmem:[#allocation6 + $0x840] sm:$0xff]  }
0x1181   : > { %15108 = vmatpush3.bf16.msra.mxu1 %v16375_v25 }
0x1182   : > { %14962 = vmatmul.mubr.msk.bf16.vlgmr.msra.gmra.mrb[60].mxu0 %vm19477_vm13, %v12921_v1  ;;  %15109 = vmatprep.subr.bf16.mxu1 %v19903_v23  ;;  %v16354_v1 = vld [vmem:[#allocation6 + $0x850] sm:$0xff]  }
0x1183   : > { %14966 = vmatpush3.bf16.msra.mxu0 %v16318_v54  ;;  %14981 = vmatprep.mubr.msk.bf16.mxu0 %vm16629_vm6, %v19903_v23  ;;  %v16353_v54 = vld [vmem:[#allocation6 + $0x848] sm:$0xff]  }
0x1184   : > { %14967 = vmatprep.subr.bf16.mxu0 %v19903_v23 }
0x1187   : > { %14968 = vmatpush3.bf16.msra.mxu0 %v16319_v5  ;;  %v16356_v5 = vld [vmem:[#allocation6 + $0x860] sm:$0xff]  }
0x1188   : > { %14969 = vmatprep.subr.bf16.mxu0 %v19903_v23 }
0x118b   : > { %14970 = vmatpush3.bf16.msra.mxu0 %v16320_v37  ;;  %v16357_v37 = vld [vmem:[#allocation6 + $0x868] sm:$0xff]  }
0x118c   : > { %14971 = vmatprep.subr.bf16.mxu0 %v19903_v23 }
0x118f   : > { %14972 = vmatpush3.bf16.msra.mxu0 %v16321_v6  ;;  %v16376_v6 = vld [vmem:[#allocation6 + $0xa00] sm:$0xff]  }
0x1190   : > { %14973 = vmatprep.subr.bf16.mxu0 %v19903_v23  ;;  %15110 = vmatpush3.bf16.msra.mxu1 %v16376_v6 }
0x1193   : > { %14974 = vmatpush3.bf16.msra.mxu0 %v16322_v9  ;;  %v19652_v9 = vld [vmem:[#allocation2] sm:$0xff] }
0x1194   : > { %14975 = vmatprep.subr.bf16.mxu0 %v19903_v23  ;;  %15111 = vmatprep.subr.bf16.mxu1 %v19652_v9 }
0x1197   : > { %14976 = vmatpush3.bf16.msra.mxu0 %v16323_v16  ;;  %v16377_v16 = vld [vmem:[#allocation6 + $0xa08] sm:$0xff]  }
0x1198   : > { %14977 = vmatprep.subr.bf16.mxu0 %v19903_v23  ;;  %15112 = vmatpush3.bf16.msra.mxu1 %v16377_v16  ;;  %v16399_v16 = vld [vmem:[#allocation6 + $0xa38] sm:$0xff]  }
0x1199   : > { %15113 = vmatprep.subr.bf16.mxu1 %v19652_v9 }
0x119b   : > { %14978 = vmatpush3.bf16.msra.mxu0 %v16324_v14  ;;  %v16378_v14 = vld [vmem:[#allocation6 + $0xa10] sm:$0xff]  }
0x119c   : > { %14979 = vmatprep.subr.bf16.mxu0 %v19903_v23  ;;  %15114 = vmatpush3.bf16.msra.mxu1 %v16378_v14  ;;  %v16400_v14 = vld [vmem:[#allocation6 + $0xa40] sm:$0xff]  }
0x119d   : > { %15115 = vmatprep.subr.bf16.mxu1 %v19652_v9 }
0x119f   : > { %14980 = vmatpush3.bf16.msra.mxu0 %v16325_v0  ;;  %v16380_v0 = vld [vmem:[#allocation6 + $0xa20] sm:$0xff]  }
0x11a0   : > { %14985 = vmatprep.subr.bf16.mxu0 %v19903_v23 }
0x11a2   : > { %14982 = vmatmul.mubr.bf16.vlgmr.msra.gmra.mrb[60].mxu0 %v10715_v24  ;;  %v16382_v24 = vld [vmem:[#allocation6 + $0x8b0] sm:$0xff]  }
0x11a3   : > { %14986 = vmatpush3.bf16.msra.mxu0 %v16326_v63  ;;  %15001 = vmatprep.mubr.msk.bf16.mxu0 %vm16629_vm6, %v19903_v23  ;;  %v16381_v63 = vld [vmem:[#allocation6 + $0xa28] sm:$0xff]  }
0x11a4   : > { %14987 = vmatprep.subr.bf16.mxu0 %v19903_v23 }
0x11a7   : > { %14988 = vmatpush3.bf16.msra.mxu0 %v16327_v44  ;;  %v16384_v44 = vld [vmem:[#allocation6 + $0x8c0] sm:$0xff]  }
0x11a8   : > { %14989 = vmatprep.subr.bf16.mxu0 %v19903_v23 }
0x11ab   : > { %14990 = vmatpush3.bf16.msra.mxu0 %v16328_v46  ;;  %v16386_v46 = vld [vmem:[#allocation6 + $0x8d0] sm:$0xff]  }
0x11ac   : > { %14991 = vmatprep.subr.bf16.mxu0 %v19903_v23 }
0x11af   : > { %14992 = vmatpush3.bf16.msra.mxu0 %v16329_v48  ;;  %v16389_v48 = vld [vmem:[#allocation6 + $0x8e8] sm:$0xff]  }
0x11b0   : > { %14993 = vmatprep.subr.bf16.mxu0 %v19903_v23 }
0x11b3   : > { %14994 = vmatpush3.bf16.msra.mxu0 %v16330_v43 }
0x11b4   : > { %14995 = vmatprep.subr.bf16.mxu0 %v19903_v23 }
0x11b7   : > { %14996 = vmatpush3.bf16.msra.mxu0 %v16331_v27 }
0x11b8   : > { %14997 = vmatprep.subr.bf16.mxu0 %v19903_v23 }
0x11bb   : > { %14998 = vmatpush3.bf16.msra.mxu0 %v16332_v51 }
0x11bc   : > { %14999 = vmatprep.subr.bf16.mxu0 %v19903_v23 }
0x11bf   : > { %15000 = vmatpush3.bf16.msra.mxu0 %v16333_v21 }
0x11c0   : > { %15005 = vmatprep.subr.bf16.mxu0 %v19903_v23 }
0x11c2   : > { %15002 = vmatmul.mubr.msk.bf16.vlgmr.msra.gmra.mrb[60].mxu0 %vm19541_vm1, %v12940_v36 }
0x11c3   : > { %15006 = vmatpush3.bf16.msra.mxu0 %v16334_v52  ;;  %15021 = vmatprep.mubr.msk.bf16.mxu0 %vm16629_vm6, %v19903_v23 }
0x11c4   : > { %15007 = vmatprep.subr.bf16.mxu0 %v19903_v23 }
0x11c7   : > { %15008 = vmatpush3.bf16.msra.mxu0 %v16335_v42 }
0x11c8   : > { %15009 = vmatprep.subr.bf16.mxu0 %v19903_v23 }
0x11cb   : > { %15010 = vmatpush3.bf16.msra.mxu0 %v16336_v35 }
0x11cc   : > { %15011 = vmatprep.subr.bf16.mxu0 %v19903_v23 }
0x11cf   : > { %15012 = vmatpush3.bf16.msra.mxu0 %v16337_v60 }
0x11d0   : > { %15013 = vmatprep.subr.bf16.mxu0 %v19903_v23 }
0x11d3   : > { %15014 = vmatpush3.bf16.msra.mxu0 %v16338_v33 }
0x11d4   : > { %15015 = vmatprep.subr.bf16.mxu0 %v19903_v23 }
0x11d7   : > { %15016 = vmatpush3.bf16.msra.mxu0 %v16339_v31 }
0x11d8   : > { %15017 = vmatprep.subr.bf16.mxu0 %v19903_v23 }
0x11db   : > { %15018 = vmatpush3.bf16.msra.mxu0 %v16340_v45 }
0x11dc   : > { %15019 = vmatprep.subr.bf16.mxu0 %v19903_v23 }
0x11df   : > { %15020 = vmatpush3.bf16.msra.mxu0 %v16341_v47  ;;  %v11270_v47 = vld [vmem:[#allocation8 + $0x15] sm:$0x1] }
0x11e0   : > { %15025 = vmatprep.subr.bf16.mxu0 %v19903_v23 }
0x11e2   : > { %15022 = vmatmul.mubr.msk.bf16.vlgmr.msra.gmra.mrb[60].mxu0 %vm19477_vm13, %v19471_v58  ;;  %v16346_v58 = vld [vmem:[#allocation6 + $0x790] sm:$0xff]  }
0x11e3   : > { %15026 = vmatpush3.bf16.msra.mxu0 %v16342_v2  ;;  %15041 = vmatprep.mubr.msk.bf16.mxu0 %vm16629_vm6, %v19903_v23 }
0x11e4   : > { %15027 = vmatprep.subr.bf16.mxu0 %v19903_v23 }
0x11e7   : > { %15028 = vmatpush3.bf16.msra.mxu0 %v16343_v61 }
0x11e8   : > { %15029 = vmatprep.subr.bf16.mxu0 %v19903_v23 }
0x11eb   : > { %15030 = vmatpush3.bf16.msra.mxu0 %v16344_v15 }
0x11ec   : > { %15031 = vmatprep.subr.bf16.mxu0 %v19903_v23 }
0x11ef   : > { %15032 = vmatpush3.bf16.msra.mxu0 %v16345_v62 }
0x11f0   : > { %15033 = vmatprep.subr.bf16.mxu0 %v19903_v23 }
0x11f3   : > { %15034 = vmatpush3.bf16.msra.mxu0 %v16346_v58 }
0x11f4   : > { %15035 = vmatprep.subr.bf16.mxu0 %v19903_v23 }
0x11f7   : > { %15036 = vmatpush3.bf16.msra.mxu0 %v16347_v22 }
0x11f8   : > { %15037 = vmatprep.subr.bf16.mxu0 %v19903_v23 }
0x11fb   : > { %15038 = vmatpush3.bf16.msra.mxu0 %v16348_v4 }
0x11fc   : > { %15039 = vmatprep.subr.bf16.mxu0 %v19903_v23 }
0x11ff   : > { %15040 = vmatpush3.bf16.msra.mxu0 %v16349_v49  ;;  %v16390_v49 = vld [vmem:[#allocation6 + $0x970] sm:$0xff]  }
0x1200   : > { %15045 = vmatprep.subr.bf16.mxu0 %v19903_v23 }
0x1202   : > { %15042 = vmatmul.mubr.bf16.vlgmr.msra.gmra.mrb[60].mxu0 %v16630_v18  ;;  %v16355_v18 = vld [vmem:[#allocation6 + $0x858] sm:$0xff]  }
0x1203   : > { %15046 = vmatpush3.bf16.msra.mxu0 %v16350_v59  ;;  %15061 = vmatprep.mubr.msk.bf16.mxu0 %vm16629_vm6, %v19903_v23 }
0x1204   : > { %15047 = vmatprep.subr.bf16.mxu0 %v19903_v23 }
0x1207   : > { %15048 = vmatpush3.bf16.msra.mxu0 %v16351_v12  ;;  %v16391_v12 = vld [vmem:[#allocation6 + $0x978] sm:$0xff]  }
0x1208   : > { %15049 = vmatprep.subr.bf16.mxu0 %v19903_v23 }
0x120b   : > { %15050 = vmatpush3.bf16.msra.mxu0 %v16352_v10  ;;  %v16392_v10 = vld [vmem:[#allocation6 + $0x980] sm:$0xff]  }
0x120c   : > { %15051 = vmatprep.subr.bf16.mxu0 %v19903_v23 }
0x120f   : > { %15052 = vmatpush3.bf16.msra.mxu0 %v16353_v54  ;;  %v16394_v54 = vld [vmem:[#allocation6 + $0x990] sm:$0xff]  }
0x1210   : > { %15053 = vmatprep.subr.bf16.mxu0 %v19903_v23 }
0x1213   : > { %15054 = vmatpush3.bf16.msra.mxu0 %v16354_v1  ;;  %v16395_v1 = vld [vmem:[#allocation6 + $0x998] sm:$0xff]  }
0x1214   : > { %15055 = vmatprep.subr.bf16.mxu0 %v19903_v23 }
0x1217   : > { %15056 = vmatpush3.bf16.msra.mxu0 %v16355_v18  ;;  %v16396_v18 = vld [vmem:[#allocation6 + $0x9a0] sm:$0xff]  }
0x1218   : > { %15057 = vmatprep.subr.bf16.mxu0 %v19903_v23 }
0x121b   : > { %15058 = vmatpush3.bf16.msra.mxu0 %v16356_v5  ;;  %v16397_v5 = vld [vmem:[#allocation6 + $0x9a8] sm:$0xff]  }
0x121c   : > { %15059 = vmatprep.subr.bf16.mxu0 %v19903_v23  ;;  %v16379_v23 = vld [vmem:[#allocation6 + $0xa18] sm:$0xff]  }
0x121d   : > { %15116 = vmatpush3.bf16.msra.mxu1 %v16379_v23  ;;  %v16401_v23 = vld [vmem:[#allocation6 + $0xa48] sm:$0xff]  }
0x121e   : > { %15117 = vmatprep.subr.bf16.mxu1 %v19652_v9 }
0x121f   : > { %15060 = vmatpush3.bf16.msra.mxu0 %v16357_v37  ;;  %v16398_v37 = vld [vmem:[#allocation6 + $0xa30] sm:$0xff]  }
0x1221   : > { %15118 = vmatpush3.bf16.msra.mxu1 %v16380_v0  ;;  %v16402_v0 = vld [vmem:[#allocation6 + $0xa50] sm:$0xff]  }
0x1222   : > { %15062 = vmatmul.mubr.msk.bf16.vlgmr.msra.gmra.mrb[60].mxu0 %vm19541_vm1, %v19536_v30  ;;  %15119 = vmatprep.subr.bf16.mxu1 %v19652_v9 }
0x1225   : > { %15120 = vmatpush3.bf16.msra.mxu1 %v16381_v63  ;;  %v16403_v63 = vld [vmem:[#allocation6 + $0xa58] sm:$0xff]  }
0x1226   : > { %15125 = vmatprep.subr.bf16.mxu1 %v19652_v9 }
0x1228   : > { %15122 = vmatmul.mubr.msk.bf16.vlgmr.msra.gmra.mrb[44].mxu1 %vm19541_vm1, %v19536_v30  ;;  %v16387_v30 = vld [vmem:[#allocation6 + $0x8d8] sm:$0xff]  }
0x1229   : > { %15126 = vmatpush3.bf16.msra.mxu1 %v16382_v24  ;;  %15141 = vmatprep.mubr.msk.bf16.mxu1 %vm16629_vm6, %v19652_v9  ;;  %v16404_v24 = vld [vmem:[#allocation6 + $0xa60] sm:$0xff]  }
0x122a   : > { %15127 = vmatprep.subr.bf16.mxu1 %v19652_v9 }
0x122d   : > { %15128 = vmatpush3.bf16.msra.mxu1 %v16383_v55  ;;  %v16405_v55 = vld [vmem:[#allocation6 + $0xa68] sm:$0xff]  }
0x122e   : > { %15129 = vmatprep.subr.bf16.mxu1 %v19652_v9 }
0x1231   : > { %15130 = vmatpush3.bf16.msra.mxu1 %v16384_v44 }
0x1232   : > { %15131 = vmatprep.subr.bf16.mxu1 %v19652_v9 }
0x1235   : > { %15132 = vmatpush3.bf16.msra.mxu1 %v16385_v11  ;;  %v16406_v11 = vld [vmem:[#allocation6 + $0x8f0] sm:$0xff]  }
0x1236   : > { %15133 = vmatprep.subr.bf16.mxu1 %v19652_v9 }
0x1239   : > { %15134 = vmatpush3.bf16.msra.mxu1 %v16386_v46 }
0x123a   : > { %15135 = vmatprep.subr.bf16.mxu1 %v19652_v9 }
0x123d   : > { %15136 = vmatpush3.bf16.msra.mxu1 %v16387_v30  ;;  %v16407_v30 = vld [vmem:[#allocation6 + $0x8f8] sm:$0xff]  }
0x123e   : > { %15137 = vmatprep.subr.bf16.mxu1 %v19652_v9 }
0x1241   : > { %15138 = vmatpush3.bf16.msra.mxu1 %v16388_v32  ;;  %v16408_v32 = vld [vmem:[#allocation6 + $0x900] sm:$0xff]  }
0x1242   : > { %15139 = vmatprep.subr.bf16.mxu1 %v19652_v9 }
0x1245   : > { %15140 = vmatpush3.bf16.msra.mxu1 %v16389_v48  ;;  %v16409_v48 = vld [vmem:[#allocation6 + $0x908] sm:$0xff]  }
0x1246   : > { %15145 = vmatprep.subr.bf16.mxu1 %v19652_v9 }
0x12f5   : > { %v11245_v20 = vpop.f32.mrb[60].mxu0 }
0x12f6   : > { %v11252_v43 = vrot.slane %v11245_v20, 4  ;;  %v11259_v29 = vmul.f32 %v11245_v20, %v11245_v20  ;;  %v15063_v27 = vpop.f32.mrb[61].mxu0 }
0x12f7   : > { %v11248_v7 = vpop.f32.mrb[62].mxu0  ;;  %v11938_v27 = vrot.slane %v19652_v9, 7 }
0x12f8   : > { %v11253_v51 = vadd.f32 %v11252_v43, %v11245_v20  ;;  %v11260_v17 = vrot.slane %v11259_v29, 4  ;;  %v15064_v21 = vpop.f32.mrb[63].mxu0  ;;  %v16411_v43 = vld [vmem:[#allocation6 + $0x918] sm:$0xff]   ;;  %v16413_v7 = vld [vmem:[#allocation6 + $0x928] sm:$0xff]  }
0x12f9   : > { %v16415_v21 = vld [vmem:[#allocation6 + $0x9b8] sm:$0xff]  }
0x12fa   : > { %v11254_v8 = vrot.slane %v11253_v51, 2  ;;  %v11261_v3 = vadd.f32 %v11260_v17, %v11259_v29  ;;  %v16412_v29 = vld [vmem:[#allocation6 + $0x920] sm:$0xff]   ;;  %v16414_v17 = vld [vmem:[#allocation6 + $0x9b0] sm:$0xff]  }
0x12fc   : > { %v11255_v52 = vadd.f32 %v11254_v8, %v11253_v51  ;;  %v11262_v36 = vrot.slane %v11261_v3, 2  ;;  %v13041_v51 = vpack.c.bf16 %v11938_v27, %v11938_v27  ;;  %v16416_v8 = vld [vmem:[#allocation6 + $0x9c0] sm:$0xff]  }
0x12fe   : > { %v11256_v38 = vrot.slane %v11255_v52, 1  ;;  %v11263_v42 = vadd.f32 %v11262_v36, %v11261_v3  ;;  %v16417_v3 = vld [vmem:[#allocation6 + $0x9c8] sm:$0xff]   ;;  %v16420_v36 = vld [vmem:[#allocation6 + $0x9e0] sm:$0xff]  }
0x1300   : > { %v11257_v41 = vadd.f32 %v11256_v38, %v11255_v52  ;;  %v11264_v35 = vrot.slane %v11263_v42, 1  ;;  %v16418_v52 = vld [vmem:[#allocation6 + $0x9d0] sm:$0xff]   ;;  %v16421_v38 = vld [vmem:[#allocation6 + $0x9e8] sm:$0xff]  }
0x1302   : > { %v11258_v19 = vmul.f32 0.125, %v11257_v41  ;;  %v11265_v60 = vadd.f32 %v11264_v35, %v11263_v42  ;;  %v12046_v42 = vpack.c.bf16 %v19652_v9, %v19652_v9  ;;  %v16422_v41 = vld [vmem:[#allocation6 + $0xa70] sm:$0xff]   ;;  %v16423_v35 = vld [vmem:[#allocation6 + $0xa78] sm:$0xff]  }
0x1304   : > { %v11266_v34 = vmul.f32 0.125, %v11265_v60  ;;  %v11267_v33 = vmul.f32 %v11258_v19, %v11258_v19  ;;  %v16425_v60 = vld [vmem:[#allocation6 + $0xa88] sm:$0xff]  }
0x1306   : > { %v11268_v26 = vsub.f32 %v11266_v34, %v11267_v33  ;;  %v16426_v34 = vld [vmem:[#allocation6 + $0xa90] sm:$0xff]   ;;  %v16427_v33 = vld [vmem:[#allocation6 + $0xa98] sm:$0xff]  }
0x1308   : > { %v11271_v31 = vadd.f32 1e-05, %v11268_v26  ;;  %v16428_v26 = vld [vmem:[#allocation6 + $0xaa0] sm:$0xff]  }
0x130a   : > { %16450 = vrsqrt.f32 %v11271_v31  ;;  %v12152_v31 = vrot.slane %v19652_v9, 1 }
0x1314   : > { %v16451_v45 = vpop.eup %16450 }
0x1315   : > { %v11273_v50 = vmul.f32 %v16451_v45, %v11269_v39  ;;  %v16429_v39 = vld [vmem:[#allocation6 + $0xaa8] sm:$0xff]   ;;  %v13060_v45 = vpack.c.bf16 %v12152_v31, %v12152_v31 }
0x1317   : > { %v11277_v56 = vrot.slane %v11273_v50, %v19912_v13  ;;  %v11279_v2 = vmul.f32 %v11273_v50, %v11258_v19  ;;  %v16424_v19 = vld [vmem:[#allocation6 + $0xa80] sm:$0xff]  }
0x1319   : > { %v11280_v40 = vsub.f32 %v11270_v47, %v11279_v2  ;;  %v11278_v61 = vmul.f32 %v11277_v56, %v11245_v20  ;;  %v16410_v20 = vld [vmem:[#allocation6 + $0x910] sm:$0xff]  }
0x131b   : > { %v11284_v25 = vrot.slane %v11280_v40, %v19912_v13 }
0x131d   : > { %v11285_v15 = vadd.f32 %v11284_v25, %v11278_v61 }
0x131f   : > { %vm11286_vm14 = vcmp.ge.f32.partialorder %v11285_v15, 0.0  ;;  %v11287_v62 = vmul.f32 0.3, %v11285_v15 }
0x1321   : > { %v11288_v58 = vsel %vm11286_vm14, %v11285_v15, %v11287_v62 }
0x1322   : > { %v11289_v22 = vadd.f32 %v11288_v58, %v19560_v57  ;;  %v16393_v57 = vld [vmem:[#allocation6 + $0x988] sm:$0xff]  }
0x1324   : > { %11292 = vst [vmem:[#allocation2 + $0x8] sm:$0xff] %v11289_v22  ;;  %v11615_v4 = vrot.slane %v11289_v22, 7  ;;  %v11723_v6 = vpack.c.bf16 %v11289_v22, %v11289_v22  ;;  %v11829_v44 = vrot.slane %v11289_v22, 1 }
0x1326   : > { %v13011_v59 = vpack.c.bf16 %v11615_v4, %v11615_v4  ;;  %v13030_v46 = vpack.c.bf16 %v11829_v44, %v11829_v44 }
0x1328   : > { %15142 = vmatmul.mubr.msk.bf16.vlgmr.msra.gmra.mrb[44].mxu1 %vm19477_vm13, %v13011_v59 }
0x1329   : > { %15146 = vmatpush3.bf16.msra.mxu1 %v16390_v49  ;;  %15161 = vmatprep.mubr.msk.bf16.mxu1 %vm16629_vm6, %v19652_v9 }
0x132a   : > { %15147 = vmatprep.subr.bf16.mxu1 %v19652_v9 }
0x132d   : > { %15148 = vmatpush3.bf16.msra.mxu1 %v16391_v12 }
0x132e   : > { %15149 = vmatprep.subr.bf16.mxu1 %v19652_v9 }
0x1331   : > { %15150 = vmatpush3.bf16.msra.mxu1 %v16392_v10 }
0x1332   : > { %15151 = vmatprep.subr.bf16.mxu1 %v19652_v9 }
0x1335   : > { %15152 = vmatpush3.bf16.msra.mxu1 %v16393_v57 }
0x1336   : > { %15153 = vmatprep.subr.bf16.mxu1 %v19652_v9 }
0x1339   : > { %15154 = vmatpush3.bf16.msra.mxu1 %v16394_v54 }
0x133a   : > { %15155 = vmatprep.subr.bf16.mxu1 %v19652_v9 }
0x133d   : > { %15156 = vmatpush3.bf16.msra.mxu1 %v16395_v1 }
0x133e   : > { %15157 = vmatprep.subr.bf16.mxu1 %v19652_v9 }
0x1341   : > { %15158 = vmatpush3.bf16.msra.mxu1 %v16396_v18 }
0x1342   : > { %15159 = vmatprep.subr.bf16.mxu1 %v19652_v9 }
0x1345   : > { %15160 = vmatpush3.bf16.msra.mxu1 %v16397_v5  ;;  %v12277_v5 = vld [vmem:[#allocation8 + $0x16] sm:$0x1] }
0x1346   : > { %15165 = vmatprep.subr.bf16.mxu1 %v19652_v9 }
0x1348   : > { %15162 = vmatmul.mubr.bf16.vlgmr.msra.gmra.mrb[44].mxu1 %v11723_v6 }
0x1349   : > { %15166 = vmatpush3.bf16.msra.mxu1 %v16398_v37  ;;  %15181 = vmatprep.mubr.msk.bf16.mxu1 %vm16629_vm6, %v19652_v9 }
0x134a   : > { %15167 = vmatprep.subr.bf16.mxu1 %v19652_v9 }
0x134d   : > { %15168 = vmatpush3.bf16.msra.mxu1 %v16399_v16  ;;  %v12278_v16 = vld [vmem:[#allocation8 + $0x17] sm:$0x1] }
0x134e   : > { %15169 = vmatprep.subr.bf16.mxu1 %v19652_v9 }
0x1351   : > { %15170 = vmatpush3.bf16.msra.mxu1 %v16400_v14 }
0x1352   : > { %15171 = vmatprep.subr.bf16.mxu1 %v19652_v9 }
0x1355   : > { %15172 = vmatpush3.bf16.msra.mxu1 %v16401_v23 }
0x1356   : > { %15173 = vmatprep.subr.bf16.mxu1 %v19652_v9 }
0x1359   : > { %15174 = vmatpush3.bf16.msra.mxu1 %v16402_v0 }
0x135a   : > { %15175 = vmatprep.subr.bf16.mxu1 %v19652_v9 }
0x135d   : > { %15176 = vmatpush3.bf16.msra.mxu1 %v16403_v63 }
0x135e   : > { %15177 = vmatprep.subr.bf16.mxu1 %v19652_v9 }
0x1361   : > { %15178 = vmatpush3.bf16.msra.mxu1 %v16404_v24 }
0x1362   : > { %15179 = vmatprep.subr.bf16.mxu1 %v19652_v9 }
0x1365   : > { %15180 = vmatpush3.bf16.msra.mxu1 %v16405_v55 }
0x1366   : > { %15185 = vmatprep.subr.bf16.mxu1 %v19652_v9 }
0x1368   : > { %15182 = vmatmul.mubr.msk.bf16.vlgmr.msra.gmra.mrb[44].mxu1 %vm19541_vm1, %v13030_v46 }
0x1369   : > { %15186 = vmatpush3.bf16.msra.mxu1 %v16406_v11  ;;  %15201 = vmatprep.mubr.msk.bf16.mxu1 %vm16629_vm6, %v19652_v9 }
0x136a   : > { %15187 = vmatprep.subr.bf16.mxu1 %v19652_v9 }
0x136d   : > { %15188 = vmatpush3.bf16.msra.mxu1 %v16407_v30 }
0x136e   : > { %15189 = vmatprep.subr.bf16.mxu1 %v19652_v9 }
0x1371   : > { %15190 = vmatpush3.bf16.msra.mxu1 %v16408_v32 }
0x1372   : > { %15191 = vmatprep.subr.bf16.mxu1 %v19652_v9 }
0x1375   : > { %15192 = vmatpush3.bf16.msra.mxu1 %v16409_v48 }
0x1376   : > { %15193 = vmatprep.subr.bf16.mxu1 %v19652_v9 }
0x1379   : > { %15194 = vmatpush3.bf16.msra.mxu1 %v16410_v20 }
0x137a   : > { %15195 = vmatprep.subr.bf16.mxu1 %v19652_v9 }
0x137d   : > { %15196 = vmatpush3.bf16.msra.mxu1 %v16411_v43 }
0x137e   : > { %15197 = vmatprep.subr.bf16.mxu1 %v19652_v9 }
0x1381   : > { %15198 = vmatpush3.bf16.msra.mxu1 %v16412_v29 }
0x1382   : > { %15199 = vmatprep.subr.bf16.mxu1 %v19652_v9 }
0x1385   : > { %15200 = vmatpush3.bf16.msra.mxu1 %v16413_v7 }
0x1386   : > { %15205 = vmatprep.subr.bf16.mxu1 %v19652_v9 }
0x1388   : > { %15202 = vmatmul.mubr.msk.bf16.vlgmr.msra.gmra.mrb[44].mxu1 %vm19477_vm13, %v13041_v51 }
0x1389   : > { %15206 = vmatpush3.bf16.msra.mxu1 %v16414_v17  ;;  %15221 = vmatprep.mubr.msk.bf16.mxu1 %vm16629_vm6, %v19652_v9 }
0x138a   : > { %15207 = vmatprep.subr.bf16.mxu1 %v19652_v9 }
0x138d   : > { %15208 = vmatpush3.bf16.msra.mxu1 %v16415_v21 }
0x138e   : > { %15209 = vmatprep.subr.bf16.mxu1 %v19652_v9 }
0x1391   : > { %15210 = vmatpush3.bf16.msra.mxu1 %v16416_v8 }
0x1392   : > { %15211 = vmatprep.subr.bf16.mxu1 %v19652_v9 }
0x1395   : > { %15212 = vmatpush3.bf16.msra.mxu1 %v16417_v3 }
0x1396   : > { %15213 = vmatprep.subr.bf16.mxu1 %v19652_v9 }
0x1399   : > { %15214 = vmatpush3.bf16.msra.mxu1 %v16418_v52 }
0x139a   : > { %15215 = vmatprep.subr.bf16.mxu1 %v19652_v9 }
0x139d   : > { %15216 = vmatpush3.bf16.msra.mxu1 %v16419_v53 }
0x139e   : > { %15217 = vmatprep.subr.bf16.mxu1 %v19652_v9 }
0x13a1   : > { %15218 = vmatpush3.bf16.msra.mxu1 %v16420_v36 }
0x13a2   : > { %15219 = vmatprep.subr.bf16.mxu1 %v19652_v9 }
0x13a5   : > { %15220 = vmatpush3.bf16.msra.mxu1 %v16421_v38 }
0x13a6   : > { %15225 = vmatprep.subr.bf16.mxu1 %v19652_v9 }
0x13a8   : > { %15222 = vmatmul.mubr.bf16.vlgmr.msra.gmra.mrb[44].mxu1 %v12046_v42 }
0x13a9   : > { %15226 = vmatpush3.bf16.msra.mxu1 %v16422_v41  ;;  %15241 = vmatprep.mubr.msk.bf16.mxu1 %vm16629_vm6, %v19652_v9 }
0x13aa   : > { %15227 = vmatprep.subr.bf16.mxu1 %v19652_v9 }
0x13ad   : > { %15228 = vmatpush3.bf16.msra.mxu1 %v16423_v35 }
0x13ae   : > { %15229 = vmatprep.subr.bf16.mxu1 %v19652_v9 }
0x13b1   : > { %15230 = vmatpush3.bf16.msra.mxu1 %v16424_v19 }
0x13b2   : > { %15231 = vmatprep.subr.bf16.mxu1 %v19652_v9 }
0x13b5   : > { %15232 = vmatpush3.bf16.msra.mxu1 %v16425_v60 }
0x13b6   : > { %15233 = vmatprep.subr.bf16.mxu1 %v19652_v9 }
0x13b9   : > { %15234 = vmatpush3.bf16.msra.mxu1 %v16426_v34 }
0x13ba   : > { %15235 = vmatprep.subr.bf16.mxu1 %v19652_v9 }
0x13bd   : > { %15236 = vmatpush3.bf16.msra.mxu1 %v16427_v33 }
0x13be   : > { %15237 = vmatprep.subr.bf16.mxu1 %v19652_v9 }
0x13c1   : > { %15238 = vmatpush3.bf16.msra.mxu1 %v16428_v26 }
0x13c2   : > { %15239 = vmatprep.subr.bf16.mxu1 %v19652_v9 }
0x13c5   : > { %15240 = vmatpush3.bf16.msra.mxu1 %v16429_v39 }
0x13c8   : > { %15242 = vmatmul.mubr.msk.bf16.vlgmr.msra.gmra.mrb[44].mxu1 %vm19541_vm1, %v13060_v45 }
0x149b   : > { %v12253_v50 = vpop.f32.mrb[44].mxu1 }
0x149c   : > { %v12260_v47 = vrot.slane %v12253_v50, 4  ;;  %v12267_v56 = vmul.f32 %v12253_v50, %v12253_v50  ;;  %v15243_v2 = vpop.f32.mrb[45].mxu1 }
0x149d   : > { %v12256_v40 = vpop.f32.mrb[46].mxu1 }
0x149e   : > { %v12261_v61 = vadd.f32 %v12260_v47, %v12253_v50  ;;  %v12268_v25 = vrot.slane %v12267_v56, 4  ;;  %v15244_v15 = vpop.f32.mrb[47].mxu1 }
0x14a0   : > { %v12262_v62 = vrot.slane %v12261_v61, 2  ;;  %v12269_v58 = vadd.f32 %v12268_v25, %v12267_v56 }
0x14a2   : > { %v12263_v22 = vadd.f32 %v12262_v62, %v12261_v61  ;;  %v12270_v4 = vrot.slane %v12269_v58, 2 }
0x14a4   : > { %v12264_v49 = vrot.slane %v12263_v22, 1  ;;  %v12271_v59 = vadd.f32 %v12270_v4, %v12269_v58 }
0x14a6   : > { %v12265_v9 = vadd.f32 %v12264_v49, %v12263_v22  ;;  %v12272_v12 = vrot.slane %v12271_v59, 1 }
0x14a8   : > { %v12266_v10 = vmul.f32 0.125, %v12265_v9  ;;  %v12273_v28 = vadd.f32 %v12272_v12, %v12271_v59 }
0x14aa   : > { %v12274_v57 = vmul.f32 0.125, %v12273_v28  ;;  %v12275_v54 = vmul.f32 %v12266_v10, %v12266_v10 }
0x14ac   : > { %v12276_v1 = vsub.f32 %v12274_v57, %v12275_v54 }
0x14ae   : > { %v12279_v18 = vadd.f32 1e-05, %v12276_v1 }
0x14b0   : > { %16452 = vrsqrt.f32 %v12279_v18 }
0x14ba   : > { %v16453_v37 = vpop.eup %16452 }
0x14bb   : > { %v12281_v6 = vmul.f32 %v16453_v37, %v12277_v5 }
0x14bd   : > { %v12285_v14 = vrot.slane %v12281_v6, %v19912_v13  ;;  %v12287_v23 = vmul.f32 %v12281_v6, %v12266_v10 }
0x14bf   : > { %v12288_v0 = vsub.f32 %v12278_v16, %v12287_v23  ;;  %v12286_v63 = vmul.f32 %v12285_v14, %v12253_v50 }
0x14c1   : > { %v12292_v24 = vrot.slane %v12288_v0, %v19912_v13 }
0x14c3   : > { %v12293_v55 = vadd.f32 %v12292_v24, %v12286_v63 }
0x14c5   : > { %v12295_v44 = vmul.f32 0.3, %v12293_v55  ;;  %vm12294_vm6 = vcmp.ge.f32.partialorder %v12293_v55, 0.0 }
0x14c7   : > { %v12296_v11 = vsel %vm12294_vm6, %v12293_v55, %v12295_v44 }
0x14c8   : > { %12297 = vst [vmem:[%s215_s17] sm:$0xff] %v12296_v11 }
0x14c9   : > { %16562 = shalt.err (!%p16559_p2)
}
0x14ca   : > { %s16563_s10 = scalar_lea.hbm %s19744_s23, 128  ;;  %s16567_s28 = scalar_lea.hbm %s19791_s3, 256 }
0x14cb   : > { %p16564_p13 = scmp.ne.s32.totalorder %s19744_s23, %s16563_s10  ;;  %p16568_p4 = scmp.lt.u32.totalorder %s19744_s23, %s19791_s3 }
0x14cc   : > { %p16569_p5 = scmp.lt.u32.totalorder %s16567_s28, %s16563_s10  ;;  %p16571_p11 = scmp.lt.u32.totalorder %s16563_s10, %s19744_s23 }
0x14cd   : > { %p16565_p6 = pnand %p16564_p13, %p19933_p0 }
0x14ce   : > { %p16570_p8 = por %p16569_p5, %p16568_p4 }
0x14cf   : > { %p16566_p10 = pneg %p16565_p6 }
0x14d0   : > { %p16572_p1 = por %p16571_p11, %p16570_p8 }
0x14d2   : > { %p16573_p3 = pnand %p16572_p1, %p16566_p10 }
0x14d4   : > { %16576 = shalt.err (!%p16573_p3)
}
0x14d5   : > { %16025 = dma.vmem_to_hbm [thread:$0]  (%p19933_p0), %s19746_s24, 128, %s19744_s23, %s12299_s5  }
0x14d6 PF: > { %s12324_s30 = sand.u32 1, %s16607_s12   ;;  %p19934_p7 = scmp.ne.s32.totalorder %s19835_s19, 0 }
0x14d7   : > { %p19935_p9 = scmp.ge.s32.totalorder %s16619_s15, 2  ;;  %s12325_s18 = scalar_lea.sflag [#allocation5], %s12324_s30 }
0x14d9   : > { %p16039_p12 = pnand %p19935_p9, %p19934_p7 }
0x14db   : > { %16602 = dma.done.wait (!%p16039_p12), %s12325_s18, 128  }
0x14dc   : > { %16604 = vsyncadd (!%p16039_p12), %s12325_s18, 4294967168  ;;  %p17_p2 = scmp.ge.s32.totalorder %s16762_s4, 4   ;;  %s19936_s12 = smov %s16611_s13 }
0x14dd   : > { %s19937_s13 = smov %s16615_s14  ;;  %s19938_s14 = smov %s16778_s7 }
0x14de   : > { %s19939_s15 = smov %s16762_s4  ;;  %19 = sbr.rel (!%p17_p2) target bundleno = 6 (0x6), region = 90 }
0x14e5   :  { %12330 = vsyncpa [#allocation4], 1 }
0x14e6   :  { %12332 = vsyncpa [#allocation4 + $0x1], 1 }
0x14e7   :  { %12333 = vsyncpa [#allocation7], 1 }
0x14e8   :  { %12334 = vsyncpa [#allocation5], 1 }
0x14e9   :  { %12336 = vsyncpa [#allocation5 + $0x1], 1 }

</bundles_post_ra>
